<compile_context>
chip_gen: v7x
topology: tpu7x:2x2x1
jax: 0.10.0
libtpu: 0.0.40
codegen_flags: <defaults>
</compile_context>

<pallas_src>
import functools

import jax
import jax.numpy as jnp
import numpy as np
from jax.experimental import pallas as pl
from jax.experimental.pallas import tpu as pltpu

BN_EPS = 1e-5
# Largest per-call VMEM need: layer-1 weight tile 8 MiB, double-buffered
# (16 MiB), plus <0.5 MiB of activations/outputs.  40 MiB gives margin on
# every generation and stays under v7x's 64 MiB physical VMEM.
VMEM_LIMIT_BYTES = 40 * 1024 * 1024


def _bn_relu(h):
    """Training-mode BatchNorm1d(affine=False) + ReLU on a (B, N) f32 block."""
    mean = jnp.mean(h, axis=0, keepdims=True)                 # per-feature mean
    var = jnp.mean((h - mean) ** 2, axis=0, keepdims=True)    # biased variance
    return jnp.maximum((h - mean) * jax.lax.rsqrt(var + BN_EPS), 0.0)


def _linear_bn_relu_kernel(x_ref, w_ref, o_ref):
    """One N-tile of relu(batchnorm(x @ W)); full K, so no reduction grid axis."""
    h = jnp.dot(x_ref[...], w_ref[...], preferred_element_type=jnp.float32)
    o_ref[...] = _bn_relu(h).astype(o_ref.dtype)


@functools.partial(jax.jit, static_argnames=("tn",))
def linear_bn_relu(x, w, *, tn=512):
    """x: (B, K) f32, w: (K, N) f32 -> relu(batchnorm(x @ w)): (B, N) f32."""
    B, K = x.shape
    Kw, N = w.shape
    assert K == Kw
    tn = min(tn, N)
    assert N % tn == 0

    return pl.pallas_call(
        _linear_bn_relu_kernel,
        out_shape=jax.ShapeDtypeStruct((B, N), jnp.float32),
        grid_spec=pltpu.PrefetchScalarGridSpec(
            num_scalar_prefetch=0,
            grid=(N // tn,),
            in_specs=[
                pl.BlockSpec((B, K), lambda n: (0, 0)),    # activations (DMA'd once)
                pl.BlockSpec((K, tn), lambda n: (0, n)),   # 8 MiB weight N-tile
            ],
            out_specs=pl.BlockSpec((B, tn), lambda n: (0, n)),
        ),
        compiler_params=pltpu.CompilerParams(
            dimension_semantics=("parallel",),             # megacore shards N tiles
            vmem_limit_bytes=VMEM_LIMIT_BYTES,
        ),
    )(x, w)


def _fused_tail_kernel(h_ref, w2_ref, w3_ref, w4_ref, o_ref):
    """Layers 2-4 fused: three (matmul -> BN -> ReLU) stages, all resident in VMEM."""
    h = _bn_relu(jnp.dot(h_ref[...], w2_ref[...], preferred_element_type=jnp.float32))
    h = _bn_relu(jnp.dot(h, w3_ref[...], preferred_element_type=jnp.float32))
    h = _bn_relu(jnp.dot(h, w4_ref[...], preferred_element_type=jnp.float32))
    o_ref[...] = h.astype(o_ref.dtype)


@jax.jit
def fused_tail(h, w2, w3, w4):
    B = h.shape[0]
    N_out = w4.shape[1]
    return pl.pallas_call(
        _fused_tail_kernel,
        out_shape=jax.ShapeDtypeStruct((B, N_out), jnp.float32),
        compiler_params=pltpu.CompilerParams(
            vmem_limit_bytes=VMEM_LIMIT_BYTES,
        ),
    )(h, w2, w3, w4)


def encoder_forward(x, weights):
    """Full Encoder forward (weights stored (in, out) = PyTorch weight.T)."""
    w1, w2, w3, w4 = weights
    h = linear_bn_relu(x, w1, tn=512)    # 4096 -> 2048, tiled, megacore-parallel
    return fused_tail(h, w2, w3, w4)     # 2048 -> 1024 -> 512 -> 256, one call


def encoder_reference(x, weights):
    """Pure-JAX reference matching PyTorch training-mode forward."""
    out = x
    for w in weights:
        h = out @ w
        mean = jnp.mean(h, axis=0, keepdims=True)
        var = jnp.mean((h - mean) ** 2, axis=0, keepdims=True)
        out = jnp.maximum((h - mean) / jnp.sqrt(var + BN_EPS), 0.0)
    return out


if __name__ == "__main__":
    # Module dims are fixed by the spec: 4096 -> 2048 -> 1024 -> 512 -> 256.
    B = 8
    dims = [4096, 2048, 1024, 512, 256]

    key = jax.random.PRNGKey(0)
    kx, *kws = jax.random.split(key, 1 + len(dims) - 1)

    x = jax.random.normal(kx, (B, dims[0]), dtype=jnp.float32)
    # Deterministic synthetic weights; stored (in, out) = PyTorch weight.T
    weights = [
        (0.02 * jax.random.normal(k, (dims[i], dims[i + 1]), dtype=jnp.float32))
        for i, k in enumerate(kws)
    ]

    out = encoder_forward(x, weights)
    out = jax.block_until_ready(out)

    ref = encoder_reference(x, weights)
    np.testing.assert_allclose(np.asarray(out), np.asarray(ref),
                               rtol=1e-3, atol=1e-3)
    assert out.shape == (B, dims[-1]) and out.dtype == jnp.float32

    print("KERNEL_OK")
</pallas_src>

<mosaic_0001>
module attributes {stable_mosaic.version = 11 : i64} {
  func.func @_linear_bn_relu_kernel(%arg0: i32, %arg1: memref<8x4096xf32, #tpu.memory_space<vmem>>, %arg2: memref<4096x512xf32, #tpu.memory_space<vmem>>, %arg3: memref<8x512xf32, #tpu.memory_space<vmem>>) attributes {dimension_semantics = [#tpu.dimension_semantics<parallel>], iteration_bounds = array<i64: 4>, scalar_prefetch = 0 : i64, scratch_operands = 0 : i64, tpu.core_type = #tpu.core_type<tc>, window_params = [{pipeline_mode = #tpu.pipeline_mode<synchronous>, transform_indices = @transform_0, window_bounds = array<i64: 8, 4096>}, {transform_indices = @transform_1, window_bounds = array<i64: 4096, 512>}, {transform_indices = @transform_2, window_bounds = array<i64: 8, 512>}]} {
    %c0 = arith.constant 0 : index
    %c0_0 = arith.constant 0 : index
    %0 = vector.load %arg1[%c0, %c0_0] : memref<8x4096xf32, #tpu.memory_space<vmem>>, vector<8x4096xf32>
    %c0_1 = arith.constant 0 : index
    %c0_2 = arith.constant 0 : index
    %1 = vector.load %arg2[%c0_1, %c0_2] : memref<4096x512xf32, #tpu.memory_space<vmem>>, vector<4096x512xf32>
    %cst = arith.constant dense<0.000000e+00> : vector<8x512xf32>
    %2 = tpu.matmul %0, %1, %cst {dimension_numbers = #tpu.dot_dimension_numbers<[1], [0], [0], [1], [0, 0, 1, 1], [], []>} : vector<8x4096xf32>, vector<4096x512xf32>, vector<8x512xf32> -> vector<8x512xf32>
    %cst_3 = arith.constant dense<0.000000e+00> : vector<512xf32>
    %3 = vector.multi_reduction <add>, %2, %cst_3 [0] : vector<8x512xf32> to vector<512xf32>
    %4 = vector.shape_cast %3 : vector<512xf32> to vector<1x512xf32>
    %cst_4 = arith.constant 8.000000e+00 : f32
    %5 = vector.broadcast %cst_4 : f32 to vector<1x512xf32>
    %6 = arith.divf %4, %5 : vector<1x512xf32>
    %7 = vector.broadcast %6 : vector<1x512xf32> to vector<8x512xf32>
    %8 = arith.subf %2, %7 : vector<8x512xf32>
    %9 = arith.mulf %8, %8 : vector<8x512xf32>
    %cst_5 = arith.constant dense<0.000000e+00> : vector<512xf32>
    %10 = vector.multi_reduction <add>, %9, %cst_5 [0] : vector<8x512xf32> to vector<512xf32>
    %11 = vector.shape_cast %10 : vector<512xf32> to vector<1x512xf32>
    %cst_6 = arith.constant 8.000000e+00 : f32
    %12 = vector.broadcast %cst_6 : f32 to vector<1x512xf32>
    %13 = arith.divf %11, %12 : vector<1x512xf32>
    %14 = vector.broadcast %6 : vector<1x512xf32> to vector<8x512xf32>
    %15 = arith.subf %2, %14 : vector<8x512xf32>
    %cst_7 = arith.constant 9.99999974E-6 : f32
    %16 = vector.broadcast %cst_7 : f32 to vector<1x512xf32>
    %17 = arith.addf %13, %16 : vector<1x512xf32>
    %18 = math.rsqrt %17 : vector<1x512xf32>
    %19 = vector.broadcast %18 : vector<1x512xf32> to vector<8x512xf32>
    %20 = arith.mulf %15, %19 : vector<8x512xf32>
    %cst_8 = arith.constant 0.000000e+00 : f32
    %21 = vector.broadcast %cst_8 : f32 to vector<8x512xf32>
    %22 = arith.maximumf %20, %21 : vector<8x512xf32>
    %c0_9 = arith.constant 0 : index
    %c0_10 = arith.constant 0 : index
    %23 = vector.load %arg3[%c0_9, %c0_10] : memref<8x512xf32, #tpu.memory_space<vmem>>, vector<8x512xf32>
    tpu.vector_store %arg3[%c0_9, %c0_10], %22 {strides = array<i32>} : memref<8x512xf32, #tpu.memory_space<vmem>>, vector<8x512xf32>,
    return
  }
  func.func @transform_0(%arg0: i32) -> (i32, i32) {
    %c0_i32 = arith.constant 0 : i32
    %c0_i32_0 = arith.constant 0 : i32
    %c0_i32_1 = arith.constant 0 : i32
    return %c0_i32, %c0_i32_0 : i32, i32
  }
  func.func @transform_1(%arg0: i32) -> (i32, i32) {
    %c0_i32 = arith.constant 0 : i32
    %c0_i32_0 = arith.constant 0 : i32
    return %c0_i32, %arg0 : i32, i32
  }
  func.func @transform_2(%arg0: i32) -> (i32, i32) {
    %c0_i32 = arith.constant 0 : i32
    %c0_i32_0 = arith.constant 0 : i32
    return %c0_i32, %arg0 : i32, i32
  }
}

</mosaic_0001>

<bundles_post_ra>
// kernel: linear_bn_relu.1
= control target key start
LH: loop header
LB: loop body
LE: loop exit
PB: predicated region body
PF: predicated region fallthrough
CT: control target
= control target key end

     0   :  { %7 = vsyncpa [#allocation3], 0  ;;  %s9301_s0 = inlined_call_operand.hbm [shape: f32[8,4096], index: 0, kind: input, shape index: {}]   ;;  %s9302_s1 = inlined_call_operand.hbm [shape: f32[4096,2048], index: 1, kind: input, shape index: {}]   ;;  %s9303_s2 = inlined_call_operand.hbm [shape: f32[8,2048], index: 2, kind: output, shape index: {}]  }
   0x1   :  { %8 = vsyncpa [#allocation6], 0 }
   0x2   :  { %10 = vsyncpa [#allocation6 + $0x1], 0 }
   0x3   :  { %11 = vsyncpa [#allocation4], 0 }
   0x4   :  { %13 = vsyncpa [#allocation4 + $0x1], 0  ;;  %s7056_s9 = smov 0   ;;  %s7058_s10 = smov 0  }
   0x5   :  { %s7060_s11 = smov 0   ;;  %s7062_s12 = smov 0  }
   0x6 LB: > { %s7077_s13 = sadd.s32 4294967295, %s7033_s12   ;;  %s4711_s14 = sadd.s32 4294967294, %s7033_s12   ;;  %s7033_s12 = sphi %s7062_s12, %s9326_s12   ;;  %s7029_s11 = sphi %s7060_s11, %s9325_s11   ;;  %s7025_s10 = sphi %s7058_s10, %s9324_s10   ;;  %s7021_s9 = sphi %s7056_s9, %s9323_s9  }
   0x7   : > { %s7081_s15 = sadd.s32 1, %s7033_s12   ;;  %s47_s16 = sadd.s32 1, %s7029_s11 }
   0x8   : > { %s44_s17 = ssub.s32 %s7033_s12, %s7081_s15  ;;  %p54_p0 = scmp.ne.s32.totalorder %s7029_s11, %s7025_s10 }
   0x9   : > { %p45_p1 = scmp.eq.s32.totalorder %s44_s17, 0  ;;  %p55_p2 = scmp.eq.s32.totalorder %s7033_s12, 0 }
   0xa   : > { %p60_p3 = scmp.ne.s32.totalorder %s7025_s10, %s7021_s9  ;;  %p9304_p4 = scmp.eq.s32.totalorder %s7077_s13, 0 }
   0xb   : > { %s7093_s18 = scalar_select %p45_p1, %s7029_s11, %s47_s16  }
   0xc   : > { %p7095_p5 = por %p55_p2, %p54_p0  ;;  %p7101_p6 = por %p9304_p4, %p60_p3 }
   0xd   : > { %p84_p7 = scmp.eq.s32.totalorder %s7077_s13, 3  ;;  %p90_p8 = scmp.eq.s32.totalorder %s4711_s14, 3 }
   0xe   : > { %s9310_s20 = scalar_select %p7101_p6, 1, 0 }
   0xf   : > { %p4712_p9 = scmp.ge.s32.totalorder %s7033_s12, 1  ;;  %p97_p10 = scmp.lt.s32.totalorder %s7033_s12, 5 }
  0x10   : > { %p7108_p11 = por %p84_p7, %p54_p0  ;;  %p7112_p12 = por %p90_p8, %p60_p3 }
  0x11   : > { %p7116_p13 = pnand %p4712_p9, %p97_p10  ;;  %s7035_s24 = smov [#allocation2]  }
  0x12   : > { %s9311_s21 = scalar_select %p7108_p11, 1, 0 }
  0x13   : > { %s9312_s22 = scalar_select %p7112_p12, 1, 0 }
  0x14   : > { %s9313_s23 = scalar_select %p7116_p13, 1, 0 }
  0x15   : > { %p6845_p1 = pneg %p7116_p13  ;;  %s110_s25 = sshll.u32 %s7035_s24, 4  ;;  %s111_s25 = int_to_ptr.vmem [resolvable:$true] %s110_s25 }
  0x16   : > { %p6858_p2 = scmp.lt.s32.totalorder %s7033_s12, 4  ;;  %s121_s27 = sand.u32 1, %s7029_s11  }
  0x17   : > { %p7125_p0 = pnand %p6845_p1, %p9304_p4  ;;  %s4715_s29 = sshll.u32 %s121_s27, 14 }
  0x18   : > { %p7132_p3 = pnand %p6858_p2, %p7095_p5  ;;  %s6905_s4 = scalar_lea.hbm %s9301_s0, 4096 }
  0x19   : > { %p6906_p7 = scmp.ne.s32.totalorder %s9301_s0, %s6905_s4  ;;  %p6907_p8 = pneg %p7125_p0 }
  0x1a   : > { %s9315_s28 = scalar_select %p7132_p3, 1, 0 }
  0x1b   : > { %p6908_p9 = pnand %p6907_p8, %p6906_p7  ;;  %p6912_p5 = scmp.lt.u32.totalorder %s6905_s4, %s9301_s0 }
  0x1d   : > { %p6909_p10 = pneg %p6908_p9 }
  0x1f   : > { %p6914_p1 = pnand %p6912_p5, %p6909_p10 }
  0x21   : > { %6917 = shalt.err (!%p6914_p1)
}
  0x22   : > { %s6918_s14 = scalar_lea.vmem %s111_s25, 4096  ;;  %p6926_p11 = scmp.lt.s32.totalorder %s111_s25, %s111_s25 }
  0x23   : > { %p6919_p2 = scmp.ne.s32.totalorder %s111_s25, %s6918_s14  ;;  %p6927_p6 = scmp.lt.s32.totalorder %s6918_s14, %s6918_s14 }
  0x25   : > { %p6921_p4 = pnand %p6919_p2, %p6907_p8  ;;  %p6928_p13 = por %p6927_p6, %p6926_p11 }
  0x27   : > { %p6922_p12 = pneg %p6921_p4 }
  0x29   : > { %p6929_p3 = pnand %p6928_p13, %p6922_p12 }
  0x2b   : > { %6932 = shalt.err (!%p6929_p3)
}
  0x2c   : > { %6848 = dma.hbm_to_vmem [thread:$0]  (!%p7125_p0), %s9301_s0, 4096, %s111_s25, [#allocation3]  }
  0x2d   : > { %s4727_s19 = sshll.u32 %s7033_s12, 9  ;;  %s125_s24 = scalar_lea.vmem [#allocation5], %s4715_s29 }
  0x2e   : > { %s132_s30 = sshll.u32 %s125_s24, 4  ;;  %s7156_s5 = scalar_lea.hbm %s9302_s1, %s4727_s19  ;;  %s7158_s30 = int_to_ptr.vmem [resolvable:$true] %s132_s30 }
  0x2f   : > { %s7160_s26 = scalar_lea.sflag [#allocation6], %s121_s27  ;;  %s6933_s6 = scalar_lea.hbm %s7156_s5, 262144 }
  0x30   : > { %p6934_p4 = scmp.ne.s32.totalorder %s7156_s5, %s6933_s6  ;;  %p9316_p6 = scmp.ne.s32.totalorder %s9315_s28, 0 }
  0x31   : > { %s6938_s7 = scalar_lea.hbm %s9302_s1, 1048576  ;;  %p6939_p0 = scmp.lt.u32.totalorder %s7156_s5, %s9302_s1 }
  0x32   : > { %p6935_p11 = pneg %p9316_p6  ;;  %p6940_p3 = scmp.lt.u32.totalorder %s6938_s7, %s6933_s6 }
  0x33   : > { %p6942_p8 = scmp.lt.u32.totalorder %s6933_s6, %s7156_s5 }
  0x34   : > { %p6936_p12 = pnand %p6935_p11, %p6934_p4  ;;  %p6941_p7 = por %p6940_p3, %p6939_p0 }
  0x36   : > { %p6937_p13 = pneg %p6936_p12  ;;  %p6943_p9 = por %p6942_p8, %p6941_p7 }
  0x38   : > { %p6944_p10 = pnand %p6943_p9, %p6937_p13 }
  0x3a   : > { %6947 = shalt.err (!%p6944_p10)
}
  0x3b   : > { %s6948_s27 = scalar_lea.vmem %s7158_s30, 262144  ;;  %s7036_s16 = smov [#allocation5]  }
  0x3c   : > { %p6949_p5 = scmp.ne.s32.totalorder %s7158_s30, %s6948_s27  ;;  %s6953_s17 = sshll.u32 %s7036_s16, 4  ;;  %s6954_s17 = int_to_ptr.vmem [resolvable:$false] %s6953_s17 }
  0x3d   : > { %s6955_s19 = scalar_lea.vmem %s6954_s17, 524288  ;;  %p6956_p4 = scmp.lt.s32.totalorder %s7158_s30, %s6954_s17 }
  0x3e   : > { %p6951_p1 = pnand %p6949_p5, %p6935_p11  ;;  %p6957_p12 = scmp.lt.s32.totalorder %s6955_s19, %s6948_s27 }
  0x40   : > { %p6952_p2 = pneg %p6951_p1  ;;  %p6958_p0 = por %p6957_p12, %p6956_p4 }
  0x42   : > { %p6959_p3 = pnand %p6958_p0, %p6952_p2 }
  0x44   : > { %6962 = shalt.err (!%p6959_p3)
}
  0x45   : > { %s7037_s24 = smov 2048   ;;  %s7038_s3 = smov 512  }
  0x46   : > { %s7039_s4 = smov 32   ;;  %p9317_p11 = scmp.ne.s32.totalorder %s9313_s23, 0 }
  0x47   : > { %6852 = dma.hbm_to_vmem [thread:$0]  (!%p9316_p6), %s7156_s5, 262144, %s7158_s30, %s7160_s26, %s7037_s24, %s7038_s3, %s7039_s4  }
  0x48   : > { %144 = sbr.rel (%p9317_p11) target bundleno = 1390 (0x56e), region = 28  ;;  %p9318_p13 = scmp.eq.s32.totalorder (!%p9317_p11), %s7077_s13, 0 }
  0x4f   : > { %7008 = dma.done.wait (%p9318_p13), [#allocation3], 4096   ;;  %p9319_p7 = pmov %p9318_p13 }
  0x50   : > { %s7195_s6 = sand.u32 1, %s7025_s10   ;;  %p9320_p6 = scmp.ne.s32.totalorder %s9310_s20, 0 }
  0x51   : > { %7010 = vsyncadd (%p9319_p7), [#allocation3], 4294963200  ;;  %s4720_s25 = sshll.u32 %s7195_s6, 14  ;;  %s151_s29 = scalar_lea.sflag [#allocation6], %s7195_s6 }
  0x52   : > { %s7199_s7 = scalar_lea.vmem [#allocation5], %s4720_s25 }
  0x53   : > { %7012 = dma.done.wait (%p9320_p6), %s151_s29, 262144  }
  0x54   : > { %7014 = vsyncadd (%p9320_p6), %s151_s29, 4294705152  ;;  %v210_v0 = vld [vmem:[%s7199_s7 + $0x8] sm:$0xff]  ;;  %v212_v2 = vld [vmem:[%s7199_s7 + $0x18] sm:$0xff]  ;;  %s4721_s20 = sshll.u32 %s7195_s6, 5  ;;  %s4728_s23 = sshll.u32 %s7077_s13, 9 }
  0x55   : > { %v214_v1 = vld [vmem:[%s7199_s7 + $0x28] sm:$0xff]  ;;  %v216_v4 = vld [vmem:[%s7199_s7 + $0x38] sm:$0xff]  ;;  %v209_v5 = vld [vmem:[%s7199_s7] sm:$0xff]  ;;  %s174_s28 = scalar_lea.vmem [#allocation7], %s4721_s20  ;;  %s9258_s8 = scalar_lea.hbm %s9303_s2, %s4728_s23 }
  0x56   : > { %v4729_v3 = vpack.c.bf16 %v214_v1, %v210_v0  ;;  %v213_v6 = vld [vmem:[%s7199_s7 + $0x20] sm:$0xff]  ;;  %v5753_v7 = vpack.c.bf16 %v216_v4, %v212_v2  ;;  %v211_v9 = vld [vmem:[%s7199_s7 + $0x10] sm:$0xff]  ;;  %v218_v11 = vld [vmem:[%s7199_s7 + $0x48] sm:$0xff]  ;;  %s4629_s30 = sshll.u32 %s174_s28, 4  ;;  %s4615_s13 = scalar_lea.sflag [#allocation4], %s7195_s6  ;;  %s9260_s30 = int_to_ptr.vmem [resolvable:$true] %s4629_s30 }
  0x57   : > { %v4731_v8 = vpack.c.bf16 %v213_v6, %v209_v5  ;;  %v215_v10 = vld [vmem:[%s7199_s7 + $0x30] sm:$0xff]  ;;  %v222_v13 = vld [vmem:[%s7199_s7 + $0x68] sm:$0xff]  ;;  %v220_v14 = vld [vmem:[%s7199_s7 + $0x58] sm:$0xff]  ;;  %s6963_s14 = scalar_lea.vmem %s9260_s30, 512  ;;  %p9321_p9 = scmp.ne.s32.totalorder %s9311_s21, 0 }
  0x58   : > { %4730 = vmatprep.subr.bf16.mxu0 %v4729_v3  ;;  %v5755_v12 = vpack.c.bf16 %v215_v10, %v211_v9  ;;  %v224_v15 = vld [vmem:[%s7199_s7 + $0x78] sm:$0xff]  ;;  %5754 = vmatprep.subr.bf16.mxu1 %v5753_v7  ;;  %v4733_v16 = vpack.c.bf16 %v222_v13, %v218_v11  ;;  %v217_v18 = vld [vmem:[%s7199_s7 + $0x40] sm:$0xff]  ;;  %v219_v20 = vld [vmem:[%s7199_s7 + $0x50] sm:$0xff]  ;;  %p6964_p8 = scmp.ne.s32.totalorder %s9260_s30, %s6963_s14  ;;  %s7040_s27 = smov [#allocation7]  }
  0x59   : > { %4732 = vmatpush1.bf16.msra.mxu0 %v4731_v8  ;;  %v5757_v17 = vpack.c.bf16 %v224_v15, %v220_v14  ;;  %v221_v19 = vld [vmem:[%s7199_s7 + $0x60] sm:$0xff]  ;;  %v223_v22 = vld [vmem:[%s7199_s7 + $0x70] sm:$0xff]  ;;  %v226_v23 = vld [vmem:[%s7199_s7 + $0x88] sm:$0xff]  ;;  %s6967_s16 = sshll.u32 %s7040_s27, 4  ;;  %s6968_s16 = int_to_ptr.vmem [resolvable:$false] %s6967_s16 }
  0x5a   : > { %5756 = vmatpush1.bf16.msra.mxu1 %v5755_v12  ;;  %v4735_v21 = vpack.c.bf16 %v221_v19, %v217_v18  ;;  %v230_v24 = vld [vmem:[%s7199_s7 + $0xa8] sm:$0xff]  ;;  %4734 = vmatprep.subr.bf16.mxu0 %v4733_v16  ;;  %v5759_v25 = vpack.c.bf16 %v223_v22, %v219_v20  ;;  %v228_v27 = vld [vmem:[%s7199_s7 + $0x98] sm:$0xff]  ;;  %v225_v29 = vld [vmem:[%s7199_s7 + $0x80] sm:$0xff]  ;;  %p6965_p10 = pnand %p6964_p8, %p9321_p9  ;;  %s6969_s17 = scalar_lea.vmem %s6968_s16, 1024 }
  0x5b   : > { %5758 = vmatprep.subr.bf16.mxu1 %v5757_v17  ;;  %v4737_v26 = vpack.c.bf16 %v230_v24, %v226_v23  ;;  %v232_v28 = vld [vmem:[%s7199_s7 + $0xb8] sm:$0xff]  ;;  %v229_v31 = vld [vmem:[%s7199_s7 + $0xa0] sm:$0xff]  ;;  %v227_v32 = vld [vmem:[%s7199_s7 + $0x90] sm:$0xff]  ;;  %p6970_p1 = scmp.lt.s32.totalorder %s9260_s30, %s6968_s16  ;;  %p6971_p2 = scmp.lt.s32.totalorder %s6969_s17, %s6963_s14 }
  0x5c   : > { %v5761_v30 = vpack.c.bf16 %v232_v28, %v228_v27  ;;  %v231_v33 = vld [vmem:[%s7199_s7 + $0xb0] sm:$0xff]  ;;  %v4739_v34 = vpack.c.bf16 %v229_v31, %v225_v29  ;;  %v234_v35 = vld [vmem:[%s7199_s7 + $0xc8] sm:$0xff]  ;;  %v236_v37 = vld [vmem:[%s7199_s7 + $0xd8] sm:$0xff]  ;;  %p6966_p5 = pneg %p6965_p10 }
  0x5d   : > { %4736 = vmatpush1.bf16.msra.mxu0 %v4735_v21  ;;  %v238_v36 = vld [vmem:[%s7199_s7 + $0xe8] sm:$0xff]  ;;  %v5763_v38 = vpack.c.bf16 %v231_v33, %v227_v32  ;;  %v240_v40 = vld [vmem:[%s7199_s7 + $0xf8] sm:$0xff]  ;;  %v233_v41 = vld [vmem:[%s7199_s7 + $0xc0] sm:$0xff]  ;;  %p6972_p4 = por %p6971_p2, %p6970_p1 }
  0x5e   : > { %5760 = vmatpush1.bf16.msra.mxu1 %v5759_v25  ;;  %4738 = vmatprep.subr.bf16.mxu0 %v4737_v26  ;;  %v4741_v39 = vpack.c.bf16 %v238_v36, %v234_v35  ;;  %v237_v42 = vld [vmem:[%s7199_s7 + $0xe0] sm:$0xff]  ;;  %v5765_v43 = vpack.c.bf16 %v240_v40, %v236_v37  ;;  %v235_v44 = vld [vmem:[%s7199_s7 + $0xd0] sm:$0xff]  ;;  %v242_v46 = vld [vmem:[%s7199_s7 + $0x108] sm:$0xff] }
  0x5f   : > { %5762 = vmatprep.subr.bf16.mxu1 %v5761_v30  ;;  %v239_v45 = vld [vmem:[%s7199_s7 + $0xf0] sm:$0xff]  ;;  %v246_v47 = vld [vmem:[%s7199_s7 + $0x128] sm:$0xff]  ;;  %v244_v48 = vld [vmem:[%s7199_s7 + $0x118] sm:$0xff]  ;;  %v4743_v50 = vpack.c.bf16 %v237_v42, %v233_v41  ;;  %p6973_p12 = pnand %p6972_p4, %p6966_p5 }
  0x60   : > { %v248_v49 = vld [vmem:[%s7199_s7 + $0x138] sm:$0xff]  ;;  %v5767_v51 = vpack.c.bf16 %v239_v45, %v235_v44  ;;  %v4745_v52 = vpack.c.bf16 %v246_v47, %v242_v46  ;;  %v241_v53 = vld [vmem:[%s7199_s7 + $0x100] sm:$0xff]  ;;  %v243_v55 = vld [vmem:[%s7199_s7 + $0x110] sm:$0xff] }
  0x61   : > { %4740 = vmatpush1.bf16.msra.mxu0 %v4739_v34  ;;  %v245_v54 = vld [vmem:[%s7199_s7 + $0x120] sm:$0xff]  ;;  %v5769_v56 = vpack.c.bf16 %v248_v49, %v244_v48  ;;  %v247_v57 = vld [vmem:[%s7199_s7 + $0x130] sm:$0xff]  ;;  %v250_v58 = vld [vmem:[%s7199_s7 + $0x148] sm:$0xff] }
  0x62   : > { %5764 = vmatpush1.bf16.msra.mxu1 %v5763_v38  ;;  %4742 = vmatprep.subr.bf16.mxu0 %v4741_v39  ;;  %v254_v59 = vld [vmem:[%s7199_s7 + $0x168] sm:$0xff]  ;;  %v252_v60 = vld [vmem:[%s7199_s7 + $0x158] sm:$0xff]  ;;  %v4747_v62 = vpack.c.bf16 %v245_v54, %v241_v53  ;;  %v5771_v63 = vpack.c.bf16 %v247_v57, %v243_v55  ;;  %v249_v1 = vld [vmem:[%s7199_s7 + $0x140] sm:$0xff] }
  0x63   : > { %5766 = vmatprep.subr.bf16.mxu1 %v5765_v43  ;;  %v256_v61 = vld [vmem:[%s7199_s7 + $0x178] sm:$0xff]  ;;  %v4749_v0 = vpack.c.bf16 %v254_v59, %v250_v58  ;;  %v253_v2 = vld [vmem:[%s7199_s7 + $0x160] sm:$0xff]  ;;  %v251_v3 = vld [vmem:[%s7199_s7 + $0x150] sm:$0xff] }
  0x64   : > { %v5773_v4 = vpack.c.bf16 %v256_v61, %v252_v60  ;;  %v255_v5 = vld [vmem:[%s7199_s7 + $0x170] sm:$0xff]  ;;  %v258_v6 = vld [vmem:[%s7199_s7 + $0x188] sm:$0xff]  ;;  %v260_v8 = vld [vmem:[%s7199_s7 + $0x198] sm:$0xff]  ;;  %v4751_v10 = vpack.c.bf16 %v253_v2, %v249_v1 }
  0x65   : > { %4744 = vmatpush1.bf16.msra.mxu0 %v4743_v50  ;;  %v262_v7 = vld [vmem:[%s7199_s7 + $0x1a8] sm:$0xff]  ;;  %v264_v9 = vld [vmem:[%s7199_s7 + $0x1b8] sm:$0xff]  ;;  %v5775_v11 = vpack.c.bf16 %v255_v5, %v251_v3  ;;  %v257_v13 = vld [vmem:[%s7199_s7 + $0x180] sm:$0xff] }
  0x66   : > { %5768 = vmatpush1.bf16.msra.mxu1 %v5767_v51  ;;  %4746 = vmatprep.subr.bf16.mxu0 %v4745_v52  ;;  %v4753_v12 = vpack.c.bf16 %v262_v7, %v258_v6  ;;  %v261_v14 = vld [vmem:[%s7199_s7 + $0x1a0] sm:$0xff]  ;;  %v259_v15 = vld [vmem:[%s7199_s7 + $0x190] sm:$0xff]  ;;  %v5777_v16 = vpack.c.bf16 %v264_v9, %v260_v8  ;;  %v266_v18 = vld [vmem:[%s7199_s7 + $0x1c8] sm:$0xff] }
  0x67   : > { %5770 = vmatprep.subr.bf16.mxu1 %v5769_v56  ;;  %v263_v17 = vld [vmem:[%s7199_s7 + $0x1b0] sm:$0xff]  ;;  %v270_v19 = vld [vmem:[%s7199_s7 + $0x1e8] sm:$0xff]  ;;  %v268_v20 = vld [vmem:[%s7199_s7 + $0x1d8] sm:$0xff]  ;;  %v4755_v22 = vpack.c.bf16 %v261_v14, %v257_v13 }
  0x68   : > { %v272_v21 = vld [vmem:[%s7199_s7 + $0x1f8] sm:$0xff]  ;;  %v5779_v23 = vpack.c.bf16 %v263_v17, %v259_v15  ;;  %v4757_v24 = vpack.c.bf16 %v270_v19, %v266_v18  ;;  %v265_v25 = vld [vmem:[%s7199_s7 + $0x1c0] sm:$0xff]  ;;  %v267_v27 = vld [vmem:[%s7199_s7 + $0x1d0] sm:$0xff] }
  0x69   : > { %4748 = vmatpush1.bf16.msra.mxu0 %v4747_v62  ;;  %v269_v26 = vld [vmem:[%s7199_s7 + $0x1e0] sm:$0xff]  ;;  %v5781_v28 = vpack.c.bf16 %v272_v21, %v268_v20  ;;  %v271_v29 = vld [vmem:[%s7199_s7 + $0x1f0] sm:$0xff]  ;;  %v274_v30 = vld [vmem:[%s7199_s7 + $0x208] sm:$0xff] }
  0x6a   : > { %5772 = vmatpush1.bf16.msra.mxu1 %v5771_v63  ;;  %4750 = vmatprep.subr.bf16.mxu0 %v4749_v0  ;;  %v278_v31 = vld [vmem:[%s7199_s7 + $0x228] sm:$0xff]  ;;  %v276_v32 = vld [vmem:[%s7199_s7 + $0x218] sm:$0xff]  ;;  %v4759_v34 = vpack.c.bf16 %v269_v26, %v265_v25  ;;  %v5783_v35 = vpack.c.bf16 %v271_v29, %v267_v27  ;;  %v273_v37 = vld [vmem:[%s7199_s7 + $0x200] sm:$0xff] }
  0x6b   : > { %5774 = vmatprep.subr.bf16.mxu1 %v5773_v4  ;;  %v280_v33 = vld [vmem:[%s7199_s7 + $0x238] sm:$0xff]  ;;  %v4761_v36 = vpack.c.bf16 %v278_v31, %v274_v30  ;;  %v277_v38 = vld [vmem:[%s7199_s7 + $0x220] sm:$0xff]  ;;  %v275_v39 = vld [vmem:[%s7199_s7 + $0x210] sm:$0xff] }
  0x6c   : > { %v5785_v40 = vpack.c.bf16 %v280_v33, %v276_v32  ;;  %v279_v41 = vld [vmem:[%s7199_s7 + $0x230] sm:$0xff]  ;;  %v282_v42 = vld [vmem:[%s7199_s7 + $0x248] sm:$0xff]  ;;  %v284_v44 = vld [vmem:[%s7199_s7 + $0x258] sm:$0xff]  ;;  %v4763_v46 = vpack.c.bf16 %v277_v38, %v273_v37 }
  0x6d   : > { %4752 = vmatpush1.bf16.msra.mxu0 %v4751_v10  ;;  %v286_v43 = vld [vmem:[%s7199_s7 + $0x268] sm:$0xff]  ;;  %v288_v45 = vld [vmem:[%s7199_s7 + $0x278] sm:$0xff]  ;;  %v5787_v47 = vpack.c.bf16 %v279_v41, %v275_v39  ;;  %v281_v49 = vld [vmem:[%s7199_s7 + $0x240] sm:$0xff] }
  0x6e   : > { %5776 = vmatpush1.bf16.msra.mxu1 %v5775_v11  ;;  %4754 = vmatprep.subr.bf16.mxu0 %v4753_v12  ;;  %v4765_v48 = vpack.c.bf16 %v286_v43, %v282_v42  ;;  %v285_v50 = vld [vmem:[%s7199_s7 + $0x260] sm:$0xff]  ;;  %v283_v51 = vld [vmem:[%s7199_s7 + $0x250] sm:$0xff]  ;;  %v5789_v52 = vpack.c.bf16 %v288_v45, %v284_v44  ;;  %v290_v54 = vld [vmem:[%s7199_s7 + $0x288] sm:$0xff] }
  0x6f   : > { %5778 = vmatprep.subr.bf16.mxu1 %v5777_v16  ;;  %v287_v53 = vld [vmem:[%s7199_s7 + $0x270] sm:$0xff]  ;;  %v294_v55 = vld [vmem:[%s7199_s7 + $0x2a8] sm:$0xff]  ;;  %v292_v56 = vld [vmem:[%s7199_s7 + $0x298] sm:$0xff]  ;;  %v4767_v58 = vpack.c.bf16 %v285_v50, %v281_v49 }
  0x70   : > { %v296_v57 = vld [vmem:[%s7199_s7 + $0x2b8] sm:$0xff]  ;;  %v5791_v59 = vpack.c.bf16 %v287_v53, %v283_v51  ;;  %v4769_v60 = vpack.c.bf16 %v294_v55, %v290_v54  ;;  %v289_v61 = vld [vmem:[%s7199_s7 + $0x280] sm:$0xff]  ;;  %v291_v63 = vld [vmem:[%s7199_s7 + $0x290] sm:$0xff] }
  0x71   : > { %4756 = vmatpush1.bf16.msra.mxu0 %v4755_v22  ;;  %v293_v62 = vld [vmem:[%s7199_s7 + $0x2a0] sm:$0xff]  ;;  %v5793_v0 = vpack.c.bf16 %v296_v57, %v292_v56  ;;  %v295_v1 = vld [vmem:[%s7199_s7 + $0x2b0] sm:$0xff]  ;;  %v298_v2 = vld [vmem:[%s7199_s7 + $0x2c8] sm:$0xff] }
  0x72   : > { %5780 = vmatpush1.bf16.msra.mxu1 %v5779_v23  ;;  %4758 = vmatprep.subr.bf16.mxu0 %v4757_v24  ;;  %v302_v3 = vld [vmem:[%s7199_s7 + $0x2e8] sm:$0xff]  ;;  %v300_v4 = vld [vmem:[%s7199_s7 + $0x2d8] sm:$0xff]  ;;  %v4771_v6 = vpack.c.bf16 %v293_v62, %v289_v61  ;;  %v297_v7 = vld [vmem:[%s7199_s7 + $0x2c0] sm:$0xff]  ;;  %v5795_v8 = vpack.c.bf16 %v295_v1, %v291_v63 }
  0x73   : > { %5782 = vmatprep.subr.bf16.mxu1 %v5781_v28  ;;  %v304_v5 = vld [vmem:[%s7199_s7 + $0x2f8] sm:$0xff]  ;;  %v4773_v9 = vpack.c.bf16 %v302_v3, %v298_v2  ;;  %v301_v10 = vld [vmem:[%s7199_s7 + $0x2e0] sm:$0xff]  ;;  %v299_v11 = vld [vmem:[%s7199_s7 + $0x2d0] sm:$0xff] }
  0x74   : > { %v303_v12 = vld [vmem:[%s7199_s7 + $0x2f0] sm:$0xff]  ;;  %v5797_v13 = vpack.c.bf16 %v304_v5, %v300_v4  ;;  %v306_v14 = vld [vmem:[%s7199_s7 + $0x308] sm:$0xff]  ;;  %v308_v17 = vld [vmem:[%s7199_s7 + $0x318] sm:$0xff]  ;;  %v4775_v19 = vpack.c.bf16 %v301_v10, %v297_v7 }
  0x75   : > { %4760 = vmatpush1.bf16.msra.mxu0 %v4759_v34  ;;  %v310_v15 = vld [vmem:[%s7199_s7 + $0x328] sm:$0xff]  ;;  %v312_v18 = vld [vmem:[%s7199_s7 + $0x338] sm:$0xff]  ;;  %v5799_v20 = vpack.c.bf16 %v303_v12, %v299_v11  ;;  %v305_v22 = vld [vmem:[%s7199_s7 + $0x300] sm:$0xff] }
  0x76   : > { %5784 = vmatpush1.bf16.msra.mxu1 %v5783_v35  ;;  %4762 = vmatprep.subr.bf16.mxu0 %v4761_v36  ;;  %v178_v16 = vld [vmem:[#allocation2 + $0x8] sm:$0xff]  ;;  %v4777_v21 = vpack.c.bf16 %v310_v15, %v306_v14  ;;  %v309_v23 = vld [vmem:[%s7199_s7 + $0x320] sm:$0xff]  ;;  %v307_v24 = vld [vmem:[%s7199_s7 + $0x310] sm:$0xff]  ;;  %v5801_v25 = vpack.c.bf16 %v312_v18, %v308_v17 }
  0x77   : > { %5786 = vmatprep.subr.bf16.mxu1 %v5785_v40  ;;  %2321 = vmatprep.mubr.f32.mxu0 %v178_v16  ;;  %v311_v26 = vld [vmem:[%s7199_s7 + $0x330] sm:$0xff]  ;;  %v314_v27 = vld [vmem:[%s7199_s7 + $0x348] sm:$0xff]  ;;  %v316_v29 = vld [vmem:[%s7199_s7 + $0x358] sm:$0xff]  ;;  %v4779_v31 = vpack.c.bf16 %v309_v23, %v305_v22 }
  0x78   : > { %3457 = vmatprep.mubr.f32.mxu1 %v178_v16  ;;  %v318_v28 = vld [vmem:[%s7199_s7 + $0x368] sm:$0xff]  ;;  %v320_v30 = vld [vmem:[%s7199_s7 + $0x378] sm:$0xff]  ;;  %v5803_v32 = vpack.c.bf16 %v311_v26, %v307_v24  ;;  %v313_v34 = vld [vmem:[%s7199_s7 + $0x340] sm:$0xff] }
  0x79   : > { %4764 = vmatpush1.bf16.msra.mxu0 %v4763_v46  ;;  %v4781_v33 = vpack.c.bf16 %v318_v28, %v314_v27  ;;  %v317_v35 = vld [vmem:[%s7199_s7 + $0x360] sm:$0xff]  ;;  %v315_v36 = vld [vmem:[%s7199_s7 + $0x350] sm:$0xff]  ;;  %v5805_v37 = vpack.c.bf16 %v320_v30, %v316_v29  ;;  %v322_v39 = vld [vmem:[%s7199_s7 + $0x388] sm:$0xff] }
  0x7a   : > { %5788 = vmatpush1.bf16.msra.mxu1 %v5787_v47  ;;  %4766 = vmatprep.subr.bf16.mxu0 %v4765_v48  ;;  %v319_v38 = vld [vmem:[%s7199_s7 + $0x370] sm:$0xff]  ;;  %v326_v40 = vld [vmem:[%s7199_s7 + $0x3a8] sm:$0xff]  ;;  %v324_v41 = vld [vmem:[%s7199_s7 + $0x398] sm:$0xff]  ;;  %v4783_v43 = vpack.c.bf16 %v317_v35, %v313_v34 }
  0x7b   : > { %5790 = vmatprep.subr.bf16.mxu1 %v5789_v52  ;;  %v328_v42 = vld [vmem:[%s7199_s7 + $0x3b8] sm:$0xff]  ;;  %v5807_v44 = vpack.c.bf16 %v319_v38, %v315_v36  ;;  %v4785_v45 = vpack.c.bf16 %v326_v40, %v322_v39  ;;  %v321_v46 = vld [vmem:[%s7199_s7 + $0x380] sm:$0xff]  ;;  %v323_v48 = vld [vmem:[%s7199_s7 + $0x390] sm:$0xff] }
  0x7c   : > { %v325_v47 = vld [vmem:[%s7199_s7 + $0x3a0] sm:$0xff]  ;;  %v5809_v49 = vpack.c.bf16 %v328_v42, %v324_v41  ;;  %v327_v50 = vld [vmem:[%s7199_s7 + $0x3b0] sm:$0xff]  ;;  %v330_v51 = vld [vmem:[%s7199_s7 + $0x3c8] sm:$0xff] }
  0x7d   : > { %4768 = vmatpush1.bf16.msra.mxu0 %v4767_v58  ;;  %v334_v52 = vld [vmem:[%s7199_s7 + $0x3e8] sm:$0xff]  ;;  %v332_v53 = vld [vmem:[%s7199_s7 + $0x3d8] sm:$0xff]  ;;  %v4787_v55 = vpack.c.bf16 %v325_v47, %v321_v46  ;;  %v5811_v56 = vpack.c.bf16 %v327_v50, %v323_v48  ;;  %v329_v58 = vld [vmem:[%s7199_s7 + $0x3c0] sm:$0xff] }
  0x7e   : > { %5792 = vmatpush1.bf16.msra.mxu1 %v5791_v59  ;;  %4770 = vmatprep.subr.bf16.mxu0 %v4769_v60  ;;  %v336_v54 = vld [vmem:[%s7199_s7 + $0x3f8] sm:$0xff]  ;;  %v4789_v57 = vpack.c.bf16 %v334_v52, %v330_v51  ;;  %v333_v59 = vld [vmem:[%s7199_s7 + $0x3e0] sm:$0xff]  ;;  %v331_v60 = vld [vmem:[%s7199_s7 + $0x3d0] sm:$0xff] }
  0x7f   : > { %5794 = vmatprep.subr.bf16.mxu1 %v5793_v0  ;;  %v5813_v61 = vpack.c.bf16 %v336_v54, %v332_v53  ;;  %v335_v62 = vld [vmem:[%s7199_s7 + $0x3f0] sm:$0xff]  ;;  %v338_v63 = vld [vmem:[%s7199_s7 + $0x408] sm:$0xff]  ;;  %v340_v1 = vld [vmem:[%s7199_s7 + $0x418] sm:$0xff]  ;;  %v4791_v3 = vpack.c.bf16 %v333_v59, %v329_v58 }
  0x80   : > { %v342_v0 = vld [vmem:[%s7199_s7 + $0x428] sm:$0xff]  ;;  %v344_v2 = vld [vmem:[%s7199_s7 + $0x438] sm:$0xff]  ;;  %v5815_v4 = vpack.c.bf16 %v335_v62, %v331_v60  ;;  %v341_v7 = vld [vmem:[%s7199_s7 + $0x420] sm:$0xff] }
  0x81   : > { %4772 = vmatpush1.bf16.msra.mxu0 %v4771_v6  ;;  %v4793_v5 = vpack.c.bf16 %v342_v0, %v338_v63  ;;  %v337_v6 = vld [vmem:[%s7199_s7 + $0x400] sm:$0xff]  ;;  %v343_v10 = vld [vmem:[%s7199_s7 + $0x430] sm:$0xff]  ;;  %v346_v11 = vld [vmem:[%s7199_s7 + $0x448] sm:$0xff] }
  0x82   : > { %5796 = vmatpush1.bf16.msra.mxu1 %v5795_v8  ;;  %4774 = vmatprep.subr.bf16.mxu0 %v4773_v9  ;;  %v339_v8 = vld [vmem:[%s7199_s7 + $0x410] sm:$0xff]  ;;  %v5817_v9 = vpack.c.bf16 %v344_v2, %v340_v1  ;;  %v350_v12 = vld [vmem:[%s7199_s7 + $0x468] sm:$0xff]  ;;  %v352_v14 = vld [vmem:[%s7199_s7 + $0x478] sm:$0xff]  ;;  %v4795_v16 = vpack.c.bf16 %v341_v7, %v337_v6 }
  0x83   : > { %5798 = vmatprep.subr.bf16.mxu1 %v5797_v13  ;;  %v348_v13 = vld [vmem:[%s7199_s7 + $0x458] sm:$0xff]  ;;  %v177_v15 = vld [vmem:[#allocation2] sm:$0xff]  ;;  %v5819_v17 = vpack.c.bf16 %v343_v10, %v339_v8  ;;  %v4797_v18 = vpack.c.bf16 %v350_v12, %v346_v11  ;;  %v351_v23 = vld [vmem:[%s7199_s7 + $0x470] sm:$0xff] }
  0x84   : > { %v5821_v22 = vpack.c.bf16 %v352_v14, %v348_v13  ;;  %v354_v24 = vld [vmem:[%s7199_s7 + $0x488] sm:$0xff]  ;;  %v356_v26 = vld [vmem:[%s7199_s7 + $0x498] sm:$0xff]  ;;  %v359_v35 = vld [vmem:[%s7199_s7 + $0x4b0] sm:$0xff] }
  0x85   : > { %4776 = vmatpush1.bf16.msra.mxu0 %v4775_v19  ;;  %v345_v19 = vld [vmem:[%s7199_s7 + $0x440] sm:$0xff]  ;;  %v360_v27 = vld [vmem:[%s7199_s7 + $0x4b8] sm:$0xff]  ;;  %v362_v36 = vld [vmem:[%s7199_s7 + $0x4c8] sm:$0xff] }
  0x86   : > { %5800 = vmatpush1.bf16.msra.mxu1 %v5799_v20  ;;  %4778 = vmatprep.subr.bf16.mxu0 %v4777_v21  ;;  %v349_v20 = vld [vmem:[%s7199_s7 + $0x460] sm:$0xff]  ;;  %v347_v21 = vld [vmem:[%s7199_s7 + $0x450] sm:$0xff]  ;;  %v5825_v34 = vpack.c.bf16 %v360_v27, %v356_v26  ;;  %v364_v38 = vld [vmem:[%s7199_s7 + $0x4d8] sm:$0xff] }
  0x87   : > { %5802 = vmatprep.subr.bf16.mxu1 %v5801_v25  ;;  %v358_v25 = vld [vmem:[%s7199_s7 + $0x4a8] sm:$0xff]  ;;  %v4799_v28 = vpack.c.bf16 %v349_v20, %v345_v19  ;;  %v5823_v29 = vpack.c.bf16 %v351_v23, %v347_v21  ;;  %v368_v39 = vld [vmem:[%s7199_s7 + $0x4f8] sm:$0xff]  ;;  %v367_v47 = vld [vmem:[%s7199_s7 + $0x4f0] sm:$0xff] }
  0x88   : > { %v4801_v30 = vpack.c.bf16 %v358_v25, %v354_v24  ;;  %v5829_v46 = vpack.c.bf16 %v368_v39, %v364_v38  ;;  %v370_v48 = vld [vmem:[%s7199_s7 + $0x508] sm:$0xff]  ;;  %v372_v50 = vld [vmem:[%s7199_s7 + $0x518] sm:$0xff]  ;;  %v375_v59 = vld [vmem:[%s7199_s7 + $0x530] sm:$0xff] }
  0x89   : > { %4780 = vmatpush1.bf16.msra.mxu0 %v4779_v31  ;;  %v353_v31 = vld [vmem:[%s7199_s7 + $0x480] sm:$0xff]  ;;  %v376_v51 = vld [vmem:[%s7199_s7 + $0x538] sm:$0xff]  ;;  %v378_v60 = vld [vmem:[%s7199_s7 + $0x548] sm:$0xff] }
  0x8a   : > { %5804 = vmatpush1.bf16.msra.mxu1 %v5803_v32  ;;  %4782 = vmatprep.subr.bf16.mxu0 %v4781_v33  ;;  %v357_v32 = vld [vmem:[%s7199_s7 + $0x4a0] sm:$0xff]  ;;  %v355_v33 = vld [vmem:[%s7199_s7 + $0x490] sm:$0xff]  ;;  %v5833_v58 = vpack.c.bf16 %v376_v51, %v372_v50  ;;  %v380_v62 = vld [vmem:[%s7199_s7 + $0x558] sm:$0xff] }
  0x8b   : > { %5806 = vmatprep.subr.bf16.mxu1 %v5805_v37  ;;  %v366_v37 = vld [vmem:[%s7199_s7 + $0x4e8] sm:$0xff]  ;;  %v4803_v40 = vpack.c.bf16 %v357_v32, %v353_v31  ;;  %v5827_v41 = vpack.c.bf16 %v359_v35, %v355_v33  ;;  %v384_v63 = vld [vmem:[%s7199_s7 + $0x578] sm:$0xff]  ;;  %v383_v7 = vld [vmem:[%s7199_s7 + $0x570] sm:$0xff] }
  0x8c   : > { %v4805_v42 = vpack.c.bf16 %v366_v37, %v362_v36  ;;  %v5837_v6 = vpack.c.bf16 %v384_v63, %v380_v62  ;;  %v386_v8 = vld [vmem:[%s7199_s7 + $0x588] sm:$0xff]  ;;  %v388_v10 = vld [vmem:[%s7199_s7 + $0x598] sm:$0xff]  ;;  %v385_v13 = vld [vmem:[%s7199_s7 + $0x580] sm:$0xff] }
  0x8d   : > { %4784 = vmatpush1.bf16.msra.mxu0 %v4783_v43  ;;  %v361_v43 = vld [vmem:[%s7199_s7 + $0x4c0] sm:$0xff]  ;;  %v392_v11 = vld [vmem:[%s7199_s7 + $0x5b8] sm:$0xff]  ;;  %v394_v20 = vld [vmem:[%s7199_s7 + $0x5c8] sm:$0xff] }
  0x8e   : > { %5808 = vmatpush1.bf16.msra.mxu1 %v5807_v44  ;;  %4786 = vmatprep.subr.bf16.mxu0 %v4785_v45  ;;  %v365_v44 = vld [vmem:[%s7199_s7 + $0x4e0] sm:$0xff]  ;;  %v363_v45 = vld [vmem:[%s7199_s7 + $0x4d0] sm:$0xff]  ;;  %v5841_v19 = vpack.c.bf16 %v392_v11, %v388_v10  ;;  %v398_v21 = vld [vmem:[%s7199_s7 + $0x5e8] sm:$0xff] }
  0x8f   : > { %5810 = vmatprep.subr.bf16.mxu1 %v5809_v49  ;;  %v374_v49 = vld [vmem:[%s7199_s7 + $0x528] sm:$0xff]  ;;  %v4807_v52 = vpack.c.bf16 %v365_v44, %v361_v43  ;;  %v5831_v53 = vpack.c.bf16 %v367_v47, %v363_v45  ;;  %v396_v23 = vld [vmem:[%s7199_s7 + $0x5d8] sm:$0xff]  ;;  %v4821_v27 = vpack.c.bf16 %v398_v21, %v394_v20  ;;  %v399_v32 = vld [vmem:[%s7199_s7 + $0x5f0] sm:$0xff] }
  0x90   : > { %v4809_v54 = vpack.c.bf16 %v374_v49, %v370_v48  ;;  %v400_v24 = vld [vmem:[%s7199_s7 + $0x5f8] sm:$0xff]  ;;  %v402_v33 = vld [vmem:[%s7199_s7 + $0x608] sm:$0xff]  ;;  %v407_v44 = vld [vmem:[%s7199_s7 + $0x630] sm:$0xff] }
  0x91   : > { %4788 = vmatpush1.bf16.msra.mxu0 %v4787_v55  ;;  %v369_v55 = vld [vmem:[%s7199_s7 + $0x500] sm:$0xff]  ;;  %v5845_v31 = vpack.c.bf16 %v400_v24, %v396_v23  ;;  %v404_v35 = vld [vmem:[%s7199_s7 + $0x618] sm:$0xff]  ;;  %v410_v45 = vld [vmem:[%s7199_s7 + $0x648] sm:$0xff] }
  0x92   : > { %5812 = vmatpush1.bf16.msra.mxu1 %v5811_v56  ;;  %4790 = vmatprep.subr.bf16.mxu0 %v4789_v57  ;;  %v373_v56 = vld [vmem:[%s7199_s7 + $0x520] sm:$0xff]  ;;  %v371_v57 = vld [vmem:[%s7199_s7 + $0x510] sm:$0xff]  ;;  %v408_v36 = vld [vmem:[%s7199_s7 + $0x638] sm:$0xff] }
  0x93   : > { %5814 = vmatprep.subr.bf16.mxu1 %v5813_v61  ;;  %v382_v61 = vld [vmem:[%s7199_s7 + $0x568] sm:$0xff]  ;;  %v4811_v0 = vpack.c.bf16 %v373_v56, %v369_v55  ;;  %v5835_v1 = vpack.c.bf16 %v375_v59, %v371_v57  ;;  %v5849_v43 = vpack.c.bf16 %v408_v36, %v404_v35  ;;  %v412_v47 = vld [vmem:[%s7199_s7 + $0x658] sm:$0xff]  ;;  %v415_v56 = vld [vmem:[%s7199_s7 + $0x670] sm:$0xff] }
  0x94   : > { %v4813_v2 = vpack.c.bf16 %v382_v61, %v378_v60  ;;  %v416_v48 = vld [vmem:[%s7199_s7 + $0x678] sm:$0xff]  ;;  %v418_v57 = vld [vmem:[%s7199_s7 + $0x688] sm:$0xff]  ;;  %v433_v24 = vld [vmem:[%s7199_s7 + $0x700] sm:$0xff] }
  0x95   : > { %4792 = vmatpush1.bf16.msra.mxu0 %v4791_v3  ;;  %v377_v3 = vld [vmem:[%s7199_s7 + $0x540] sm:$0xff]  ;;  %v5853_v55 = vpack.c.bf16 %v416_v48, %v412_v47  ;;  %v420_v59 = vld [vmem:[%s7199_s7 + $0x698] sm:$0xff] }
  0x96   : > { %5816 = vmatpush1.bf16.msra.mxu1 %v5815_v4  ;;  %4794 = vmatprep.subr.bf16.mxu0 %v4793_v5  ;;  %v381_v4 = vld [vmem:[%s7199_s7 + $0x560] sm:$0xff]  ;;  %v379_v5 = vld [vmem:[%s7199_s7 + $0x550] sm:$0xff]  ;;  %v424_v60 = vld [vmem:[%s7199_s7 + $0x6b8] sm:$0xff] }
  0x97   : > { %5818 = vmatprep.subr.bf16.mxu1 %v5817_v9  ;;  %v390_v9 = vld [vmem:[%s7199_s7 + $0x5a8] sm:$0xff]  ;;  %v4815_v12 = vpack.c.bf16 %v381_v4, %v377_v3  ;;  %v5839_v14 = vpack.c.bf16 %v383_v7, %v379_v5  ;;  %v5857_v3 = vpack.c.bf16 %v424_v60, %v420_v59  ;;  %v423_v4 = vld [vmem:[%s7199_s7 + $0x6b0] sm:$0xff]  ;;  %v428_v7 = vld [vmem:[%s7199_s7 + $0x6d8] sm:$0xff] }
  0x98   : > { %2322 = vmatmul.mubr.f32.vlgmr.msra.gmra.mrb[0].mxu0 %v177_v15  ;;  %v426_v5 = vld [vmem:[%s7199_s7 + $0x6c8] sm:$0xff]  ;;  %v440_v20 = vld [vmem:[%s7199_s7 + $0x738] sm:$0xff]  ;;  %v441_v36 = vld [vmem:[%s7199_s7 + $0x740] sm:$0xff] }
  0x99   : > { %4796 = vmatpush1.bf16.msra.mxu0 %v4795_v16  ;;  %3458 = vmatmul.mubr.f32.vlgmr.msra.gmra.mrb[0].mxu1 %v177_v15  ;;  %v4817_v15 = vpack.c.bf16 %v390_v9, %v386_v8  ;;  %v389_v16 = vld [vmem:[%s7199_s7 + $0x5a0] sm:$0xff]  ;;  %v432_v8 = vld [vmem:[%s7199_s7 + $0x6f8] sm:$0xff] }
  0x9a   : > { %5820 = vmatpush1.bf16.msra.mxu1 %v5819_v17  ;;  %4798 = vmatprep.subr.bf16.mxu0 %v4797_v18  ;;  %v387_v17 = vld [vmem:[%s7199_s7 + $0x590] sm:$0xff]  ;;  %v4819_v25 = vpack.c.bf16 %v389_v16, %v385_v13  ;;  %v429_v13 = vld [vmem:[%s7199_s7 + $0x6e0] sm:$0xff] }
  0x9b   : > { %5822 = vmatprep.subr.bf16.mxu1 %v5821_v22  ;;  %v391_v18 = vld [vmem:[%s7199_s7 + $0x5b0] sm:$0xff]  ;;  %v180_v22 = vld [vmem:[#allocation2 + $0x18] sm:$0xff]  ;;  %v449_v48 = vld [vmem:[%s7199_s7 + $0x780] sm:$0xff] }
  0x9c   : > { %2392 = vmatprep.mubr.f32.mxu0 %v180_v22  ;;  %3528 = vmatprep.mubr.f32.mxu1 %v180_v22  ;;  %v5843_v26 = vpack.c.bf16 %v391_v18, %v387_v17  ;;  %v431_v16 = vld [vmem:[%s7199_s7 + $0x6f0] sm:$0xff]  ;;  %v434_v17 = vld [vmem:[%s7199_s7 + $0x708] sm:$0xff]  ;;  %v457_v60 = vld [vmem:[%s7199_s7 + $0x7c0] sm:$0xff] }
  0x9d   : > { %4800 = vmatpush1.bf16.msra.mxu0 %v4799_v28  ;;  %v393_v28 = vld [vmem:[%s7199_s7 + $0x5c0] sm:$0xff]  ;;  %v438_v18 = vld [vmem:[%s7199_s7 + $0x728] sm:$0xff] }
  0x9e   : > { %5824 = vmatpush1.bf16.msra.mxu1 %v5823_v29  ;;  %4802 = vmatprep.subr.bf16.mxu0 %v4801_v30  ;;  %v397_v29 = vld [vmem:[%s7199_s7 + $0x5e0] sm:$0xff]  ;;  %v395_v30 = vld [vmem:[%s7199_s7 + $0x5d0] sm:$0xff]  ;;  %v4841_v23 = vpack.c.bf16 %v438_v18, %v434_v17 }
  0x9f   : > { %5826 = vmatprep.subr.bf16.mxu1 %v5825_v34  ;;  %v406_v34 = vld [vmem:[%s7199_s7 + $0x628] sm:$0xff]  ;;  %v4823_v37 = vpack.c.bf16 %v397_v29, %v393_v28  ;;  %v5847_v38 = vpack.c.bf16 %v399_v32, %v395_v30  ;;  %v439_v28 = vld [vmem:[%s7199_s7 + $0x730] sm:$0xff]  ;;  %v448_v32 = vld [vmem:[%s7199_s7 + $0x778] sm:$0xff] }
  0xa0   : > { %v4825_v39 = vpack.c.bf16 %v406_v34, %v402_v33  ;;  %v442_v29 = vld [vmem:[%s7199_s7 + $0x748] sm:$0xff]  ;;  %v179_v17 = vld [vmem:[#allocation2 + $0x10] sm:$0xff] }
  0xa1   : > { %4804 = vmatpush1.bf16.msra.mxu0 %v4803_v40  ;;  %v401_v40 = vld [vmem:[%s7199_s7 + $0x600] sm:$0xff]  ;;  %v446_v30 = vld [vmem:[%s7199_s7 + $0x768] sm:$0xff] }
  0xa2   : > { %5828 = vmatpush1.bf16.msra.mxu1 %v5827_v41  ;;  %4806 = vmatprep.subr.bf16.mxu0 %v4805_v42  ;;  %v405_v41 = vld [vmem:[%s7199_s7 + $0x620] sm:$0xff]  ;;  %v403_v42 = vld [vmem:[%s7199_s7 + $0x610] sm:$0xff]  ;;  %v4845_v35 = vpack.c.bf16 %v446_v30, %v442_v29  ;;  %v488_v29 = vld [vmem:[%s7199_s7 + $0x8b8] sm:$0xff] }
  0xa3   : > { %5830 = vmatprep.subr.bf16.mxu1 %v5829_v46  ;;  %v414_v46 = vld [vmem:[%s7199_s7 + $0x668] sm:$0xff]  ;;  %v4827_v49 = vpack.c.bf16 %v405_v41, %v401_v40  ;;  %v5851_v50 = vpack.c.bf16 %v407_v44, %v403_v42  ;;  %v447_v40 = vld [vmem:[%s7199_s7 + $0x770] sm:$0xff]  ;;  %v456_v44 = vld [vmem:[%s7199_s7 + $0x7b8] sm:$0xff] }
  0xa4   : > { %v4829_v51 = vpack.c.bf16 %v414_v46, %v410_v45  ;;  %v450_v41 = vld [vmem:[%s7199_s7 + $0x788] sm:$0xff] }
  0xa5   : > { %4808 = vmatpush1.bf16.msra.mxu0 %v4807_v52  ;;  %v409_v52 = vld [vmem:[%s7199_s7 + $0x640] sm:$0xff]  ;;  %v454_v42 = vld [vmem:[%s7199_s7 + $0x7a8] sm:$0xff] }
  0xa6   : > { %5832 = vmatpush1.bf16.msra.mxu1 %v5831_v53  ;;  %4810 = vmatprep.subr.bf16.mxu0 %v4809_v54  ;;  %v413_v53 = vld [vmem:[%s7199_s7 + $0x660] sm:$0xff]  ;;  %v411_v54 = vld [vmem:[%s7199_s7 + $0x650] sm:$0xff]  ;;  %v4849_v47 = vpack.c.bf16 %v454_v42, %v450_v41  ;;  %v182_v30 = vld [vmem:[#allocation2 + $0x28] sm:$0xff] }
  0xa7   : > { %5834 = vmatprep.subr.bf16.mxu1 %v5833_v58  ;;  %v422_v58 = vld [vmem:[%s7199_s7 + $0x6a8] sm:$0xff]  ;;  %v4831_v61 = vpack.c.bf16 %v413_v53, %v409_v52  ;;  %v5855_v62 = vpack.c.bf16 %v415_v56, %v411_v54  ;;  %v455_v52 = vld [vmem:[%s7199_s7 + $0x7b0] sm:$0xff]  ;;  %v464_v56 = vld [vmem:[%s7199_s7 + $0x7f8] sm:$0xff] }
  0xa8   : > { %v4833_v63 = vpack.c.bf16 %v422_v58, %v418_v57  ;;  %v458_v53 = vld [vmem:[%s7199_s7 + $0x7c8] sm:$0xff]  ;;  %v492_v41 = vld [vmem:[%s7199_s7 + $0x8d8] sm:$0xff] }
  0xa9   : > { %4812 = vmatpush1.bf16.msra.mxu0 %v4811_v0  ;;  %v417_v0 = vld [vmem:[%s7199_s7 + $0x680] sm:$0xff]  ;;  %v462_v54 = vld [vmem:[%s7199_s7 + $0x7e8] sm:$0xff]  ;;  %v496_v42 = vld [vmem:[%s7199_s7 + $0x8f8] sm:$0xff] }
  0xaa   : > { %5836 = vmatpush1.bf16.msra.mxu1 %v5835_v1  ;;  %4814 = vmatprep.subr.bf16.mxu0 %v4813_v2  ;;  %v421_v1 = vld [vmem:[%s7199_s7 + $0x6a0] sm:$0xff]  ;;  %v419_v2 = vld [vmem:[%s7199_s7 + $0x690] sm:$0xff]  ;;  %v4853_v59 = vpack.c.bf16 %v462_v54, %v458_v53  ;;  %v500_v53 = vld [vmem:[%s7199_s7 + $0x918] sm:$0xff] }
  0xab   : > { %5838 = vmatprep.subr.bf16.mxu1 %v5837_v6  ;;  %v430_v6 = vld [vmem:[%s7199_s7 + $0x6e8] sm:$0xff]  ;;  %v4835_v9 = vpack.c.bf16 %v421_v1, %v417_v0  ;;  %v5859_v10 = vpack.c.bf16 %v423_v4, %v419_v2  ;;  %v463_v0 = vld [vmem:[%s7199_s7 + $0x7f0] sm:$0xff]  ;;  %v472_v4 = vld [vmem:[%s7199_s7 + $0x838] sm:$0xff] }
  0xac   : > { %v4837_v11 = vpack.c.bf16 %v430_v6, %v426_v5  ;;  %v466_v1 = vld [vmem:[%s7199_s7 + $0x808] sm:$0xff]  ;;  %v504_v54 = vld [vmem:[%s7199_s7 + $0x938] sm:$0xff] }
  0xad   : > { %4816 = vmatpush1.bf16.msra.mxu0 %v4815_v12  ;;  %v425_v12 = vld [vmem:[%s7199_s7 + $0x6c0] sm:$0xff]  ;;  %v470_v2 = vld [vmem:[%s7199_s7 + $0x828] sm:$0xff] }
  0xae   : > { %5840 = vmatpush1.bf16.msra.mxu1 %v5839_v14  ;;  %4818 = vmatprep.subr.bf16.mxu0 %v4817_v15  ;;  %v427_v14 = vld [vmem:[%s7199_s7 + $0x6d0] sm:$0xff]  ;;  %v5861_v15 = vpack.c.bf16 %v432_v8, %v428_v7  ;;  %v4839_v21 = vpack.c.bf16 %v429_v13, %v425_v12  ;;  %v4857_v7 = vpack.c.bf16 %v470_v2, %v466_v1  ;;  %v465_v8 = vld [vmem:[%s7199_s7 + $0x800] sm:$0xff]  ;;  %v474_v13 = vld [vmem:[%s7199_s7 + $0x848] sm:$0xff] }
  0xaf   : > { %5842 = vmatprep.subr.bf16.mxu1 %v5841_v19  ;;  %v436_v19 = vld [vmem:[%s7199_s7 + $0x718] sm:$0xff]  ;;  %v5863_v22 = vpack.c.bf16 %v431_v16, %v427_v14  ;;  %v471_v12 = vld [vmem:[%s7199_s7 + $0x830] sm:$0xff]  ;;  %v478_v14 = vld [vmem:[%s7199_s7 + $0x868] sm:$0xff] }
  0xb0   : > { %v480_v16 = vld [vmem:[%s7199_s7 + $0x878] sm:$0xff] }
  0xb1   : > { %4820 = vmatpush1.bf16.msra.mxu0 %v4819_v25  ;;  %v437_v25 = vld [vmem:[%s7199_s7 + $0x720] sm:$0xff]  ;;  %v508_v1 = vld [vmem:[%s7199_s7 + $0x958] sm:$0xff] }
  0xb2   : > { %5844 = vmatpush1.bf16.msra.mxu1 %v5843_v26  ;;  %4822 = vmatprep.subr.bf16.mxu0 %v4821_v27  ;;  %v435_v26 = vld [vmem:[%s7199_s7 + $0x710] sm:$0xff]  ;;  %v5865_v27 = vpack.c.bf16 %v440_v20, %v436_v19  ;;  %v4843_v33 = vpack.c.bf16 %v437_v25, %v433_v24  ;;  %v4861_v20 = vpack.c.bf16 %v478_v14, %v474_v13  ;;  %v512_v2 = vld [vmem:[%s7199_s7 + $0x978] sm:$0xff] }
  0xb3   : > { %5846 = vmatprep.subr.bf16.mxu1 %v5845_v31  ;;  %v444_v31 = vld [vmem:[%s7199_s7 + $0x758] sm:$0xff]  ;;  %v5867_v34 = vpack.c.bf16 %v439_v28, %v435_v26  ;;  %v479_v25 = vld [vmem:[%s7199_s7 + $0x870] sm:$0xff]  ;;  %v482_v26 = vld [vmem:[%s7199_s7 + $0x888] sm:$0xff] }
  0xb4   : > { %v484_v28 = vld [vmem:[%s7199_s7 + $0x898] sm:$0xff] }
  0xb5   : > { %4824 = vmatpush1.bf16.msra.mxu0 %v4823_v37  ;;  %v445_v37 = vld [vmem:[%s7199_s7 + $0x760] sm:$0xff]  ;;  %v516_v13 = vld [vmem:[%s7199_s7 + $0x998] sm:$0xff] }
  0xb6   : > { %5848 = vmatpush1.bf16.msra.mxu1 %v5847_v38  ;;  %4826 = vmatprep.subr.bf16.mxu0 %v4825_v39  ;;  %v443_v38 = vld [vmem:[%s7199_s7 + $0x750] sm:$0xff]  ;;  %v5869_v39 = vpack.c.bf16 %v448_v32, %v444_v31  ;;  %v4847_v45 = vpack.c.bf16 %v445_v37, %v441_v36  ;;  %v5889_v37 = vpack.c.bf16 %v488_v29, %v484_v28  ;;  %v520_v14 = vld [vmem:[%s7199_s7 + $0x9b8] sm:$0xff] }
  0xb7   : > { %5850 = vmatprep.subr.bf16.mxu1 %v5849_v43  ;;  %v452_v43 = vld [vmem:[%s7199_s7 + $0x798] sm:$0xff]  ;;  %v5871_v46 = vpack.c.bf16 %v447_v40, %v443_v38  ;;  %v483_v36 = vld [vmem:[%s7199_s7 + $0x890] sm:$0xff]  ;;  %v494_v40 = vld [vmem:[%s7199_s7 + $0x8e8] sm:$0xff] }
  0xb8   : > { %v487_v38 = vld [vmem:[%s7199_s7 + $0x8b0] sm:$0xff] }
  0xb9   : > { %4828 = vmatpush1.bf16.msra.mxu0 %v4827_v49  ;;  %v453_v49 = vld [vmem:[%s7199_s7 + $0x7a0] sm:$0xff] }
  0xba   : > { %5852 = vmatpush1.bf16.msra.mxu1 %v5851_v50  ;;  %4830 = vmatprep.subr.bf16.mxu0 %v4829_v51  ;;  %v451_v50 = vld [vmem:[%s7199_s7 + $0x790] sm:$0xff]  ;;  %v5873_v51 = vpack.c.bf16 %v456_v44, %v452_v43  ;;  %v4851_v57 = vpack.c.bf16 %v453_v49, %v449_v48  ;;  %v5891_v44 = vpack.c.bf16 %v487_v38, %v483_v36  ;;  %v534_v36 = vld [vmem:[%s7199_s7 + $0xa28] sm:$0xff]  ;;  %v536_v38 = vld [vmem:[%s7199_s7 + $0xa38] sm:$0xff] }
  0xbb   : > { %5854 = vmatprep.subr.bf16.mxu1 %v5853_v55  ;;  %v460_v55 = vld [vmem:[%s7199_s7 + $0x7d8] sm:$0xff]  ;;  %v5875_v58 = vpack.c.bf16 %v455_v52, %v451_v50  ;;  %v491_v48 = vld [vmem:[%s7199_s7 + $0x8d0] sm:$0xff]  ;;  %v5893_v49 = vpack.c.bf16 %v496_v42, %v492_v41  ;;  %v502_v52 = vld [vmem:[%s7199_s7 + $0x928] sm:$0xff] }
  0xbc   : > { %v495_v50 = vld [vmem:[%s7199_s7 + $0x8f0] sm:$0xff]  ;;  %v529_v42 = vld [vmem:[%s7199_s7 + $0xa00] sm:$0xff] }
  0xbd   : > { %4832 = vmatpush1.bf16.msra.mxu0 %v4831_v61  ;;  %v461_v61 = vld [vmem:[%s7199_s7 + $0x7e0] sm:$0xff] }
  0xbe   : > { %5856 = vmatpush1.bf16.msra.mxu1 %v5855_v62  ;;  %4834 = vmatprep.subr.bf16.mxu0 %v4833_v63  ;;  %v459_v62 = vld [vmem:[%s7199_s7 + $0x7d0] sm:$0xff]  ;;  %v5877_v63 = vpack.c.bf16 %v464_v56, %v460_v55  ;;  %v4855_v5 = vpack.c.bf16 %v461_v61, %v457_v60  ;;  %v5895_v56 = vpack.c.bf16 %v495_v50, %v491_v48  ;;  %v542_v48 = vld [vmem:[%s7199_s7 + $0xa68] sm:$0xff]  ;;  %v544_v50 = vld [vmem:[%s7199_s7 + $0xa78] sm:$0xff] }
  0xbf   : > { %5858 = vmatprep.subr.bf16.mxu1 %v5857_v3  ;;  %v468_v3 = vld [vmem:[%s7199_s7 + $0x818] sm:$0xff]  ;;  %v5879_v6 = vpack.c.bf16 %v463_v0, %v459_v62  ;;  %v499_v60 = vld [vmem:[%s7199_s7 + $0x910] sm:$0xff]  ;;  %v5897_v61 = vpack.c.bf16 %v504_v54, %v500_v53  ;;  %v510_v0 = vld [vmem:[%s7199_s7 + $0x968] sm:$0xff] }
  0xc0   : > { %v503_v62 = vld [vmem:[%s7199_s7 + $0x930] sm:$0xff]  ;;  %v537_v54 = vld [vmem:[%s7199_s7 + $0xa40] sm:$0xff] }
  0xc1   : > { %4836 = vmatpush1.bf16.msra.mxu0 %v4835_v9  ;;  %v469_v9 = vld [vmem:[%s7199_s7 + $0x820] sm:$0xff] }
  0xc2   : > { %5860 = vmatpush1.bf16.msra.mxu1 %v5859_v10  ;;  %4838 = vmatprep.subr.bf16.mxu0 %v4837_v11  ;;  %v467_v10 = vld [vmem:[%s7199_s7 + $0x810] sm:$0xff]  ;;  %v5881_v11 = vpack.c.bf16 %v472_v4, %v468_v3  ;;  %v4859_v18 = vpack.c.bf16 %v469_v9, %v465_v8  ;;  %v5899_v4 = vpack.c.bf16 %v503_v62, %v499_v60  ;;  %v550_v60 = vld [vmem:[%s7199_s7 + $0xaa8] sm:$0xff]  ;;  %v552_v62 = vld [vmem:[%s7199_s7 + $0xab8] sm:$0xff] }
  0xc3   : > { %5862 = vmatprep.subr.bf16.mxu1 %v5861_v15  ;;  %v476_v15 = vld [vmem:[%s7199_s7 + $0x858] sm:$0xff]  ;;  %v5883_v19 = vpack.c.bf16 %v471_v12, %v467_v10  ;;  %v507_v8 = vld [vmem:[%s7199_s7 + $0x950] sm:$0xff]  ;;  %v5901_v9 = vpack.c.bf16 %v512_v2, %v508_v1  ;;  %v518_v12 = vld [vmem:[%s7199_s7 + $0x9a8] sm:$0xff] }
  0xc4   : > { %v5885_v24 = vpack.c.bf16 %v480_v16, %v476_v15  ;;  %v511_v10 = vld [vmem:[%s7199_s7 + $0x970] sm:$0xff]  ;;  %v545_v2 = vld [vmem:[%s7199_s7 + $0xa80] sm:$0xff] }
  0xc5   : > { %4840 = vmatpush1.bf16.msra.mxu0 %v4839_v21  ;;  %v473_v21 = vld [vmem:[%s7199_s7 + $0x840] sm:$0xff]  ;;  %v5903_v16 = vpack.c.bf16 %v511_v10, %v507_v8  ;;  %v558_v8 = vld [vmem:[%s7199_s7 + $0xae8] sm:$0xff]  ;;  %v560_v10 = vld [vmem:[%s7199_s7 + $0xaf8] sm:$0xff] }
  0xc6   : > { %5864 = vmatpush1.bf16.msra.mxu1 %v5863_v22  ;;  %4842 = vmatprep.subr.bf16.mxu0 %v4841_v23  ;;  %v477_v22 = vld [vmem:[%s7199_s7 + $0x860] sm:$0xff]  ;;  %v475_v23 = vld [vmem:[%s7199_s7 + $0x850] sm:$0xff] }
  0xc7   : > { %5866 = vmatprep.subr.bf16.mxu1 %v5865_v27  ;;  %v486_v27 = vld [vmem:[%s7199_s7 + $0x8a8] sm:$0xff]  ;;  %v4863_v31 = vpack.c.bf16 %v477_v22, %v473_v21  ;;  %v5887_v32 = vpack.c.bf16 %v479_v25, %v475_v23  ;;  %v5905_v21 = vpack.c.bf16 %v520_v14, %v516_v13  ;;  %v519_v22 = vld [vmem:[%s7199_s7 + $0x9b0] sm:$0xff]  ;;  %v524_v25 = vld [vmem:[%s7199_s7 + $0x9d8] sm:$0xff] }
  0xc8   : > { %v522_v23 = vld [vmem:[%s7199_s7 + $0x9c8] sm:$0xff]  ;;  %v553_v14 = vld [vmem:[%s7199_s7 + $0xac0] sm:$0xff] }
  0xc9   : > { %4844 = vmatpush1.bf16.msra.mxu0 %v4843_v33  ;;  %v4865_v33 = vpack.c.bf16 %v486_v27, %v482_v26  ;;  %v528_v26 = vld [vmem:[%s7199_s7 + $0x9f8] sm:$0xff] }
  0xca   : > { %5868 = vmatpush1.bf16.msra.mxu1 %v5867_v34  ;;  %4846 = vmatprep.subr.bf16.mxu0 %v4845_v35  ;;  %v481_v34 = vld [vmem:[%s7199_s7 + $0x880] sm:$0xff] }
  0xcb   : > { %5870 = vmatprep.subr.bf16.mxu1 %v5869_v39  ;;  %v485_v35 = vld [vmem:[%s7199_s7 + $0x8a0] sm:$0xff]  ;;  %v490_v39 = vld [vmem:[%s7199_s7 + $0x8c8] sm:$0xff] }
  0xcc   : > { %v4867_v43 = vpack.c.bf16 %v485_v35, %v481_v34  ;;  %v527_v34 = vld [vmem:[%s7199_s7 + $0x9f0] sm:$0xff]  ;;  %v530_v35 = vld [vmem:[%s7199_s7 + $0xa08] sm:$0xff] }
  0xcd   : > { %4848 = vmatpush1.bf16.msra.mxu0 %v4847_v45  ;;  %v4869_v45 = vpack.c.bf16 %v494_v40, %v490_v39  ;;  %v4889_v41 = vpack.c.bf16 %v534_v36, %v530_v35 }
  0xce   : > { %5872 = vmatpush1.bf16.msra.mxu1 %v5871_v46  ;;  %4850 = vmatprep.subr.bf16.mxu0 %v4849_v47  ;;  %v489_v46 = vld [vmem:[%s7199_s7 + $0x8c0] sm:$0xff] }
  0xcf   : > { %5874 = vmatprep.subr.bf16.mxu1 %v5873_v51  ;;  %v493_v47 = vld [vmem:[%s7199_s7 + $0x8e0] sm:$0xff]  ;;  %v498_v51 = vld [vmem:[%s7199_s7 + $0x908] sm:$0xff] }
  0xd0   : > { %v4871_v55 = vpack.c.bf16 %v493_v47, %v489_v46  ;;  %v535_v46 = vld [vmem:[%s7199_s7 + $0xa30] sm:$0xff]  ;;  %v538_v47 = vld [vmem:[%s7199_s7 + $0xa48] sm:$0xff] }
  0xd1   : > { %4852 = vmatpush1.bf16.msra.mxu0 %v4851_v57  ;;  %v4873_v57 = vpack.c.bf16 %v502_v52, %v498_v51  ;;  %v4893_v53 = vpack.c.bf16 %v542_v48, %v538_v47 }
  0xd2   : > { %5876 = vmatpush1.bf16.msra.mxu1 %v5875_v58  ;;  %4854 = vmatprep.subr.bf16.mxu0 %v4853_v59  ;;  %v497_v58 = vld [vmem:[%s7199_s7 + $0x900] sm:$0xff] }
  0xd3   : > { %5878 = vmatprep.subr.bf16.mxu1 %v5877_v63  ;;  %v501_v59 = vld [vmem:[%s7199_s7 + $0x920] sm:$0xff]  ;;  %v506_v63 = vld [vmem:[%s7199_s7 + $0x948] sm:$0xff] }
  0xd4   : > { %v4875_v3 = vpack.c.bf16 %v501_v59, %v497_v58  ;;  %v543_v58 = vld [vmem:[%s7199_s7 + $0xa70] sm:$0xff]  ;;  %v546_v59 = vld [vmem:[%s7199_s7 + $0xa88] sm:$0xff] }
  0xd5   : > { %4856 = vmatpush1.bf16.msra.mxu0 %v4855_v5  ;;  %v4877_v5 = vpack.c.bf16 %v510_v0, %v506_v63  ;;  %v4897_v1 = vpack.c.bf16 %v550_v60, %v546_v59 }
  0xd6   : > { %5880 = vmatpush1.bf16.msra.mxu1 %v5879_v6  ;;  %4858 = vmatprep.subr.bf16.mxu0 %v4857_v7  ;;  %v505_v6 = vld [vmem:[%s7199_s7 + $0x940] sm:$0xff] }
  0xd7   : > { %5882 = vmatprep.subr.bf16.mxu1 %v5881_v11  ;;  %v509_v7 = vld [vmem:[%s7199_s7 + $0x960] sm:$0xff]  ;;  %v514_v11 = vld [vmem:[%s7199_s7 + $0x988] sm:$0xff] }
  0xd8   : > { %2393 = vmatmul.mubr.f32.vlgmr.msra.gmra.mrb[0].mxu0 %v179_v17  ;;  %v4879_v15 = vpack.c.bf16 %v509_v7, %v505_v6  ;;  %v551_v6 = vld [vmem:[%s7199_s7 + $0xab0] sm:$0xff]  ;;  %v554_v7 = vld [vmem:[%s7199_s7 + $0xac8] sm:$0xff] }
  0xd9   : > { %4860 = vmatpush1.bf16.msra.mxu0 %v4859_v18  ;;  %3529 = vmatmul.mubr.f32.vlgmr.msra.gmra.mrb[0].mxu1 %v179_v17  ;;  %v4881_v17 = vpack.c.bf16 %v518_v12, %v514_v11  ;;  %v513_v18 = vld [vmem:[%s7199_s7 + $0x980] sm:$0xff]  ;;  %v4901_v13 = vpack.c.bf16 %v558_v8, %v554_v7 }
  0xda   : > { %5884 = vmatpush1.bf16.msra.mxu1 %v5883_v19  ;;  %4862 = vmatprep.subr.bf16.mxu0 %v4861_v20  ;;  %v517_v19 = vld [vmem:[%s7199_s7 + $0x9a0] sm:$0xff]  ;;  %v515_v20 = vld [vmem:[%s7199_s7 + $0x990] sm:$0xff] }
  0xdb   : > { %5886 = vmatprep.subr.bf16.mxu1 %v5885_v24  ;;  %2463 = vmatprep.mubr.f32.mxu0 %v182_v30  ;;  %v526_v24 = vld [vmem:[%s7199_s7 + $0x9e8] sm:$0xff]  ;;  %v4883_v27 = vpack.c.bf16 %v517_v19, %v513_v18  ;;  %v5907_v28 = vpack.c.bf16 %v519_v22, %v515_v20  ;;  %v559_v18 = vld [vmem:[%s7199_s7 + $0xaf0] sm:$0xff]  ;;  %v568_v22 = vld [vmem:[%s7199_s7 + $0xb38] sm:$0xff] }
  0xdc   : > { %3599 = vmatprep.mubr.f32.mxu1 %v182_v30  ;;  %v4885_v29 = vpack.c.bf16 %v526_v24, %v522_v23  ;;  %v521_v30 = vld [vmem:[%s7199_s7 + $0x9c0] sm:$0xff]  ;;  %v562_v19 = vld [vmem:[%s7199_s7 + $0xb08] sm:$0xff] }
  0xdd   : > { %4864 = vmatpush1.bf16.msra.mxu0 %v4863_v31  ;;  %v525_v31 = vld [vmem:[%s7199_s7 + $0x9e0] sm:$0xff]  ;;  %v566_v20 = vld [vmem:[%s7199_s7 + $0xb28] sm:$0xff] }
  0xde   : > { %5888 = vmatpush1.bf16.msra.mxu1 %v5887_v32  ;;  %4866 = vmatprep.subr.bf16.mxu0 %v4865_v33  ;;  %v523_v32 = vld [vmem:[%s7199_s7 + $0x9d0] sm:$0xff]  ;;  %v5909_v33 = vpack.c.bf16 %v528_v26, %v524_v25  ;;  %v4887_v39 = vpack.c.bf16 %v525_v31, %v521_v30  ;;  %v4905_v25 = vpack.c.bf16 %v566_v20, %v562_v19  ;;  %v561_v26 = vld [vmem:[%s7199_s7 + $0xb00] sm:$0xff]  ;;  %v570_v31 = vld [vmem:[%s7199_s7 + $0xb48] sm:$0xff] }
  0xdf   : > { %5890 = vmatprep.subr.bf16.mxu1 %v5889_v37  ;;  %v532_v37 = vld [vmem:[%s7199_s7 + $0xa18] sm:$0xff]  ;;  %v5911_v40 = vpack.c.bf16 %v527_v34, %v523_v32  ;;  %v567_v30 = vld [vmem:[%s7199_s7 + $0xb30] sm:$0xff]  ;;  %v574_v32 = vld [vmem:[%s7199_s7 + $0xb68] sm:$0xff] }
  0xe0   : > { %v576_v34 = vld [vmem:[%s7199_s7 + $0xb78] sm:$0xff]  ;;  %v181_v19 = vld [vmem:[#allocation2 + $0x20] sm:$0xff] }
  0xe1   : > { %4868 = vmatpush1.bf16.msra.mxu0 %v4867_v43  ;;  %v533_v43 = vld [vmem:[%s7199_s7 + $0xa20] sm:$0xff] }
  0xe2   : > { %5892 = vmatpush1.bf16.msra.mxu1 %v5891_v44  ;;  %4870 = vmatprep.subr.bf16.mxu0 %v4869_v45  ;;  %v531_v44 = vld [vmem:[%s7199_s7 + $0xa10] sm:$0xff]  ;;  %v5913_v45 = vpack.c.bf16 %v536_v38, %v532_v37  ;;  %v4891_v51 = vpack.c.bf16 %v533_v43, %v529_v42  ;;  %v4909_v37 = vpack.c.bf16 %v574_v32, %v570_v31  ;;  %v569_v38 = vld [vmem:[%s7199_s7 + $0xb40] sm:$0xff]  ;;  %v578_v43 = vld [vmem:[%s7199_s7 + $0xb88] sm:$0xff] }
  0xe3   : > { %5894 = vmatprep.subr.bf16.mxu1 %v5893_v49  ;;  %v540_v49 = vld [vmem:[%s7199_s7 + $0xa58] sm:$0xff]  ;;  %v5915_v52 = vpack.c.bf16 %v535_v46, %v531_v44  ;;  %v575_v42 = vld [vmem:[%s7199_s7 + $0xb70] sm:$0xff]  ;;  %v582_v44 = vld [vmem:[%s7199_s7 + $0xba8] sm:$0xff] }
  0xe4   : > { %v584_v46 = vld [vmem:[%s7199_s7 + $0xbb8] sm:$0xff] }
  0xe5   : > { %4872 = vmatpush1.bf16.msra.mxu0 %v4871_v55  ;;  %v541_v55 = vld [vmem:[%s7199_s7 + $0xa60] sm:$0xff]  ;;  %v616_v31 = vld [vmem:[%s7199_s7 + $0xcb8] sm:$0xff] }
  0xe6   : > { %5896 = vmatpush1.bf16.msra.mxu1 %v5895_v56  ;;  %4874 = vmatprep.subr.bf16.mxu0 %v4873_v57  ;;  %v539_v56 = vld [vmem:[%s7199_s7 + $0xa50] sm:$0xff]  ;;  %v5917_v57 = vpack.c.bf16 %v544_v50, %v540_v49  ;;  %v4895_v63 = vpack.c.bf16 %v541_v55, %v537_v54  ;;  %v4913_v49 = vpack.c.bf16 %v582_v44, %v578_v43  ;;  %v577_v50 = vld [vmem:[%s7199_s7 + $0xb80] sm:$0xff]  ;;  %v586_v55 = vld [vmem:[%s7199_s7 + $0xbc8] sm:$0xff] }
  0xe7   : > { %5898 = vmatprep.subr.bf16.mxu1 %v5897_v61  ;;  %v548_v61 = vld [vmem:[%s7199_s7 + $0xa98] sm:$0xff]  ;;  %v5919_v0 = vpack.c.bf16 %v543_v58, %v539_v56  ;;  %v583_v54 = vld [vmem:[%s7199_s7 + $0xbb0] sm:$0xff]  ;;  %v590_v56 = vld [vmem:[%s7199_s7 + $0xbe8] sm:$0xff] }
  0xe8   : > { %v592_v58 = vld [vmem:[%s7199_s7 + $0xbf8] sm:$0xff] }
  0xe9   : > { %4876 = vmatpush1.bf16.msra.mxu0 %v4875_v3  ;;  %v549_v3 = vld [vmem:[%s7199_s7 + $0xaa0] sm:$0xff]  ;;  %v184_v32 = vld [vmem:[#allocation2 + $0x38] sm:$0xff] }
  0xea   : > { %5900 = vmatpush1.bf16.msra.mxu1 %v5899_v4  ;;  %4878 = vmatprep.subr.bf16.mxu0 %v4877_v5  ;;  %v547_v4 = vld [vmem:[%s7199_s7 + $0xa90] sm:$0xff]  ;;  %v5921_v5 = vpack.c.bf16 %v552_v62, %v548_v61  ;;  %v4899_v11 = vpack.c.bf16 %v549_v3, %v545_v2  ;;  %v4917_v61 = vpack.c.bf16 %v590_v56, %v586_v55  ;;  %v585_v62 = vld [vmem:[%s7199_s7 + $0xbc0] sm:$0xff]  ;;  %v594_v3 = vld [vmem:[%s7199_s7 + $0xc08] sm:$0xff] }
  0xeb   : > { %5902 = vmatprep.subr.bf16.mxu1 %v5901_v9  ;;  %v556_v9 = vld [vmem:[%s7199_s7 + $0xad8] sm:$0xff]  ;;  %v5923_v12 = vpack.c.bf16 %v551_v6, %v547_v4  ;;  %v591_v2 = vld [vmem:[%s7199_s7 + $0xbf0] sm:$0xff]  ;;  %v598_v4 = vld [vmem:[%s7199_s7 + $0xc28] sm:$0xff] }
  0xec   : > { %v600_v6 = vld [vmem:[%s7199_s7 + $0xc38] sm:$0xff] }
  0xed   : > { %4880 = vmatpush1.bf16.msra.mxu0 %v4879_v15  ;;  %v557_v15 = vld [vmem:[%s7199_s7 + $0xae0] sm:$0xff]  ;;  %v620_v43 = vld [vmem:[%s7199_s7 + $0xcd8] sm:$0xff] }
  0xee   : > { %5904 = vmatpush1.bf16.msra.mxu1 %v5903_v16  ;;  %4882 = vmatprep.subr.bf16.mxu0 %v4881_v17  ;;  %v555_v16 = vld [vmem:[%s7199_s7 + $0xad0] sm:$0xff]  ;;  %v5925_v17 = vpack.c.bf16 %v560_v10, %v556_v9  ;;  %v4903_v23 = vpack.c.bf16 %v557_v15, %v553_v14  ;;  %v4921_v9 = vpack.c.bf16 %v598_v4, %v594_v3  ;;  %v593_v10 = vld [vmem:[%s7199_s7 + $0xc00] sm:$0xff]  ;;  %v602_v15 = vld [vmem:[%s7199_s7 + $0xc48] sm:$0xff] }
  0xef   : > { %5906 = vmatprep.subr.bf16.mxu1 %v5905_v21  ;;  %v564_v21 = vld [vmem:[%s7199_s7 + $0xb18] sm:$0xff]  ;;  %v5927_v24 = vpack.c.bf16 %v559_v18, %v555_v16  ;;  %v599_v14 = vld [vmem:[%s7199_s7 + $0xc30] sm:$0xff]  ;;  %v606_v16 = vld [vmem:[%s7199_s7 + $0xc68] sm:$0xff] }
  0xf0   : > { %v608_v18 = vld [vmem:[%s7199_s7 + $0xc78] sm:$0xff] }
  0xf1   : > { %4884 = vmatpush1.bf16.msra.mxu0 %v4883_v27  ;;  %v565_v27 = vld [vmem:[%s7199_s7 + $0xb20] sm:$0xff]  ;;  %v624_v44 = vld [vmem:[%s7199_s7 + $0xcf8] sm:$0xff] }
  0xf2   : > { %5908 = vmatpush1.bf16.msra.mxu1 %v5907_v28  ;;  %4886 = vmatprep.subr.bf16.mxu0 %v4885_v29  ;;  %v563_v28 = vld [vmem:[%s7199_s7 + $0xb10] sm:$0xff]  ;;  %v5929_v29 = vpack.c.bf16 %v568_v22, %v564_v21  ;;  %v4907_v35 = vpack.c.bf16 %v565_v27, %v561_v26  ;;  %v4925_v22 = vpack.c.bf16 %v606_v16, %v602_v15  ;;  %v628_v55 = vld [vmem:[%s7199_s7 + $0xd18] sm:$0xff] }
  0xf3   : > { %5910 = vmatprep.subr.bf16.mxu1 %v5909_v33  ;;  %v572_v33 = vld [vmem:[%s7199_s7 + $0xb58] sm:$0xff]  ;;  %v5931_v36 = vpack.c.bf16 %v567_v30, %v563_v28  ;;  %v607_v27 = vld [vmem:[%s7199_s7 + $0xc70] sm:$0xff]  ;;  %v610_v28 = vld [vmem:[%s7199_s7 + $0xc88] sm:$0xff] }
  0xf4   : > { %v612_v30 = vld [vmem:[%s7199_s7 + $0xc98] sm:$0xff] }
  0xf5   : > { %4888 = vmatpush1.bf16.msra.mxu0 %v4887_v39  ;;  %v573_v39 = vld [vmem:[%s7199_s7 + $0xb60] sm:$0xff]  ;;  %v632_v56 = vld [vmem:[%s7199_s7 + $0xd38] sm:$0xff] }
  0xf6   : > { %5912 = vmatpush1.bf16.msra.mxu1 %v5911_v40  ;;  %4890 = vmatprep.subr.bf16.mxu0 %v4889_v41  ;;  %v571_v40 = vld [vmem:[%s7199_s7 + $0xb50] sm:$0xff]  ;;  %v5933_v41 = vpack.c.bf16 %v576_v34, %v572_v33  ;;  %v4911_v47 = vpack.c.bf16 %v573_v39, %v569_v38  ;;  %v5953_v39 = vpack.c.bf16 %v616_v31, %v612_v30  ;;  %v636_v3 = vld [vmem:[%s7199_s7 + $0xd58] sm:$0xff] }
  0xf7   : > { %5914 = vmatprep.subr.bf16.mxu1 %v5913_v45  ;;  %v580_v45 = vld [vmem:[%s7199_s7 + $0xb98] sm:$0xff]  ;;  %v5935_v48 = vpack.c.bf16 %v575_v42, %v571_v40  ;;  %v611_v38 = vld [vmem:[%s7199_s7 + $0xc90] sm:$0xff]  ;;  %v622_v42 = vld [vmem:[%s7199_s7 + $0xce8] sm:$0xff] }
  0xf8   : > { %v615_v40 = vld [vmem:[%s7199_s7 + $0xcb0] sm:$0xff]  ;;  %v640_v4 = vld [vmem:[%s7199_s7 + $0xd78] sm:$0xff] }
  0xf9   : > { %4892 = vmatpush1.bf16.msra.mxu0 %v4891_v51  ;;  %v581_v51 = vld [vmem:[%s7199_s7 + $0xba0] sm:$0xff]  ;;  %v644_v15 = vld [vmem:[%s7199_s7 + $0xd98] sm:$0xff] }
  0xfa   : > { %5916 = vmatpush1.bf16.msra.mxu1 %v5915_v52  ;;  %4894 = vmatprep.subr.bf16.mxu0 %v4893_v53  ;;  %v579_v52 = vld [vmem:[%s7199_s7 + $0xb90] sm:$0xff]  ;;  %v5937_v53 = vpack.c.bf16 %v584_v46, %v580_v45  ;;  %v4915_v59 = vpack.c.bf16 %v581_v51, %v577_v50  ;;  %v5955_v46 = vpack.c.bf16 %v615_v40, %v611_v38  ;;  %v648_v16 = vld [vmem:[%s7199_s7 + $0xdb8] sm:$0xff]  ;;  %v662_v38 = vld [vmem:[%s7199_s7 + $0xe28] sm:$0xff] }
  0xfb   : > { %5918 = vmatprep.subr.bf16.mxu1 %v5917_v57  ;;  %v588_v57 = vld [vmem:[%s7199_s7 + $0xbd8] sm:$0xff]  ;;  %v5939_v60 = vpack.c.bf16 %v583_v54, %v579_v52  ;;  %v619_v50 = vld [vmem:[%s7199_s7 + $0xcd0] sm:$0xff]  ;;  %v5957_v51 = vpack.c.bf16 %v624_v44, %v620_v43  ;;  %v630_v54 = vld [vmem:[%s7199_s7 + $0xd28] sm:$0xff] }
  0xfc   : > { %v623_v52 = vld [vmem:[%s7199_s7 + $0xcf0] sm:$0xff]  ;;  %v664_v40 = vld [vmem:[%s7199_s7 + $0xe38] sm:$0xff]  ;;  %v657_v44 = vld [vmem:[%s7199_s7 + $0xe00] sm:$0xff] }
  0xfd   : > { %4896 = vmatpush1.bf16.msra.mxu0 %v4895_v63  ;;  %v589_v63 = vld [vmem:[%s7199_s7 + $0xbe0] sm:$0xff] }
  0xfe   : > { %5920 = vmatpush1.bf16.msra.mxu1 %v5919_v0  ;;  %4898 = vmatprep.subr.bf16.mxu0 %v4897_v1  ;;  %v587_v0 = vld [vmem:[%s7199_s7 + $0xbd0] sm:$0xff]  ;;  %v5941_v1 = vpack.c.bf16 %v592_v58, %v588_v57  ;;  %v4919_v7 = vpack.c.bf16 %v589_v63, %v585_v62  ;;  %v5959_v58 = vpack.c.bf16 %v623_v52, %v619_v50  ;;  %v670_v50 = vld [vmem:[%s7199_s7 + $0xe68] sm:$0xff]  ;;  %v672_v52 = vld [vmem:[%s7199_s7 + $0xe78] sm:$0xff] }
  0xff   : > { %5922 = vmatprep.subr.bf16.mxu1 %v5921_v5  ;;  %v596_v5 = vld [vmem:[%s7199_s7 + $0xc18] sm:$0xff]  ;;  %v5943_v8 = vpack.c.bf16 %v591_v2, %v587_v0  ;;  %v627_v62 = vld [vmem:[%s7199_s7 + $0xd10] sm:$0xff]  ;;  %v5961_v63 = vpack.c.bf16 %v632_v56, %v628_v55  ;;  %v638_v2 = vld [vmem:[%s7199_s7 + $0xd68] sm:$0xff] }
 0x100   : > { %v631_v0 = vld [vmem:[%s7199_s7 + $0xd30] sm:$0xff]  ;;  %v665_v56 = vld [vmem:[%s7199_s7 + $0xe40] sm:$0xff] }
 0x101   : > { %4900 = vmatpush1.bf16.msra.mxu0 %v4899_v11  ;;  %v597_v11 = vld [vmem:[%s7199_s7 + $0xc20] sm:$0xff] }
 0x102   : > { %5924 = vmatpush1.bf16.msra.mxu1 %v5923_v12  ;;  %4902 = vmatprep.subr.bf16.mxu0 %v4901_v13  ;;  %v595_v12 = vld [vmem:[%s7199_s7 + $0xc10] sm:$0xff]  ;;  %v5945_v13 = vpack.c.bf16 %v600_v6, %v596_v5  ;;  %v4923_v20 = vpack.c.bf16 %v597_v11, %v593_v10  ;;  %v5963_v6 = vpack.c.bf16 %v631_v0, %v627_v62  ;;  %v678_v62 = vld [vmem:[%s7199_s7 + $0xea8] sm:$0xff]  ;;  %v680_v0 = vld [vmem:[%s7199_s7 + $0xeb8] sm:$0xff] }
 0x103   : > { %5926 = vmatprep.subr.bf16.mxu1 %v5925_v17  ;;  %v604_v17 = vld [vmem:[%s7199_s7 + $0xc58] sm:$0xff]  ;;  %v5947_v21 = vpack.c.bf16 %v599_v14, %v595_v12  ;;  %v635_v10 = vld [vmem:[%s7199_s7 + $0xd50] sm:$0xff]  ;;  %v5965_v11 = vpack.c.bf16 %v640_v4, %v636_v3  ;;  %v646_v14 = vld [vmem:[%s7199_s7 + $0xda8] sm:$0xff] }
 0x104   : > { %v5949_v26 = vpack.c.bf16 %v608_v18, %v604_v17  ;;  %v639_v12 = vld [vmem:[%s7199_s7 + $0xd70] sm:$0xff]  ;;  %v673_v4 = vld [vmem:[%s7199_s7 + $0xe80] sm:$0xff] }
 0x105   : > { %4904 = vmatpush1.bf16.msra.mxu0 %v4903_v23  ;;  %v601_v23 = vld [vmem:[%s7199_s7 + $0xc40] sm:$0xff]  ;;  %v5967_v18 = vpack.c.bf16 %v639_v12, %v635_v10  ;;  %v686_v10 = vld [vmem:[%s7199_s7 + $0xee8] sm:$0xff]  ;;  %v688_v12 = vld [vmem:[%s7199_s7 + $0xef8] sm:$0xff] }
 0x106   : > { %5928 = vmatpush1.bf16.msra.mxu1 %v5927_v24  ;;  %4906 = vmatprep.subr.bf16.mxu0 %v4905_v25  ;;  %v605_v24 = vld [vmem:[%s7199_s7 + $0xc60] sm:$0xff]  ;;  %v603_v25 = vld [vmem:[%s7199_s7 + $0xc50] sm:$0xff] }
 0x107   : > { %5930 = vmatprep.subr.bf16.mxu1 %v5929_v29  ;;  %v614_v29 = vld [vmem:[%s7199_s7 + $0xca8] sm:$0xff]  ;;  %v4927_v33 = vpack.c.bf16 %v605_v24, %v601_v23  ;;  %v5951_v34 = vpack.c.bf16 %v607_v27, %v603_v25  ;;  %v5969_v23 = vpack.c.bf16 %v648_v16, %v644_v15  ;;  %v647_v24 = vld [vmem:[%s7199_s7 + $0xdb0] sm:$0xff]  ;;  %v652_v27 = vld [vmem:[%s7199_s7 + $0xdd8] sm:$0xff] }
 0x108   : > { %v650_v25 = vld [vmem:[%s7199_s7 + $0xdc8] sm:$0xff]  ;;  %v681_v16 = vld [vmem:[%s7199_s7 + $0xec0] sm:$0xff] }
 0x109   : > { %4908 = vmatpush1.bf16.msra.mxu0 %v4907_v35  ;;  %v4929_v35 = vpack.c.bf16 %v614_v29, %v610_v28  ;;  %v656_v28 = vld [vmem:[%s7199_s7 + $0xdf8] sm:$0xff] }
 0x10a   : > { %5932 = vmatpush1.bf16.msra.mxu1 %v5931_v36  ;;  %4910 = vmatprep.subr.bf16.mxu0 %v4909_v37  ;;  %v609_v36 = vld [vmem:[%s7199_s7 + $0xc80] sm:$0xff] }
 0x10b   : > { %5934 = vmatprep.subr.bf16.mxu1 %v5933_v41  ;;  %v613_v37 = vld [vmem:[%s7199_s7 + $0xca0] sm:$0xff]  ;;  %v618_v41 = vld [vmem:[%s7199_s7 + $0xcc8] sm:$0xff] }
 0x10c   : > { %v4931_v45 = vpack.c.bf16 %v613_v37, %v609_v36  ;;  %v655_v36 = vld [vmem:[%s7199_s7 + $0xdf0] sm:$0xff]  ;;  %v658_v37 = vld [vmem:[%s7199_s7 + $0xe08] sm:$0xff] }
 0x10d   : > { %4912 = vmatpush1.bf16.msra.mxu0 %v4911_v47  ;;  %v4933_v47 = vpack.c.bf16 %v622_v42, %v618_v41  ;;  %v4953_v43 = vpack.c.bf16 %v662_v38, %v658_v37 }
 0x10e   : > { %5936 = vmatpush1.bf16.msra.mxu1 %v5935_v48  ;;  %4914 = vmatprep.subr.bf16.mxu0 %v4913_v49  ;;  %v617_v48 = vld [vmem:[%s7199_s7 + $0xcc0] sm:$0xff] }
 0x10f   : > { %5938 = vmatprep.subr.bf16.mxu1 %v5937_v53  ;;  %v621_v49 = vld [vmem:[%s7199_s7 + $0xce0] sm:$0xff]  ;;  %v626_v53 = vld [vmem:[%s7199_s7 + $0xd08] sm:$0xff] }
 0x110   : > { %v4935_v57 = vpack.c.bf16 %v621_v49, %v617_v48  ;;  %v663_v48 = vld [vmem:[%s7199_s7 + $0xe30] sm:$0xff]  ;;  %v666_v49 = vld [vmem:[%s7199_s7 + $0xe48] sm:$0xff] }
 0x111   : > { %4916 = vmatpush1.bf16.msra.mxu0 %v4915_v59  ;;  %v4937_v59 = vpack.c.bf16 %v630_v54, %v626_v53  ;;  %v4957_v55 = vpack.c.bf16 %v670_v50, %v666_v49 }
 0x112   : > { %5940 = vmatpush1.bf16.msra.mxu1 %v5939_v60  ;;  %4918 = vmatprep.subr.bf16.mxu0 %v4917_v61  ;;  %v625_v60 = vld [vmem:[%s7199_s7 + $0xd00] sm:$0xff] }
 0x113   : > { %5942 = vmatprep.subr.bf16.mxu1 %v5941_v1  ;;  %v629_v61 = vld [vmem:[%s7199_s7 + $0xd20] sm:$0xff]  ;;  %v634_v1 = vld [vmem:[%s7199_s7 + $0xd48] sm:$0xff] }
 0x114   : > { %v4939_v5 = vpack.c.bf16 %v629_v61, %v625_v60  ;;  %v671_v60 = vld [vmem:[%s7199_s7 + $0xe70] sm:$0xff]  ;;  %v674_v61 = vld [vmem:[%s7199_s7 + $0xe88] sm:$0xff] }
 0x115   : > { %4920 = vmatpush1.bf16.msra.mxu0 %v4919_v7  ;;  %v4941_v7 = vpack.c.bf16 %v638_v2, %v634_v1  ;;  %v4961_v3 = vpack.c.bf16 %v678_v62, %v674_v61 }
 0x116   : > { %5944 = vmatpush1.bf16.msra.mxu1 %v5943_v8  ;;  %4922 = vmatprep.subr.bf16.mxu0 %v4921_v9  ;;  %v633_v8 = vld [vmem:[%s7199_s7 + $0xd40] sm:$0xff] }
 0x117   : > { %5946 = vmatprep.subr.bf16.mxu1 %v5945_v13  ;;  %v637_v9 = vld [vmem:[%s7199_s7 + $0xd60] sm:$0xff]  ;;  %v642_v13 = vld [vmem:[%s7199_s7 + $0xd88] sm:$0xff] }
 0x118   : > { %2464 = vmatmul.mubr.f32.vlgmr.msra.gmra.mrb[0].mxu0 %v181_v19  ;;  %v4943_v17 = vpack.c.bf16 %v637_v9, %v633_v8  ;;  %v679_v8 = vld [vmem:[%s7199_s7 + $0xeb0] sm:$0xff]  ;;  %v682_v9 = vld [vmem:[%s7199_s7 + $0xec8] sm:$0xff] }
 0x119   : > { %4924 = vmatpush1.bf16.msra.mxu0 %v4923_v20  ;;  %3600 = vmatmul.mubr.f32.vlgmr.msra.gmra.mrb[0].mxu1 %v181_v19  ;;  %v4945_v19 = vpack.c.bf16 %v646_v14, %v642_v13  ;;  %v641_v20 = vld [vmem:[%s7199_s7 + $0xd80] sm:$0xff]  ;;  %v4965_v15 = vpack.c.bf16 %v686_v10, %v682_v9 }
 0x11a   : > { %5948 = vmatpush1.bf16.msra.mxu1 %v5947_v21  ;;  %4926 = vmatprep.subr.bf16.mxu0 %v4925_v22  ;;  %v645_v21 = vld [vmem:[%s7199_s7 + $0xda0] sm:$0xff]  ;;  %v643_v22 = vld [vmem:[%s7199_s7 + $0xd90] sm:$0xff] }
 0x11b   : > { %5950 = vmatprep.subr.bf16.mxu1 %v5949_v26  ;;  %2534 = vmatprep.mubr.f32.mxu0 %v184_v32  ;;  %v654_v26 = vld [vmem:[%s7199_s7 + $0xde8] sm:$0xff]  ;;  %v4947_v29 = vpack.c.bf16 %v645_v21, %v641_v20  ;;  %v5971_v30 = vpack.c.bf16 %v647_v24, %v643_v22  ;;  %v687_v20 = vld [vmem:[%s7199_s7 + $0xef0] sm:$0xff]  ;;  %v696_v24 = vld [vmem:[%s7199_s7 + $0xf38] sm:$0xff] }
 0x11c   : > { %3670 = vmatprep.mubr.f32.mxu1 %v184_v32  ;;  %v4949_v31 = vpack.c.bf16 %v654_v26, %v650_v25  ;;  %v649_v32 = vld [vmem:[%s7199_s7 + $0xdc0] sm:$0xff]  ;;  %v690_v21 = vld [vmem:[%s7199_s7 + $0xf08] sm:$0xff] }
 0x11d   : > { %4928 = vmatpush1.bf16.msra.mxu0 %v4927_v33  ;;  %v653_v33 = vld [vmem:[%s7199_s7 + $0xde0] sm:$0xff]  ;;  %v694_v22 = vld [vmem:[%s7199_s7 + $0xf28] sm:$0xff] }
 0x11e   : > { %5952 = vmatpush1.bf16.msra.mxu1 %v5951_v34  ;;  %4930 = vmatprep.subr.bf16.mxu0 %v4929_v35  ;;  %v651_v34 = vld [vmem:[%s7199_s7 + $0xdd0] sm:$0xff]  ;;  %v5973_v35 = vpack.c.bf16 %v656_v28, %v652_v27  ;;  %v4951_v41 = vpack.c.bf16 %v653_v33, %v649_v32  ;;  %v4969_v27 = vpack.c.bf16 %v694_v22, %v690_v21  ;;  %v689_v28 = vld [vmem:[%s7199_s7 + $0xf00] sm:$0xff]  ;;  %v698_v33 = vld [vmem:[%s7199_s7 + $0xf48] sm:$0xff] }
 0x11f   : > { %5954 = vmatprep.subr.bf16.mxu1 %v5953_v39  ;;  %v660_v39 = vld [vmem:[%s7199_s7 + $0xe18] sm:$0xff]  ;;  %v5975_v42 = vpack.c.bf16 %v655_v36, %v651_v34  ;;  %v695_v32 = vld [vmem:[%s7199_s7 + $0xf30] sm:$0xff]  ;;  %v702_v34 = vld [vmem:[%s7199_s7 + $0xf68] sm:$0xff] }
 0x120   : > { %v704_v36 = vld [vmem:[%s7199_s7 + $0xf78] sm:$0xff]  ;;  %v183_v21 = vld [vmem:[#allocation2 + $0x30] sm:$0xff] }
 0x121   : > { %4932 = vmatpush1.bf16.msra.mxu0 %v4931_v45  ;;  %v661_v45 = vld [vmem:[%s7199_s7 + $0xe20] sm:$0xff] }
 0x122   : > { %5956 = vmatpush1.bf16.msra.mxu1 %v5955_v46  ;;  %4934 = vmatprep.subr.bf16.mxu0 %v4933_v47  ;;  %v659_v46 = vld [vmem:[%s7199_s7 + $0xe10] sm:$0xff]  ;;  %v5977_v47 = vpack.c.bf16 %v664_v40, %v660_v39  ;;  %v4955_v53 = vpack.c.bf16 %v661_v45, %v657_v44  ;;  %v4973_v39 = vpack.c.bf16 %v702_v34, %v698_v33  ;;  %v697_v40 = vld [vmem:[%s7199_s7 + $0xf40] sm:$0xff]  ;;  %v706_v45 = vld [vmem:[%s7199_s7 + $0xf88] sm:$0xff] }
 0x123   : > { %5958 = vmatprep.subr.bf16.mxu1 %v5957_v51  ;;  %v668_v51 = vld [vmem:[%s7199_s7 + $0xe58] sm:$0xff]  ;;  %v5979_v54 = vpack.c.bf16 %v663_v48, %v659_v46  ;;  %v703_v44 = vld [vmem:[%s7199_s7 + $0xf70] sm:$0xff]  ;;  %v710_v46 = vld [vmem:[%s7199_s7 + $0xfa8] sm:$0xff] }
 0x124   : > { %v712_v48 = vld [vmem:[%s7199_s7 + $0xfb8] sm:$0xff]  ;;  %v186_v34 = vld [vmem:[#allocation2 + $0x48] sm:$0xff] }
 0x125   : > { %4936 = vmatpush1.bf16.msra.mxu0 %v4935_v57  ;;  %v669_v57 = vld [vmem:[%s7199_s7 + $0xe60] sm:$0xff]  ;;  %v744_v33 = vld [vmem:[%s7199_s7 + $0x10b8] sm:$0xff] }
 0x126   : > { %5960 = vmatpush1.bf16.msra.mxu1 %v5959_v58  ;;  %4938 = vmatprep.subr.bf16.mxu0 %v4937_v59  ;;  %v667_v58 = vld [vmem:[%s7199_s7 + $0xe50] sm:$0xff]  ;;  %v5981_v59 = vpack.c.bf16 %v672_v52, %v668_v51  ;;  %v4959_v1 = vpack.c.bf16 %v669_v57, %v665_v56  ;;  %v4977_v51 = vpack.c.bf16 %v710_v46, %v706_v45  ;;  %v705_v52 = vld [vmem:[%s7199_s7 + $0xf80] sm:$0xff]  ;;  %v714_v57 = vld [vmem:[%s7199_s7 + $0xfc8] sm:$0xff] }
 0x127   : > { %5962 = vmatprep.subr.bf16.mxu1 %v5961_v63  ;;  %v676_v63 = vld [vmem:[%s7199_s7 + $0xe98] sm:$0xff]  ;;  %v5983_v2 = vpack.c.bf16 %v671_v60, %v667_v58  ;;  %v711_v56 = vld [vmem:[%s7199_s7 + $0xfb0] sm:$0xff]  ;;  %v718_v58 = vld [vmem:[%s7199_s7 + $0xfe8] sm:$0xff] }
 0x128   : > { %v720_v60 = vld [vmem:[%s7199_s7 + $0xff8] sm:$0xff] }
 0x129   : > { %4940 = vmatpush1.bf16.msra.mxu0 %v4939_v5  ;;  %v677_v5 = vld [vmem:[%s7199_s7 + $0xea0] sm:$0xff]  ;;  %v748_v45 = vld [vmem:[%s7199_s7 + $0x10d8] sm:$0xff] }
 0x12a   : > { %5964 = vmatpush1.bf16.msra.mxu1 %v5963_v6  ;;  %4942 = vmatprep.subr.bf16.mxu0 %v4941_v7  ;;  %v675_v6 = vld [vmem:[%s7199_s7 + $0xe90] sm:$0xff]  ;;  %v5985_v7 = vpack.c.bf16 %v680_v0, %v676_v63  ;;  %v4963_v13 = vpack.c.bf16 %v677_v5, %v673_v4  ;;  %v4981_v63 = vpack.c.bf16 %v718_v58, %v714_v57  ;;  %v713_v0 = vld [vmem:[%s7199_s7 + $0xfc0] sm:$0xff]  ;;  %v722_v5 = vld [vmem:[%s7199_s7 + $0x1008] sm:$0xff] }
 0x12b   : > { %5966 = vmatprep.subr.bf16.mxu1 %v5965_v11  ;;  %v684_v11 = vld [vmem:[%s7199_s7 + $0xed8] sm:$0xff]  ;;  %v5987_v14 = vpack.c.bf16 %v679_v8, %v675_v6  ;;  %v719_v4 = vld [vmem:[%s7199_s7 + $0xff0] sm:$0xff]  ;;  %v726_v6 = vld [vmem:[%s7199_s7 + $0x1028] sm:$0xff] }
 0x12c   : > { %v728_v8 = vld [vmem:[%s7199_s7 + $0x1038] sm:$0xff] }
 0x12d   : > { %4944 = vmatpush1.bf16.msra.mxu0 %v4943_v17  ;;  %v685_v17 = vld [vmem:[%s7199_s7 + $0xee0] sm:$0xff]  ;;  %v752_v46 = vld [vmem:[%s7199_s7 + $0x10f8] sm:$0xff] }
 0x12e   : > { %5968 = vmatpush1.bf16.msra.mxu1 %v5967_v18  ;;  %4946 = vmatprep.subr.bf16.mxu0 %v4945_v19  ;;  %v683_v18 = vld [vmem:[%s7199_s7 + $0xed0] sm:$0xff]  ;;  %v5989_v19 = vpack.c.bf16 %v688_v12, %v684_v11  ;;  %v4967_v25 = vpack.c.bf16 %v685_v17, %v681_v16  ;;  %v4985_v11 = vpack.c.bf16 %v726_v6, %v722_v5  ;;  %v721_v12 = vld [vmem:[%s7199_s7 + $0x1000] sm:$0xff]  ;;  %v730_v17 = vld [vmem:[%s7199_s7 + $0x1048] sm:$0xff] }
 0x12f   : > { %5970 = vmatprep.subr.bf16.mxu1 %v5969_v23  ;;  %v692_v23 = vld [vmem:[%s7199_s7 + $0xf18] sm:$0xff]  ;;  %v5991_v26 = vpack.c.bf16 %v687_v20, %v683_v18  ;;  %v727_v16 = vld [vmem:[%s7199_s7 + $0x1030] sm:$0xff]  ;;  %v734_v18 = vld [vmem:[%s7199_s7 + $0x1068] sm:$0xff] }
 0x130   : > { %v736_v20 = vld [vmem:[%s7199_s7 + $0x1078] sm:$0xff] }
 0x131   : > { %4948 = vmatpush1.bf16.msra.mxu0 %v4947_v29  ;;  %v693_v29 = vld [vmem:[%s7199_s7 + $0xf20] sm:$0xff]  ;;  %v756_v57 = vld [vmem:[%s7199_s7 + $0x1118] sm:$0xff] }
 0x132   : > { %5972 = vmatpush1.bf16.msra.mxu1 %v5971_v30  ;;  %4950 = vmatprep.subr.bf16.mxu0 %v4949_v31  ;;  %v691_v30 = vld [vmem:[%s7199_s7 + $0xf10] sm:$0xff]  ;;  %v5993_v31 = vpack.c.bf16 %v696_v24, %v692_v23  ;;  %v4971_v37 = vpack.c.bf16 %v693_v29, %v689_v28  ;;  %v4989_v24 = vpack.c.bf16 %v734_v18, %v730_v17  ;;  %v760_v58 = vld [vmem:[%s7199_s7 + $0x1138] sm:$0xff] }
 0x133   : > { %5974 = vmatprep.subr.bf16.mxu1 %v5973_v35  ;;  %v700_v35 = vld [vmem:[%s7199_s7 + $0xf58] sm:$0xff]  ;;  %v5995_v38 = vpack.c.bf16 %v695_v32, %v691_v30  ;;  %v735_v29 = vld [vmem:[%s7199_s7 + $0x1070] sm:$0xff]  ;;  %v738_v30 = vld [vmem:[%s7199_s7 + $0x1088] sm:$0xff] }
 0x134   : > { %v740_v32 = vld [vmem:[%s7199_s7 + $0x1098] sm:$0xff] }
 0x135   : > { %4952 = vmatpush1.bf16.msra.mxu0 %v4951_v41  ;;  %v701_v41 = vld [vmem:[%s7199_s7 + $0xf60] sm:$0xff]  ;;  %v764_v5 = vld [vmem:[%s7199_s7 + $0x1158] sm:$0xff] }
 0x136   : > { %5976 = vmatpush1.bf16.msra.mxu1 %v5975_v42  ;;  %4954 = vmatprep.subr.bf16.mxu0 %v4953_v43  ;;  %v699_v42 = vld [vmem:[%s7199_s7 + $0xf50] sm:$0xff]  ;;  %v5997_v43 = vpack.c.bf16 %v704_v36, %v700_v35  ;;  %v4975_v49 = vpack.c.bf16 %v701_v41, %v697_v40  ;;  %v6017_v41 = vpack.c.bf16 %v744_v33, %v740_v32  ;;  %v768_v6 = vld [vmem:[%s7199_s7 + $0x1178] sm:$0xff] }
 0x137   : > { %5978 = vmatprep.subr.bf16.mxu1 %v5977_v47  ;;  %v708_v47 = vld [vmem:[%s7199_s7 + $0xf98] sm:$0xff]  ;;  %v5999_v50 = vpack.c.bf16 %v703_v44, %v699_v42  ;;  %v739_v40 = vld [vmem:[%s7199_s7 + $0x1090] sm:$0xff]  ;;  %v750_v44 = vld [vmem:[%s7199_s7 + $0x10e8] sm:$0xff] }
 0x138   : > { %v743_v42 = vld [vmem:[%s7199_s7 + $0x10b0] sm:$0xff]  ;;  %v772_v17 = vld [vmem:[%s7199_s7 + $0x1198] sm:$0xff] }
 0x139   : > { %4956 = vmatpush1.bf16.msra.mxu0 %v4955_v53  ;;  %v709_v53 = vld [vmem:[%s7199_s7 + $0xfa0] sm:$0xff]  ;;  %v776_v18 = vld [vmem:[%s7199_s7 + $0x11b8] sm:$0xff] }
 0x13a   : > { %5980 = vmatpush1.bf16.msra.mxu1 %v5979_v54  ;;  %4958 = vmatprep.subr.bf16.mxu0 %v4957_v55  ;;  %v707_v54 = vld [vmem:[%s7199_s7 + $0xf90] sm:$0xff]  ;;  %v6001_v55 = vpack.c.bf16 %v712_v48, %v708_v47  ;;  %v4979_v61 = vpack.c.bf16 %v709_v53, %v705_v52  ;;  %v6019_v48 = vpack.c.bf16 %v743_v42, %v739_v40  ;;  %v790_v40 = vld [vmem:[%s7199_s7 + $0x1228] sm:$0xff]  ;;  %v792_v42 = vld [vmem:[%s7199_s7 + $0x1238] sm:$0xff] }
 0x13b   : > { %5982 = vmatprep.subr.bf16.mxu1 %v5981_v59  ;;  %v716_v59 = vld [vmem:[%s7199_s7 + $0xfd8] sm:$0xff]  ;;  %v6003_v62 = vpack.c.bf16 %v711_v56, %v707_v54  ;;  %v747_v52 = vld [vmem:[%s7199_s7 + $0x10d0] sm:$0xff]  ;;  %v6021_v53 = vpack.c.bf16 %v752_v46, %v748_v45  ;;  %v758_v56 = vld [vmem:[%s7199_s7 + $0x1128] sm:$0xff] }
 0x13c   : > { %v751_v54 = vld [vmem:[%s7199_s7 + $0x10f0] sm:$0xff]  ;;  %v785_v46 = vld [vmem:[%s7199_s7 + $0x1200] sm:$0xff] }
 0x13d   : > { %4960 = vmatpush1.bf16.msra.mxu0 %v4959_v1  ;;  %v717_v1 = vld [vmem:[%s7199_s7 + $0xfe0] sm:$0xff] }
 0x13e   : > { %5984 = vmatpush1.bf16.msra.mxu1 %v5983_v2  ;;  %4962 = vmatprep.subr.bf16.mxu0 %v4961_v3  ;;  %v715_v2 = vld [vmem:[%s7199_s7 + $0xfd0] sm:$0xff]  ;;  %v6005_v3 = vpack.c.bf16 %v720_v60, %v716_v59  ;;  %v4983_v9 = vpack.c.bf16 %v717_v1, %v713_v0  ;;  %v6023_v60 = vpack.c.bf16 %v751_v54, %v747_v52  ;;  %v798_v52 = vld [vmem:[%s7199_s7 + $0x1268] sm:$0xff]  ;;  %v800_v54 = vld [vmem:[%s7199_s7 + $0x1278] sm:$0xff] }
 0x13f   : > { %5986 = vmatprep.subr.bf16.mxu1 %v5985_v7  ;;  %v724_v7 = vld [vmem:[%s7199_s7 + $0x1018] sm:$0xff]  ;;  %v6007_v10 = vpack.c.bf16 %v719_v4, %v715_v2  ;;  %v755_v0 = vld [vmem:[%s7199_s7 + $0x1110] sm:$0xff]  ;;  %v6025_v1 = vpack.c.bf16 %v760_v58, %v756_v57  ;;  %v766_v4 = vld [vmem:[%s7199_s7 + $0x1168] sm:$0xff] }
 0x140   : > { %v759_v2 = vld [vmem:[%s7199_s7 + $0x1130] sm:$0xff]  ;;  %v793_v58 = vld [vmem:[%s7199_s7 + $0x1240] sm:$0xff] }
 0x141   : > { %4964 = vmatpush1.bf16.msra.mxu0 %v4963_v13  ;;  %v725_v13 = vld [vmem:[%s7199_s7 + $0x1020] sm:$0xff] }
 0x142   : > { %5988 = vmatpush1.bf16.msra.mxu1 %v5987_v14  ;;  %4966 = vmatprep.subr.bf16.mxu0 %v4965_v15  ;;  %v723_v14 = vld [vmem:[%s7199_s7 + $0x1010] sm:$0xff]  ;;  %v6009_v15 = vpack.c.bf16 %v728_v8, %v724_v7  ;;  %v4987_v22 = vpack.c.bf16 %v725_v13, %v721_v12  ;;  %v6027_v8 = vpack.c.bf16 %v759_v2, %v755_v0  ;;  %v806_v0 = vld [vmem:[%s7199_s7 + $0x12a8] sm:$0xff]  ;;  %v808_v2 = vld [vmem:[%s7199_s7 + $0x12b8] sm:$0xff] }
 0x143   : > { %5990 = vmatprep.subr.bf16.mxu1 %v5989_v19  ;;  %v732_v19 = vld [vmem:[%s7199_s7 + $0x1058] sm:$0xff]  ;;  %v6011_v23 = vpack.c.bf16 %v727_v16, %v723_v14  ;;  %v763_v12 = vld [vmem:[%s7199_s7 + $0x1150] sm:$0xff]  ;;  %v6029_v13 = vpack.c.bf16 %v768_v6, %v764_v5  ;;  %v774_v16 = vld [vmem:[%s7199_s7 + $0x11a8] sm:$0xff] }
 0x144   : > { %v6013_v28 = vpack.c.bf16 %v736_v20, %v732_v19  ;;  %v767_v14 = vld [vmem:[%s7199_s7 + $0x1170] sm:$0xff]  ;;  %v801_v6 = vld [vmem:[%s7199_s7 + $0x1280] sm:$0xff] }
 0x145   : > { %4968 = vmatpush1.bf16.msra.mxu0 %v4967_v25  ;;  %v729_v25 = vld [vmem:[%s7199_s7 + $0x1040] sm:$0xff]  ;;  %v6031_v20 = vpack.c.bf16 %v767_v14, %v763_v12  ;;  %v814_v12 = vld [vmem:[%s7199_s7 + $0x12e8] sm:$0xff]  ;;  %v816_v14 = vld [vmem:[%s7199_s7 + $0x12f8] sm:$0xff] }
 0x146   : > { %5992 = vmatpush1.bf16.msra.mxu1 %v5991_v26  ;;  %4970 = vmatprep.subr.bf16.mxu0 %v4969_v27  ;;  %v733_v26 = vld [vmem:[%s7199_s7 + $0x1060] sm:$0xff]  ;;  %v731_v27 = vld [vmem:[%s7199_s7 + $0x1050] sm:$0xff] }
 0x147   : > { %5994 = vmatprep.subr.bf16.mxu1 %v5993_v31  ;;  %v742_v31 = vld [vmem:[%s7199_s7 + $0x10a8] sm:$0xff]  ;;  %v4991_v35 = vpack.c.bf16 %v733_v26, %v729_v25  ;;  %v6015_v36 = vpack.c.bf16 %v735_v29, %v731_v27  ;;  %v6033_v25 = vpack.c.bf16 %v776_v18, %v772_v17  ;;  %v775_v26 = vld [vmem:[%s7199_s7 + $0x11b0] sm:$0xff]  ;;  %v780_v29 = vld [vmem:[%s7199_s7 + $0x11d8] sm:$0xff] }
 0x148   : > { %v778_v27 = vld [vmem:[%s7199_s7 + $0x11c8] sm:$0xff]  ;;  %v809_v18 = vld [vmem:[%s7199_s7 + $0x12c0] sm:$0xff] }
 0x149   : > { %4972 = vmatpush1.bf16.msra.mxu0 %v4971_v37  ;;  %v4993_v37 = vpack.c.bf16 %v742_v31, %v738_v30  ;;  %v784_v30 = vld [vmem:[%s7199_s7 + $0x11f8] sm:$0xff] }
 0x14a   : > { %5996 = vmatpush1.bf16.msra.mxu1 %v5995_v38  ;;  %4974 = vmatprep.subr.bf16.mxu0 %v4973_v39  ;;  %v737_v38 = vld [vmem:[%s7199_s7 + $0x1080] sm:$0xff] }
 0x14b   : > { %5998 = vmatprep.subr.bf16.mxu1 %v5997_v43  ;;  %v741_v39 = vld [vmem:[%s7199_s7 + $0x10a0] sm:$0xff]  ;;  %v746_v43 = vld [vmem:[%s7199_s7 + $0x10c8] sm:$0xff] }
 0x14c   : > { %v4995_v47 = vpack.c.bf16 %v741_v39, %v737_v38  ;;  %v783_v38 = vld [vmem:[%s7199_s7 + $0x11f0] sm:$0xff]  ;;  %v786_v39 = vld [vmem:[%s7199_s7 + $0x1208] sm:$0xff] }
 0x14d   : > { %4976 = vmatpush1.bf16.msra.mxu0 %v4975_v49  ;;  %v4997_v49 = vpack.c.bf16 %v750_v44, %v746_v43  ;;  %v5017_v45 = vpack.c.bf16 %v790_v40, %v786_v39 }
 0x14e   : > { %6000 = vmatpush1.bf16.msra.mxu1 %v5999_v50  ;;  %4978 = vmatprep.subr.bf16.mxu0 %v4977_v51  ;;  %v745_v50 = vld [vmem:[%s7199_s7 + $0x10c0] sm:$0xff] }
 0x14f   : > { %6002 = vmatprep.subr.bf16.mxu1 %v6001_v55  ;;  %v749_v51 = vld [vmem:[%s7199_s7 + $0x10e0] sm:$0xff]  ;;  %v754_v55 = vld [vmem:[%s7199_s7 + $0x1108] sm:$0xff] }
 0x150   : > { %v4999_v59 = vpack.c.bf16 %v749_v51, %v745_v50  ;;  %v791_v50 = vld [vmem:[%s7199_s7 + $0x1230] sm:$0xff]  ;;  %v794_v51 = vld [vmem:[%s7199_s7 + $0x1248] sm:$0xff] }
 0x151   : > { %4980 = vmatpush1.bf16.msra.mxu0 %v4979_v61  ;;  %v5001_v61 = vpack.c.bf16 %v758_v56, %v754_v55  ;;  %v5021_v57 = vpack.c.bf16 %v798_v52, %v794_v51 }
 0x152   : > { %6004 = vmatpush1.bf16.msra.mxu1 %v6003_v62  ;;  %4982 = vmatprep.subr.bf16.mxu0 %v4981_v63  ;;  %v753_v62 = vld [vmem:[%s7199_s7 + $0x1100] sm:$0xff] }
 0x153   : > { %6006 = vmatprep.subr.bf16.mxu1 %v6005_v3  ;;  %v757_v63 = vld [vmem:[%s7199_s7 + $0x1120] sm:$0xff]  ;;  %v762_v3 = vld [vmem:[%s7199_s7 + $0x1148] sm:$0xff] }
 0x154   : > { %v5003_v7 = vpack.c.bf16 %v757_v63, %v753_v62  ;;  %v799_v62 = vld [vmem:[%s7199_s7 + $0x1270] sm:$0xff]  ;;  %v802_v63 = vld [vmem:[%s7199_s7 + $0x1288] sm:$0xff] }
 0x155   : > { %4984 = vmatpush1.bf16.msra.mxu0 %v4983_v9  ;;  %v5005_v9 = vpack.c.bf16 %v766_v4, %v762_v3  ;;  %v5025_v5 = vpack.c.bf16 %v806_v0, %v802_v63 }
 0x156   : > { %6008 = vmatpush1.bf16.msra.mxu1 %v6007_v10  ;;  %4986 = vmatprep.subr.bf16.mxu0 %v4985_v11  ;;  %v761_v10 = vld [vmem:[%s7199_s7 + $0x1140] sm:$0xff] }
 0x157   : > { %6010 = vmatprep.subr.bf16.mxu1 %v6009_v15  ;;  %v765_v11 = vld [vmem:[%s7199_s7 + $0x1160] sm:$0xff]  ;;  %v770_v15 = vld [vmem:[%s7199_s7 + $0x1188] sm:$0xff] }
 0x158   : > { %2535 = vmatmul.mubr.f32.vlgmr.msra.gmra.mrb[0].mxu0 %v183_v21  ;;  %v5007_v19 = vpack.c.bf16 %v765_v11, %v761_v10  ;;  %v807_v10 = vld [vmem:[%s7199_s7 + $0x12b0] sm:$0xff]  ;;  %v810_v11 = vld [vmem:[%s7199_s7 + $0x12c8] sm:$0xff] }
 0x159   : > { %4988 = vmatpush1.bf16.msra.mxu0 %v4987_v22  ;;  %3671 = vmatmul.mubr.f32.vlgmr.msra.gmra.mrb[0].mxu1 %v183_v21  ;;  %v5009_v21 = vpack.c.bf16 %v774_v16, %v770_v15  ;;  %v769_v22 = vld [vmem:[%s7199_s7 + $0x1180] sm:$0xff]  ;;  %v5029_v17 = vpack.c.bf16 %v814_v12, %v810_v11 }
 0x15a   : > { %6012 = vmatpush1.bf16.msra.mxu1 %v6011_v23  ;;  %4990 = vmatprep.subr.bf16.mxu0 %v4989_v24  ;;  %v773_v23 = vld [vmem:[%s7199_s7 + $0x11a0] sm:$0xff]  ;;  %v771_v24 = vld [vmem:[%s7199_s7 + $0x1190] sm:$0xff] }
 0x15b   : > { %6014 = vmatprep.subr.bf16.mxu1 %v6013_v28  ;;  %2605 = vmatprep.mubr.f32.mxu0 %v186_v34  ;;  %v782_v28 = vld [vmem:[%s7199_s7 + $0x11e8] sm:$0xff]  ;;  %v5011_v31 = vpack.c.bf16 %v773_v23, %v769_v22  ;;  %v6035_v32 = vpack.c.bf16 %v775_v26, %v771_v24  ;;  %v815_v22 = vld [vmem:[%s7199_s7 + $0x12f0] sm:$0xff]  ;;  %v824_v26 = vld [vmem:[%s7199_s7 + $0x1338] sm:$0xff] }
 0x15c   : > { %3741 = vmatprep.mubr.f32.mxu1 %v186_v34  ;;  %v5013_v33 = vpack.c.bf16 %v782_v28, %v778_v27  ;;  %v777_v34 = vld [vmem:[%s7199_s7 + $0x11c0] sm:$0xff]  ;;  %v818_v23 = vld [vmem:[%s7199_s7 + $0x1308] sm:$0xff] }
 0x15d   : > { %4992 = vmatpush1.bf16.msra.mxu0 %v4991_v35  ;;  %v781_v35 = vld [vmem:[%s7199_s7 + $0x11e0] sm:$0xff]  ;;  %v822_v24 = vld [vmem:[%s7199_s7 + $0x1328] sm:$0xff] }
 0x15e   : > { %6016 = vmatpush1.bf16.msra.mxu1 %v6015_v36  ;;  %4994 = vmatprep.subr.bf16.mxu0 %v4993_v37  ;;  %v779_v36 = vld [vmem:[%s7199_s7 + $0x11d0] sm:$0xff]  ;;  %v6037_v37 = vpack.c.bf16 %v784_v30, %v780_v29  ;;  %v5015_v43 = vpack.c.bf16 %v781_v35, %v777_v34  ;;  %v5033_v29 = vpack.c.bf16 %v822_v24, %v818_v23  ;;  %v817_v30 = vld [vmem:[%s7199_s7 + $0x1300] sm:$0xff]  ;;  %v826_v35 = vld [vmem:[%s7199_s7 + $0x1348] sm:$0xff] }
 0x15f   : > { %6018 = vmatprep.subr.bf16.mxu1 %v6017_v41  ;;  %v788_v41 = vld [vmem:[%s7199_s7 + $0x1218] sm:$0xff]  ;;  %v6039_v44 = vpack.c.bf16 %v783_v38, %v779_v36  ;;  %v823_v34 = vld [vmem:[%s7199_s7 + $0x1330] sm:$0xff]  ;;  %v830_v36 = vld [vmem:[%s7199_s7 + $0x1368] sm:$0xff] }
 0x160   : > { %v832_v38 = vld [vmem:[%s7199_s7 + $0x1378] sm:$0xff]  ;;  %v185_v23 = vld [vmem:[#allocation2 + $0x40] sm:$0xff] }
 0x161   : > { %4996 = vmatpush1.bf16.msra.mxu0 %v4995_v47  ;;  %v789_v47 = vld [vmem:[%s7199_s7 + $0x1220] sm:$0xff] }
 0x162   : > { %6020 = vmatpush1.bf16.msra.mxu1 %v6019_v48  ;;  %4998 = vmatprep.subr.bf16.mxu0 %v4997_v49  ;;  %v787_v48 = vld [vmem:[%s7199_s7 + $0x1210] sm:$0xff]  ;;  %v6041_v49 = vpack.c.bf16 %v792_v42, %v788_v41  ;;  %v5019_v55 = vpack.c.bf16 %v789_v47, %v785_v46  ;;  %v5037_v41 = vpack.c.bf16 %v830_v36, %v826_v35  ;;  %v825_v42 = vld [vmem:[%s7199_s7 + $0x1340] sm:$0xff]  ;;  %v834_v47 = vld [vmem:[%s7199_s7 + $0x1388] sm:$0xff] }
 0x163   : > { %6022 = vmatprep.subr.bf16.mxu1 %v6021_v53  ;;  %v796_v53 = vld [vmem:[%s7199_s7 + $0x1258] sm:$0xff]  ;;  %v6043_v56 = vpack.c.bf16 %v791_v50, %v787_v48  ;;  %v831_v46 = vld [vmem:[%s7199_s7 + $0x1370] sm:$0xff]  ;;  %v838_v48 = vld [vmem:[%s7199_s7 + $0x13a8] sm:$0xff] }
 0x164   : > { %v840_v50 = vld [vmem:[%s7199_s7 + $0x13b8] sm:$0xff] }
 0x165   : > { %5000 = vmatpush1.bf16.msra.mxu0 %v4999_v59  ;;  %v797_v59 = vld [vmem:[%s7199_s7 + $0x1260] sm:$0xff]  ;;  %v872_v35 = vld [vmem:[%s7199_s7 + $0x14b8] sm:$0xff] }
 0x166   : > { %6024 = vmatpush1.bf16.msra.mxu1 %v6023_v60  ;;  %5002 = vmatprep.subr.bf16.mxu0 %v5001_v61  ;;  %v795_v60 = vld [vmem:[%s7199_s7 + $0x1250] sm:$0xff]  ;;  %v6045_v61 = vpack.c.bf16 %v800_v54, %v796_v53  ;;  %v5023_v3 = vpack.c.bf16 %v797_v59, %v793_v58  ;;  %v5041_v53 = vpack.c.bf16 %v838_v48, %v834_v47  ;;  %v833_v54 = vld [vmem:[%s7199_s7 + $0x1380] sm:$0xff]  ;;  %v842_v59 = vld [vmem:[%s7199_s7 + $0x13c8] sm:$0xff] }
 0x167   : > { %6026 = vmatprep.subr.bf16.mxu1 %v6025_v1  ;;  %v804_v1 = vld [vmem:[%s7199_s7 + $0x1298] sm:$0xff]  ;;  %v6047_v4 = vpack.c.bf16 %v799_v62, %v795_v60  ;;  %v839_v58 = vld [vmem:[%s7199_s7 + $0x13b0] sm:$0xff]  ;;  %v846_v60 = vld [vmem:[%s7199_s7 + $0x13e8] sm:$0xff] }
 0x168   : > { %v848_v62 = vld [vmem:[%s7199_s7 + $0x13f8] sm:$0xff] }
 0x169   : > { %5004 = vmatpush1.bf16.msra.mxu0 %v5003_v7  ;;  %v805_v7 = vld [vmem:[%s7199_s7 + $0x12a0] sm:$0xff]  ;;  %v188_v36 = vld [vmem:[#allocation2 + $0x58] sm:$0xff] }
 0x16a   : > { %6028 = vmatpush1.bf16.msra.mxu1 %v6027_v8  ;;  %5006 = vmatprep.subr.bf16.mxu0 %v5005_v9  ;;  %v803_v8 = vld [vmem:[%s7199_s7 + $0x1290] sm:$0xff]  ;;  %v6049_v9 = vpack.c.bf16 %v808_v2, %v804_v1  ;;  %v5027_v15 = vpack.c.bf16 %v805_v7, %v801_v6  ;;  %v5045_v1 = vpack.c.bf16 %v846_v60, %v842_v59  ;;  %v841_v2 = vld [vmem:[%s7199_s7 + $0x13c0] sm:$0xff]  ;;  %v850_v7 = vld [vmem:[%s7199_s7 + $0x1408] sm:$0xff] }
 0x16b   : > { %6030 = vmatprep.subr.bf16.mxu1 %v6029_v13  ;;  %v812_v13 = vld [vmem:[%s7199_s7 + $0x12d8] sm:$0xff]  ;;  %v6051_v16 = vpack.c.bf16 %v807_v10, %v803_v8  ;;  %v847_v6 = vld [vmem:[%s7199_s7 + $0x13f0] sm:$0xff]  ;;  %v854_v8 = vld [vmem:[%s7199_s7 + $0x1428] sm:$0xff] }
 0x16c   : > { %v856_v10 = vld [vmem:[%s7199_s7 + $0x1438] sm:$0xff] }
 0x16d   : > { %5008 = vmatpush1.bf16.msra.mxu0 %v5007_v19  ;;  %v813_v19 = vld [vmem:[%s7199_s7 + $0x12e0] sm:$0xff]  ;;  %v876_v47 = vld [vmem:[%s7199_s7 + $0x14d8] sm:$0xff] }
 0x16e   : > { %6032 = vmatpush1.bf16.msra.mxu1 %v6031_v20  ;;  %5010 = vmatprep.subr.bf16.mxu0 %v5009_v21  ;;  %v811_v20 = vld [vmem:[%s7199_s7 + $0x12d0] sm:$0xff]  ;;  %v6053_v21 = vpack.c.bf16 %v816_v14, %v812_v13  ;;  %v5031_v27 = vpack.c.bf16 %v813_v19, %v809_v18  ;;  %v5049_v13 = vpack.c.bf16 %v854_v8, %v850_v7  ;;  %v849_v14 = vld [vmem:[%s7199_s7 + $0x1400] sm:$0xff]  ;;  %v858_v19 = vld [vmem:[%s7199_s7 + $0x1448] sm:$0xff] }
 0x16f   : > { %6034 = vmatprep.subr.bf16.mxu1 %v6033_v25  ;;  %v820_v25 = vld [vmem:[%s7199_s7 + $0x1318] sm:$0xff]  ;;  %v6055_v28 = vpack.c.bf16 %v815_v22, %v811_v20  ;;  %v855_v18 = vld [vmem:[%s7199_s7 + $0x1430] sm:$0xff]  ;;  %v862_v20 = vld [vmem:[%s7199_s7 + $0x1468] sm:$0xff] }
 0x170   : > { %v864_v22 = vld [vmem:[%s7199_s7 + $0x1478] sm:$0xff] }
 0x171   : > { %5012 = vmatpush1.bf16.msra.mxu0 %v5011_v31  ;;  %v821_v31 = vld [vmem:[%s7199_s7 + $0x1320] sm:$0xff]  ;;  %v880_v48 = vld [vmem:[%s7199_s7 + $0x14f8] sm:$0xff] }
 0x172   : > { %6036 = vmatpush1.bf16.msra.mxu1 %v6035_v32  ;;  %5014 = vmatprep.subr.bf16.mxu0 %v5013_v33  ;;  %v819_v32 = vld [vmem:[%s7199_s7 + $0x1310] sm:$0xff]  ;;  %v6057_v33 = vpack.c.bf16 %v824_v26, %v820_v25  ;;  %v5035_v39 = vpack.c.bf16 %v821_v31, %v817_v30  ;;  %v5053_v26 = vpack.c.bf16 %v862_v20, %v858_v19  ;;  %v884_v59 = vld [vmem:[%s7199_s7 + $0x1518] sm:$0xff] }
 0x173   : > { %6038 = vmatprep.subr.bf16.mxu1 %v6037_v37  ;;  %v828_v37 = vld [vmem:[%s7199_s7 + $0x1358] sm:$0xff]  ;;  %v6059_v40 = vpack.c.bf16 %v823_v34, %v819_v32  ;;  %v863_v31 = vld [vmem:[%s7199_s7 + $0x1470] sm:$0xff]  ;;  %v866_v32 = vld [vmem:[%s7199_s7 + $0x1488] sm:$0xff] }
 0x174   : > { %v868_v34 = vld [vmem:[%s7199_s7 + $0x1498] sm:$0xff] }
 0x175   : > { %5016 = vmatpush1.bf16.msra.mxu0 %v5015_v43  ;;  %v829_v43 = vld [vmem:[%s7199_s7 + $0x1360] sm:$0xff]  ;;  %v888_v60 = vld [vmem:[%s7199_s7 + $0x1538] sm:$0xff] }
 0x176   : > { %6040 = vmatpush1.bf16.msra.mxu1 %v6039_v44  ;;  %5018 = vmatprep.subr.bf16.mxu0 %v5017_v45  ;;  %v827_v44 = vld [vmem:[%s7199_s7 + $0x1350] sm:$0xff]  ;;  %v6061_v45 = vpack.c.bf16 %v832_v38, %v828_v37  ;;  %v5039_v51 = vpack.c.bf16 %v829_v43, %v825_v42  ;;  %v6081_v43 = vpack.c.bf16 %v872_v35, %v868_v34  ;;  %v892_v7 = vld [vmem:[%s7199_s7 + $0x1558] sm:$0xff] }
 0x177   : > { %6042 = vmatprep.subr.bf16.mxu1 %v6041_v49  ;;  %v836_v49 = vld [vmem:[%s7199_s7 + $0x1398] sm:$0xff]  ;;  %v6063_v52 = vpack.c.bf16 %v831_v46, %v827_v44  ;;  %v867_v42 = vld [vmem:[%s7199_s7 + $0x1490] sm:$0xff]  ;;  %v878_v46 = vld [vmem:[%s7199_s7 + $0x14e8] sm:$0xff] }
 0x178   : > { %v871_v44 = vld [vmem:[%s7199_s7 + $0x14b0] sm:$0xff]  ;;  %v896_v8 = vld [vmem:[%s7199_s7 + $0x1578] sm:$0xff] }
 0x179   : > { %5020 = vmatpush1.bf16.msra.mxu0 %v5019_v55  ;;  %v837_v55 = vld [vmem:[%s7199_s7 + $0x13a0] sm:$0xff]  ;;  %v900_v19 = vld [vmem:[%s7199_s7 + $0x1598] sm:$0xff] }
 0x17a   : > { %6044 = vmatpush1.bf16.msra.mxu1 %v6043_v56  ;;  %5022 = vmatprep.subr.bf16.mxu0 %v5021_v57  ;;  %v835_v56 = vld [vmem:[%s7199_s7 + $0x1390] sm:$0xff]  ;;  %v6065_v57 = vpack.c.bf16 %v840_v50, %v836_v49  ;;  %v5043_v63 = vpack.c.bf16 %v837_v55, %v833_v54  ;;  %v6083_v50 = vpack.c.bf16 %v871_v44, %v867_v42  ;;  %v904_v20 = vld [vmem:[%s7199_s7 + $0x15b8] sm:$0xff]  ;;  %v918_v42 = vld [vmem:[%s7199_s7 + $0x1628] sm:$0xff] }
 0x17b   : > { %6046 = vmatprep.subr.bf16.mxu1 %v6045_v61  ;;  %v844_v61 = vld [vmem:[%s7199_s7 + $0x13d8] sm:$0xff]  ;;  %v6067_v0 = vpack.c.bf16 %v839_v58, %v835_v56  ;;  %v875_v54 = vld [vmem:[%s7199_s7 + $0x14d0] sm:$0xff]  ;;  %v6085_v55 = vpack.c.bf16 %v880_v48, %v876_v47  ;;  %v886_v58 = vld [vmem:[%s7199_s7 + $0x1528] sm:$0xff] }
 0x17c   : > { %v879_v56 = vld [vmem:[%s7199_s7 + $0x14f0] sm:$0xff]  ;;  %v920_v44 = vld [vmem:[%s7199_s7 + $0x1638] sm:$0xff]  ;;  %v913_v48 = vld [vmem:[%s7199_s7 + $0x1600] sm:$0xff] }
 0x17d   : > { %5024 = vmatpush1.bf16.msra.mxu0 %v5023_v3  ;;  %v845_v3 = vld [vmem:[%s7199_s7 + $0x13e0] sm:$0xff] }
 0x17e   : > { %6048 = vmatpush1.bf16.msra.mxu1 %v6047_v4  ;;  %5026 = vmatprep.subr.bf16.mxu0 %v5025_v5  ;;  %v843_v4 = vld [vmem:[%s7199_s7 + $0x13d0] sm:$0xff]  ;;  %v6069_v5 = vpack.c.bf16 %v848_v62, %v844_v61  ;;  %v5047_v11 = vpack.c.bf16 %v845_v3, %v841_v2  ;;  %v6087_v62 = vpack.c.bf16 %v879_v56, %v875_v54  ;;  %v926_v54 = vld [vmem:[%s7199_s7 + $0x1668] sm:$0xff]  ;;  %v928_v56 = vld [vmem:[%s7199_s7 + $0x1678] sm:$0xff] }
 0x17f   : > { %6050 = vmatprep.subr.bf16.mxu1 %v6049_v9  ;;  %v852_v9 = vld [vmem:[%s7199_s7 + $0x1418] sm:$0xff]  ;;  %v6071_v12 = vpack.c.bf16 %v847_v6, %v843_v4  ;;  %v883_v2 = vld [vmem:[%s7199_s7 + $0x1510] sm:$0xff]  ;;  %v6089_v3 = vpack.c.bf16 %v888_v60, %v884_v59  ;;  %v894_v6 = vld [vmem:[%s7199_s7 + $0x1568] sm:$0xff] }
 0x180   : > { %v887_v4 = vld [vmem:[%s7199_s7 + $0x1530] sm:$0xff]  ;;  %v921_v60 = vld [vmem:[%s7199_s7 + $0x1640] sm:$0xff] }
 0x181   : > { %5028 = vmatpush1.bf16.msra.mxu0 %v5027_v15  ;;  %v853_v15 = vld [vmem:[%s7199_s7 + $0x1420] sm:$0xff] }
 0x182   : > { %6052 = vmatpush1.bf16.msra.mxu1 %v6051_v16  ;;  %5030 = vmatprep.subr.bf16.mxu0 %v5029_v17  ;;  %v851_v16 = vld [vmem:[%s7199_s7 + $0x1410] sm:$0xff]  ;;  %v6073_v17 = vpack.c.bf16 %v856_v10, %v852_v9  ;;  %v5051_v24 = vpack.c.bf16 %v853_v15, %v849_v14  ;;  %v6091_v10 = vpack.c.bf16 %v887_v4, %v883_v2  ;;  %v934_v2 = vld [vmem:[%s7199_s7 + $0x16a8] sm:$0xff]  ;;  %v936_v4 = vld [vmem:[%s7199_s7 + $0x16b8] sm:$0xff] }
 0x183   : > { %6054 = vmatprep.subr.bf16.mxu1 %v6053_v21  ;;  %v860_v21 = vld [vmem:[%s7199_s7 + $0x1458] sm:$0xff]  ;;  %v6075_v25 = vpack.c.bf16 %v855_v18, %v851_v16  ;;  %v891_v14 = vld [vmem:[%s7199_s7 + $0x1550] sm:$0xff]  ;;  %v6093_v15 = vpack.c.bf16 %v896_v8, %v892_v7  ;;  %v902_v18 = vld [vmem:[%s7199_s7 + $0x15a8] sm:$0xff] }
 0x184   : > { %v6077_v30 = vpack.c.bf16 %v864_v22, %v860_v21  ;;  %v895_v16 = vld [vmem:[%s7199_s7 + $0x1570] sm:$0xff]  ;;  %v929_v8 = vld [vmem:[%s7199_s7 + $0x1680] sm:$0xff] }
 0x185   : > { %5032 = vmatpush1.bf16.msra.mxu0 %v5031_v27  ;;  %v857_v27 = vld [vmem:[%s7199_s7 + $0x1440] sm:$0xff]  ;;  %v6095_v22 = vpack.c.bf16 %v895_v16, %v891_v14  ;;  %v942_v14 = vld [vmem:[%s7199_s7 + $0x16e8] sm:$0xff]  ;;  %v944_v16 = vld [vmem:[%s7199_s7 + $0x16f8] sm:$0xff] }
 0x186   : > { %6056 = vmatpush1.bf16.msra.mxu1 %v6055_v28  ;;  %5034 = vmatprep.subr.bf16.mxu0 %v5033_v29  ;;  %v861_v28 = vld [vmem:[%s7199_s7 + $0x1460] sm:$0xff]  ;;  %v859_v29 = vld [vmem:[%s7199_s7 + $0x1450] sm:$0xff] }
 0x187   : > { %6058 = vmatprep.subr.bf16.mxu1 %v6057_v33  ;;  %v870_v33 = vld [vmem:[%s7199_s7 + $0x14a8] sm:$0xff]  ;;  %v5055_v37 = vpack.c.bf16 %v861_v28, %v857_v27  ;;  %v6079_v38 = vpack.c.bf16 %v863_v31, %v859_v29  ;;  %v6097_v27 = vpack.c.bf16 %v904_v20, %v900_v19  ;;  %v903_v28 = vld [vmem:[%s7199_s7 + $0x15b0] sm:$0xff]  ;;  %v908_v31 = vld [vmem:[%s7199_s7 + $0x15d8] sm:$0xff] }
 0x188   : > { %v906_v29 = vld [vmem:[%s7199_s7 + $0x15c8] sm:$0xff]  ;;  %v937_v20 = vld [vmem:[%s7199_s7 + $0x16c0] sm:$0xff] }
 0x189   : > { %5036 = vmatpush1.bf16.msra.mxu0 %v5035_v39  ;;  %v5057_v39 = vpack.c.bf16 %v870_v33, %v866_v32  ;;  %v912_v32 = vld [vmem:[%s7199_s7 + $0x15f8] sm:$0xff] }
 0x18a   : > { %6060 = vmatpush1.bf16.msra.mxu1 %v6059_v40  ;;  %5038 = vmatprep.subr.bf16.mxu0 %v5037_v41  ;;  %v865_v40 = vld [vmem:[%s7199_s7 + $0x1480] sm:$0xff] }
 0x18b   : > { %6062 = vmatprep.subr.bf16.mxu1 %v6061_v45  ;;  %v869_v41 = vld [vmem:[%s7199_s7 + $0x14a0] sm:$0xff]  ;;  %v874_v45 = vld [vmem:[%s7199_s7 + $0x14c8] sm:$0xff] }
 0x18c   : > { %v5059_v49 = vpack.c.bf16 %v869_v41, %v865_v40  ;;  %v911_v40 = vld [vmem:[%s7199_s7 + $0x15f0] sm:$0xff]  ;;  %v914_v41 = vld [vmem:[%s7199_s7 + $0x1608] sm:$0xff] }
 0x18d   : > { %5040 = vmatpush1.bf16.msra.mxu0 %v5039_v51  ;;  %v5061_v51 = vpack.c.bf16 %v878_v46, %v874_v45  ;;  %v5081_v47 = vpack.c.bf16 %v918_v42, %v914_v41 }
 0x18e   : > { %6064 = vmatpush1.bf16.msra.mxu1 %v6063_v52  ;;  %5042 = vmatprep.subr.bf16.mxu0 %v5041_v53  ;;  %v873_v52 = vld [vmem:[%s7199_s7 + $0x14c0] sm:$0xff] }
 0x18f   : > { %6066 = vmatprep.subr.bf16.mxu1 %v6065_v57  ;;  %v877_v53 = vld [vmem:[%s7199_s7 + $0x14e0] sm:$0xff]  ;;  %v882_v57 = vld [vmem:[%s7199_s7 + $0x1508] sm:$0xff] }
 0x190   : > { %v5063_v61 = vpack.c.bf16 %v877_v53, %v873_v52  ;;  %v919_v52 = vld [vmem:[%s7199_s7 + $0x1630] sm:$0xff]  ;;  %v922_v53 = vld [vmem:[%s7199_s7 + $0x1648] sm:$0xff] }
 0x191   : > { %5044 = vmatpush1.bf16.msra.mxu0 %v5043_v63  ;;  %v5065_v63 = vpack.c.bf16 %v886_v58, %v882_v57  ;;  %v5085_v59 = vpack.c.bf16 %v926_v54, %v922_v53 }
 0x192   : > { %6068 = vmatpush1.bf16.msra.mxu1 %v6067_v0  ;;  %5046 = vmatprep.subr.bf16.mxu0 %v5045_v1  ;;  %v881_v0 = vld [vmem:[%s7199_s7 + $0x1500] sm:$0xff] }
 0x193   : > { %6070 = vmatprep.subr.bf16.mxu1 %v6069_v5  ;;  %v885_v1 = vld [vmem:[%s7199_s7 + $0x1520] sm:$0xff]  ;;  %v890_v5 = vld [vmem:[%s7199_s7 + $0x1548] sm:$0xff] }
 0x194   : > { %v5067_v9 = vpack.c.bf16 %v885_v1, %v881_v0  ;;  %v927_v0 = vld [vmem:[%s7199_s7 + $0x1670] sm:$0xff]  ;;  %v930_v1 = vld [vmem:[%s7199_s7 + $0x1688] sm:$0xff] }
 0x195   : > { %5048 = vmatpush1.bf16.msra.mxu0 %v5047_v11  ;;  %v5069_v11 = vpack.c.bf16 %v894_v6, %v890_v5  ;;  %v5089_v7 = vpack.c.bf16 %v934_v2, %v930_v1 }
 0x196   : > { %6072 = vmatpush1.bf16.msra.mxu1 %v6071_v12  ;;  %5050 = vmatprep.subr.bf16.mxu0 %v5049_v13  ;;  %v889_v12 = vld [vmem:[%s7199_s7 + $0x1540] sm:$0xff] }
 0x197   : > { %6074 = vmatprep.subr.bf16.mxu1 %v6073_v17  ;;  %v893_v13 = vld [vmem:[%s7199_s7 + $0x1560] sm:$0xff]  ;;  %v898_v17 = vld [vmem:[%s7199_s7 + $0x1588] sm:$0xff] }
 0x198   : > { %2606 = vmatmul.mubr.f32.vlgmr.msra.gmra.mrb[0].mxu0 %v185_v23  ;;  %v5071_v21 = vpack.c.bf16 %v893_v13, %v889_v12  ;;  %v935_v12 = vld [vmem:[%s7199_s7 + $0x16b0] sm:$0xff]  ;;  %v938_v13 = vld [vmem:[%s7199_s7 + $0x16c8] sm:$0xff] }
 0x199   : > { %5052 = vmatpush1.bf16.msra.mxu0 %v5051_v24  ;;  %3742 = vmatmul.mubr.f32.vlgmr.msra.gmra.mrb[0].mxu1 %v185_v23  ;;  %v5073_v23 = vpack.c.bf16 %v902_v18, %v898_v17  ;;  %v897_v24 = vld [vmem:[%s7199_s7 + $0x1580] sm:$0xff]  ;;  %v5093_v19 = vpack.c.bf16 %v942_v14, %v938_v13 }
 0x19a   : > { %6076 = vmatpush1.bf16.msra.mxu1 %v6075_v25  ;;  %5054 = vmatprep.subr.bf16.mxu0 %v5053_v26  ;;  %v901_v25 = vld [vmem:[%s7199_s7 + $0x15a0] sm:$0xff]  ;;  %v899_v26 = vld [vmem:[%s7199_s7 + $0x1590] sm:$0xff] }
 0x19b   : > { %6078 = vmatprep.subr.bf16.mxu1 %v6077_v30  ;;  %2676 = vmatprep.mubr.f32.mxu0 %v188_v36  ;;  %v910_v30 = vld [vmem:[%s7199_s7 + $0x15e8] sm:$0xff]  ;;  %v5075_v33 = vpack.c.bf16 %v901_v25, %v897_v24  ;;  %v6099_v34 = vpack.c.bf16 %v903_v28, %v899_v26  ;;  %v943_v24 = vld [vmem:[%s7199_s7 + $0x16f0] sm:$0xff]  ;;  %v952_v28 = vld [vmem:[%s7199_s7 + $0x1738] sm:$0xff] }
 0x19c   : > { %3812 = vmatprep.mubr.f32.mxu1 %v188_v36  ;;  %v5077_v35 = vpack.c.bf16 %v910_v30, %v906_v29  ;;  %v905_v36 = vld [vmem:[%s7199_s7 + $0x15c0] sm:$0xff]  ;;  %v946_v25 = vld [vmem:[%s7199_s7 + $0x1708] sm:$0xff] }
 0x19d   : > { %5056 = vmatpush1.bf16.msra.mxu0 %v5055_v37  ;;  %v909_v37 = vld [vmem:[%s7199_s7 + $0x15e0] sm:$0xff]  ;;  %v950_v26 = vld [vmem:[%s7199_s7 + $0x1728] sm:$0xff] }
 0x19e   : > { %6080 = vmatpush1.bf16.msra.mxu1 %v6079_v38  ;;  %5058 = vmatprep.subr.bf16.mxu0 %v5057_v39  ;;  %v907_v38 = vld [vmem:[%s7199_s7 + $0x15d0] sm:$0xff]  ;;  %v6101_v39 = vpack.c.bf16 %v912_v32, %v908_v31  ;;  %v5079_v45 = vpack.c.bf16 %v909_v37, %v905_v36  ;;  %v5097_v31 = vpack.c.bf16 %v950_v26, %v946_v25  ;;  %v945_v32 = vld [vmem:[%s7199_s7 + $0x1700] sm:$0xff]  ;;  %v954_v37 = vld [vmem:[%s7199_s7 + $0x1748] sm:$0xff] }
 0x19f   : > { %6082 = vmatprep.subr.bf16.mxu1 %v6081_v43  ;;  %v916_v43 = vld [vmem:[%s7199_s7 + $0x1618] sm:$0xff]  ;;  %v6103_v46 = vpack.c.bf16 %v911_v40, %v907_v38  ;;  %v951_v36 = vld [vmem:[%s7199_s7 + $0x1730] sm:$0xff]  ;;  %v958_v38 = vld [vmem:[%s7199_s7 + $0x1768] sm:$0xff] }
 0x1a0   : > { %v960_v40 = vld [vmem:[%s7199_s7 + $0x1778] sm:$0xff]  ;;  %v187_v25 = vld [vmem:[#allocation2 + $0x50] sm:$0xff] }
 0x1a1   : > { %5060 = vmatpush1.bf16.msra.mxu0 %v5059_v49  ;;  %v917_v49 = vld [vmem:[%s7199_s7 + $0x1620] sm:$0xff] }
 0x1a2   : > { %6084 = vmatpush1.bf16.msra.mxu1 %v6083_v50  ;;  %5062 = vmatprep.subr.bf16.mxu0 %v5061_v51  ;;  %v915_v50 = vld [vmem:[%s7199_s7 + $0x1610] sm:$0xff]  ;;  %v6105_v51 = vpack.c.bf16 %v920_v44, %v916_v43  ;;  %v5083_v57 = vpack.c.bf16 %v917_v49, %v913_v48  ;;  %v5101_v43 = vpack.c.bf16 %v958_v38, %v954_v37  ;;  %v953_v44 = vld [vmem:[%s7199_s7 + $0x1740] sm:$0xff]  ;;  %v962_v49 = vld [vmem:[%s7199_s7 + $0x1788] sm:$0xff] }
 0x1a3   : > { %6086 = vmatprep.subr.bf16.mxu1 %v6085_v55  ;;  %v924_v55 = vld [vmem:[%s7199_s7 + $0x1658] sm:$0xff]  ;;  %v6107_v58 = vpack.c.bf16 %v919_v52, %v915_v50  ;;  %v959_v48 = vld [vmem:[%s7199_s7 + $0x1770] sm:$0xff]  ;;  %v966_v50 = vld [vmem:[%s7199_s7 + $0x17a8] sm:$0xff] }
 0x1a4   : > { %v968_v52 = vld [vmem:[%s7199_s7 + $0x17b8] sm:$0xff]  ;;  %v190_v38 = vld [vmem:[#allocation2 + $0x68] sm:$0xff] }
 0x1a5   : > { %5064 = vmatpush1.bf16.msra.mxu0 %v5063_v61  ;;  %v925_v61 = vld [vmem:[%s7199_s7 + $0x1660] sm:$0xff]  ;;  %v1000_v37 = vld [vmem:[%s7199_s7 + $0x18b8] sm:$0xff] }
 0x1a6   : > { %6088 = vmatpush1.bf16.msra.mxu1 %v6087_v62  ;;  %5066 = vmatprep.subr.bf16.mxu0 %v5065_v63  ;;  %v923_v62 = vld [vmem:[%s7199_s7 + $0x1650] sm:$0xff]  ;;  %v6109_v63 = vpack.c.bf16 %v928_v56, %v924_v55  ;;  %v5087_v5 = vpack.c.bf16 %v925_v61, %v921_v60  ;;  %v5105_v55 = vpack.c.bf16 %v966_v50, %v962_v49  ;;  %v961_v56 = vld [vmem:[%s7199_s7 + $0x1780] sm:$0xff]  ;;  %v970_v61 = vld [vmem:[%s7199_s7 + $0x17c8] sm:$0xff] }
 0x1a7   : > { %6090 = vmatprep.subr.bf16.mxu1 %v6089_v3  ;;  %v932_v3 = vld [vmem:[%s7199_s7 + $0x1698] sm:$0xff]  ;;  %v6111_v6 = vpack.c.bf16 %v927_v0, %v923_v62  ;;  %v967_v60 = vld [vmem:[%s7199_s7 + $0x17b0] sm:$0xff]  ;;  %v974_v62 = vld [vmem:[%s7199_s7 + $0x17e8] sm:$0xff] }
 0x1a8   : > { %v976_v0 = vld [vmem:[%s7199_s7 + $0x17f8] sm:$0xff] }
 0x1a9   : > { %5068 = vmatpush1.bf16.msra.mxu0 %v5067_v9  ;;  %v933_v9 = vld [vmem:[%s7199_s7 + $0x16a0] sm:$0xff]  ;;  %v1004_v49 = vld [vmem:[%s7199_s7 + $0x18d8] sm:$0xff] }
 0x1aa   : > { %6092 = vmatpush1.bf16.msra.mxu1 %v6091_v10  ;;  %5070 = vmatprep.subr.bf16.mxu0 %v5069_v11  ;;  %v931_v10 = vld [vmem:[%s7199_s7 + $0x1690] sm:$0xff]  ;;  %v6113_v11 = vpack.c.bf16 %v936_v4, %v932_v3  ;;  %v5091_v17 = vpack.c.bf16 %v933_v9, %v929_v8  ;;  %v5109_v3 = vpack.c.bf16 %v974_v62, %v970_v61  ;;  %v969_v4 = vld [vmem:[%s7199_s7 + $0x17c0] sm:$0xff]  ;;  %v978_v9 = vld [vmem:[%s7199_s7 + $0x1808] sm:$0xff] }
 0x1ab   : > { %6094 = vmatprep.subr.bf16.mxu1 %v6093_v15  ;;  %v940_v15 = vld [vmem:[%s7199_s7 + $0x16d8] sm:$0xff]  ;;  %v6115_v18 = vpack.c.bf16 %v935_v12, %v931_v10  ;;  %v975_v8 = vld [vmem:[%s7199_s7 + $0x17f0] sm:$0xff]  ;;  %v982_v10 = vld [vmem:[%s7199_s7 + $0x1828] sm:$0xff] }
 0x1ac   : > { %v984_v12 = vld [vmem:[%s7199_s7 + $0x1838] sm:$0xff] }
 0x1ad   : > { %5072 = vmatpush1.bf16.msra.mxu0 %v5071_v21  ;;  %v941_v21 = vld [vmem:[%s7199_s7 + $0x16e0] sm:$0xff]  ;;  %v1008_v50 = vld [vmem:[%s7199_s7 + $0x18f8] sm:$0xff] }
 0x1ae   : > { %6096 = vmatpush1.bf16.msra.mxu1 %v6095_v22  ;;  %5074 = vmatprep.subr.bf16.mxu0 %v5073_v23  ;;  %v939_v22 = vld [vmem:[%s7199_s7 + $0x16d0] sm:$0xff]  ;;  %v6117_v23 = vpack.c.bf16 %v944_v16, %v940_v15  ;;  %v5095_v29 = vpack.c.bf16 %v941_v21, %v937_v20  ;;  %v5113_v15 = vpack.c.bf16 %v982_v10, %v978_v9  ;;  %v977_v16 = vld [vmem:[%s7199_s7 + $0x1800] sm:$0xff]  ;;  %v986_v21 = vld [vmem:[%s7199_s7 + $0x1848] sm:$0xff] }
 0x1af   : > { %6098 = vmatprep.subr.bf16.mxu1 %v6097_v27  ;;  %v948_v27 = vld [vmem:[%s7199_s7 + $0x1718] sm:$0xff]  ;;  %v6119_v30 = vpack.c.bf16 %v943_v24, %v939_v22  ;;  %v983_v20 = vld [vmem:[%s7199_s7 + $0x1830] sm:$0xff]  ;;  %v990_v22 = vld [vmem:[%s7199_s7 + $0x1868] sm:$0xff] }
 0x1b0   : > { %v992_v24 = vld [vmem:[%s7199_s7 + $0x1878] sm:$0xff] }
 0x1b1   : > { %5076 = vmatpush1.bf16.msra.mxu0 %v5075_v33  ;;  %v949_v33 = vld [vmem:[%s7199_s7 + $0x1720] sm:$0xff]  ;;  %v1012_v61 = vld [vmem:[%s7199_s7 + $0x1918] sm:$0xff] }
 0x1b2   : > { %6100 = vmatpush1.bf16.msra.mxu1 %v6099_v34  ;;  %5078 = vmatprep.subr.bf16.mxu0 %v5077_v35  ;;  %v947_v34 = vld [vmem:[%s7199_s7 + $0x1710] sm:$0xff]  ;;  %v6121_v35 = vpack.c.bf16 %v952_v28, %v948_v27  ;;  %v5099_v41 = vpack.c.bf16 %v949_v33, %v945_v32  ;;  %v5117_v28 = vpack.c.bf16 %v990_v22, %v986_v21  ;;  %v1016_v62 = vld [vmem:[%s7199_s7 + $0x1938] sm:$0xff] }
 0x1b3   : > { %6102 = vmatprep.subr.bf16.mxu1 %v6101_v39  ;;  %v956_v39 = vld [vmem:[%s7199_s7 + $0x1758] sm:$0xff]  ;;  %v6123_v42 = vpack.c.bf16 %v951_v36, %v947_v34  ;;  %v991_v33 = vld [vmem:[%s7199_s7 + $0x1870] sm:$0xff]  ;;  %v994_v34 = vld [vmem:[%s7199_s7 + $0x1888] sm:$0xff] }
 0x1b4   : > { %v996_v36 = vld [vmem:[%s7199_s7 + $0x1898] sm:$0xff] }
 0x1b5   : > { %5080 = vmatpush1.bf16.msra.mxu0 %v5079_v45  ;;  %v957_v45 = vld [vmem:[%s7199_s7 + $0x1760] sm:$0xff]  ;;  %v1020_v9 = vld [vmem:[%s7199_s7 + $0x1958] sm:$0xff] }
 0x1b6   : > { %6104 = vmatpush1.bf16.msra.mxu1 %v6103_v46  ;;  %5082 = vmatprep.subr.bf16.mxu0 %v5081_v47  ;;  %v955_v46 = vld [vmem:[%s7199_s7 + $0x1750] sm:$0xff]  ;;  %v6125_v47 = vpack.c.bf16 %v960_v40, %v956_v39  ;;  %v5103_v53 = vpack.c.bf16 %v957_v45, %v953_v44  ;;  %v6145_v45 = vpack.c.bf16 %v1000_v37, %v996_v36  ;;  %v1024_v10 = vld [vmem:[%s7199_s7 + $0x1978] sm:$0xff] }
 0x1b7   : > { %6106 = vmatprep.subr.bf16.mxu1 %v6105_v51  ;;  %v964_v51 = vld [vmem:[%s7199_s7 + $0x1798] sm:$0xff]  ;;  %v6127_v54 = vpack.c.bf16 %v959_v48, %v955_v46  ;;  %v995_v44 = vld [vmem:[%s7199_s7 + $0x1890] sm:$0xff]  ;;  %v1006_v48 = vld [vmem:[%s7199_s7 + $0x18e8] sm:$0xff] }
 0x1b8   : > { %v999_v46 = vld [vmem:[%s7199_s7 + $0x18b0] sm:$0xff]  ;;  %v1028_v21 = vld [vmem:[%s7199_s7 + $0x1998] sm:$0xff] }
 0x1b9   : > { %5084 = vmatpush1.bf16.msra.mxu0 %v5083_v57  ;;  %v965_v57 = vld [vmem:[%s7199_s7 + $0x17a0] sm:$0xff]  ;;  %v1032_v22 = vld [vmem:[%s7199_s7 + $0x19b8] sm:$0xff] }
 0x1ba   : > { %6108 = vmatpush1.bf16.msra.mxu1 %v6107_v58  ;;  %5086 = vmatprep.subr.bf16.mxu0 %v5085_v59  ;;  %v963_v58 = vld [vmem:[%s7199_s7 + $0x1790] sm:$0xff]  ;;  %v6129_v59 = vpack.c.bf16 %v968_v52, %v964_v51  ;;  %v5107_v1 = vpack.c.bf16 %v965_v57, %v961_v56  ;;  %v6147_v52 = vpack.c.bf16 %v999_v46, %v995_v44  ;;  %v1046_v44 = vld [vmem:[%s7199_s7 + $0x1a28] sm:$0xff]  ;;  %v1048_v46 = vld [vmem:[%s7199_s7 + $0x1a38] sm:$0xff] }
 0x1bb   : > { %6110 = vmatprep.subr.bf16.mxu1 %v6109_v63  ;;  %v972_v63 = vld [vmem:[%s7199_s7 + $0x17d8] sm:$0xff]  ;;  %v6131_v2 = vpack.c.bf16 %v967_v60, %v963_v58  ;;  %v1003_v56 = vld [vmem:[%s7199_s7 + $0x18d0] sm:$0xff]  ;;  %v6149_v57 = vpack.c.bf16 %v1008_v50, %v1004_v49  ;;  %v1014_v60 = vld [vmem:[%s7199_s7 + $0x1928] sm:$0xff] }
 0x1bc   : > { %v1007_v58 = vld [vmem:[%s7199_s7 + $0x18f0] sm:$0xff]  ;;  %v1041_v50 = vld [vmem:[%s7199_s7 + $0x1a00] sm:$0xff] }
 0x1bd   : > { %5088 = vmatpush1.bf16.msra.mxu0 %v5087_v5  ;;  %v973_v5 = vld [vmem:[%s7199_s7 + $0x17e0] sm:$0xff] }
 0x1be   : > { %6112 = vmatpush1.bf16.msra.mxu1 %v6111_v6  ;;  %5090 = vmatprep.subr.bf16.mxu0 %v5089_v7  ;;  %v971_v6 = vld [vmem:[%s7199_s7 + $0x17d0] sm:$0xff]  ;;  %v6133_v7 = vpack.c.bf16 %v976_v0, %v972_v63  ;;  %v5111_v13 = vpack.c.bf16 %v973_v5, %v969_v4  ;;  %v6151_v0 = vpack.c.bf16 %v1007_v58, %v1003_v56  ;;  %v1054_v56 = vld [vmem:[%s7199_s7 + $0x1a68] sm:$0xff]  ;;  %v1056_v58 = vld [vmem:[%s7199_s7 + $0x1a78] sm:$0xff] }
 0x1bf   : > { %6114 = vmatprep.subr.bf16.mxu1 %v6113_v11  ;;  %v980_v11 = vld [vmem:[%s7199_s7 + $0x1818] sm:$0xff]  ;;  %v6135_v14 = vpack.c.bf16 %v975_v8, %v971_v6  ;;  %v1011_v4 = vld [vmem:[%s7199_s7 + $0x1910] sm:$0xff]  ;;  %v6153_v5 = vpack.c.bf16 %v1016_v62, %v1012_v61  ;;  %v1022_v8 = vld [vmem:[%s7199_s7 + $0x1968] sm:$0xff] }
 0x1c0   : > { %v1015_v6 = vld [vmem:[%s7199_s7 + $0x1930] sm:$0xff]  ;;  %v1049_v62 = vld [vmem:[%s7199_s7 + $0x1a40] sm:$0xff] }
 0x1c1   : > { %5092 = vmatpush1.bf16.msra.mxu0 %v5091_v17  ;;  %v981_v17 = vld [vmem:[%s7199_s7 + $0x1820] sm:$0xff] }
 0x1c2   : > { %6116 = vmatpush1.bf16.msra.mxu1 %v6115_v18  ;;  %5094 = vmatprep.subr.bf16.mxu0 %v5093_v19  ;;  %v979_v18 = vld [vmem:[%s7199_s7 + $0x1810] sm:$0xff]  ;;  %v6137_v19 = vpack.c.bf16 %v984_v12, %v980_v11  ;;  %v5115_v26 = vpack.c.bf16 %v981_v17, %v977_v16  ;;  %v6155_v12 = vpack.c.bf16 %v1015_v6, %v1011_v4  ;;  %v1062_v4 = vld [vmem:[%s7199_s7 + $0x1aa8] sm:$0xff]  ;;  %v1064_v6 = vld [vmem:[%s7199_s7 + $0x1ab8] sm:$0xff] }
 0x1c3   : > { %6118 = vmatprep.subr.bf16.mxu1 %v6117_v23  ;;  %v988_v23 = vld [vmem:[%s7199_s7 + $0x1858] sm:$0xff]  ;;  %v6139_v27 = vpack.c.bf16 %v983_v20, %v979_v18  ;;  %v1019_v16 = vld [vmem:[%s7199_s7 + $0x1950] sm:$0xff]  ;;  %v6157_v17 = vpack.c.bf16 %v1024_v10, %v1020_v9  ;;  %v1030_v20 = vld [vmem:[%s7199_s7 + $0x19a8] sm:$0xff] }
 0x1c4   : > { %v6141_v32 = vpack.c.bf16 %v992_v24, %v988_v23  ;;  %v1023_v18 = vld [vmem:[%s7199_s7 + $0x1970] sm:$0xff]  ;;  %v1057_v10 = vld [vmem:[%s7199_s7 + $0x1a80] sm:$0xff] }
 0x1c5   : > { %5096 = vmatpush1.bf16.msra.mxu0 %v5095_v29  ;;  %v985_v29 = vld [vmem:[%s7199_s7 + $0x1840] sm:$0xff]  ;;  %v6159_v24 = vpack.c.bf16 %v1023_v18, %v1019_v16  ;;  %v1070_v16 = vld [vmem:[%s7199_s7 + $0x1ae8] sm:$0xff]  ;;  %v1072_v18 = vld [vmem:[%s7199_s7 + $0x1af8] sm:$0xff] }
 0x1c6   : > { %6120 = vmatpush1.bf16.msra.mxu1 %v6119_v30  ;;  %5098 = vmatprep.subr.bf16.mxu0 %v5097_v31  ;;  %v989_v30 = vld [vmem:[%s7199_s7 + $0x1860] sm:$0xff]  ;;  %v987_v31 = vld [vmem:[%s7199_s7 + $0x1850] sm:$0xff] }
 0x1c7   : > { %6122 = vmatprep.subr.bf16.mxu1 %v6121_v35  ;;  %v998_v35 = vld [vmem:[%s7199_s7 + $0x18a8] sm:$0xff]  ;;  %v5119_v39 = vpack.c.bf16 %v989_v30, %v985_v29  ;;  %v6143_v40 = vpack.c.bf16 %v991_v33, %v987_v31  ;;  %v6161_v29 = vpack.c.bf16 %v1032_v22, %v1028_v21  ;;  %v1031_v30 = vld [vmem:[%s7199_s7 + $0x19b0] sm:$0xff]  ;;  %v1036_v33 = vld [vmem:[%s7199_s7 + $0x19d8] sm:$0xff] }
 0x1c8   : > { %v1034_v31 = vld [vmem:[%s7199_s7 + $0x19c8] sm:$0xff]  ;;  %v1065_v22 = vld [vmem:[%s7199_s7 + $0x1ac0] sm:$0xff] }
 0x1c9   : > { %5100 = vmatpush1.bf16.msra.mxu0 %v5099_v41  ;;  %v5121_v41 = vpack.c.bf16 %v998_v35, %v994_v34  ;;  %v1040_v34 = vld [vmem:[%s7199_s7 + $0x19f8] sm:$0xff] }
 0x1ca   : > { %6124 = vmatpush1.bf16.msra.mxu1 %v6123_v42  ;;  %5102 = vmatprep.subr.bf16.mxu0 %v5101_v43  ;;  %v993_v42 = vld [vmem:[%s7199_s7 + $0x1880] sm:$0xff] }
 0x1cb   : > { %6126 = vmatprep.subr.bf16.mxu1 %v6125_v47  ;;  %v997_v43 = vld [vmem:[%s7199_s7 + $0x18a0] sm:$0xff]  ;;  %v1002_v47 = vld [vmem:[%s7199_s7 + $0x18c8] sm:$0xff] }
 0x1cc   : > { %v5123_v51 = vpack.c.bf16 %v997_v43, %v993_v42  ;;  %v1039_v42 = vld [vmem:[%s7199_s7 + $0x19f0] sm:$0xff]  ;;  %v1042_v43 = vld [vmem:[%s7199_s7 + $0x1a08] sm:$0xff] }
 0x1cd   : > { %5104 = vmatpush1.bf16.msra.mxu0 %v5103_v53  ;;  %v5125_v53 = vpack.c.bf16 %v1006_v48, %v1002_v47  ;;  %v5145_v49 = vpack.c.bf16 %v1046_v44, %v1042_v43 }
 0x1ce   : > { %6128 = vmatpush1.bf16.msra.mxu1 %v6127_v54  ;;  %5106 = vmatprep.subr.bf16.mxu0 %v5105_v55  ;;  %v1001_v54 = vld [vmem:[%s7199_s7 + $0x18c0] sm:$0xff] }
 0x1cf   : > { %6130 = vmatprep.subr.bf16.mxu1 %v6129_v59  ;;  %v1005_v55 = vld [vmem:[%s7199_s7 + $0x18e0] sm:$0xff]  ;;  %v1010_v59 = vld [vmem:[%s7199_s7 + $0x1908] sm:$0xff] }
 0x1d0   : > { %v5127_v63 = vpack.c.bf16 %v1005_v55, %v1001_v54  ;;  %v1047_v54 = vld [vmem:[%s7199_s7 + $0x1a30] sm:$0xff]  ;;  %v1050_v55 = vld [vmem:[%s7199_s7 + $0x1a48] sm:$0xff] }
 0x1d1   : > { %5108 = vmatpush1.bf16.msra.mxu0 %v5107_v1  ;;  %v5129_v1 = vpack.c.bf16 %v1014_v60, %v1010_v59  ;;  %v5149_v61 = vpack.c.bf16 %v1054_v56, %v1050_v55 }
 0x1d2   : > { %6132 = vmatpush1.bf16.msra.mxu1 %v6131_v2  ;;  %5110 = vmatprep.subr.bf16.mxu0 %v5109_v3  ;;  %v1009_v2 = vld [vmem:[%s7199_s7 + $0x1900] sm:$0xff] }
 0x1d3   : > { %6134 = vmatprep.subr.bf16.mxu1 %v6133_v7  ;;  %v1013_v3 = vld [vmem:[%s7199_s7 + $0x1920] sm:$0xff]  ;;  %v1018_v7 = vld [vmem:[%s7199_s7 + $0x1948] sm:$0xff] }
 0x1d4   : > { %v5131_v11 = vpack.c.bf16 %v1013_v3, %v1009_v2  ;;  %v1055_v2 = vld [vmem:[%s7199_s7 + $0x1a70] sm:$0xff]  ;;  %v1058_v3 = vld [vmem:[%s7199_s7 + $0x1a88] sm:$0xff] }
 0x1d5   : > { %5112 = vmatpush1.bf16.msra.mxu0 %v5111_v13  ;;  %v5133_v13 = vpack.c.bf16 %v1022_v8, %v1018_v7  ;;  %v5153_v9 = vpack.c.bf16 %v1062_v4, %v1058_v3 }
 0x1d6   : > { %6136 = vmatpush1.bf16.msra.mxu1 %v6135_v14  ;;  %5114 = vmatprep.subr.bf16.mxu0 %v5113_v15  ;;  %v1017_v14 = vld [vmem:[%s7199_s7 + $0x1940] sm:$0xff] }
 0x1d7   : > { %6138 = vmatprep.subr.bf16.mxu1 %v6137_v19  ;;  %v1021_v15 = vld [vmem:[%s7199_s7 + $0x1960] sm:$0xff]  ;;  %v1026_v19 = vld [vmem:[%s7199_s7 + $0x1988] sm:$0xff] }
 0x1d8   : > { %2677 = vmatmul.mubr.f32.vlgmr.msra.gmra.mrb[0].mxu0 %v187_v25  ;;  %v5135_v23 = vpack.c.bf16 %v1021_v15, %v1017_v14  ;;  %v1063_v14 = vld [vmem:[%s7199_s7 + $0x1ab0] sm:$0xff]  ;;  %v1066_v15 = vld [vmem:[%s7199_s7 + $0x1ac8] sm:$0xff] }
 0x1d9   : > { %5116 = vmatpush1.bf16.msra.mxu0 %v5115_v26  ;;  %3813 = vmatmul.mubr.f32.vlgmr.msra.gmra.mrb[0].mxu1 %v187_v25  ;;  %v5137_v25 = vpack.c.bf16 %v1030_v20, %v1026_v19  ;;  %v1025_v26 = vld [vmem:[%s7199_s7 + $0x1980] sm:$0xff]  ;;  %v5157_v21 = vpack.c.bf16 %v1070_v16, %v1066_v15 }
 0x1da   : > { %6140 = vmatpush1.bf16.msra.mxu1 %v6139_v27  ;;  %5118 = vmatprep.subr.bf16.mxu0 %v5117_v28  ;;  %v1029_v27 = vld [vmem:[%s7199_s7 + $0x19a0] sm:$0xff]  ;;  %v1027_v28 = vld [vmem:[%s7199_s7 + $0x1990] sm:$0xff] }
 0x1db   : > { %6142 = vmatprep.subr.bf16.mxu1 %v6141_v32  ;;  %2747 = vmatprep.mubr.f32.mxu0 %v190_v38  ;;  %v1038_v32 = vld [vmem:[%s7199_s7 + $0x19e8] sm:$0xff]  ;;  %v5139_v35 = vpack.c.bf16 %v1029_v27, %v1025_v26  ;;  %v6163_v36 = vpack.c.bf16 %v1031_v30, %v1027_v28  ;;  %v1071_v26 = vld [vmem:[%s7199_s7 + $0x1af0] sm:$0xff]  ;;  %v1080_v30 = vld [vmem:[%s7199_s7 + $0x1b38] sm:$0xff] }
 0x1dc   : > { %3883 = vmatprep.mubr.f32.mxu1 %v190_v38  ;;  %v5141_v37 = vpack.c.bf16 %v1038_v32, %v1034_v31  ;;  %v1033_v38 = vld [vmem:[%s7199_s7 + $0x19c0] sm:$0xff]  ;;  %v1074_v27 = vld [vmem:[%s7199_s7 + $0x1b08] sm:$0xff] }
 0x1dd   : > { %5120 = vmatpush1.bf16.msra.mxu0 %v5119_v39  ;;  %v1037_v39 = vld [vmem:[%s7199_s7 + $0x19e0] sm:$0xff]  ;;  %v1078_v28 = vld [vmem:[%s7199_s7 + $0x1b28] sm:$0xff] }
 0x1de   : > { %6144 = vmatpush1.bf16.msra.mxu1 %v6143_v40  ;;  %5122 = vmatprep.subr.bf16.mxu0 %v5121_v41  ;;  %v1035_v40 = vld [vmem:[%s7199_s7 + $0x19d0] sm:$0xff]  ;;  %v6165_v41 = vpack.c.bf16 %v1040_v34, %v1036_v33  ;;  %v5143_v47 = vpack.c.bf16 %v1037_v39, %v1033_v38  ;;  %v5161_v33 = vpack.c.bf16 %v1078_v28, %v1074_v27  ;;  %v1073_v34 = vld [vmem:[%s7199_s7 + $0x1b00] sm:$0xff]  ;;  %v1082_v39 = vld [vmem:[%s7199_s7 + $0x1b48] sm:$0xff] }
 0x1df   : > { %6146 = vmatprep.subr.bf16.mxu1 %v6145_v45  ;;  %v1044_v45 = vld [vmem:[%s7199_s7 + $0x1a18] sm:$0xff]  ;;  %v6167_v48 = vpack.c.bf16 %v1039_v42, %v1035_v40  ;;  %v1079_v38 = vld [vmem:[%s7199_s7 + $0x1b30] sm:$0xff]  ;;  %v1086_v40 = vld [vmem:[%s7199_s7 + $0x1b68] sm:$0xff] }
 0x1e0   : > { %v1088_v42 = vld [vmem:[%s7199_s7 + $0x1b78] sm:$0xff]  ;;  %v189_v27 = vld [vmem:[#allocation2 + $0x60] sm:$0xff] }
 0x1e1   : > { %5124 = vmatpush1.bf16.msra.mxu0 %v5123_v51  ;;  %v1045_v51 = vld [vmem:[%s7199_s7 + $0x1a20] sm:$0xff] }
 0x1e2   : > { %6148 = vmatpush1.bf16.msra.mxu1 %v6147_v52  ;;  %5126 = vmatprep.subr.bf16.mxu0 %v5125_v53  ;;  %v1043_v52 = vld [vmem:[%s7199_s7 + $0x1a10] sm:$0xff]  ;;  %v6169_v53 = vpack.c.bf16 %v1048_v46, %v1044_v45  ;;  %v5147_v59 = vpack.c.bf16 %v1045_v51, %v1041_v50  ;;  %v5165_v45 = vpack.c.bf16 %v1086_v40, %v1082_v39  ;;  %v1081_v46 = vld [vmem:[%s7199_s7 + $0x1b40] sm:$0xff]  ;;  %v1090_v51 = vld [vmem:[%s7199_s7 + $0x1b88] sm:$0xff] }
 0x1e3   : > { %6150 = vmatprep.subr.bf16.mxu1 %v6149_v57  ;;  %v1052_v57 = vld [vmem:[%s7199_s7 + $0x1a58] sm:$0xff]  ;;  %v6171_v60 = vpack.c.bf16 %v1047_v54, %v1043_v52  ;;  %v1087_v50 = vld [vmem:[%s7199_s7 + $0x1b70] sm:$0xff]  ;;  %v1094_v52 = vld [vmem:[%s7199_s7 + $0x1ba8] sm:$0xff] }
 0x1e4   : > { %v1096_v54 = vld [vmem:[%s7199_s7 + $0x1bb8] sm:$0xff] }
 0x1e5   : > { %5128 = vmatpush1.bf16.msra.mxu0 %v5127_v63  ;;  %v1053_v63 = vld [vmem:[%s7199_s7 + $0x1a60] sm:$0xff]  ;;  %v1128_v39 = vld [vmem:[%s7199_s7 + $0x1cb8] sm:$0xff] }
 0x1e6   : > { %6152 = vmatpush1.bf16.msra.mxu1 %v6151_v0  ;;  %5130 = vmatprep.subr.bf16.mxu0 %v5129_v1  ;;  %v1051_v0 = vld [vmem:[%s7199_s7 + $0x1a50] sm:$0xff]  ;;  %v6173_v1 = vpack.c.bf16 %v1056_v58, %v1052_v57  ;;  %v5151_v7 = vpack.c.bf16 %v1053_v63, %v1049_v62  ;;  %v5169_v57 = vpack.c.bf16 %v1094_v52, %v1090_v51  ;;  %v1089_v58 = vld [vmem:[%s7199_s7 + $0x1b80] sm:$0xff]  ;;  %v1098_v63 = vld [vmem:[%s7199_s7 + $0x1bc8] sm:$0xff] }
 0x1e7   : > { %6154 = vmatprep.subr.bf16.mxu1 %v6153_v5  ;;  %v1060_v5 = vld [vmem:[%s7199_s7 + $0x1a98] sm:$0xff]  ;;  %v6175_v8 = vpack.c.bf16 %v1055_v2, %v1051_v0  ;;  %v1095_v62 = vld [vmem:[%s7199_s7 + $0x1bb0] sm:$0xff]  ;;  %v1102_v0 = vld [vmem:[%s7199_s7 + $0x1be8] sm:$0xff] }
 0x1e8   : > { %v1104_v2 = vld [vmem:[%s7199_s7 + $0x1bf8] sm:$0xff] }
 0x1e9   : > { %5132 = vmatpush1.bf16.msra.mxu0 %v5131_v11  ;;  %v1061_v11 = vld [vmem:[%s7199_s7 + $0x1aa0] sm:$0xff]  ;;  %v192_v40 = vld [vmem:[#allocation2 + $0x78] sm:$0xff] }
 0x1ea   : > { %6156 = vmatpush1.bf16.msra.mxu1 %v6155_v12  ;;  %5134 = vmatprep.subr.bf16.mxu0 %v5133_v13  ;;  %v1059_v12 = vld [vmem:[%s7199_s7 + $0x1a90] sm:$0xff]  ;;  %v6177_v13 = vpack.c.bf16 %v1064_v6, %v1060_v5  ;;  %v5155_v19 = vpack.c.bf16 %v1061_v11, %v1057_v10  ;;  %v5173_v5 = vpack.c.bf16 %v1102_v0, %v1098_v63  ;;  %v1097_v6 = vld [vmem:[%s7199_s7 + $0x1bc0] sm:$0xff]  ;;  %v1106_v11 = vld [vmem:[%s7199_s7 + $0x1c08] sm:$0xff] }
 0x1eb   : > { %6158 = vmatprep.subr.bf16.mxu1 %v6157_v17  ;;  %v1068_v17 = vld [vmem:[%s7199_s7 + $0x1ad8] sm:$0xff]  ;;  %v6179_v20 = vpack.c.bf16 %v1063_v14, %v1059_v12  ;;  %v1103_v10 = vld [vmem:[%s7199_s7 + $0x1bf0] sm:$0xff]  ;;  %v1110_v12 = vld [vmem:[%s7199_s7 + $0x1c28] sm:$0xff] }
 0x1ec   : > { %v1112_v14 = vld [vmem:[%s7199_s7 + $0x1c38] sm:$0xff] }
 0x1ed   : > { %5136 = vmatpush1.bf16.msra.mxu0 %v5135_v23  ;;  %v1069_v23 = vld [vmem:[%s7199_s7 + $0x1ae0] sm:$0xff]  ;;  %v1132_v51 = vld [vmem:[%s7199_s7 + $0x1cd8] sm:$0xff] }
 0x1ee   : > { %6160 = vmatpush1.bf16.msra.mxu1 %v6159_v24  ;;  %5138 = vmatprep.subr.bf16.mxu0 %v5137_v25  ;;  %v1067_v24 = vld [vmem:[%s7199_s7 + $0x1ad0] sm:$0xff]  ;;  %v6181_v25 = vpack.c.bf16 %v1072_v18, %v1068_v17  ;;  %v5159_v31 = vpack.c.bf16 %v1069_v23, %v1065_v22  ;;  %v5177_v17 = vpack.c.bf16 %v1110_v12, %v1106_v11  ;;  %v1105_v18 = vld [vmem:[%s7199_s7 + $0x1c00] sm:$0xff]  ;;  %v1114_v23 = vld [vmem:[%s7199_s7 + $0x1c48] sm:$0xff] }
 0x1ef   : > { %6162 = vmatprep.subr.bf16.mxu1 %v6161_v29  ;;  %v1076_v29 = vld [vmem:[%s7199_s7 + $0x1b18] sm:$0xff]  ;;  %v6183_v32 = vpack.c.bf16 %v1071_v26, %v1067_v24  ;;  %v1111_v22 = vld [vmem:[%s7199_s7 + $0x1c30] sm:$0xff]  ;;  %v1118_v24 = vld [vmem:[%s7199_s7 + $0x1c68] sm:$0xff] }
 0x1f0   : > { %v1120_v26 = vld [vmem:[%s7199_s7 + $0x1c78] sm:$0xff] }
 0x1f1   : > { %5140 = vmatpush1.bf16.msra.mxu0 %v5139_v35  ;;  %v1077_v35 = vld [vmem:[%s7199_s7 + $0x1b20] sm:$0xff]  ;;  %v1136_v52 = vld [vmem:[%s7199_s7 + $0x1cf8] sm:$0xff] }
 0x1f2   : > { %6164 = vmatpush1.bf16.msra.mxu1 %v6163_v36  ;;  %5142 = vmatprep.subr.bf16.mxu0 %v5141_v37  ;;  %v1075_v36 = vld [vmem:[%s7199_s7 + $0x1b10] sm:$0xff]  ;;  %v6185_v37 = vpack.c.bf16 %v1080_v30, %v1076_v29  ;;  %v5163_v43 = vpack.c.bf16 %v1077_v35, %v1073_v34  ;;  %v5181_v30 = vpack.c.bf16 %v1118_v24, %v1114_v23  ;;  %v1140_v63 = vld [vmem:[%s7199_s7 + $0x1d18] sm:$0xff] }
 0x1f3   : > { %6166 = vmatprep.subr.bf16.mxu1 %v6165_v41  ;;  %v1084_v41 = vld [vmem:[%s7199_s7 + $0x1b58] sm:$0xff]  ;;  %v6187_v44 = vpack.c.bf16 %v1079_v38, %v1075_v36  ;;  %v1119_v35 = vld [vmem:[%s7199_s7 + $0x1c70] sm:$0xff]  ;;  %v1122_v36 = vld [vmem:[%s7199_s7 + $0x1c88] sm:$0xff] }
 0x1f4   : > { %v1124_v38 = vld [vmem:[%s7199_s7 + $0x1c98] sm:$0xff] }
 0x1f5   : > { %5144 = vmatpush1.bf16.msra.mxu0 %v5143_v47  ;;  %v1085_v47 = vld [vmem:[%s7199_s7 + $0x1b60] sm:$0xff]  ;;  %v1144_v0 = vld [vmem:[%s7199_s7 + $0x1d38] sm:$0xff] }
 0x1f6   : > { %6168 = vmatpush1.bf16.msra.mxu1 %v6167_v48  ;;  %5146 = vmatprep.subr.bf16.mxu0 %v5145_v49  ;;  %v1083_v48 = vld [vmem:[%s7199_s7 + $0x1b50] sm:$0xff]  ;;  %v6189_v49 = vpack.c.bf16 %v1088_v42, %v1084_v41  ;;  %v5167_v55 = vpack.c.bf16 %v1085_v47, %v1081_v46  ;;  %v6209_v47 = vpack.c.bf16 %v1128_v39, %v1124_v38  ;;  %v1148_v11 = vld [vmem:[%s7199_s7 + $0x1d58] sm:$0xff] }
 0x1f7   : > { %6170 = vmatprep.subr.bf16.mxu1 %v6169_v53  ;;  %v1092_v53 = vld [vmem:[%s7199_s7 + $0x1b98] sm:$0xff]  ;;  %v6191_v56 = vpack.c.bf16 %v1087_v50, %v1083_v48  ;;  %v1123_v46 = vld [vmem:[%s7199_s7 + $0x1c90] sm:$0xff]  ;;  %v1134_v50 = vld [vmem:[%s7199_s7 + $0x1ce8] sm:$0xff] }
 0x1f8   : > { %v1127_v48 = vld [vmem:[%s7199_s7 + $0x1cb0] sm:$0xff]  ;;  %v1152_v12 = vld [vmem:[%s7199_s7 + $0x1d78] sm:$0xff] }
 0x1f9   : > { %5148 = vmatpush1.bf16.msra.mxu0 %v5147_v59  ;;  %v1093_v59 = vld [vmem:[%s7199_s7 + $0x1ba0] sm:$0xff]  ;;  %v1156_v23 = vld [vmem:[%s7199_s7 + $0x1d98] sm:$0xff] }
 0x1fa   : > { %6172 = vmatpush1.bf16.msra.mxu1 %v6171_v60  ;;  %5150 = vmatprep.subr.bf16.mxu0 %v5149_v61  ;;  %v1091_v60 = vld [vmem:[%s7199_s7 + $0x1b90] sm:$0xff]  ;;  %v6193_v61 = vpack.c.bf16 %v1096_v54, %v1092_v53  ;;  %v5171_v3 = vpack.c.bf16 %v1093_v59, %v1089_v58  ;;  %v6211_v54 = vpack.c.bf16 %v1127_v48, %v1123_v46  ;;  %v1160_v24 = vld [vmem:[%s7199_s7 + $0x1db8] sm:$0xff]  ;;  %v1174_v46 = vld [vmem:[%s7199_s7 + $0x1e28] sm:$0xff] }
 0x1fb   : > { %6174 = vmatprep.subr.bf16.mxu1 %v6173_v1  ;;  %v1100_v1 = vld [vmem:[%s7199_s7 + $0x1bd8] sm:$0xff]  ;;  %v6195_v4 = vpack.c.bf16 %v1095_v62, %v1091_v60  ;;  %v1131_v58 = vld [vmem:[%s7199_s7 + $0x1cd0] sm:$0xff]  ;;  %v6213_v59 = vpack.c.bf16 %v1136_v52, %v1132_v51  ;;  %v1142_v62 = vld [vmem:[%s7199_s7 + $0x1d28] sm:$0xff] }
 0x1fc   : > { %v1135_v60 = vld [vmem:[%s7199_s7 + $0x1cf0] sm:$0xff]  ;;  %v1176_v48 = vld [vmem:[%s7199_s7 + $0x1e38] sm:$0xff]  ;;  %v1169_v52 = vld [vmem:[%s7199_s7 + $0x1e00] sm:$0xff] }
 0x1fd   : > { %5152 = vmatpush1.bf16.msra.mxu0 %v5151_v7  ;;  %v1101_v7 = vld [vmem:[%s7199_s7 + $0x1be0] sm:$0xff] }
 0x1fe   : > { %6176 = vmatpush1.bf16.msra.mxu1 %v6175_v8  ;;  %5154 = vmatprep.subr.bf16.mxu0 %v5153_v9  ;;  %v1099_v8 = vld [vmem:[%s7199_s7 + $0x1bd0] sm:$0xff]  ;;  %v6197_v9 = vpack.c.bf16 %v1104_v2, %v1100_v1  ;;  %v5175_v15 = vpack.c.bf16 %v1101_v7, %v1097_v6  ;;  %v6215_v2 = vpack.c.bf16 %v1135_v60, %v1131_v58  ;;  %v1182_v58 = vld [vmem:[%s7199_s7 + $0x1e68] sm:$0xff]  ;;  %v1184_v60 = vld [vmem:[%s7199_s7 + $0x1e78] sm:$0xff] }
 0x1ff   : > { %6178 = vmatprep.subr.bf16.mxu1 %v6177_v13  ;;  %v1108_v13 = vld [vmem:[%s7199_s7 + $0x1c18] sm:$0xff]  ;;  %v6199_v16 = vpack.c.bf16 %v1103_v10, %v1099_v8  ;;  %v1139_v6 = vld [vmem:[%s7199_s7 + $0x1d10] sm:$0xff]  ;;  %v6217_v7 = vpack.c.bf16 %v1144_v0, %v1140_v63  ;;  %v1150_v10 = vld [vmem:[%s7199_s7 + $0x1d68] sm:$0xff] }
 0x200   : > { %v1143_v8 = vld [vmem:[%s7199_s7 + $0x1d30] sm:$0xff]  ;;  %v1177_v0 = vld [vmem:[%s7199_s7 + $0x1e40] sm:$0xff] }
 0x201   : > { %5156 = vmatpush1.bf16.msra.mxu0 %v5155_v19  ;;  %v1109_v19 = vld [vmem:[%s7199_s7 + $0x1c20] sm:$0xff] }
 0x202   : > { %6180 = vmatpush1.bf16.msra.mxu1 %v6179_v20  ;;  %5158 = vmatprep.subr.bf16.mxu0 %v5157_v21  ;;  %v1107_v20 = vld [vmem:[%s7199_s7 + $0x1c10] sm:$0xff]  ;;  %v6201_v21 = vpack.c.bf16 %v1112_v14, %v1108_v13  ;;  %v5179_v28 = vpack.c.bf16 %v1109_v19, %v1105_v18  ;;  %v6219_v14 = vpack.c.bf16 %v1143_v8, %v1139_v6  ;;  %v1190_v6 = vld [vmem:[%s7199_s7 + $0x1ea8] sm:$0xff]  ;;  %v1192_v8 = vld [vmem:[%s7199_s7 + $0x1eb8] sm:$0xff] }
 0x203   : > { %6182 = vmatprep.subr.bf16.mxu1 %v6181_v25  ;;  %v1116_v25 = vld [vmem:[%s7199_s7 + $0x1c58] sm:$0xff]  ;;  %v6203_v29 = vpack.c.bf16 %v1111_v22, %v1107_v20  ;;  %v1147_v18 = vld [vmem:[%s7199_s7 + $0x1d50] sm:$0xff]  ;;  %v6221_v19 = vpack.c.bf16 %v1152_v12, %v1148_v11  ;;  %v1158_v22 = vld [vmem:[%s7199_s7 + $0x1da8] sm:$0xff] }
 0x204   : > { %v6205_v34 = vpack.c.bf16 %v1120_v26, %v1116_v25  ;;  %v1151_v20 = vld [vmem:[%s7199_s7 + $0x1d70] sm:$0xff]  ;;  %v1185_v12 = vld [vmem:[%s7199_s7 + $0x1e80] sm:$0xff] }
 0x205   : > { %5160 = vmatpush1.bf16.msra.mxu0 %v5159_v31  ;;  %v1113_v31 = vld [vmem:[%s7199_s7 + $0x1c40] sm:$0xff]  ;;  %v6223_v26 = vpack.c.bf16 %v1151_v20, %v1147_v18  ;;  %v1198_v18 = vld [vmem:[%s7199_s7 + $0x1ee8] sm:$0xff]  ;;  %v1200_v20 = vld [vmem:[%s7199_s7 + $0x1ef8] sm:$0xff] }
 0x206   : > { %6184 = vmatpush1.bf16.msra.mxu1 %v6183_v32  ;;  %5162 = vmatprep.subr.bf16.mxu0 %v5161_v33  ;;  %v1117_v32 = vld [vmem:[%s7199_s7 + $0x1c60] sm:$0xff]  ;;  %v1115_v33 = vld [vmem:[%s7199_s7 + $0x1c50] sm:$0xff] }
 0x207   : > { %6186 = vmatprep.subr.bf16.mxu1 %v6185_v37  ;;  %v1126_v37 = vld [vmem:[%s7199_s7 + $0x1ca8] sm:$0xff]  ;;  %v5183_v41 = vpack.c.bf16 %v1117_v32, %v1113_v31  ;;  %v6207_v42 = vpack.c.bf16 %v1119_v35, %v1115_v33  ;;  %v6225_v31 = vpack.c.bf16 %v1160_v24, %v1156_v23  ;;  %v1159_v32 = vld [vmem:[%s7199_s7 + $0x1db0] sm:$0xff]  ;;  %v1164_v35 = vld [vmem:[%s7199_s7 + $0x1dd8] sm:$0xff] }
 0x208   : > { %v1162_v33 = vld [vmem:[%s7199_s7 + $0x1dc8] sm:$0xff]  ;;  %v1193_v24 = vld [vmem:[%s7199_s7 + $0x1ec0] sm:$0xff] }
 0x209   : > { %5164 = vmatpush1.bf16.msra.mxu0 %v5163_v43  ;;  %v5185_v43 = vpack.c.bf16 %v1126_v37, %v1122_v36  ;;  %v1168_v36 = vld [vmem:[%s7199_s7 + $0x1df8] sm:$0xff] }
 0x20a   : > { %6188 = vmatpush1.bf16.msra.mxu1 %v6187_v44  ;;  %5166 = vmatprep.subr.bf16.mxu0 %v5165_v45  ;;  %v1121_v44 = vld [vmem:[%s7199_s7 + $0x1c80] sm:$0xff] }
 0x20b   : > { %6190 = vmatprep.subr.bf16.mxu1 %v6189_v49  ;;  %v1125_v45 = vld [vmem:[%s7199_s7 + $0x1ca0] sm:$0xff]  ;;  %v1130_v49 = vld [vmem:[%s7199_s7 + $0x1cc8] sm:$0xff] }
 0x20c   : > { %v5187_v53 = vpack.c.bf16 %v1125_v45, %v1121_v44  ;;  %v1167_v44 = vld [vmem:[%s7199_s7 + $0x1df0] sm:$0xff]  ;;  %v1170_v45 = vld [vmem:[%s7199_s7 + $0x1e08] sm:$0xff] }
 0x20d   : > { %5168 = vmatpush1.bf16.msra.mxu0 %v5167_v55  ;;  %v5189_v55 = vpack.c.bf16 %v1134_v50, %v1130_v49  ;;  %v5209_v51 = vpack.c.bf16 %v1174_v46, %v1170_v45 }
 0x20e   : > { %6192 = vmatpush1.bf16.msra.mxu1 %v6191_v56  ;;  %5170 = vmatprep.subr.bf16.mxu0 %v5169_v57  ;;  %v1129_v56 = vld [vmem:[%s7199_s7 + $0x1cc0] sm:$0xff] }
 0x20f   : > { %6194 = vmatprep.subr.bf16.mxu1 %v6193_v61  ;;  %v1133_v57 = vld [vmem:[%s7199_s7 + $0x1ce0] sm:$0xff]  ;;  %v1138_v61 = vld [vmem:[%s7199_s7 + $0x1d08] sm:$0xff] }
 0x210   : > { %v5191_v1 = vpack.c.bf16 %v1133_v57, %v1129_v56  ;;  %v1175_v56 = vld [vmem:[%s7199_s7 + $0x1e30] sm:$0xff]  ;;  %v1178_v57 = vld [vmem:[%s7199_s7 + $0x1e48] sm:$0xff] }
 0x211   : > { %5172 = vmatpush1.bf16.msra.mxu0 %v5171_v3  ;;  %v5193_v3 = vpack.c.bf16 %v1142_v62, %v1138_v61  ;;  %v5213_v63 = vpack.c.bf16 %v1182_v58, %v1178_v57 }
 0x212   : > { %6196 = vmatpush1.bf16.msra.mxu1 %v6195_v4  ;;  %5174 = vmatprep.subr.bf16.mxu0 %v5173_v5  ;;  %v1137_v4 = vld [vmem:[%s7199_s7 + $0x1d00] sm:$0xff] }
 0x213   : > { %6198 = vmatprep.subr.bf16.mxu1 %v6197_v9  ;;  %v1141_v5 = vld [vmem:[%s7199_s7 + $0x1d20] sm:$0xff]  ;;  %v1146_v9 = vld [vmem:[%s7199_s7 + $0x1d48] sm:$0xff] }
 0x214   : > { %v5195_v13 = vpack.c.bf16 %v1141_v5, %v1137_v4  ;;  %v1183_v4 = vld [vmem:[%s7199_s7 + $0x1e70] sm:$0xff]  ;;  %v1186_v5 = vld [vmem:[%s7199_s7 + $0x1e88] sm:$0xff] }
 0x215   : > { %5176 = vmatpush1.bf16.msra.mxu0 %v5175_v15  ;;  %v5197_v15 = vpack.c.bf16 %v1150_v10, %v1146_v9  ;;  %v5217_v11 = vpack.c.bf16 %v1190_v6, %v1186_v5 }
 0x216   : > { %6200 = vmatpush1.bf16.msra.mxu1 %v6199_v16  ;;  %5178 = vmatprep.subr.bf16.mxu0 %v5177_v17  ;;  %v1145_v16 = vld [vmem:[%s7199_s7 + $0x1d40] sm:$0xff] }
 0x217   : > { %6202 = vmatprep.subr.bf16.mxu1 %v6201_v21  ;;  %v1149_v17 = vld [vmem:[%s7199_s7 + $0x1d60] sm:$0xff]  ;;  %v1154_v21 = vld [vmem:[%s7199_s7 + $0x1d88] sm:$0xff] }
 0x218   : > { %2748 = vmatmul.mubr.f32.vlgmr.msra.gmra.mrb[0].mxu0 %v189_v27  ;;  %v5199_v25 = vpack.c.bf16 %v1149_v17, %v1145_v16  ;;  %v1191_v16 = vld [vmem:[%s7199_s7 + $0x1eb0] sm:$0xff]  ;;  %v1194_v17 = vld [vmem:[%s7199_s7 + $0x1ec8] sm:$0xff] }
 0x219   : > { %5180 = vmatpush1.bf16.msra.mxu0 %v5179_v28  ;;  %3884 = vmatmul.mubr.f32.vlgmr.msra.gmra.mrb[0].mxu1 %v189_v27  ;;  %v5201_v27 = vpack.c.bf16 %v1158_v22, %v1154_v21  ;;  %v1153_v28 = vld [vmem:[%s7199_s7 + $0x1d80] sm:$0xff]  ;;  %v5221_v23 = vpack.c.bf16 %v1198_v18, %v1194_v17 }
 0x21a   : > { %6204 = vmatpush1.bf16.msra.mxu1 %v6203_v29  ;;  %5182 = vmatprep.subr.bf16.mxu0 %v5181_v30  ;;  %v1157_v29 = vld [vmem:[%s7199_s7 + $0x1da0] sm:$0xff]  ;;  %v1155_v30 = vld [vmem:[%s7199_s7 + $0x1d90] sm:$0xff] }
 0x21b   : > { %6206 = vmatprep.subr.bf16.mxu1 %v6205_v34  ;;  %2818 = vmatprep.mubr.f32.mxu0 %v192_v40  ;;  %v1166_v34 = vld [vmem:[%s7199_s7 + $0x1de8] sm:$0xff]  ;;  %v5203_v37 = vpack.c.bf16 %v1157_v29, %v1153_v28  ;;  %v6227_v38 = vpack.c.bf16 %v1159_v32, %v1155_v30  ;;  %v1199_v28 = vld [vmem:[%s7199_s7 + $0x1ef0] sm:$0xff]  ;;  %v1208_v32 = vld [vmem:[%s7199_s7 + $0x1f38] sm:$0xff] }
 0x21c   : > { %3954 = vmatprep.mubr.f32.mxu1 %v192_v40  ;;  %v5205_v39 = vpack.c.bf16 %v1166_v34, %v1162_v33  ;;  %v1161_v40 = vld [vmem:[%s7199_s7 + $0x1dc0] sm:$0xff]  ;;  %v1202_v29 = vld [vmem:[%s7199_s7 + $0x1f08] sm:$0xff] }
 0x21d   : > { %5184 = vmatpush1.bf16.msra.mxu0 %v5183_v41  ;;  %v1165_v41 = vld [vmem:[%s7199_s7 + $0x1de0] sm:$0xff]  ;;  %v1206_v30 = vld [vmem:[%s7199_s7 + $0x1f28] sm:$0xff] }
 0x21e   : > { %6208 = vmatpush1.bf16.msra.mxu1 %v6207_v42  ;;  %5186 = vmatprep.subr.bf16.mxu0 %v5185_v43  ;;  %v1163_v42 = vld [vmem:[%s7199_s7 + $0x1dd0] sm:$0xff]  ;;  %v6229_v43 = vpack.c.bf16 %v1168_v36, %v1164_v35  ;;  %v5207_v49 = vpack.c.bf16 %v1165_v41, %v1161_v40  ;;  %v5225_v35 = vpack.c.bf16 %v1206_v30, %v1202_v29  ;;  %v1201_v36 = vld [vmem:[%s7199_s7 + $0x1f00] sm:$0xff]  ;;  %v1210_v41 = vld [vmem:[%s7199_s7 + $0x1f48] sm:$0xff] }
 0x21f   : > { %6210 = vmatprep.subr.bf16.mxu1 %v6209_v47  ;;  %v1172_v47 = vld [vmem:[%s7199_s7 + $0x1e18] sm:$0xff]  ;;  %v6231_v50 = vpack.c.bf16 %v1167_v44, %v1163_v42  ;;  %v1207_v40 = vld [vmem:[%s7199_s7 + $0x1f30] sm:$0xff]  ;;  %v1214_v42 = vld [vmem:[%s7199_s7 + $0x1f68] sm:$0xff] }
 0x220   : > { %v1216_v44 = vld [vmem:[%s7199_s7 + $0x1f78] sm:$0xff]  ;;  %v191_v29 = vld [vmem:[#allocation2 + $0x70] sm:$0xff] }
 0x221   : > { %5188 = vmatpush1.bf16.msra.mxu0 %v5187_v53  ;;  %v1173_v53 = vld [vmem:[%s7199_s7 + $0x1e20] sm:$0xff] }
 0x222   : > { %6212 = vmatpush1.bf16.msra.mxu1 %v6211_v54  ;;  %5190 = vmatprep.subr.bf16.mxu0 %v5189_v55  ;;  %v1171_v54 = vld [vmem:[%s7199_s7 + $0x1e10] sm:$0xff]  ;;  %v6233_v55 = vpack.c.bf16 %v1176_v48, %v1172_v47  ;;  %v5211_v61 = vpack.c.bf16 %v1173_v53, %v1169_v52  ;;  %v5229_v47 = vpack.c.bf16 %v1214_v42, %v1210_v41  ;;  %v1209_v48 = vld [vmem:[%s7199_s7 + $0x1f40] sm:$0xff]  ;;  %v1218_v53 = vld [vmem:[%s7199_s7 + $0x1f88] sm:$0xff] }
 0x223   : > { %6214 = vmatprep.subr.bf16.mxu1 %v6213_v59  ;;  %v1180_v59 = vld [vmem:[%s7199_s7 + $0x1e58] sm:$0xff]  ;;  %v6235_v62 = vpack.c.bf16 %v1175_v56, %v1171_v54  ;;  %v1215_v52 = vld [vmem:[%s7199_s7 + $0x1f70] sm:$0xff]  ;;  %v1222_v54 = vld [vmem:[%s7199_s7 + $0x1fa8] sm:$0xff] }
 0x224   : > { %v1224_v56 = vld [vmem:[%s7199_s7 + $0x1fb8] sm:$0xff]  ;;  %v194_v42 = vld [vmem:[#allocation2 + $0x88] sm:$0xff] }
 0x225   : > { %5192 = vmatpush1.bf16.msra.mxu0 %v5191_v1  ;;  %v1181_v1 = vld [vmem:[%s7199_s7 + $0x1e60] sm:$0xff]  ;;  %v1256_v41 = vld [vmem:[%s7199_s7 + $0x20b8] sm:$0xff] }
 0x226   : > { %6216 = vmatpush1.bf16.msra.mxu1 %v6215_v2  ;;  %5194 = vmatprep.subr.bf16.mxu0 %v5193_v3  ;;  %v1179_v2 = vld [vmem:[%s7199_s7 + $0x1e50] sm:$0xff]  ;;  %v6237_v3 = vpack.c.bf16 %v1184_v60, %v1180_v59  ;;  %v5215_v9 = vpack.c.bf16 %v1181_v1, %v1177_v0  ;;  %v5233_v59 = vpack.c.bf16 %v1222_v54, %v1218_v53  ;;  %v1217_v60 = vld [vmem:[%s7199_s7 + $0x1f80] sm:$0xff]  ;;  %v1226_v1 = vld [vmem:[%s7199_s7 + $0x1fc8] sm:$0xff] }
 0x227   : > { %6218 = vmatprep.subr.bf16.mxu1 %v6217_v7  ;;  %v1188_v7 = vld [vmem:[%s7199_s7 + $0x1e98] sm:$0xff]  ;;  %v6239_v10 = vpack.c.bf16 %v1183_v4, %v1179_v2  ;;  %v1223_v0 = vld [vmem:[%s7199_s7 + $0x1fb0] sm:$0xff]  ;;  %v1230_v2 = vld [vmem:[%s7199_s7 + $0x1fe8] sm:$0xff] }
 0x228   : > { %v1232_v4 = vld [vmem:[%s7199_s7 + $0x1ff8] sm:$0xff] }
 0x229   : > { %5196 = vmatpush1.bf16.msra.mxu0 %v5195_v13  ;;  %v1189_v13 = vld [vmem:[%s7199_s7 + $0x1ea0] sm:$0xff]  ;;  %v1260_v53 = vld [vmem:[%s7199_s7 + $0x20d8] sm:$0xff] }
 0x22a   : > { %6220 = vmatpush1.bf16.msra.mxu1 %v6219_v14  ;;  %5198 = vmatprep.subr.bf16.mxu0 %v5197_v15  ;;  %v1187_v14 = vld [vmem:[%s7199_s7 + $0x1e90] sm:$0xff]  ;;  %v6241_v15 = vpack.c.bf16 %v1192_v8, %v1188_v7  ;;  %v5219_v21 = vpack.c.bf16 %v1189_v13, %v1185_v12  ;;  %v5237_v7 = vpack.c.bf16 %v1230_v2, %v1226_v1  ;;  %v1225_v8 = vld [vmem:[%s7199_s7 + $0x1fc0] sm:$0xff]  ;;  %v1234_v13 = vld [vmem:[%s7199_s7 + $0x2008] sm:$0xff] }
 0x22b   : > { %6222 = vmatprep.subr.bf16.mxu1 %v6221_v19  ;;  %v1196_v19 = vld [vmem:[%s7199_s7 + $0x1ed8] sm:$0xff]  ;;  %v6243_v22 = vpack.c.bf16 %v1191_v16, %v1187_v14  ;;  %v1231_v12 = vld [vmem:[%s7199_s7 + $0x1ff0] sm:$0xff]  ;;  %v1238_v14 = vld [vmem:[%s7199_s7 + $0x2028] sm:$0xff] }
 0x22c   : > { %v1240_v16 = vld [vmem:[%s7199_s7 + $0x2038] sm:$0xff] }
 0x22d   : > { %5200 = vmatpush1.bf16.msra.mxu0 %v5199_v25  ;;  %v1197_v25 = vld [vmem:[%s7199_s7 + $0x1ee0] sm:$0xff]  ;;  %v1264_v54 = vld [vmem:[%s7199_s7 + $0x20f8] sm:$0xff] }
 0x22e   : > { %6224 = vmatpush1.bf16.msra.mxu1 %v6223_v26  ;;  %5202 = vmatprep.subr.bf16.mxu0 %v5201_v27  ;;  %v1195_v26 = vld [vmem:[%s7199_s7 + $0x1ed0] sm:$0xff]  ;;  %v6245_v27 = vpack.c.bf16 %v1200_v20, %v1196_v19  ;;  %v5223_v33 = vpack.c.bf16 %v1197_v25, %v1193_v24  ;;  %v5241_v19 = vpack.c.bf16 %v1238_v14, %v1234_v13  ;;  %v1233_v20 = vld [vmem:[%s7199_s7 + $0x2000] sm:$0xff]  ;;  %v1242_v25 = vld [vmem:[%s7199_s7 + $0x2048] sm:$0xff] }
 0x22f   : > { %6226 = vmatprep.subr.bf16.mxu1 %v6225_v31  ;;  %v1204_v31 = vld [vmem:[%s7199_s7 + $0x1f18] sm:$0xff]  ;;  %v6247_v34 = vpack.c.bf16 %v1199_v28, %v1195_v26  ;;  %v1239_v24 = vld [vmem:[%s7199_s7 + $0x2030] sm:$0xff]  ;;  %v1246_v26 = vld [vmem:[%s7199_s7 + $0x2068] sm:$0xff] }
 0x230   : > { %v1248_v28 = vld [vmem:[%s7199_s7 + $0x2078] sm:$0xff] }
 0x231   : > { %5204 = vmatpush1.bf16.msra.mxu0 %v5203_v37  ;;  %v1205_v37 = vld [vmem:[%s7199_s7 + $0x1f20] sm:$0xff]  ;;  %v1268_v1 = vld [vmem:[%s7199_s7 + $0x2118] sm:$0xff] }
 0x232   : > { %6228 = vmatpush1.bf16.msra.mxu1 %v6227_v38  ;;  %5206 = vmatprep.subr.bf16.mxu0 %v5205_v39  ;;  %v1203_v38 = vld [vmem:[%s7199_s7 + $0x1f10] sm:$0xff]  ;;  %v6249_v39 = vpack.c.bf16 %v1208_v32, %v1204_v31  ;;  %v5227_v45 = vpack.c.bf16 %v1205_v37, %v1201_v36  ;;  %v5245_v32 = vpack.c.bf16 %v1246_v26, %v1242_v25  ;;  %v1272_v2 = vld [vmem:[%s7199_s7 + $0x2138] sm:$0xff] }
 0x233   : > { %6230 = vmatprep.subr.bf16.mxu1 %v6229_v43  ;;  %v1212_v43 = vld [vmem:[%s7199_s7 + $0x1f58] sm:$0xff]  ;;  %v6251_v46 = vpack.c.bf16 %v1207_v40, %v1203_v38  ;;  %v1247_v37 = vld [vmem:[%s7199_s7 + $0x2070] sm:$0xff]  ;;  %v1250_v38 = vld [vmem:[%s7199_s7 + $0x2088] sm:$0xff] }
 0x234   : > { %v1252_v40 = vld [vmem:[%s7199_s7 + $0x2098] sm:$0xff] }
 0x235   : > { %5208 = vmatpush1.bf16.msra.mxu0 %v5207_v49  ;;  %v1213_v49 = vld [vmem:[%s7199_s7 + $0x1f60] sm:$0xff]  ;;  %v1276_v13 = vld [vmem:[%s7199_s7 + $0x2158] sm:$0xff] }
 0x236   : > { %6232 = vmatpush1.bf16.msra.mxu1 %v6231_v50  ;;  %5210 = vmatprep.subr.bf16.mxu0 %v5209_v51  ;;  %v1211_v50 = vld [vmem:[%s7199_s7 + $0x1f50] sm:$0xff]  ;;  %v6253_v51 = vpack.c.bf16 %v1216_v44, %v1212_v43  ;;  %v5231_v57 = vpack.c.bf16 %v1213_v49, %v1209_v48  ;;  %v6273_v49 = vpack.c.bf16 %v1256_v41, %v1252_v40  ;;  %v1280_v14 = vld [vmem:[%s7199_s7 + $0x2178] sm:$0xff] }
 0x237   : > { %6234 = vmatprep.subr.bf16.mxu1 %v6233_v55  ;;  %v1220_v55 = vld [vmem:[%s7199_s7 + $0x1f98] sm:$0xff]  ;;  %v6255_v58 = vpack.c.bf16 %v1215_v52, %v1211_v50  ;;  %v1251_v48 = vld [vmem:[%s7199_s7 + $0x2090] sm:$0xff]  ;;  %v1262_v52 = vld [vmem:[%s7199_s7 + $0x20e8] sm:$0xff] }
 0x238   : > { %v1255_v50 = vld [vmem:[%s7199_s7 + $0x20b0] sm:$0xff]  ;;  %v1284_v25 = vld [vmem:[%s7199_s7 + $0x2198] sm:$0xff] }
 0x239   : > { %5212 = vmatpush1.bf16.msra.mxu0 %v5211_v61  ;;  %v1221_v61 = vld [vmem:[%s7199_s7 + $0x1fa0] sm:$0xff]  ;;  %v1288_v26 = vld [vmem:[%s7199_s7 + $0x21b8] sm:$0xff] }
 0x23a   : > { %6236 = vmatpush1.bf16.msra.mxu1 %v6235_v62  ;;  %5214 = vmatprep.subr.bf16.mxu0 %v5213_v63  ;;  %v1219_v62 = vld [vmem:[%s7199_s7 + $0x1f90] sm:$0xff]  ;;  %v6257_v63 = vpack.c.bf16 %v1224_v56, %v1220_v55  ;;  %v5235_v5 = vpack.c.bf16 %v1221_v61, %v1217_v60  ;;  %v6275_v56 = vpack.c.bf16 %v1255_v50, %v1251_v48  ;;  %v1302_v48 = vld [vmem:[%s7199_s7 + $0x2228] sm:$0xff]  ;;  %v1304_v50 = vld [vmem:[%s7199_s7 + $0x2238] sm:$0xff] }
 0x23b   : > { %6238 = vmatprep.subr.bf16.mxu1 %v6237_v3  ;;  %v1228_v3 = vld [vmem:[%s7199_s7 + $0x1fd8] sm:$0xff]  ;;  %v6259_v6 = vpack.c.bf16 %v1223_v0, %v1219_v62  ;;  %v1259_v60 = vld [vmem:[%s7199_s7 + $0x20d0] sm:$0xff]  ;;  %v6277_v61 = vpack.c.bf16 %v1264_v54, %v1260_v53  ;;  %v1270_v0 = vld [vmem:[%s7199_s7 + $0x2128] sm:$0xff] }
 0x23c   : > { %v1263_v62 = vld [vmem:[%s7199_s7 + $0x20f0] sm:$0xff]  ;;  %v1297_v54 = vld [vmem:[%s7199_s7 + $0x2200] sm:$0xff] }
 0x23d   : > { %5216 = vmatpush1.bf16.msra.mxu0 %v5215_v9  ;;  %v1229_v9 = vld [vmem:[%s7199_s7 + $0x1fe0] sm:$0xff] }
 0x23e   : > { %6240 = vmatpush1.bf16.msra.mxu1 %v6239_v10  ;;  %5218 = vmatprep.subr.bf16.mxu0 %v5217_v11  ;;  %v1227_v10 = vld [vmem:[%s7199_s7 + $0x1fd0] sm:$0xff]  ;;  %v6261_v11 = vpack.c.bf16 %v1232_v4, %v1228_v3  ;;  %v5239_v17 = vpack.c.bf16 %v1229_v9, %v1225_v8  ;;  %v6279_v4 = vpack.c.bf16 %v1263_v62, %v1259_v60  ;;  %v1310_v60 = vld [vmem:[%s7199_s7 + $0x2268] sm:$0xff]  ;;  %v1312_v62 = vld [vmem:[%s7199_s7 + $0x2278] sm:$0xff] }
 0x23f   : > { %6242 = vmatprep.subr.bf16.mxu1 %v6241_v15  ;;  %v1236_v15 = vld [vmem:[%s7199_s7 + $0x2018] sm:$0xff]  ;;  %v6263_v18 = vpack.c.bf16 %v1231_v12, %v1227_v10  ;;  %v1267_v8 = vld [vmem:[%s7199_s7 + $0x2110] sm:$0xff]  ;;  %v6281_v9 = vpack.c.bf16 %v1272_v2, %v1268_v1  ;;  %v1278_v12 = vld [vmem:[%s7199_s7 + $0x2168] sm:$0xff] }
 0x240   : > { %v1271_v10 = vld [vmem:[%s7199_s7 + $0x2130] sm:$0xff]  ;;  %v1305_v2 = vld [vmem:[%s7199_s7 + $0x2240] sm:$0xff] }
 0x241   : > { %5220 = vmatpush1.bf16.msra.mxu0 %v5219_v21  ;;  %v1237_v21 = vld [vmem:[%s7199_s7 + $0x2020] sm:$0xff] }
 0x242   : > { %6244 = vmatpush1.bf16.msra.mxu1 %v6243_v22  ;;  %5222 = vmatprep.subr.bf16.mxu0 %v5221_v23  ;;  %v1235_v22 = vld [vmem:[%s7199_s7 + $0x2010] sm:$0xff]  ;;  %v6265_v23 = vpack.c.bf16 %v1240_v16, %v1236_v15  ;;  %v5243_v30 = vpack.c.bf16 %v1237_v21, %v1233_v20  ;;  %v6283_v16 = vpack.c.bf16 %v1271_v10, %v1267_v8  ;;  %v1318_v8 = vld [vmem:[%s7199_s7 + $0x22a8] sm:$0xff]  ;;  %v1320_v10 = vld [vmem:[%s7199_s7 + $0x22b8] sm:$0xff] }
 0x243   : > { %6246 = vmatprep.subr.bf16.mxu1 %v6245_v27  ;;  %v1244_v27 = vld [vmem:[%s7199_s7 + $0x2058] sm:$0xff]  ;;  %v6267_v31 = vpack.c.bf16 %v1239_v24, %v1235_v22  ;;  %v1275_v20 = vld [vmem:[%s7199_s7 + $0x2150] sm:$0xff]  ;;  %v6285_v21 = vpack.c.bf16 %v1280_v14, %v1276_v13  ;;  %v1286_v24 = vld [vmem:[%s7199_s7 + $0x21a8] sm:$0xff] }
 0x244   : > { %v6269_v36 = vpack.c.bf16 %v1248_v28, %v1244_v27  ;;  %v1279_v22 = vld [vmem:[%s7199_s7 + $0x2170] sm:$0xff]  ;;  %v1313_v14 = vld [vmem:[%s7199_s7 + $0x2280] sm:$0xff] }
 0x245   : > { %5224 = vmatpush1.bf16.msra.mxu0 %v5223_v33  ;;  %v1241_v33 = vld [vmem:[%s7199_s7 + $0x2040] sm:$0xff]  ;;  %v6287_v28 = vpack.c.bf16 %v1279_v22, %v1275_v20  ;;  %v1326_v20 = vld [vmem:[%s7199_s7 + $0x22e8] sm:$0xff]  ;;  %v1328_v22 = vld [vmem:[%s7199_s7 + $0x22f8] sm:$0xff] }
 0x246   : > { %6248 = vmatpush1.bf16.msra.mxu1 %v6247_v34  ;;  %5226 = vmatprep.subr.bf16.mxu0 %v5225_v35  ;;  %v1245_v34 = vld [vmem:[%s7199_s7 + $0x2060] sm:$0xff]  ;;  %v1243_v35 = vld [vmem:[%s7199_s7 + $0x2050] sm:$0xff] }
 0x247   : > { %6250 = vmatprep.subr.bf16.mxu1 %v6249_v39  ;;  %v1254_v39 = vld [vmem:[%s7199_s7 + $0x20a8] sm:$0xff]  ;;  %v5247_v43 = vpack.c.bf16 %v1245_v34, %v1241_v33  ;;  %v6271_v44 = vpack.c.bf16 %v1247_v37, %v1243_v35  ;;  %v6289_v33 = vpack.c.bf16 %v1288_v26, %v1284_v25  ;;  %v1287_v34 = vld [vmem:[%s7199_s7 + $0x21b0] sm:$0xff]  ;;  %v1292_v37 = vld [vmem:[%s7199_s7 + $0x21d8] sm:$0xff] }
 0x248   : > { %v1290_v35 = vld [vmem:[%s7199_s7 + $0x21c8] sm:$0xff]  ;;  %v1321_v26 = vld [vmem:[%s7199_s7 + $0x22c0] sm:$0xff] }
 0x249   : > { %5228 = vmatpush1.bf16.msra.mxu0 %v5227_v45  ;;  %v5249_v45 = vpack.c.bf16 %v1254_v39, %v1250_v38  ;;  %v1296_v38 = vld [vmem:[%s7199_s7 + $0x21f8] sm:$0xff] }
 0x24a   : > { %6252 = vmatpush1.bf16.msra.mxu1 %v6251_v46  ;;  %5230 = vmatprep.subr.bf16.mxu0 %v5229_v47  ;;  %v1249_v46 = vld [vmem:[%s7199_s7 + $0x2080] sm:$0xff] }
 0x24b   : > { %6254 = vmatprep.subr.bf16.mxu1 %v6253_v51  ;;  %v1253_v47 = vld [vmem:[%s7199_s7 + $0x20a0] sm:$0xff]  ;;  %v1258_v51 = vld [vmem:[%s7199_s7 + $0x20c8] sm:$0xff] }
 0x24c   : > { %v5251_v55 = vpack.c.bf16 %v1253_v47, %v1249_v46  ;;  %v1295_v46 = vld [vmem:[%s7199_s7 + $0x21f0] sm:$0xff]  ;;  %v1298_v47 = vld [vmem:[%s7199_s7 + $0x2208] sm:$0xff] }
 0x24d   : > { %5232 = vmatpush1.bf16.msra.mxu0 %v5231_v57  ;;  %v5253_v57 = vpack.c.bf16 %v1262_v52, %v1258_v51  ;;  %v5273_v53 = vpack.c.bf16 %v1302_v48, %v1298_v47 }
 0x24e   : > { %6256 = vmatpush1.bf16.msra.mxu1 %v6255_v58  ;;  %5234 = vmatprep.subr.bf16.mxu0 %v5233_v59  ;;  %v1257_v58 = vld [vmem:[%s7199_s7 + $0x20c0] sm:$0xff] }
 0x24f   : > { %6258 = vmatprep.subr.bf16.mxu1 %v6257_v63  ;;  %v1261_v59 = vld [vmem:[%s7199_s7 + $0x20e0] sm:$0xff]  ;;  %v1266_v63 = vld [vmem:[%s7199_s7 + $0x2108] sm:$0xff] }
 0x250   : > { %v5255_v3 = vpack.c.bf16 %v1261_v59, %v1257_v58  ;;  %v1303_v58 = vld [vmem:[%s7199_s7 + $0x2230] sm:$0xff]  ;;  %v1306_v59 = vld [vmem:[%s7199_s7 + $0x2248] sm:$0xff] }
 0x251   : > { %5236 = vmatpush1.bf16.msra.mxu0 %v5235_v5  ;;  %v5257_v5 = vpack.c.bf16 %v1270_v0, %v1266_v63  ;;  %v5277_v1 = vpack.c.bf16 %v1310_v60, %v1306_v59 }
 0x252   : > { %6260 = vmatpush1.bf16.msra.mxu1 %v6259_v6  ;;  %5238 = vmatprep.subr.bf16.mxu0 %v5237_v7  ;;  %v1265_v6 = vld [vmem:[%s7199_s7 + $0x2100] sm:$0xff] }
 0x253   : > { %6262 = vmatprep.subr.bf16.mxu1 %v6261_v11  ;;  %v1269_v7 = vld [vmem:[%s7199_s7 + $0x2120] sm:$0xff]  ;;  %v1274_v11 = vld [vmem:[%s7199_s7 + $0x2148] sm:$0xff] }
 0x254   : > { %v5259_v15 = vpack.c.bf16 %v1269_v7, %v1265_v6  ;;  %v1311_v6 = vld [vmem:[%s7199_s7 + $0x2270] sm:$0xff]  ;;  %v1314_v7 = vld [vmem:[%s7199_s7 + $0x2288] sm:$0xff] }
 0x255   : > { %5240 = vmatpush1.bf16.msra.mxu0 %v5239_v17  ;;  %v5261_v17 = vpack.c.bf16 %v1278_v12, %v1274_v11  ;;  %v5281_v13 = vpack.c.bf16 %v1318_v8, %v1314_v7 }
 0x256   : > { %6264 = vmatpush1.bf16.msra.mxu1 %v6263_v18  ;;  %5242 = vmatprep.subr.bf16.mxu0 %v5241_v19  ;;  %v1273_v18 = vld [vmem:[%s7199_s7 + $0x2140] sm:$0xff] }
 0x257   : > { %6266 = vmatprep.subr.bf16.mxu1 %v6265_v23  ;;  %v1277_v19 = vld [vmem:[%s7199_s7 + $0x2160] sm:$0xff]  ;;  %v1282_v23 = vld [vmem:[%s7199_s7 + $0x2188] sm:$0xff] }
 0x258   : > { %2819 = vmatmul.mubr.f32.vlgmr.msra.gmra.mrb[0].mxu0 %v191_v29  ;;  %v5263_v27 = vpack.c.bf16 %v1277_v19, %v1273_v18  ;;  %v1319_v18 = vld [vmem:[%s7199_s7 + $0x22b0] sm:$0xff]  ;;  %v1322_v19 = vld [vmem:[%s7199_s7 + $0x22c8] sm:$0xff] }
 0x259   : > { %5244 = vmatpush1.bf16.msra.mxu0 %v5243_v30  ;;  %3955 = vmatmul.mubr.f32.vlgmr.msra.gmra.mrb[0].mxu1 %v191_v29  ;;  %v5265_v29 = vpack.c.bf16 %v1286_v24, %v1282_v23  ;;  %v1281_v30 = vld [vmem:[%s7199_s7 + $0x2180] sm:$0xff]  ;;  %v5285_v25 = vpack.c.bf16 %v1326_v20, %v1322_v19 }
 0x25a   : > { %6268 = vmatpush1.bf16.msra.mxu1 %v6267_v31  ;;  %5246 = vmatprep.subr.bf16.mxu0 %v5245_v32  ;;  %v1285_v31 = vld [vmem:[%s7199_s7 + $0x21a0] sm:$0xff]  ;;  %v1283_v32 = vld [vmem:[%s7199_s7 + $0x2190] sm:$0xff] }
 0x25b   : > { %6270 = vmatprep.subr.bf16.mxu1 %v6269_v36  ;;  %2889 = vmatprep.mubr.f32.mxu0 %v194_v42  ;;  %v1294_v36 = vld [vmem:[%s7199_s7 + $0x21e8] sm:$0xff]  ;;  %v5267_v39 = vpack.c.bf16 %v1285_v31, %v1281_v30  ;;  %v6291_v40 = vpack.c.bf16 %v1287_v34, %v1283_v32  ;;  %v1327_v30 = vld [vmem:[%s7199_s7 + $0x22f0] sm:$0xff]  ;;  %v1336_v34 = vld [vmem:[%s7199_s7 + $0x2338] sm:$0xff] }
 0x25c   : > { %4025 = vmatprep.mubr.f32.mxu1 %v194_v42  ;;  %v5269_v41 = vpack.c.bf16 %v1294_v36, %v1290_v35  ;;  %v1289_v42 = vld [vmem:[%s7199_s7 + $0x21c0] sm:$0xff]  ;;  %v1330_v31 = vld [vmem:[%s7199_s7 + $0x2308] sm:$0xff] }
 0x25d   : > { %5248 = vmatpush1.bf16.msra.mxu0 %v5247_v43  ;;  %v1293_v43 = vld [vmem:[%s7199_s7 + $0x21e0] sm:$0xff]  ;;  %v1334_v32 = vld [vmem:[%s7199_s7 + $0x2328] sm:$0xff] }
 0x25e   : > { %6272 = vmatpush1.bf16.msra.mxu1 %v6271_v44  ;;  %5250 = vmatprep.subr.bf16.mxu0 %v5249_v45  ;;  %v1291_v44 = vld [vmem:[%s7199_s7 + $0x21d0] sm:$0xff]  ;;  %v6293_v45 = vpack.c.bf16 %v1296_v38, %v1292_v37  ;;  %v5271_v51 = vpack.c.bf16 %v1293_v43, %v1289_v42  ;;  %v5289_v37 = vpack.c.bf16 %v1334_v32, %v1330_v31  ;;  %v1329_v38 = vld [vmem:[%s7199_s7 + $0x2300] sm:$0xff]  ;;  %v1338_v43 = vld [vmem:[%s7199_s7 + $0x2348] sm:$0xff] }
 0x25f   : > { %6274 = vmatprep.subr.bf16.mxu1 %v6273_v49  ;;  %v1300_v49 = vld [vmem:[%s7199_s7 + $0x2218] sm:$0xff]  ;;  %v6295_v52 = vpack.c.bf16 %v1295_v46, %v1291_v44  ;;  %v1335_v42 = vld [vmem:[%s7199_s7 + $0x2330] sm:$0xff]  ;;  %v1342_v44 = vld [vmem:[%s7199_s7 + $0x2368] sm:$0xff] }
 0x260   : > { %v1344_v46 = vld [vmem:[%s7199_s7 + $0x2378] sm:$0xff]  ;;  %v193_v31 = vld [vmem:[#allocation2 + $0x80] sm:$0xff] }
 0x261   : > { %5252 = vmatpush1.bf16.msra.mxu0 %v5251_v55  ;;  %v1301_v55 = vld [vmem:[%s7199_s7 + $0x2220] sm:$0xff] }
 0x262   : > { %6276 = vmatpush1.bf16.msra.mxu1 %v6275_v56  ;;  %5254 = vmatprep.subr.bf16.mxu0 %v5253_v57  ;;  %v1299_v56 = vld [vmem:[%s7199_s7 + $0x2210] sm:$0xff]  ;;  %v6297_v57 = vpack.c.bf16 %v1304_v50, %v1300_v49  ;;  %v5275_v63 = vpack.c.bf16 %v1301_v55, %v1297_v54  ;;  %v5293_v49 = vpack.c.bf16 %v1342_v44, %v1338_v43  ;;  %v1337_v50 = vld [vmem:[%s7199_s7 + $0x2340] sm:$0xff]  ;;  %v1346_v55 = vld [vmem:[%s7199_s7 + $0x2388] sm:$0xff] }
 0x263   : > { %6278 = vmatprep.subr.bf16.mxu1 %v6277_v61  ;;  %v1308_v61 = vld [vmem:[%s7199_s7 + $0x2258] sm:$0xff]  ;;  %v6299_v0 = vpack.c.bf16 %v1303_v58, %v1299_v56  ;;  %v1343_v54 = vld [vmem:[%s7199_s7 + $0x2370] sm:$0xff]  ;;  %v1350_v56 = vld [vmem:[%s7199_s7 + $0x23a8] sm:$0xff] }
 0x264   : > { %v1352_v58 = vld [vmem:[%s7199_s7 + $0x23b8] sm:$0xff] }
 0x265   : > { %5256 = vmatpush1.bf16.msra.mxu0 %v5255_v3  ;;  %v1309_v3 = vld [vmem:[%s7199_s7 + $0x2260] sm:$0xff]  ;;  %v1384_v43 = vld [vmem:[%s7199_s7 + $0x24b8] sm:$0xff] }
 0x266   : > { %6280 = vmatpush1.bf16.msra.mxu1 %v6279_v4  ;;  %5258 = vmatprep.subr.bf16.mxu0 %v5257_v5  ;;  %v1307_v4 = vld [vmem:[%s7199_s7 + $0x2250] sm:$0xff]  ;;  %v6301_v5 = vpack.c.bf16 %v1312_v62, %v1308_v61  ;;  %v5279_v11 = vpack.c.bf16 %v1309_v3, %v1305_v2  ;;  %v5297_v61 = vpack.c.bf16 %v1350_v56, %v1346_v55  ;;  %v1345_v62 = vld [vmem:[%s7199_s7 + $0x2380] sm:$0xff]  ;;  %v1354_v3 = vld [vmem:[%s7199_s7 + $0x23c8] sm:$0xff] }
 0x267   : > { %6282 = vmatprep.subr.bf16.mxu1 %v6281_v9  ;;  %v1316_v9 = vld [vmem:[%s7199_s7 + $0x2298] sm:$0xff]  ;;  %v6303_v12 = vpack.c.bf16 %v1311_v6, %v1307_v4  ;;  %v1351_v2 = vld [vmem:[%s7199_s7 + $0x23b0] sm:$0xff]  ;;  %v1358_v4 = vld [vmem:[%s7199_s7 + $0x23e8] sm:$0xff] }
 0x268   : > { %v1360_v6 = vld [vmem:[%s7199_s7 + $0x23f8] sm:$0xff] }
 0x269   : > { %5260 = vmatpush1.bf16.msra.mxu0 %v5259_v15  ;;  %v1317_v15 = vld [vmem:[%s7199_s7 + $0x22a0] sm:$0xff]  ;;  %v196_v44 = vld [vmem:[#allocation2 + $0x98] sm:$0xff] }
 0x26a   : > { %6284 = vmatpush1.bf16.msra.mxu1 %v6283_v16  ;;  %5262 = vmatprep.subr.bf16.mxu0 %v5261_v17  ;;  %v1315_v16 = vld [vmem:[%s7199_s7 + $0x2290] sm:$0xff]  ;;  %v6305_v17 = vpack.c.bf16 %v1320_v10, %v1316_v9  ;;  %v5283_v23 = vpack.c.bf16 %v1317_v15, %v1313_v14  ;;  %v5301_v9 = vpack.c.bf16 %v1358_v4, %v1354_v3  ;;  %v1353_v10 = vld [vmem:[%s7199_s7 + $0x23c0] sm:$0xff]  ;;  %v1362_v15 = vld [vmem:[%s7199_s7 + $0x2408] sm:$0xff] }
 0x26b   : > { %6286 = vmatprep.subr.bf16.mxu1 %v6285_v21  ;;  %v1324_v21 = vld [vmem:[%s7199_s7 + $0x22d8] sm:$0xff]  ;;  %v6307_v24 = vpack.c.bf16 %v1319_v18, %v1315_v16  ;;  %v1359_v14 = vld [vmem:[%s7199_s7 + $0x23f0] sm:$0xff]  ;;  %v1366_v16 = vld [vmem:[%s7199_s7 + $0x2428] sm:$0xff] }
 0x26c   : > { %v1368_v18 = vld [vmem:[%s7199_s7 + $0x2438] sm:$0xff] }
 0x26d   : > { %5264 = vmatpush1.bf16.msra.mxu0 %v5263_v27  ;;  %v1325_v27 = vld [vmem:[%s7199_s7 + $0x22e0] sm:$0xff]  ;;  %v1388_v55 = vld [vmem:[%s7199_s7 + $0x24d8] sm:$0xff] }
 0x26e   : > { %6288 = vmatpush1.bf16.msra.mxu1 %v6287_v28  ;;  %5266 = vmatprep.subr.bf16.mxu0 %v5265_v29  ;;  %v1323_v28 = vld [vmem:[%s7199_s7 + $0x22d0] sm:$0xff]  ;;  %v6309_v29 = vpack.c.bf16 %v1328_v22, %v1324_v21  ;;  %v5287_v35 = vpack.c.bf16 %v1325_v27, %v1321_v26  ;;  %v5305_v21 = vpack.c.bf16 %v1366_v16, %v1362_v15  ;;  %v1361_v22 = vld [vmem:[%s7199_s7 + $0x2400] sm:$0xff]  ;;  %v1370_v27 = vld [vmem:[%s7199_s7 + $0x2448] sm:$0xff] }
 0x26f   : > { %6290 = vmatprep.subr.bf16.mxu1 %v6289_v33  ;;  %v1332_v33 = vld [vmem:[%s7199_s7 + $0x2318] sm:$0xff]  ;;  %v6311_v36 = vpack.c.bf16 %v1327_v30, %v1323_v28  ;;  %v1367_v26 = vld [vmem:[%s7199_s7 + $0x2430] sm:$0xff]  ;;  %v1374_v28 = vld [vmem:[%s7199_s7 + $0x2468] sm:$0xff] }
 0x270   : > { %v1376_v30 = vld [vmem:[%s7199_s7 + $0x2478] sm:$0xff] }
 0x271   : > { %5268 = vmatpush1.bf16.msra.mxu0 %v5267_v39  ;;  %v1333_v39 = vld [vmem:[%s7199_s7 + $0x2320] sm:$0xff]  ;;  %v1392_v56 = vld [vmem:[%s7199_s7 + $0x24f8] sm:$0xff] }
 0x272   : > { %6292 = vmatpush1.bf16.msra.mxu1 %v6291_v40  ;;  %5270 = vmatprep.subr.bf16.mxu0 %v5269_v41  ;;  %v1331_v40 = vld [vmem:[%s7199_s7 + $0x2310] sm:$0xff]  ;;  %v6313_v41 = vpack.c.bf16 %v1336_v34, %v1332_v33  ;;  %v5291_v47 = vpack.c.bf16 %v1333_v39, %v1329_v38  ;;  %v5309_v34 = vpack.c.bf16 %v1374_v28, %v1370_v27  ;;  %v1396_v3 = vld [vmem:[%s7199_s7 + $0x2518] sm:$0xff] }
 0x273   : > { %6294 = vmatprep.subr.bf16.mxu1 %v6293_v45  ;;  %v1340_v45 = vld [vmem:[%s7199_s7 + $0x2358] sm:$0xff]  ;;  %v6315_v48 = vpack.c.bf16 %v1335_v42, %v1331_v40  ;;  %v1375_v39 = vld [vmem:[%s7199_s7 + $0x2470] sm:$0xff]  ;;  %v1378_v40 = vld [vmem:[%s7199_s7 + $0x2488] sm:$0xff] }
 0x274   : > { %v1380_v42 = vld [vmem:[%s7199_s7 + $0x2498] sm:$0xff] }
 0x275   : > { %5272 = vmatpush1.bf16.msra.mxu0 %v5271_v51  ;;  %v1341_v51 = vld [vmem:[%s7199_s7 + $0x2360] sm:$0xff]  ;;  %v1400_v4 = vld [vmem:[%s7199_s7 + $0x2538] sm:$0xff] }
 0x276   : > { %6296 = vmatpush1.bf16.msra.mxu1 %v6295_v52  ;;  %5274 = vmatprep.subr.bf16.mxu0 %v5273_v53  ;;  %v1339_v52 = vld [vmem:[%s7199_s7 + $0x2350] sm:$0xff]  ;;  %v6317_v53 = vpack.c.bf16 %v1344_v46, %v1340_v45  ;;  %v5295_v59 = vpack.c.bf16 %v1341_v51, %v1337_v50  ;;  %v6337_v51 = vpack.c.bf16 %v1384_v43, %v1380_v42  ;;  %v1404_v15 = vld [vmem:[%s7199_s7 + $0x2558] sm:$0xff] }
 0x277   : > { %6298 = vmatprep.subr.bf16.mxu1 %v6297_v57  ;;  %v1348_v57 = vld [vmem:[%s7199_s7 + $0x2398] sm:$0xff]  ;;  %v6319_v60 = vpack.c.bf16 %v1343_v54, %v1339_v52  ;;  %v1379_v50 = vld [vmem:[%s7199_s7 + $0x2490] sm:$0xff]  ;;  %v1390_v54 = vld [vmem:[%s7199_s7 + $0x24e8] sm:$0xff] }
 0x278   : > { %v1383_v52 = vld [vmem:[%s7199_s7 + $0x24b0] sm:$0xff]  ;;  %v1408_v16 = vld [vmem:[%s7199_s7 + $0x2578] sm:$0xff] }
 0x279   : > { %5276 = vmatpush1.bf16.msra.mxu0 %v5275_v63  ;;  %v1349_v63 = vld [vmem:[%s7199_s7 + $0x23a0] sm:$0xff]  ;;  %v1412_v27 = vld [vmem:[%s7199_s7 + $0x2598] sm:$0xff] }
 0x27a   : > { %6300 = vmatpush1.bf16.msra.mxu1 %v6299_v0  ;;  %5278 = vmatprep.subr.bf16.mxu0 %v5277_v1  ;;  %v1347_v0 = vld [vmem:[%s7199_s7 + $0x2390] sm:$0xff]  ;;  %v6321_v1 = vpack.c.bf16 %v1352_v58, %v1348_v57  ;;  %v5299_v7 = vpack.c.bf16 %v1349_v63, %v1345_v62  ;;  %v6339_v58 = vpack.c.bf16 %v1383_v52, %v1379_v50  ;;  %v1416_v28 = vld [vmem:[%s7199_s7 + $0x25b8] sm:$0xff]  ;;  %v1430_v50 = vld [vmem:[%s7199_s7 + $0x2628] sm:$0xff] }
 0x27b   : > { %6302 = vmatprep.subr.bf16.mxu1 %v6301_v5  ;;  %v1356_v5 = vld [vmem:[%s7199_s7 + $0x23d8] sm:$0xff]  ;;  %v6323_v8 = vpack.c.bf16 %v1351_v2, %v1347_v0  ;;  %v1387_v62 = vld [vmem:[%s7199_s7 + $0x24d0] sm:$0xff]  ;;  %v6341_v63 = vpack.c.bf16 %v1392_v56, %v1388_v55  ;;  %v1398_v2 = vld [vmem:[%s7199_s7 + $0x2528] sm:$0xff] }
 0x27c   : > { %v1391_v0 = vld [vmem:[%s7199_s7 + $0x24f0] sm:$0xff]  ;;  %v1432_v52 = vld [vmem:[%s7199_s7 + $0x2638] sm:$0xff]  ;;  %v1425_v56 = vld [vmem:[%s7199_s7 + $0x2600] sm:$0xff] }
 0x27d   : > { %5280 = vmatpush1.bf16.msra.mxu0 %v5279_v11  ;;  %v1357_v11 = vld [vmem:[%s7199_s7 + $0x23e0] sm:$0xff] }
 0x27e   : > { %6304 = vmatpush1.bf16.msra.mxu1 %v6303_v12  ;;  %5282 = vmatprep.subr.bf16.mxu0 %v5281_v13  ;;  %v1355_v12 = vld [vmem:[%s7199_s7 + $0x23d0] sm:$0xff]  ;;  %v6325_v13 = vpack.c.bf16 %v1360_v6, %v1356_v5  ;;  %v5303_v19 = vpack.c.bf16 %v1357_v11, %v1353_v10  ;;  %v6343_v6 = vpack.c.bf16 %v1391_v0, %v1387_v62  ;;  %v1438_v62 = vld [vmem:[%s7199_s7 + $0x2668] sm:$0xff]  ;;  %v1440_v0 = vld [vmem:[%s7199_s7 + $0x2678] sm:$0xff] }
 0x27f   : > { %6306 = vmatprep.subr.bf16.mxu1 %v6305_v17  ;;  %v1364_v17 = vld [vmem:[%s7199_s7 + $0x2418] sm:$0xff]  ;;  %v6327_v20 = vpack.c.bf16 %v1359_v14, %v1355_v12  ;;  %v1395_v10 = vld [vmem:[%s7199_s7 + $0x2510] sm:$0xff]  ;;  %v6345_v11 = vpack.c.bf16 %v1400_v4, %v1396_v3  ;;  %v1406_v14 = vld [vmem:[%s7199_s7 + $0x2568] sm:$0xff] }
 0x280   : > { %v1399_v12 = vld [vmem:[%s7199_s7 + $0x2530] sm:$0xff]  ;;  %v1433_v4 = vld [vmem:[%s7199_s7 + $0x2640] sm:$0xff] }
 0x281   : > { %5284 = vmatpush1.bf16.msra.mxu0 %v5283_v23  ;;  %v1365_v23 = vld [vmem:[%s7199_s7 + $0x2420] sm:$0xff] }
 0x282   : > { %6308 = vmatpush1.bf16.msra.mxu1 %v6307_v24  ;;  %5286 = vmatprep.subr.bf16.mxu0 %v5285_v25  ;;  %v1363_v24 = vld [vmem:[%s7199_s7 + $0x2410] sm:$0xff]  ;;  %v6329_v25 = vpack.c.bf16 %v1368_v18, %v1364_v17  ;;  %v5307_v32 = vpack.c.bf16 %v1365_v23, %v1361_v22  ;;  %v6347_v18 = vpack.c.bf16 %v1399_v12, %v1395_v10  ;;  %v1446_v10 = vld [vmem:[%s7199_s7 + $0x26a8] sm:$0xff]  ;;  %v1448_v12 = vld [vmem:[%s7199_s7 + $0x26b8] sm:$0xff] }
 0x283   : > { %6310 = vmatprep.subr.bf16.mxu1 %v6309_v29  ;;  %v1372_v29 = vld [vmem:[%s7199_s7 + $0x2458] sm:$0xff]  ;;  %v6331_v33 = vpack.c.bf16 %v1367_v26, %v1363_v24  ;;  %v1403_v22 = vld [vmem:[%s7199_s7 + $0x2550] sm:$0xff]  ;;  %v6349_v23 = vpack.c.bf16 %v1408_v16, %v1404_v15  ;;  %v1414_v26 = vld [vmem:[%s7199_s7 + $0x25a8] sm:$0xff] }
 0x284   : > { %v6333_v38 = vpack.c.bf16 %v1376_v30, %v1372_v29  ;;  %v1407_v24 = vld [vmem:[%s7199_s7 + $0x2570] sm:$0xff]  ;;  %v1441_v16 = vld [vmem:[%s7199_s7 + $0x2680] sm:$0xff] }
 0x285   : > { %5288 = vmatpush1.bf16.msra.mxu0 %v5287_v35  ;;  %v1369_v35 = vld [vmem:[%s7199_s7 + $0x2440] sm:$0xff]  ;;  %v6351_v30 = vpack.c.bf16 %v1407_v24, %v1403_v22  ;;  %v1454_v22 = vld [vmem:[%s7199_s7 + $0x26e8] sm:$0xff]  ;;  %v1456_v24 = vld [vmem:[%s7199_s7 + $0x26f8] sm:$0xff] }
 0x286   : > { %6312 = vmatpush1.bf16.msra.mxu1 %v6311_v36  ;;  %5290 = vmatprep.subr.bf16.mxu0 %v5289_v37  ;;  %v1373_v36 = vld [vmem:[%s7199_s7 + $0x2460] sm:$0xff]  ;;  %v1371_v37 = vld [vmem:[%s7199_s7 + $0x2450] sm:$0xff] }
 0x287   : > { %6314 = vmatprep.subr.bf16.mxu1 %v6313_v41  ;;  %v1382_v41 = vld [vmem:[%s7199_s7 + $0x24a8] sm:$0xff]  ;;  %v5311_v45 = vpack.c.bf16 %v1373_v36, %v1369_v35  ;;  %v6335_v46 = vpack.c.bf16 %v1375_v39, %v1371_v37  ;;  %v6353_v35 = vpack.c.bf16 %v1416_v28, %v1412_v27  ;;  %v1415_v36 = vld [vmem:[%s7199_s7 + $0x25b0] sm:$0xff]  ;;  %v1420_v39 = vld [vmem:[%s7199_s7 + $0x25d8] sm:$0xff] }
 0x288   : > { %v1418_v37 = vld [vmem:[%s7199_s7 + $0x25c8] sm:$0xff]  ;;  %v1449_v28 = vld [vmem:[%s7199_s7 + $0x26c0] sm:$0xff] }
 0x289   : > { %5292 = vmatpush1.bf16.msra.mxu0 %v5291_v47  ;;  %v5313_v47 = vpack.c.bf16 %v1382_v41, %v1378_v40  ;;  %v1424_v40 = vld [vmem:[%s7199_s7 + $0x25f8] sm:$0xff] }
 0x28a   : > { %6316 = vmatpush1.bf16.msra.mxu1 %v6315_v48  ;;  %5294 = vmatprep.subr.bf16.mxu0 %v5293_v49  ;;  %v1377_v48 = vld [vmem:[%s7199_s7 + $0x2480] sm:$0xff] }
 0x28b   : > { %6318 = vmatprep.subr.bf16.mxu1 %v6317_v53  ;;  %v1381_v49 = vld [vmem:[%s7199_s7 + $0x24a0] sm:$0xff]  ;;  %v1386_v53 = vld [vmem:[%s7199_s7 + $0x24c8] sm:$0xff] }
 0x28c   : > { %v5315_v57 = vpack.c.bf16 %v1381_v49, %v1377_v48  ;;  %v1423_v48 = vld [vmem:[%s7199_s7 + $0x25f0] sm:$0xff]  ;;  %v1426_v49 = vld [vmem:[%s7199_s7 + $0x2608] sm:$0xff] }
 0x28d   : > { %5296 = vmatpush1.bf16.msra.mxu0 %v5295_v59  ;;  %v5317_v59 = vpack.c.bf16 %v1390_v54, %v1386_v53  ;;  %v5337_v55 = vpack.c.bf16 %v1430_v50, %v1426_v49 }
 0x28e   : > { %6320 = vmatpush1.bf16.msra.mxu1 %v6319_v60  ;;  %5298 = vmatprep.subr.bf16.mxu0 %v5297_v61  ;;  %v1385_v60 = vld [vmem:[%s7199_s7 + $0x24c0] sm:$0xff] }
 0x28f   : > { %6322 = vmatprep.subr.bf16.mxu1 %v6321_v1  ;;  %v1389_v61 = vld [vmem:[%s7199_s7 + $0x24e0] sm:$0xff]  ;;  %v1394_v1 = vld [vmem:[%s7199_s7 + $0x2508] sm:$0xff] }
 0x290   : > { %v5319_v5 = vpack.c.bf16 %v1389_v61, %v1385_v60  ;;  %v1431_v60 = vld [vmem:[%s7199_s7 + $0x2630] sm:$0xff]  ;;  %v1434_v61 = vld [vmem:[%s7199_s7 + $0x2648] sm:$0xff] }
 0x291   : > { %5300 = vmatpush1.bf16.msra.mxu0 %v5299_v7  ;;  %v5321_v7 = vpack.c.bf16 %v1398_v2, %v1394_v1  ;;  %v5341_v3 = vpack.c.bf16 %v1438_v62, %v1434_v61 }
 0x292   : > { %6324 = vmatpush1.bf16.msra.mxu1 %v6323_v8  ;;  %5302 = vmatprep.subr.bf16.mxu0 %v5301_v9  ;;  %v1393_v8 = vld [vmem:[%s7199_s7 + $0x2500] sm:$0xff] }
 0x293   : > { %6326 = vmatprep.subr.bf16.mxu1 %v6325_v13  ;;  %v1397_v9 = vld [vmem:[%s7199_s7 + $0x2520] sm:$0xff]  ;;  %v1402_v13 = vld [vmem:[%s7199_s7 + $0x2548] sm:$0xff] }
 0x294   : > { %v5323_v17 = vpack.c.bf16 %v1397_v9, %v1393_v8  ;;  %v1439_v8 = vld [vmem:[%s7199_s7 + $0x2670] sm:$0xff]  ;;  %v1442_v9 = vld [vmem:[%s7199_s7 + $0x2688] sm:$0xff] }
 0x295   : > { %5304 = vmatpush1.bf16.msra.mxu0 %v5303_v19  ;;  %v5325_v19 = vpack.c.bf16 %v1406_v14, %v1402_v13  ;;  %v5345_v15 = vpack.c.bf16 %v1446_v10, %v1442_v9 }
 0x296   : > { %6328 = vmatpush1.bf16.msra.mxu1 %v6327_v20  ;;  %5306 = vmatprep.subr.bf16.mxu0 %v5305_v21  ;;  %v1401_v20 = vld [vmem:[%s7199_s7 + $0x2540] sm:$0xff] }
 0x297   : > { %6330 = vmatprep.subr.bf16.mxu1 %v6329_v25  ;;  %v1405_v21 = vld [vmem:[%s7199_s7 + $0x2560] sm:$0xff]  ;;  %v1410_v25 = vld [vmem:[%s7199_s7 + $0x2588] sm:$0xff] }
 0x298   : > { %2890 = vmatmul.mubr.f32.vlgmr.msra.gmra.mrb[0].mxu0 %v193_v31  ;;  %v5327_v29 = vpack.c.bf16 %v1405_v21, %v1401_v20  ;;  %v1447_v20 = vld [vmem:[%s7199_s7 + $0x26b0] sm:$0xff]  ;;  %v1450_v21 = vld [vmem:[%s7199_s7 + $0x26c8] sm:$0xff] }
 0x299   : > { %5308 = vmatpush1.bf16.msra.mxu0 %v5307_v32  ;;  %4026 = vmatmul.mubr.f32.vlgmr.msra.gmra.mrb[0].mxu1 %v193_v31  ;;  %v5329_v31 = vpack.c.bf16 %v1414_v26, %v1410_v25  ;;  %v1409_v32 = vld [vmem:[%s7199_s7 + $0x2580] sm:$0xff]  ;;  %v5349_v27 = vpack.c.bf16 %v1454_v22, %v1450_v21 }
 0x29a   : > { %6332 = vmatpush1.bf16.msra.mxu1 %v6331_v33  ;;  %5310 = vmatprep.subr.bf16.mxu0 %v5309_v34  ;;  %v1413_v33 = vld [vmem:[%s7199_s7 + $0x25a0] sm:$0xff]  ;;  %v1411_v34 = vld [vmem:[%s7199_s7 + $0x2590] sm:$0xff] }
 0x29b   : > { %6334 = vmatprep.subr.bf16.mxu1 %v6333_v38  ;;  %2960 = vmatprep.mubr.f32.mxu0 %v196_v44  ;;  %v1422_v38 = vld [vmem:[%s7199_s7 + $0x25e8] sm:$0xff]  ;;  %v5331_v41 = vpack.c.bf16 %v1413_v33, %v1409_v32  ;;  %v6355_v42 = vpack.c.bf16 %v1415_v36, %v1411_v34  ;;  %v1455_v32 = vld [vmem:[%s7199_s7 + $0x26f0] sm:$0xff]  ;;  %v1464_v36 = vld [vmem:[%s7199_s7 + $0x2738] sm:$0xff] }
 0x29c   : > { %4096 = vmatprep.mubr.f32.mxu1 %v196_v44  ;;  %v5333_v43 = vpack.c.bf16 %v1422_v38, %v1418_v37  ;;  %v1417_v44 = vld [vmem:[%s7199_s7 + $0x25c0] sm:$0xff]  ;;  %v1458_v33 = vld [vmem:[%s7199_s7 + $0x2708] sm:$0xff] }
 0x29d   : > { %5312 = vmatpush1.bf16.msra.mxu0 %v5311_v45  ;;  %v1421_v45 = vld [vmem:[%s7199_s7 + $0x25e0] sm:$0xff]  ;;  %v1462_v34 = vld [vmem:[%s7199_s7 + $0x2728] sm:$0xff] }
 0x29e   : > { %6336 = vmatpush1.bf16.msra.mxu1 %v6335_v46  ;;  %5314 = vmatprep.subr.bf16.mxu0 %v5313_v47  ;;  %v1419_v46 = vld [vmem:[%s7199_s7 + $0x25d0] sm:$0xff]  ;;  %v6357_v47 = vpack.c.bf16 %v1424_v40, %v1420_v39  ;;  %v5335_v53 = vpack.c.bf16 %v1421_v45, %v1417_v44  ;;  %v5353_v39 = vpack.c.bf16 %v1462_v34, %v1458_v33  ;;  %v1457_v40 = vld [vmem:[%s7199_s7 + $0x2700] sm:$0xff]  ;;  %v1466_v45 = vld [vmem:[%s7199_s7 + $0x2748] sm:$0xff] }
 0x29f   : > { %6338 = vmatprep.subr.bf16.mxu1 %v6337_v51  ;;  %v1428_v51 = vld [vmem:[%s7199_s7 + $0x2618] sm:$0xff]  ;;  %v6359_v54 = vpack.c.bf16 %v1423_v48, %v1419_v46  ;;  %v1463_v44 = vld [vmem:[%s7199_s7 + $0x2730] sm:$0xff]  ;;  %v1470_v46 = vld [vmem:[%s7199_s7 + $0x2768] sm:$0xff] }
 0x2a0   : > { %v1472_v48 = vld [vmem:[%s7199_s7 + $0x2778] sm:$0xff]  ;;  %v195_v33 = vld [vmem:[#allocation2 + $0x90] sm:$0xff] }
 0x2a1   : > { %5316 = vmatpush1.bf16.msra.mxu0 %v5315_v57  ;;  %v1429_v57 = vld [vmem:[%s7199_s7 + $0x2620] sm:$0xff] }
 0x2a2   : > { %6340 = vmatpush1.bf16.msra.mxu1 %v6339_v58  ;;  %5318 = vmatprep.subr.bf16.mxu0 %v5317_v59  ;;  %v1427_v58 = vld [vmem:[%s7199_s7 + $0x2610] sm:$0xff]  ;;  %v6361_v59 = vpack.c.bf16 %v1432_v52, %v1428_v51  ;;  %v5339_v1 = vpack.c.bf16 %v1429_v57, %v1425_v56  ;;  %v5357_v51 = vpack.c.bf16 %v1470_v46, %v1466_v45  ;;  %v1465_v52 = vld [vmem:[%s7199_s7 + $0x2740] sm:$0xff]  ;;  %v1474_v57 = vld [vmem:[%s7199_s7 + $0x2788] sm:$0xff] }
 0x2a3   : > { %6342 = vmatprep.subr.bf16.mxu1 %v6341_v63  ;;  %v1436_v63 = vld [vmem:[%s7199_s7 + $0x2658] sm:$0xff]  ;;  %v6363_v2 = vpack.c.bf16 %v1431_v60, %v1427_v58  ;;  %v1471_v56 = vld [vmem:[%s7199_s7 + $0x2770] sm:$0xff]  ;;  %v1478_v58 = vld [vmem:[%s7199_s7 + $0x27a8] sm:$0xff] }
 0x2a4   : > { %v1480_v60 = vld [vmem:[%s7199_s7 + $0x27b8] sm:$0xff]  ;;  %v198_v46 = vld [vmem:[#allocation2 + $0xa8] sm:$0xff] }
 0x2a5   : > { %5320 = vmatpush1.bf16.msra.mxu0 %v5319_v5  ;;  %v1437_v5 = vld [vmem:[%s7199_s7 + $0x2660] sm:$0xff]  ;;  %v1512_v45 = vld [vmem:[%s7199_s7 + $0x28b8] sm:$0xff] }
 0x2a6   : > { %6344 = vmatpush1.bf16.msra.mxu1 %v6343_v6  ;;  %5322 = vmatprep.subr.bf16.mxu0 %v5321_v7  ;;  %v1435_v6 = vld [vmem:[%s7199_s7 + $0x2650] sm:$0xff]  ;;  %v6365_v7 = vpack.c.bf16 %v1440_v0, %v1436_v63  ;;  %v5343_v13 = vpack.c.bf16 %v1437_v5, %v1433_v4  ;;  %v5361_v63 = vpack.c.bf16 %v1478_v58, %v1474_v57  ;;  %v1473_v0 = vld [vmem:[%s7199_s7 + $0x2780] sm:$0xff]  ;;  %v1482_v5 = vld [vmem:[%s7199_s7 + $0x27c8] sm:$0xff] }
 0x2a7   : > { %6346 = vmatprep.subr.bf16.mxu1 %v6345_v11  ;;  %v1444_v11 = vld [vmem:[%s7199_s7 + $0x2698] sm:$0xff]  ;;  %v6367_v14 = vpack.c.bf16 %v1439_v8, %v1435_v6  ;;  %v1479_v4 = vld [vmem:[%s7199_s7 + $0x27b0] sm:$0xff]  ;;  %v1486_v6 = vld [vmem:[%s7199_s7 + $0x27e8] sm:$0xff] }
 0x2a8   : > { %v1488_v8 = vld [vmem:[%s7199_s7 + $0x27f8] sm:$0xff] }
 0x2a9   : > { %5324 = vmatpush1.bf16.msra.mxu0 %v5323_v17  ;;  %v1445_v17 = vld [vmem:[%s7199_s7 + $0x26a0] sm:$0xff]  ;;  %v1516_v57 = vld [vmem:[%s7199_s7 + $0x28d8] sm:$0xff] }
 0x2aa   : > { %6348 = vmatpush1.bf16.msra.mxu1 %v6347_v18  ;;  %5326 = vmatprep.subr.bf16.mxu0 %v5325_v19  ;;  %v1443_v18 = vld [vmem:[%s7199_s7 + $0x2690] sm:$0xff]  ;;  %v6369_v19 = vpack.c.bf16 %v1448_v12, %v1444_v11  ;;  %v5347_v25 = vpack.c.bf16 %v1445_v17, %v1441_v16  ;;  %v5365_v11 = vpack.c.bf16 %v1486_v6, %v1482_v5  ;;  %v1481_v12 = vld [vmem:[%s7199_s7 + $0x27c0] sm:$0xff]  ;;  %v1490_v17 = vld [vmem:[%s7199_s7 + $0x2808] sm:$0xff] }
 0x2ab   : > { %6350 = vmatprep.subr.bf16.mxu1 %v6349_v23  ;;  %v1452_v23 = vld [vmem:[%s7199_s7 + $0x26d8] sm:$0xff]  ;;  %v6371_v26 = vpack.c.bf16 %v1447_v20, %v1443_v18  ;;  %v1487_v16 = vld [vmem:[%s7199_s7 + $0x27f0] sm:$0xff]  ;;  %v1494_v18 = vld [vmem:[%s7199_s7 + $0x2828] sm:$0xff] }
 0x2ac   : > { %v1496_v20 = vld [vmem:[%s7199_s7 + $0x2838] sm:$0xff] }
 0x2ad   : > { %5328 = vmatpush1.bf16.msra.mxu0 %v5327_v29  ;;  %v1453_v29 = vld [vmem:[%s7199_s7 + $0x26e0] sm:$0xff]  ;;  %v1520_v58 = vld [vmem:[%s7199_s7 + $0x28f8] sm:$0xff] }
 0x2ae   : > { %6352 = vmatpush1.bf16.msra.mxu1 %v6351_v30  ;;  %5330 = vmatprep.subr.bf16.mxu0 %v5329_v31  ;;  %v1451_v30 = vld [vmem:[%s7199_s7 + $0x26d0] sm:$0xff]  ;;  %v6373_v31 = vpack.c.bf16 %v1456_v24, %v1452_v23  ;;  %v5351_v37 = vpack.c.bf16 %v1453_v29, %v1449_v28  ;;  %v5369_v23 = vpack.c.bf16 %v1494_v18, %v1490_v17  ;;  %v1489_v24 = vld [vmem:[%s7199_s7 + $0x2800] sm:$0xff]  ;;  %v1498_v29 = vld [vmem:[%s7199_s7 + $0x2848] sm:$0xff] }
 0x2af   : > { %6354 = vmatprep.subr.bf16.mxu1 %v6353_v35  ;;  %v1460_v35 = vld [vmem:[%s7199_s7 + $0x2718] sm:$0xff]  ;;  %v6375_v38 = vpack.c.bf16 %v1455_v32, %v1451_v30  ;;  %v1495_v28 = vld [vmem:[%s7199_s7 + $0x2830] sm:$0xff]  ;;  %v1502_v30 = vld [vmem:[%s7199_s7 + $0x2868] sm:$0xff] }
 0x2b0   : > { %v1504_v32 = vld [vmem:[%s7199_s7 + $0x2878] sm:$0xff] }
 0x2b1   : > { %5332 = vmatpush1.bf16.msra.mxu0 %v5331_v41  ;;  %v1461_v41 = vld [vmem:[%s7199_s7 + $0x2720] sm:$0xff]  ;;  %v1524_v5 = vld [vmem:[%s7199_s7 + $0x2918] sm:$0xff] }
 0x2b2   : > { %6356 = vmatpush1.bf16.msra.mxu1 %v6355_v42  ;;  %5334 = vmatprep.subr.bf16.mxu0 %v5333_v43  ;;  %v1459_v42 = vld [vmem:[%s7199_s7 + $0x2710] sm:$0xff]  ;;  %v6377_v43 = vpack.c.bf16 %v1464_v36, %v1460_v35  ;;  %v5355_v49 = vpack.c.bf16 %v1461_v41, %v1457_v40  ;;  %v5373_v36 = vpack.c.bf16 %v1502_v30, %v1498_v29  ;;  %v1528_v6 = vld [vmem:[%s7199_s7 + $0x2938] sm:$0xff] }
 0x2b3   : > { %6358 = vmatprep.subr.bf16.mxu1 %v6357_v47  ;;  %v1468_v47 = vld [vmem:[%s7199_s7 + $0x2758] sm:$0xff]  ;;  %v6379_v50 = vpack.c.bf16 %v1463_v44, %v1459_v42  ;;  %v1503_v41 = vld [vmem:[%s7199_s7 + $0x2870] sm:$0xff]  ;;  %v1506_v42 = vld [vmem:[%s7199_s7 + $0x2888] sm:$0xff] }
 0x2b4   : > { %v1508_v44 = vld [vmem:[%s7199_s7 + $0x2898] sm:$0xff] }
 0x2b5   : > { %5336 = vmatpush1.bf16.msra.mxu0 %v5335_v53  ;;  %v1469_v53 = vld [vmem:[%s7199_s7 + $0x2760] sm:$0xff]  ;;  %v1532_v17 = vld [vmem:[%s7199_s7 + $0x2958] sm:$0xff] }
 0x2b6   : > { %6360 = vmatpush1.bf16.msra.mxu1 %v6359_v54  ;;  %5338 = vmatprep.subr.bf16.mxu0 %v5337_v55  ;;  %v1467_v54 = vld [vmem:[%s7199_s7 + $0x2750] sm:$0xff]  ;;  %v6381_v55 = vpack.c.bf16 %v1472_v48, %v1468_v47  ;;  %v5359_v61 = vpack.c.bf16 %v1469_v53, %v1465_v52  ;;  %v6401_v53 = vpack.c.bf16 %v1512_v45, %v1508_v44  ;;  %v1536_v18 = vld [vmem:[%s7199_s7 + $0x2978] sm:$0xff] }
 0x2b7   : > { %6362 = vmatprep.subr.bf16.mxu1 %v6361_v59  ;;  %v1476_v59 = vld [vmem:[%s7199_s7 + $0x2798] sm:$0xff]  ;;  %v6383_v62 = vpack.c.bf16 %v1471_v56, %v1467_v54  ;;  %v1507_v52 = vld [vmem:[%s7199_s7 + $0x2890] sm:$0xff]  ;;  %v1518_v56 = vld [vmem:[%s7199_s7 + $0x28e8] sm:$0xff] }
 0x2b8   : > { %v1511_v54 = vld [vmem:[%s7199_s7 + $0x28b0] sm:$0xff]  ;;  %v1540_v29 = vld [vmem:[%s7199_s7 + $0x2998] sm:$0xff] }
 0x2b9   : > { %5340 = vmatpush1.bf16.msra.mxu0 %v5339_v1  ;;  %v1477_v1 = vld [vmem:[%s7199_s7 + $0x27a0] sm:$0xff]  ;;  %v1544_v30 = vld [vmem:[%s7199_s7 + $0x29b8] sm:$0xff] }
 0x2ba   : > { %6364 = vmatpush1.bf16.msra.mxu1 %v6363_v2  ;;  %5342 = vmatprep.subr.bf16.mxu0 %v5341_v3  ;;  %v1475_v2 = vld [vmem:[%s7199_s7 + $0x2790] sm:$0xff]  ;;  %v6385_v3 = vpack.c.bf16 %v1480_v60, %v1476_v59  ;;  %v5363_v9 = vpack.c.bf16 %v1477_v1, %v1473_v0  ;;  %v6403_v60 = vpack.c.bf16 %v1511_v54, %v1507_v52  ;;  %v1558_v52 = vld [vmem:[%s7199_s7 + $0x2a28] sm:$0xff]  ;;  %v1560_v54 = vld [vmem:[%s7199_s7 + $0x2a38] sm:$0xff] }
 0x2bb   : > { %6366 = vmatprep.subr.bf16.mxu1 %v6365_v7  ;;  %v1484_v7 = vld [vmem:[%s7199_s7 + $0x27d8] sm:$0xff]  ;;  %v6387_v10 = vpack.c.bf16 %v1479_v4, %v1475_v2  ;;  %v1515_v0 = vld [vmem:[%s7199_s7 + $0x28d0] sm:$0xff]  ;;  %v6405_v1 = vpack.c.bf16 %v1520_v58, %v1516_v57  ;;  %v1526_v4 = vld [vmem:[%s7199_s7 + $0x2928] sm:$0xff] }
 0x2bc   : > { %v1519_v2 = vld [vmem:[%s7199_s7 + $0x28f0] sm:$0xff]  ;;  %v1553_v58 = vld [vmem:[%s7199_s7 + $0x2a00] sm:$0xff] }
 0x2bd   : > { %5344 = vmatpush1.bf16.msra.mxu0 %v5343_v13  ;;  %v1485_v13 = vld [vmem:[%s7199_s7 + $0x27e0] sm:$0xff] }
 0x2be   : > { %6368 = vmatpush1.bf16.msra.mxu1 %v6367_v14  ;;  %5346 = vmatprep.subr.bf16.mxu0 %v5345_v15  ;;  %v1483_v14 = vld [vmem:[%s7199_s7 + $0x27d0] sm:$0xff]  ;;  %v6389_v15 = vpack.c.bf16 %v1488_v8, %v1484_v7  ;;  %v5367_v21 = vpack.c.bf16 %v1485_v13, %v1481_v12  ;;  %v6407_v8 = vpack.c.bf16 %v1519_v2, %v1515_v0  ;;  %v1566_v0 = vld [vmem:[%s7199_s7 + $0x2a68] sm:$0xff]  ;;  %v1568_v2 = vld [vmem:[%s7199_s7 + $0x2a78] sm:$0xff] }
 0x2bf   : > { %6370 = vmatprep.subr.bf16.mxu1 %v6369_v19  ;;  %v1492_v19 = vld [vmem:[%s7199_s7 + $0x2818] sm:$0xff]  ;;  %v6391_v22 = vpack.c.bf16 %v1487_v16, %v1483_v14  ;;  %v1523_v12 = vld [vmem:[%s7199_s7 + $0x2910] sm:$0xff]  ;;  %v6409_v13 = vpack.c.bf16 %v1528_v6, %v1524_v5  ;;  %v1534_v16 = vld [vmem:[%s7199_s7 + $0x2968] sm:$0xff] }
 0x2c0   : > { %v1527_v14 = vld [vmem:[%s7199_s7 + $0x2930] sm:$0xff]  ;;  %v1561_v6 = vld [vmem:[%s7199_s7 + $0x2a40] sm:$0xff] }
 0x2c1   : > { %5348 = vmatpush1.bf16.msra.mxu0 %v5347_v25  ;;  %v1493_v25 = vld [vmem:[%s7199_s7 + $0x2820] sm:$0xff] }
 0x2c2   : > { %6372 = vmatpush1.bf16.msra.mxu1 %v6371_v26  ;;  %5350 = vmatprep.subr.bf16.mxu0 %v5349_v27  ;;  %v1491_v26 = vld [vmem:[%s7199_s7 + $0x2810] sm:$0xff]  ;;  %v6393_v27 = vpack.c.bf16 %v1496_v20, %v1492_v19  ;;  %v5371_v34 = vpack.c.bf16 %v1493_v25, %v1489_v24  ;;  %v6411_v20 = vpack.c.bf16 %v1527_v14, %v1523_v12  ;;  %v1574_v12 = vld [vmem:[%s7199_s7 + $0x2aa8] sm:$0xff]  ;;  %v1576_v14 = vld [vmem:[%s7199_s7 + $0x2ab8] sm:$0xff] }
 0x2c3   : > { %6374 = vmatprep.subr.bf16.mxu1 %v6373_v31  ;;  %v1500_v31 = vld [vmem:[%s7199_s7 + $0x2858] sm:$0xff]  ;;  %v6395_v35 = vpack.c.bf16 %v1495_v28, %v1491_v26  ;;  %v1531_v24 = vld [vmem:[%s7199_s7 + $0x2950] sm:$0xff]  ;;  %v6413_v25 = vpack.c.bf16 %v1536_v18, %v1532_v17  ;;  %v1542_v28 = vld [vmem:[%s7199_s7 + $0x29a8] sm:$0xff] }
 0x2c4   : > { %v6397_v40 = vpack.c.bf16 %v1504_v32, %v1500_v31  ;;  %v1535_v26 = vld [vmem:[%s7199_s7 + $0x2970] sm:$0xff]  ;;  %v1569_v18 = vld [vmem:[%s7199_s7 + $0x2a80] sm:$0xff] }
 0x2c5   : > { %5352 = vmatpush1.bf16.msra.mxu0 %v5351_v37  ;;  %v1497_v37 = vld [vmem:[%s7199_s7 + $0x2840] sm:$0xff]  ;;  %v6415_v32 = vpack.c.bf16 %v1535_v26, %v1531_v24  ;;  %v1582_v24 = vld [vmem:[%s7199_s7 + $0x2ae8] sm:$0xff]  ;;  %v1584_v26 = vld [vmem:[%s7199_s7 + $0x2af8] sm:$0xff] }
 0x2c6   : > { %6376 = vmatpush1.bf16.msra.mxu1 %v6375_v38  ;;  %5354 = vmatprep.subr.bf16.mxu0 %v5353_v39  ;;  %v1501_v38 = vld [vmem:[%s7199_s7 + $0x2860] sm:$0xff]  ;;  %v1499_v39 = vld [vmem:[%s7199_s7 + $0x2850] sm:$0xff] }
 0x2c7   : > { %6378 = vmatprep.subr.bf16.mxu1 %v6377_v43  ;;  %v1510_v43 = vld [vmem:[%s7199_s7 + $0x28a8] sm:$0xff]  ;;  %v5375_v47 = vpack.c.bf16 %v1501_v38, %v1497_v37  ;;  %v6399_v48 = vpack.c.bf16 %v1503_v41, %v1499_v39  ;;  %v6417_v37 = vpack.c.bf16 %v1544_v30, %v1540_v29  ;;  %v1543_v38 = vld [vmem:[%s7199_s7 + $0x29b0] sm:$0xff]  ;;  %v1548_v41 = vld [vmem:[%s7199_s7 + $0x29d8] sm:$0xff] }
 0x2c8   : > { %v1546_v39 = vld [vmem:[%s7199_s7 + $0x29c8] sm:$0xff]  ;;  %v1577_v30 = vld [vmem:[%s7199_s7 + $0x2ac0] sm:$0xff] }
 0x2c9   : > { %5356 = vmatpush1.bf16.msra.mxu0 %v5355_v49  ;;  %v5377_v49 = vpack.c.bf16 %v1510_v43, %v1506_v42  ;;  %v1552_v42 = vld [vmem:[%s7199_s7 + $0x29f8] sm:$0xff] }
 0x2ca   : > { %6380 = vmatpush1.bf16.msra.mxu1 %v6379_v50  ;;  %5358 = vmatprep.subr.bf16.mxu0 %v5357_v51  ;;  %v1505_v50 = vld [vmem:[%s7199_s7 + $0x2880] sm:$0xff] }
 0x2cb   : > { %6382 = vmatprep.subr.bf16.mxu1 %v6381_v55  ;;  %v1509_v51 = vld [vmem:[%s7199_s7 + $0x28a0] sm:$0xff]  ;;  %v1514_v55 = vld [vmem:[%s7199_s7 + $0x28c8] sm:$0xff] }
 0x2cc   : > { %v5379_v59 = vpack.c.bf16 %v1509_v51, %v1505_v50  ;;  %v1551_v50 = vld [vmem:[%s7199_s7 + $0x29f0] sm:$0xff]  ;;  %v1554_v51 = vld [vmem:[%s7199_s7 + $0x2a08] sm:$0xff] }
 0x2cd   : > { %5360 = vmatpush1.bf16.msra.mxu0 %v5359_v61  ;;  %v5381_v61 = vpack.c.bf16 %v1518_v56, %v1514_v55  ;;  %v5401_v57 = vpack.c.bf16 %v1558_v52, %v1554_v51 }
 0x2ce   : > { %6384 = vmatpush1.bf16.msra.mxu1 %v6383_v62  ;;  %5362 = vmatprep.subr.bf16.mxu0 %v5361_v63  ;;  %v1513_v62 = vld [vmem:[%s7199_s7 + $0x28c0] sm:$0xff] }
 0x2cf   : > { %6386 = vmatprep.subr.bf16.mxu1 %v6385_v3  ;;  %v1517_v63 = vld [vmem:[%s7199_s7 + $0x28e0] sm:$0xff]  ;;  %v1522_v3 = vld [vmem:[%s7199_s7 + $0x2908] sm:$0xff] }
 0x2d0   : > { %v5383_v7 = vpack.c.bf16 %v1517_v63, %v1513_v62  ;;  %v1559_v62 = vld [vmem:[%s7199_s7 + $0x2a30] sm:$0xff]  ;;  %v1562_v63 = vld [vmem:[%s7199_s7 + $0x2a48] sm:$0xff] }
 0x2d1   : > { %5364 = vmatpush1.bf16.msra.mxu0 %v5363_v9  ;;  %v5385_v9 = vpack.c.bf16 %v1526_v4, %v1522_v3  ;;  %v5405_v5 = vpack.c.bf16 %v1566_v0, %v1562_v63 }
 0x2d2   : > { %6388 = vmatpush1.bf16.msra.mxu1 %v6387_v10  ;;  %5366 = vmatprep.subr.bf16.mxu0 %v5365_v11  ;;  %v1521_v10 = vld [vmem:[%s7199_s7 + $0x2900] sm:$0xff] }
 0x2d3   : > { %6390 = vmatprep.subr.bf16.mxu1 %v6389_v15  ;;  %v1525_v11 = vld [vmem:[%s7199_s7 + $0x2920] sm:$0xff]  ;;  %v1530_v15 = vld [vmem:[%s7199_s7 + $0x2948] sm:$0xff] }
 0x2d4   : > { %v5387_v19 = vpack.c.bf16 %v1525_v11, %v1521_v10  ;;  %v1567_v10 = vld [vmem:[%s7199_s7 + $0x2a70] sm:$0xff]  ;;  %v1570_v11 = vld [vmem:[%s7199_s7 + $0x2a88] sm:$0xff] }
 0x2d5   : > { %5368 = vmatpush1.bf16.msra.mxu0 %v5367_v21  ;;  %v5389_v21 = vpack.c.bf16 %v1534_v16, %v1530_v15  ;;  %v5409_v17 = vpack.c.bf16 %v1574_v12, %v1570_v11 }
 0x2d6   : > { %6392 = vmatpush1.bf16.msra.mxu1 %v6391_v22  ;;  %5370 = vmatprep.subr.bf16.mxu0 %v5369_v23  ;;  %v1529_v22 = vld [vmem:[%s7199_s7 + $0x2940] sm:$0xff] }
 0x2d7   : > { %6394 = vmatprep.subr.bf16.mxu1 %v6393_v27  ;;  %v1533_v23 = vld [vmem:[%s7199_s7 + $0x2960] sm:$0xff]  ;;  %v1538_v27 = vld [vmem:[%s7199_s7 + $0x2988] sm:$0xff] }
 0x2d8   : > { %2961 = vmatmul.mubr.f32.vlgmr.msra.gmra.mrb[0].mxu0 %v195_v33  ;;  %v5391_v31 = vpack.c.bf16 %v1533_v23, %v1529_v22  ;;  %v1575_v22 = vld [vmem:[%s7199_s7 + $0x2ab0] sm:$0xff]  ;;  %v1578_v23 = vld [vmem:[%s7199_s7 + $0x2ac8] sm:$0xff] }
 0x2d9   : > { %5372 = vmatpush1.bf16.msra.mxu0 %v5371_v34  ;;  %4097 = vmatmul.mubr.f32.vlgmr.msra.gmra.mrb[0].mxu1 %v195_v33  ;;  %v5393_v33 = vpack.c.bf16 %v1542_v28, %v1538_v27  ;;  %v1537_v34 = vld [vmem:[%s7199_s7 + $0x2980] sm:$0xff]  ;;  %v5413_v29 = vpack.c.bf16 %v1582_v24, %v1578_v23 }
 0x2da   : > { %6396 = vmatpush1.bf16.msra.mxu1 %v6395_v35  ;;  %5374 = vmatprep.subr.bf16.mxu0 %v5373_v36  ;;  %v1541_v35 = vld [vmem:[%s7199_s7 + $0x29a0] sm:$0xff]  ;;  %v1539_v36 = vld [vmem:[%s7199_s7 + $0x2990] sm:$0xff] }
 0x2db   : > { %6398 = vmatprep.subr.bf16.mxu1 %v6397_v40  ;;  %3031 = vmatprep.mubr.f32.mxu0 %v198_v46  ;;  %v1550_v40 = vld [vmem:[%s7199_s7 + $0x29e8] sm:$0xff]  ;;  %v5395_v43 = vpack.c.bf16 %v1541_v35, %v1537_v34  ;;  %v6419_v44 = vpack.c.bf16 %v1543_v38, %v1539_v36  ;;  %v1583_v34 = vld [vmem:[%s7199_s7 + $0x2af0] sm:$0xff]  ;;  %v1592_v38 = vld [vmem:[%s7199_s7 + $0x2b38] sm:$0xff] }
 0x2dc   : > { %4167 = vmatprep.mubr.f32.mxu1 %v198_v46  ;;  %v5397_v45 = vpack.c.bf16 %v1550_v40, %v1546_v39  ;;  %v1545_v46 = vld [vmem:[%s7199_s7 + $0x29c0] sm:$0xff]  ;;  %v1586_v35 = vld [vmem:[%s7199_s7 + $0x2b08] sm:$0xff] }
 0x2dd   : > { %5376 = vmatpush1.bf16.msra.mxu0 %v5375_v47  ;;  %v1549_v47 = vld [vmem:[%s7199_s7 + $0x29e0] sm:$0xff]  ;;  %v1590_v36 = vld [vmem:[%s7199_s7 + $0x2b28] sm:$0xff] }
 0x2de   : > { %6400 = vmatpush1.bf16.msra.mxu1 %v6399_v48  ;;  %5378 = vmatprep.subr.bf16.mxu0 %v5377_v49  ;;  %v1547_v48 = vld [vmem:[%s7199_s7 + $0x29d0] sm:$0xff]  ;;  %v6421_v49 = vpack.c.bf16 %v1552_v42, %v1548_v41  ;;  %v5399_v55 = vpack.c.bf16 %v1549_v47, %v1545_v46  ;;  %v5417_v41 = vpack.c.bf16 %v1590_v36, %v1586_v35  ;;  %v1585_v42 = vld [vmem:[%s7199_s7 + $0x2b00] sm:$0xff]  ;;  %v1594_v47 = vld [vmem:[%s7199_s7 + $0x2b48] sm:$0xff] }
 0x2df   : > { %6402 = vmatprep.subr.bf16.mxu1 %v6401_v53  ;;  %v1556_v53 = vld [vmem:[%s7199_s7 + $0x2a18] sm:$0xff]  ;;  %v6423_v56 = vpack.c.bf16 %v1551_v50, %v1547_v48  ;;  %v1591_v46 = vld [vmem:[%s7199_s7 + $0x2b30] sm:$0xff]  ;;  %v1598_v48 = vld [vmem:[%s7199_s7 + $0x2b68] sm:$0xff] }
 0x2e0   : > { %v1600_v50 = vld [vmem:[%s7199_s7 + $0x2b78] sm:$0xff]  ;;  %v197_v35 = vld [vmem:[#allocation2 + $0xa0] sm:$0xff] }
 0x2e1   : > { %5380 = vmatpush1.bf16.msra.mxu0 %v5379_v59  ;;  %v1557_v59 = vld [vmem:[%s7199_s7 + $0x2a20] sm:$0xff] }
 0x2e2   : > { %6404 = vmatpush1.bf16.msra.mxu1 %v6403_v60  ;;  %5382 = vmatprep.subr.bf16.mxu0 %v5381_v61  ;;  %v1555_v60 = vld [vmem:[%s7199_s7 + $0x2a10] sm:$0xff]  ;;  %v6425_v61 = vpack.c.bf16 %v1560_v54, %v1556_v53  ;;  %v5403_v3 = vpack.c.bf16 %v1557_v59, %v1553_v58  ;;  %v5421_v53 = vpack.c.bf16 %v1598_v48, %v1594_v47  ;;  %v1593_v54 = vld [vmem:[%s7199_s7 + $0x2b40] sm:$0xff]  ;;  %v1602_v59 = vld [vmem:[%s7199_s7 + $0x2b88] sm:$0xff] }
 0x2e3   : > { %6406 = vmatprep.subr.bf16.mxu1 %v6405_v1  ;;  %v1564_v1 = vld [vmem:[%s7199_s7 + $0x2a58] sm:$0xff]  ;;  %v6427_v4 = vpack.c.bf16 %v1559_v62, %v1555_v60  ;;  %v1599_v58 = vld [vmem:[%s7199_s7 + $0x2b70] sm:$0xff]  ;;  %v1606_v60 = vld [vmem:[%s7199_s7 + $0x2ba8] sm:$0xff] }
 0x2e4   : > { %v1608_v62 = vld [vmem:[%s7199_s7 + $0x2bb8] sm:$0xff] }
 0x2e5   : > { %5384 = vmatpush1.bf16.msra.mxu0 %v5383_v7  ;;  %v1565_v7 = vld [vmem:[%s7199_s7 + $0x2a60] sm:$0xff]  ;;  %v1640_v47 = vld [vmem:[%s7199_s7 + $0x2cb8] sm:$0xff] }
 0x2e6   : > { %6408 = vmatpush1.bf16.msra.mxu1 %v6407_v8  ;;  %5386 = vmatprep.subr.bf16.mxu0 %v5385_v9  ;;  %v1563_v8 = vld [vmem:[%s7199_s7 + $0x2a50] sm:$0xff]  ;;  %v6429_v9 = vpack.c.bf16 %v1568_v2, %v1564_v1  ;;  %v5407_v15 = vpack.c.bf16 %v1565_v7, %v1561_v6  ;;  %v5425_v1 = vpack.c.bf16 %v1606_v60, %v1602_v59  ;;  %v1601_v2 = vld [vmem:[%s7199_s7 + $0x2b80] sm:$0xff]  ;;  %v1610_v7 = vld [vmem:[%s7199_s7 + $0x2bc8] sm:$0xff] }
 0x2e7   : > { %6410 = vmatprep.subr.bf16.mxu1 %v6409_v13  ;;  %v1572_v13 = vld [vmem:[%s7199_s7 + $0x2a98] sm:$0xff]  ;;  %v6431_v16 = vpack.c.bf16 %v1567_v10, %v1563_v8  ;;  %v1607_v6 = vld [vmem:[%s7199_s7 + $0x2bb0] sm:$0xff]  ;;  %v1614_v8 = vld [vmem:[%s7199_s7 + $0x2be8] sm:$0xff] }
 0x2e8   : > { %v1616_v10 = vld [vmem:[%s7199_s7 + $0x2bf8] sm:$0xff] }
 0x2e9   : > { %5388 = vmatpush1.bf16.msra.mxu0 %v5387_v19  ;;  %v1573_v19 = vld [vmem:[%s7199_s7 + $0x2aa0] sm:$0xff]  ;;  %v200_v48 = vld [vmem:[#allocation2 + $0xb8] sm:$0xff] }
 0x2ea   : > { %6412 = vmatpush1.bf16.msra.mxu1 %v6411_v20  ;;  %5390 = vmatprep.subr.bf16.mxu0 %v5389_v21  ;;  %v1571_v20 = vld [vmem:[%s7199_s7 + $0x2a90] sm:$0xff]  ;;  %v6433_v21 = vpack.c.bf16 %v1576_v14, %v1572_v13  ;;  %v5411_v27 = vpack.c.bf16 %v1573_v19, %v1569_v18  ;;  %v5429_v13 = vpack.c.bf16 %v1614_v8, %v1610_v7  ;;  %v1609_v14 = vld [vmem:[%s7199_s7 + $0x2bc0] sm:$0xff]  ;;  %v1618_v19 = vld [vmem:[%s7199_s7 + $0x2c08] sm:$0xff] }
 0x2eb   : > { %6414 = vmatprep.subr.bf16.mxu1 %v6413_v25  ;;  %v1580_v25 = vld [vmem:[%s7199_s7 + $0x2ad8] sm:$0xff]  ;;  %v6435_v28 = vpack.c.bf16 %v1575_v22, %v1571_v20  ;;  %v1615_v18 = vld [vmem:[%s7199_s7 + $0x2bf0] sm:$0xff]  ;;  %v1622_v20 = vld [vmem:[%s7199_s7 + $0x2c28] sm:$0xff] }
 0x2ec   : > { %v1624_v22 = vld [vmem:[%s7199_s7 + $0x2c38] sm:$0xff] }
 0x2ed   : > { %5392 = vmatpush1.bf16.msra.mxu0 %v5391_v31  ;;  %v1581_v31 = vld [vmem:[%s7199_s7 + $0x2ae0] sm:$0xff]  ;;  %v1644_v59 = vld [vmem:[%s7199_s7 + $0x2cd8] sm:$0xff] }
 0x2ee   : > { %6416 = vmatpush1.bf16.msra.mxu1 %v6415_v32  ;;  %5394 = vmatprep.subr.bf16.mxu0 %v5393_v33  ;;  %v1579_v32 = vld [vmem:[%s7199_s7 + $0x2ad0] sm:$0xff]  ;;  %v6437_v33 = vpack.c.bf16 %v1584_v26, %v1580_v25  ;;  %v5415_v39 = vpack.c.bf16 %v1581_v31, %v1577_v30  ;;  %v5433_v25 = vpack.c.bf16 %v1622_v20, %v1618_v19  ;;  %v1617_v26 = vld [vmem:[%s7199_s7 + $0x2c00] sm:$0xff]  ;;  %v1626_v31 = vld [vmem:[%s7199_s7 + $0x2c48] sm:$0xff] }
 0x2ef   : > { %6418 = vmatprep.subr.bf16.mxu1 %v6417_v37  ;;  %v1588_v37 = vld [vmem:[%s7199_s7 + $0x2b18] sm:$0xff]  ;;  %v6439_v40 = vpack.c.bf16 %v1583_v34, %v1579_v32  ;;  %v1623_v30 = vld [vmem:[%s7199_s7 + $0x2c30] sm:$0xff]  ;;  %v1630_v32 = vld [vmem:[%s7199_s7 + $0x2c68] sm:$0xff] }
 0x2f0   : > { %v1632_v34 = vld [vmem:[%s7199_s7 + $0x2c78] sm:$0xff] }
 0x2f1   : > { %5396 = vmatpush1.bf16.msra.mxu0 %v5395_v43  ;;  %v1589_v43 = vld [vmem:[%s7199_s7 + $0x2b20] sm:$0xff]  ;;  %v1648_v60 = vld [vmem:[%s7199_s7 + $0x2cf8] sm:$0xff] }
 0x2f2   : > { %6420 = vmatpush1.bf16.msra.mxu1 %v6419_v44  ;;  %5398 = vmatprep.subr.bf16.mxu0 %v5397_v45  ;;  %v1587_v44 = vld [vmem:[%s7199_s7 + $0x2b10] sm:$0xff]  ;;  %v6441_v45 = vpack.c.bf16 %v1592_v38, %v1588_v37  ;;  %v5419_v51 = vpack.c.bf16 %v1589_v43, %v1585_v42  ;;  %v5437_v38 = vpack.c.bf16 %v1630_v32, %v1626_v31  ;;  %v1652_v7 = vld [vmem:[%s7199_s7 + $0x2d18] sm:$0xff] }
 0x2f3   : > { %6422 = vmatprep.subr.bf16.mxu1 %v6421_v49  ;;  %v1596_v49 = vld [vmem:[%s7199_s7 + $0x2b58] sm:$0xff]  ;;  %v6443_v52 = vpack.c.bf16 %v1591_v46, %v1587_v44  ;;  %v1631_v43 = vld [vmem:[%s7199_s7 + $0x2c70] sm:$0xff]  ;;  %v1634_v44 = vld [vmem:[%s7199_s7 + $0x2c88] sm:$0xff] }
 0x2f4   : > { %v1636_v46 = vld [vmem:[%s7199_s7 + $0x2c98] sm:$0xff] }
 0x2f5   : > { %5400 = vmatpush1.bf16.msra.mxu0 %v5399_v55  ;;  %v1597_v55 = vld [vmem:[%s7199_s7 + $0x2b60] sm:$0xff]  ;;  %v1656_v8 = vld [vmem:[%s7199_s7 + $0x2d38] sm:$0xff] }
 0x2f6   : > { %6424 = vmatpush1.bf16.msra.mxu1 %v6423_v56  ;;  %5402 = vmatprep.subr.bf16.mxu0 %v5401_v57  ;;  %v1595_v56 = vld [vmem:[%s7199_s7 + $0x2b50] sm:$0xff]  ;;  %v6445_v57 = vpack.c.bf16 %v1600_v50, %v1596_v49  ;;  %v5423_v63 = vpack.c.bf16 %v1597_v55, %v1593_v54  ;;  %v6465_v55 = vpack.c.bf16 %v1640_v47, %v1636_v46  ;;  %v1660_v19 = vld [vmem:[%s7199_s7 + $0x2d58] sm:$0xff] }
 0x2f7   : > { %6426 = vmatprep.subr.bf16.mxu1 %v6425_v61  ;;  %v1604_v61 = vld [vmem:[%s7199_s7 + $0x2b98] sm:$0xff]  ;;  %v6447_v0 = vpack.c.bf16 %v1599_v58, %v1595_v56  ;;  %v1635_v54 = vld [vmem:[%s7199_s7 + $0x2c90] sm:$0xff]  ;;  %v1646_v58 = vld [vmem:[%s7199_s7 + $0x2ce8] sm:$0xff] }
 0x2f8   : > { %v1639_v56 = vld [vmem:[%s7199_s7 + $0x2cb0] sm:$0xff]  ;;  %v1664_v20 = vld [vmem:[%s7199_s7 + $0x2d78] sm:$0xff] }
 0x2f9   : > { %5404 = vmatpush1.bf16.msra.mxu0 %v5403_v3  ;;  %v1605_v3 = vld [vmem:[%s7199_s7 + $0x2ba0] sm:$0xff]  ;;  %v1668_v31 = vld [vmem:[%s7199_s7 + $0x2d98] sm:$0xff] }
 0x2fa   : > { %6428 = vmatpush1.bf16.msra.mxu1 %v6427_v4  ;;  %5406 = vmatprep.subr.bf16.mxu0 %v5405_v5  ;;  %v1603_v4 = vld [vmem:[%s7199_s7 + $0x2b90] sm:$0xff]  ;;  %v6449_v5 = vpack.c.bf16 %v1608_v62, %v1604_v61  ;;  %v5427_v11 = vpack.c.bf16 %v1605_v3, %v1601_v2  ;;  %v6467_v62 = vpack.c.bf16 %v1639_v56, %v1635_v54  ;;  %v1672_v32 = vld [vmem:[%s7199_s7 + $0x2db8] sm:$0xff]  ;;  %v1686_v54 = vld [vmem:[%s7199_s7 + $0x2e28] sm:$0xff] }
 0x2fb   : > { %6430 = vmatprep.subr.bf16.mxu1 %v6429_v9  ;;  %v1612_v9 = vld [vmem:[%s7199_s7 + $0x2bd8] sm:$0xff]  ;;  %v6451_v12 = vpack.c.bf16 %v1607_v6, %v1603_v4  ;;  %v1643_v2 = vld [vmem:[%s7199_s7 + $0x2cd0] sm:$0xff]  ;;  %v6469_v3 = vpack.c.bf16 %v1648_v60, %v1644_v59  ;;  %v1654_v6 = vld [vmem:[%s7199_s7 + $0x2d28] sm:$0xff] }
 0x2fc   : > { %v1647_v4 = vld [vmem:[%s7199_s7 + $0x2cf0] sm:$0xff]  ;;  %v1688_v56 = vld [vmem:[%s7199_s7 + $0x2e38] sm:$0xff]  ;;  %v1681_v60 = vld [vmem:[%s7199_s7 + $0x2e00] sm:$0xff] }
 0x2fd   : > { %5408 = vmatpush1.bf16.msra.mxu0 %v5407_v15  ;;  %v1613_v15 = vld [vmem:[%s7199_s7 + $0x2be0] sm:$0xff] }
 0x2fe   : > { %6432 = vmatpush1.bf16.msra.mxu1 %v6431_v16  ;;  %5410 = vmatprep.subr.bf16.mxu0 %v5409_v17  ;;  %v1611_v16 = vld [vmem:[%s7199_s7 + $0x2bd0] sm:$0xff]  ;;  %v6453_v17 = vpack.c.bf16 %v1616_v10, %v1612_v9  ;;  %v5431_v23 = vpack.c.bf16 %v1613_v15, %v1609_v14  ;;  %v6471_v10 = vpack.c.bf16 %v1647_v4, %v1643_v2  ;;  %v1694_v2 = vld [vmem:[%s7199_s7 + $0x2e68] sm:$0xff]  ;;  %v1696_v4 = vld [vmem:[%s7199_s7 + $0x2e78] sm:$0xff] }
 0x2ff   : > { %6434 = vmatprep.subr.bf16.mxu1 %v6433_v21  ;;  %v1620_v21 = vld [vmem:[%s7199_s7 + $0x2c18] sm:$0xff]  ;;  %v6455_v24 = vpack.c.bf16 %v1615_v18, %v1611_v16  ;;  %v1651_v14 = vld [vmem:[%s7199_s7 + $0x2d10] sm:$0xff]  ;;  %v6473_v15 = vpack.c.bf16 %v1656_v8, %v1652_v7  ;;  %v1662_v18 = vld [vmem:[%s7199_s7 + $0x2d68] sm:$0xff] }
 0x300   : > { %v1655_v16 = vld [vmem:[%s7199_s7 + $0x2d30] sm:$0xff]  ;;  %v1689_v8 = vld [vmem:[%s7199_s7 + $0x2e40] sm:$0xff] }
 0x301   : > { %5412 = vmatpush1.bf16.msra.mxu0 %v5411_v27  ;;  %v1621_v27 = vld [vmem:[%s7199_s7 + $0x2c20] sm:$0xff] }
 0x302   : > { %6436 = vmatpush1.bf16.msra.mxu1 %v6435_v28  ;;  %5414 = vmatprep.subr.bf16.mxu0 %v5413_v29  ;;  %v1619_v28 = vld [vmem:[%s7199_s7 + $0x2c10] sm:$0xff]  ;;  %v6457_v29 = vpack.c.bf16 %v1624_v22, %v1620_v21  ;;  %v5435_v36 = vpack.c.bf16 %v1621_v27, %v1617_v26  ;;  %v6475_v22 = vpack.c.bf16 %v1655_v16, %v1651_v14  ;;  %v1702_v14 = vld [vmem:[%s7199_s7 + $0x2ea8] sm:$0xff]  ;;  %v1704_v16 = vld [vmem:[%s7199_s7 + $0x2eb8] sm:$0xff] }
 0x303   : > { %6438 = vmatprep.subr.bf16.mxu1 %v6437_v33  ;;  %v1628_v33 = vld [vmem:[%s7199_s7 + $0x2c58] sm:$0xff]  ;;  %v6459_v37 = vpack.c.bf16 %v1623_v30, %v1619_v28  ;;  %v1659_v26 = vld [vmem:[%s7199_s7 + $0x2d50] sm:$0xff]  ;;  %v6477_v27 = vpack.c.bf16 %v1664_v20, %v1660_v19  ;;  %v1670_v30 = vld [vmem:[%s7199_s7 + $0x2da8] sm:$0xff] }
 0x304   : > { %v6461_v42 = vpack.c.bf16 %v1632_v34, %v1628_v33  ;;  %v1663_v28 = vld [vmem:[%s7199_s7 + $0x2d70] sm:$0xff]  ;;  %v1697_v20 = vld [vmem:[%s7199_s7 + $0x2e80] sm:$0xff] }
 0x305   : > { %5416 = vmatpush1.bf16.msra.mxu0 %v5415_v39  ;;  %v1625_v39 = vld [vmem:[%s7199_s7 + $0x2c40] sm:$0xff]  ;;  %v6479_v34 = vpack.c.bf16 %v1663_v28, %v1659_v26  ;;  %v1710_v26 = vld [vmem:[%s7199_s7 + $0x2ee8] sm:$0xff]  ;;  %v1712_v28 = vld [vmem:[%s7199_s7 + $0x2ef8] sm:$0xff] }
 0x306   : > { %6440 = vmatpush1.bf16.msra.mxu1 %v6439_v40  ;;  %5418 = vmatprep.subr.bf16.mxu0 %v5417_v41  ;;  %v1629_v40 = vld [vmem:[%s7199_s7 + $0x2c60] sm:$0xff]  ;;  %v1627_v41 = vld [vmem:[%s7199_s7 + $0x2c50] sm:$0xff] }
 0x307   : > { %6442 = vmatprep.subr.bf16.mxu1 %v6441_v45  ;;  %v1638_v45 = vld [vmem:[%s7199_s7 + $0x2ca8] sm:$0xff]  ;;  %v5439_v49 = vpack.c.bf16 %v1629_v40, %v1625_v39  ;;  %v6463_v50 = vpack.c.bf16 %v1631_v43, %v1627_v41  ;;  %v6481_v39 = vpack.c.bf16 %v1672_v32, %v1668_v31  ;;  %v1671_v40 = vld [vmem:[%s7199_s7 + $0x2db0] sm:$0xff]  ;;  %v1676_v43 = vld [vmem:[%s7199_s7 + $0x2dd8] sm:$0xff] }
 0x308   : > { %v1674_v41 = vld [vmem:[%s7199_s7 + $0x2dc8] sm:$0xff]  ;;  %v1705_v32 = vld [vmem:[%s7199_s7 + $0x2ec0] sm:$0xff] }
 0x309   : > { %5420 = vmatpush1.bf16.msra.mxu0 %v5419_v51  ;;  %v5441_v51 = vpack.c.bf16 %v1638_v45, %v1634_v44  ;;  %v1680_v44 = vld [vmem:[%s7199_s7 + $0x2df8] sm:$0xff] }
 0x30a   : > { %6444 = vmatpush1.bf16.msra.mxu1 %v6443_v52  ;;  %5422 = vmatprep.subr.bf16.mxu0 %v5421_v53  ;;  %v1633_v52 = vld [vmem:[%s7199_s7 + $0x2c80] sm:$0xff] }
 0x30b   : > { %6446 = vmatprep.subr.bf16.mxu1 %v6445_v57  ;;  %v1637_v53 = vld [vmem:[%s7199_s7 + $0x2ca0] sm:$0xff]  ;;  %v1642_v57 = vld [vmem:[%s7199_s7 + $0x2cc8] sm:$0xff] }
 0x30c   : > { %v5443_v61 = vpack.c.bf16 %v1637_v53, %v1633_v52  ;;  %v1679_v52 = vld [vmem:[%s7199_s7 + $0x2df0] sm:$0xff]  ;;  %v1682_v53 = vld [vmem:[%s7199_s7 + $0x2e08] sm:$0xff] }
 0x30d   : > { %5424 = vmatpush1.bf16.msra.mxu0 %v5423_v63  ;;  %v5445_v63 = vpack.c.bf16 %v1646_v58, %v1642_v57  ;;  %v5465_v59 = vpack.c.bf16 %v1686_v54, %v1682_v53 }
 0x30e   : > { %6448 = vmatpush1.bf16.msra.mxu1 %v6447_v0  ;;  %5426 = vmatprep.subr.bf16.mxu0 %v5425_v1  ;;  %v1641_v0 = vld [vmem:[%s7199_s7 + $0x2cc0] sm:$0xff] }
 0x30f   : > { %6450 = vmatprep.subr.bf16.mxu1 %v6449_v5  ;;  %v1645_v1 = vld [vmem:[%s7199_s7 + $0x2ce0] sm:$0xff]  ;;  %v1650_v5 = vld [vmem:[%s7199_s7 + $0x2d08] sm:$0xff] }
 0x310   : > { %v5447_v9 = vpack.c.bf16 %v1645_v1, %v1641_v0  ;;  %v1687_v0 = vld [vmem:[%s7199_s7 + $0x2e30] sm:$0xff]  ;;  %v1690_v1 = vld [vmem:[%s7199_s7 + $0x2e48] sm:$0xff] }
 0x311   : > { %5428 = vmatpush1.bf16.msra.mxu0 %v5427_v11  ;;  %v5449_v11 = vpack.c.bf16 %v1654_v6, %v1650_v5  ;;  %v5469_v7 = vpack.c.bf16 %v1694_v2, %v1690_v1 }
 0x312   : > { %6452 = vmatpush1.bf16.msra.mxu1 %v6451_v12  ;;  %5430 = vmatprep.subr.bf16.mxu0 %v5429_v13  ;;  %v1649_v12 = vld [vmem:[%s7199_s7 + $0x2d00] sm:$0xff] }
 0x313   : > { %6454 = vmatprep.subr.bf16.mxu1 %v6453_v17  ;;  %v1653_v13 = vld [vmem:[%s7199_s7 + $0x2d20] sm:$0xff]  ;;  %v1658_v17 = vld [vmem:[%s7199_s7 + $0x2d48] sm:$0xff] }
 0x314   : > { %v5451_v21 = vpack.c.bf16 %v1653_v13, %v1649_v12  ;;  %v1695_v12 = vld [vmem:[%s7199_s7 + $0x2e70] sm:$0xff]  ;;  %v1698_v13 = vld [vmem:[%s7199_s7 + $0x2e88] sm:$0xff] }
 0x315   : > { %5432 = vmatpush1.bf16.msra.mxu0 %v5431_v23  ;;  %v5453_v23 = vpack.c.bf16 %v1662_v18, %v1658_v17  ;;  %v5473_v19 = vpack.c.bf16 %v1702_v14, %v1698_v13 }
 0x316   : > { %6456 = vmatpush1.bf16.msra.mxu1 %v6455_v24  ;;  %5434 = vmatprep.subr.bf16.mxu0 %v5433_v25  ;;  %v1657_v24 = vld [vmem:[%s7199_s7 + $0x2d40] sm:$0xff] }
 0x317   : > { %6458 = vmatprep.subr.bf16.mxu1 %v6457_v29  ;;  %v1661_v25 = vld [vmem:[%s7199_s7 + $0x2d60] sm:$0xff]  ;;  %v1666_v29 = vld [vmem:[%s7199_s7 + $0x2d88] sm:$0xff] }
 0x318   : > { %3032 = vmatmul.mubr.f32.vlgmr.msra.gmra.mrb[0].mxu0 %v197_v35  ;;  %v5455_v33 = vpack.c.bf16 %v1661_v25, %v1657_v24  ;;  %v1703_v24 = vld [vmem:[%s7199_s7 + $0x2eb0] sm:$0xff]  ;;  %v1706_v25 = vld [vmem:[%s7199_s7 + $0x2ec8] sm:$0xff] }
 0x319   : > { %5436 = vmatpush1.bf16.msra.mxu0 %v5435_v36  ;;  %4168 = vmatmul.mubr.f32.vlgmr.msra.gmra.mrb[0].mxu1 %v197_v35  ;;  %v5457_v35 = vpack.c.bf16 %v1670_v30, %v1666_v29  ;;  %v1665_v36 = vld [vmem:[%s7199_s7 + $0x2d80] sm:$0xff]  ;;  %v5477_v31 = vpack.c.bf16 %v1710_v26, %v1706_v25 }
 0x31a   : > { %6460 = vmatpush1.bf16.msra.mxu1 %v6459_v37  ;;  %5438 = vmatprep.subr.bf16.mxu0 %v5437_v38  ;;  %v1669_v37 = vld [vmem:[%s7199_s7 + $0x2da0] sm:$0xff]  ;;  %v1667_v38 = vld [vmem:[%s7199_s7 + $0x2d90] sm:$0xff] }
 0x31b   : > { %6462 = vmatprep.subr.bf16.mxu1 %v6461_v42  ;;  %3102 = vmatprep.mubr.f32.mxu0 %v200_v48  ;;  %v1678_v42 = vld [vmem:[%s7199_s7 + $0x2de8] sm:$0xff]  ;;  %v5459_v45 = vpack.c.bf16 %v1669_v37, %v1665_v36  ;;  %v6483_v46 = vpack.c.bf16 %v1671_v40, %v1667_v38  ;;  %v1711_v36 = vld [vmem:[%s7199_s7 + $0x2ef0] sm:$0xff]  ;;  %v1720_v40 = vld [vmem:[%s7199_s7 + $0x2f38] sm:$0xff] }
 0x31c   : > { %4238 = vmatprep.mubr.f32.mxu1 %v200_v48  ;;  %v5461_v47 = vpack.c.bf16 %v1678_v42, %v1674_v41  ;;  %v1673_v48 = vld [vmem:[%s7199_s7 + $0x2dc0] sm:$0xff]  ;;  %v1714_v37 = vld [vmem:[%s7199_s7 + $0x2f08] sm:$0xff] }
 0x31d   : > { %5440 = vmatpush1.bf16.msra.mxu0 %v5439_v49  ;;  %v1677_v49 = vld [vmem:[%s7199_s7 + $0x2de0] sm:$0xff]  ;;  %v1718_v38 = vld [vmem:[%s7199_s7 + $0x2f28] sm:$0xff] }
 0x31e   : > { %6464 = vmatpush1.bf16.msra.mxu1 %v6463_v50  ;;  %5442 = vmatprep.subr.bf16.mxu0 %v5441_v51  ;;  %v1675_v50 = vld [vmem:[%s7199_s7 + $0x2dd0] sm:$0xff]  ;;  %v6485_v51 = vpack.c.bf16 %v1680_v44, %v1676_v43  ;;  %v5463_v57 = vpack.c.bf16 %v1677_v49, %v1673_v48  ;;  %v5481_v43 = vpack.c.bf16 %v1718_v38, %v1714_v37  ;;  %v1713_v44 = vld [vmem:[%s7199_s7 + $0x2f00] sm:$0xff]  ;;  %v1722_v49 = vld [vmem:[%s7199_s7 + $0x2f48] sm:$0xff] }
 0x31f   : > { %6466 = vmatprep.subr.bf16.mxu1 %v6465_v55  ;;  %v1684_v55 = vld [vmem:[%s7199_s7 + $0x2e18] sm:$0xff]  ;;  %v6487_v58 = vpack.c.bf16 %v1679_v52, %v1675_v50  ;;  %v1719_v48 = vld [vmem:[%s7199_s7 + $0x2f30] sm:$0xff]  ;;  %v1726_v50 = vld [vmem:[%s7199_s7 + $0x2f68] sm:$0xff] }
 0x320   : > { %v1728_v52 = vld [vmem:[%s7199_s7 + $0x2f78] sm:$0xff]  ;;  %v199_v37 = vld [vmem:[#allocation2 + $0xb0] sm:$0xff] }
 0x321   : > { %5444 = vmatpush1.bf16.msra.mxu0 %v5443_v61  ;;  %v1685_v61 = vld [vmem:[%s7199_s7 + $0x2e20] sm:$0xff] }
 0x322   : > { %6468 = vmatpush1.bf16.msra.mxu1 %v6467_v62  ;;  %5446 = vmatprep.subr.bf16.mxu0 %v5445_v63  ;;  %v1683_v62 = vld [vmem:[%s7199_s7 + $0x2e10] sm:$0xff]  ;;  %v6489_v63 = vpack.c.bf16 %v1688_v56, %v1684_v55  ;;  %v5467_v5 = vpack.c.bf16 %v1685_v61, %v1681_v60  ;;  %v5485_v55 = vpack.c.bf16 %v1726_v50, %v1722_v49  ;;  %v1721_v56 = vld [vmem:[%s7199_s7 + $0x2f40] sm:$0xff]  ;;  %v1730_v61 = vld [vmem:[%s7199_s7 + $0x2f88] sm:$0xff] }
 0x323   : > { %6470 = vmatprep.subr.bf16.mxu1 %v6469_v3  ;;  %v1692_v3 = vld [vmem:[%s7199_s7 + $0x2e58] sm:$0xff]  ;;  %v6491_v6 = vpack.c.bf16 %v1687_v0, %v1683_v62  ;;  %v1727_v60 = vld [vmem:[%s7199_s7 + $0x2f70] sm:$0xff]  ;;  %v1734_v62 = vld [vmem:[%s7199_s7 + $0x2fa8] sm:$0xff] }
 0x324   : > { %v1736_v0 = vld [vmem:[%s7199_s7 + $0x2fb8] sm:$0xff]  ;;  %v202_v50 = vld [vmem:[#allocation2 + $0xc8] sm:$0xff] }
 0x325   : > { %5448 = vmatpush1.bf16.msra.mxu0 %v5447_v9  ;;  %v1693_v9 = vld [vmem:[%s7199_s7 + $0x2e60] sm:$0xff]  ;;  %v1768_v49 = vld [vmem:[%s7199_s7 + $0x30b8] sm:$0xff] }
 0x326   : > { %6472 = vmatpush1.bf16.msra.mxu1 %v6471_v10  ;;  %5450 = vmatprep.subr.bf16.mxu0 %v5449_v11  ;;  %v1691_v10 = vld [vmem:[%s7199_s7 + $0x2e50] sm:$0xff]  ;;  %v6493_v11 = vpack.c.bf16 %v1696_v4, %v1692_v3  ;;  %v5471_v17 = vpack.c.bf16 %v1693_v9, %v1689_v8  ;;  %v5489_v3 = vpack.c.bf16 %v1734_v62, %v1730_v61  ;;  %v1729_v4 = vld [vmem:[%s7199_s7 + $0x2f80] sm:$0xff]  ;;  %v1738_v9 = vld [vmem:[%s7199_s7 + $0x2fc8] sm:$0xff] }
 0x327   : > { %6474 = vmatprep.subr.bf16.mxu1 %v6473_v15  ;;  %v1700_v15 = vld [vmem:[%s7199_s7 + $0x2e98] sm:$0xff]  ;;  %v6495_v18 = vpack.c.bf16 %v1695_v12, %v1691_v10  ;;  %v1735_v8 = vld [vmem:[%s7199_s7 + $0x2fb0] sm:$0xff]  ;;  %v1742_v10 = vld [vmem:[%s7199_s7 + $0x2fe8] sm:$0xff] }
 0x328   : > { %v1744_v12 = vld [vmem:[%s7199_s7 + $0x2ff8] sm:$0xff] }
 0x329   : > { %5452 = vmatpush1.bf16.msra.mxu0 %v5451_v21  ;;  %v1701_v21 = vld [vmem:[%s7199_s7 + $0x2ea0] sm:$0xff]  ;;  %v1772_v61 = vld [vmem:[%s7199_s7 + $0x30d8] sm:$0xff] }
 0x32a   : > { %6476 = vmatpush1.bf16.msra.mxu1 %v6475_v22  ;;  %5454 = vmatprep.subr.bf16.mxu0 %v5453_v23  ;;  %v1699_v22 = vld [vmem:[%s7199_s7 + $0x2e90] sm:$0xff]  ;;  %v6497_v23 = vpack.c.bf16 %v1704_v16, %v1700_v15  ;;  %v5475_v29 = vpack.c.bf16 %v1701_v21, %v1697_v20  ;;  %v5493_v15 = vpack.c.bf16 %v1742_v10, %v1738_v9  ;;  %v1737_v16 = vld [vmem:[%s7199_s7 + $0x2fc0] sm:$0xff]  ;;  %v1746_v21 = vld [vmem:[%s7199_s7 + $0x3008] sm:$0xff] }
 0x32b   : > { %6478 = vmatprep.subr.bf16.mxu1 %v6477_v27  ;;  %v1708_v27 = vld [vmem:[%s7199_s7 + $0x2ed8] sm:$0xff]  ;;  %v6499_v30 = vpack.c.bf16 %v1703_v24, %v1699_v22  ;;  %v1743_v20 = vld [vmem:[%s7199_s7 + $0x2ff0] sm:$0xff]  ;;  %v1750_v22 = vld [vmem:[%s7199_s7 + $0x3028] sm:$0xff] }
 0x32c   : > { %v1752_v24 = vld [vmem:[%s7199_s7 + $0x3038] sm:$0xff] }
 0x32d   : > { %5456 = vmatpush1.bf16.msra.mxu0 %v5455_v33  ;;  %v1709_v33 = vld [vmem:[%s7199_s7 + $0x2ee0] sm:$0xff]  ;;  %v1776_v62 = vld [vmem:[%s7199_s7 + $0x30f8] sm:$0xff] }
 0x32e   : > { %6480 = vmatpush1.bf16.msra.mxu1 %v6479_v34  ;;  %5458 = vmatprep.subr.bf16.mxu0 %v5457_v35  ;;  %v1707_v34 = vld [vmem:[%s7199_s7 + $0x2ed0] sm:$0xff]  ;;  %v6501_v35 = vpack.c.bf16 %v1712_v28, %v1708_v27  ;;  %v5479_v41 = vpack.c.bf16 %v1709_v33, %v1705_v32  ;;  %v5497_v27 = vpack.c.bf16 %v1750_v22, %v1746_v21  ;;  %v1745_v28 = vld [vmem:[%s7199_s7 + $0x3000] sm:$0xff]  ;;  %v1754_v33 = vld [vmem:[%s7199_s7 + $0x3048] sm:$0xff] }
 0x32f   : > { %6482 = vmatprep.subr.bf16.mxu1 %v6481_v39  ;;  %v1716_v39 = vld [vmem:[%s7199_s7 + $0x2f18] sm:$0xff]  ;;  %v6503_v42 = vpack.c.bf16 %v1711_v36, %v1707_v34  ;;  %v1751_v32 = vld [vmem:[%s7199_s7 + $0x3030] sm:$0xff]  ;;  %v1758_v34 = vld [vmem:[%s7199_s7 + $0x3068] sm:$0xff] }
 0x330   : > { %v1760_v36 = vld [vmem:[%s7199_s7 + $0x3078] sm:$0xff] }
 0x331   : > { %5460 = vmatpush1.bf16.msra.mxu0 %v5459_v45  ;;  %v1717_v45 = vld [vmem:[%s7199_s7 + $0x2f20] sm:$0xff]  ;;  %v1780_v9 = vld [vmem:[%s7199_s7 + $0x3118] sm:$0xff] }
 0x332   : > { %6484 = vmatpush1.bf16.msra.mxu1 %v6483_v46  ;;  %5462 = vmatprep.subr.bf16.mxu0 %v5461_v47  ;;  %v1715_v46 = vld [vmem:[%s7199_s7 + $0x2f10] sm:$0xff]  ;;  %v6505_v47 = vpack.c.bf16 %v1720_v40, %v1716_v39  ;;  %v5483_v53 = vpack.c.bf16 %v1717_v45, %v1713_v44  ;;  %v5501_v40 = vpack.c.bf16 %v1758_v34, %v1754_v33  ;;  %v1784_v10 = vld [vmem:[%s7199_s7 + $0x3138] sm:$0xff] }
 0x333   : > { %6486 = vmatprep.subr.bf16.mxu1 %v6485_v51  ;;  %v1724_v51 = vld [vmem:[%s7199_s7 + $0x2f58] sm:$0xff]  ;;  %v6507_v54 = vpack.c.bf16 %v1719_v48, %v1715_v46  ;;  %v1759_v45 = vld [vmem:[%s7199_s7 + $0x3070] sm:$0xff]  ;;  %v1762_v46 = vld [vmem:[%s7199_s7 + $0x3088] sm:$0xff] }
 0x334   : > { %v1764_v48 = vld [vmem:[%s7199_s7 + $0x3098] sm:$0xff] }
 0x335   : > { %5464 = vmatpush1.bf16.msra.mxu0 %v5463_v57  ;;  %v1725_v57 = vld [vmem:[%s7199_s7 + $0x2f60] sm:$0xff]  ;;  %v1788_v21 = vld [vmem:[%s7199_s7 + $0x3158] sm:$0xff] }
 0x336   : > { %6488 = vmatpush1.bf16.msra.mxu1 %v6487_v58  ;;  %5466 = vmatprep.subr.bf16.mxu0 %v5465_v59  ;;  %v1723_v58 = vld [vmem:[%s7199_s7 + $0x2f50] sm:$0xff]  ;;  %v6509_v59 = vpack.c.bf16 %v1728_v52, %v1724_v51  ;;  %v5487_v1 = vpack.c.bf16 %v1725_v57, %v1721_v56  ;;  %v6529_v57 = vpack.c.bf16 %v1768_v49, %v1764_v48  ;;  %v1792_v22 = vld [vmem:[%s7199_s7 + $0x3178] sm:$0xff] }
 0x337   : > { %6490 = vmatprep.subr.bf16.mxu1 %v6489_v63  ;;  %v1732_v63 = vld [vmem:[%s7199_s7 + $0x2f98] sm:$0xff]  ;;  %v6511_v2 = vpack.c.bf16 %v1727_v60, %v1723_v58  ;;  %v1763_v56 = vld [vmem:[%s7199_s7 + $0x3090] sm:$0xff]  ;;  %v1774_v60 = vld [vmem:[%s7199_s7 + $0x30e8] sm:$0xff] }
 0x338   : > { %v1767_v58 = vld [vmem:[%s7199_s7 + $0x30b0] sm:$0xff]  ;;  %v1796_v33 = vld [vmem:[%s7199_s7 + $0x3198] sm:$0xff] }
 0x339   : > { %5468 = vmatpush1.bf16.msra.mxu0 %v5467_v5  ;;  %v1733_v5 = vld [vmem:[%s7199_s7 + $0x2fa0] sm:$0xff]  ;;  %v1800_v34 = vld [vmem:[%s7199_s7 + $0x31b8] sm:$0xff] }
 0x33a   : > { %6492 = vmatpush1.bf16.msra.mxu1 %v6491_v6  ;;  %5470 = vmatprep.subr.bf16.mxu0 %v5469_v7  ;;  %v1731_v6 = vld [vmem:[%s7199_s7 + $0x2f90] sm:$0xff]  ;;  %v6513_v7 = vpack.c.bf16 %v1736_v0, %v1732_v63  ;;  %v5491_v13 = vpack.c.bf16 %v1733_v5, %v1729_v4  ;;  %v6531_v0 = vpack.c.bf16 %v1767_v58, %v1763_v56  ;;  %v1814_v56 = vld [vmem:[%s7199_s7 + $0x3228] sm:$0xff]  ;;  %v1816_v58 = vld [vmem:[%s7199_s7 + $0x3238] sm:$0xff] }
 0x33b   : > { %6494 = vmatprep.subr.bf16.mxu1 %v6493_v11  ;;  %v1740_v11 = vld [vmem:[%s7199_s7 + $0x2fd8] sm:$0xff]  ;;  %v6515_v14 = vpack.c.bf16 %v1735_v8, %v1731_v6  ;;  %v1771_v4 = vld [vmem:[%s7199_s7 + $0x30d0] sm:$0xff]  ;;  %v6533_v5 = vpack.c.bf16 %v1776_v62, %v1772_v61  ;;  %v1782_v8 = vld [vmem:[%s7199_s7 + $0x3128] sm:$0xff] }
 0x33c   : > { %v1775_v6 = vld [vmem:[%s7199_s7 + $0x30f0] sm:$0xff]  ;;  %v1809_v62 = vld [vmem:[%s7199_s7 + $0x3200] sm:$0xff] }
 0x33d   : > { %5472 = vmatpush1.bf16.msra.mxu0 %v5471_v17  ;;  %v1741_v17 = vld [vmem:[%s7199_s7 + $0x2fe0] sm:$0xff] }
 0x33e   : > { %6496 = vmatpush1.bf16.msra.mxu1 %v6495_v18  ;;  %5474 = vmatprep.subr.bf16.mxu0 %v5473_v19  ;;  %v1739_v18 = vld [vmem:[%s7199_s7 + $0x2fd0] sm:$0xff]  ;;  %v6517_v19 = vpack.c.bf16 %v1744_v12, %v1740_v11  ;;  %v5495_v25 = vpack.c.bf16 %v1741_v17, %v1737_v16  ;;  %v6535_v12 = vpack.c.bf16 %v1775_v6, %v1771_v4  ;;  %v1822_v4 = vld [vmem:[%s7199_s7 + $0x3268] sm:$0xff]  ;;  %v1824_v6 = vld [vmem:[%s7199_s7 + $0x3278] sm:$0xff] }
 0x33f   : > { %6498 = vmatprep.subr.bf16.mxu1 %v6497_v23  ;;  %v1748_v23 = vld [vmem:[%s7199_s7 + $0x3018] sm:$0xff]  ;;  %v6519_v26 = vpack.c.bf16 %v1743_v20, %v1739_v18  ;;  %v1779_v16 = vld [vmem:[%s7199_s7 + $0x3110] sm:$0xff]  ;;  %v6537_v17 = vpack.c.bf16 %v1784_v10, %v1780_v9  ;;  %v1790_v20 = vld [vmem:[%s7199_s7 + $0x3168] sm:$0xff] }
 0x340   : > { %v1783_v18 = vld [vmem:[%s7199_s7 + $0x3130] sm:$0xff]  ;;  %v1817_v10 = vld [vmem:[%s7199_s7 + $0x3240] sm:$0xff] }
 0x341   : > { %5476 = vmatpush1.bf16.msra.mxu0 %v5475_v29  ;;  %v1749_v29 = vld [vmem:[%s7199_s7 + $0x3020] sm:$0xff] }
 0x342   : > { %6500 = vmatpush1.bf16.msra.mxu1 %v6499_v30  ;;  %5478 = vmatprep.subr.bf16.mxu0 %v5477_v31  ;;  %v1747_v30 = vld [vmem:[%s7199_s7 + $0x3010] sm:$0xff]  ;;  %v6521_v31 = vpack.c.bf16 %v1752_v24, %v1748_v23  ;;  %v5499_v38 = vpack.c.bf16 %v1749_v29, %v1745_v28  ;;  %v6539_v24 = vpack.c.bf16 %v1783_v18, %v1779_v16  ;;  %v1830_v16 = vld [vmem:[%s7199_s7 + $0x32a8] sm:$0xff]  ;;  %v1832_v18 = vld [vmem:[%s7199_s7 + $0x32b8] sm:$0xff] }
 0x343   : > { %6502 = vmatprep.subr.bf16.mxu1 %v6501_v35  ;;  %v1756_v35 = vld [vmem:[%s7199_s7 + $0x3058] sm:$0xff]  ;;  %v6523_v39 = vpack.c.bf16 %v1751_v32, %v1747_v30  ;;  %v1787_v28 = vld [vmem:[%s7199_s7 + $0x3150] sm:$0xff]  ;;  %v6541_v29 = vpack.c.bf16 %v1792_v22, %v1788_v21  ;;  %v1798_v32 = vld [vmem:[%s7199_s7 + $0x31a8] sm:$0xff] }
 0x344   : > { %v6525_v44 = vpack.c.bf16 %v1760_v36, %v1756_v35  ;;  %v1791_v30 = vld [vmem:[%s7199_s7 + $0x3170] sm:$0xff]  ;;  %v1825_v22 = vld [vmem:[%s7199_s7 + $0x3280] sm:$0xff] }
 0x345   : > { %5480 = vmatpush1.bf16.msra.mxu0 %v5479_v41  ;;  %v1753_v41 = vld [vmem:[%s7199_s7 + $0x3040] sm:$0xff]  ;;  %v6543_v36 = vpack.c.bf16 %v1791_v30, %v1787_v28  ;;  %v1838_v28 = vld [vmem:[%s7199_s7 + $0x32e8] sm:$0xff]  ;;  %v1840_v30 = vld [vmem:[%s7199_s7 + $0x32f8] sm:$0xff] }
 0x346   : > { %6504 = vmatpush1.bf16.msra.mxu1 %v6503_v42  ;;  %5482 = vmatprep.subr.bf16.mxu0 %v5481_v43  ;;  %v1757_v42 = vld [vmem:[%s7199_s7 + $0x3060] sm:$0xff]  ;;  %v1755_v43 = vld [vmem:[%s7199_s7 + $0x3050] sm:$0xff] }
 0x347   : > { %6506 = vmatprep.subr.bf16.mxu1 %v6505_v47  ;;  %v1766_v47 = vld [vmem:[%s7199_s7 + $0x30a8] sm:$0xff]  ;;  %v5503_v51 = vpack.c.bf16 %v1757_v42, %v1753_v41  ;;  %v6527_v52 = vpack.c.bf16 %v1759_v45, %v1755_v43  ;;  %v6545_v41 = vpack.c.bf16 %v1800_v34, %v1796_v33  ;;  %v1799_v42 = vld [vmem:[%s7199_s7 + $0x31b0] sm:$0xff]  ;;  %v1804_v45 = vld [vmem:[%s7199_s7 + $0x31d8] sm:$0xff] }
 0x348   : > { %v1802_v43 = vld [vmem:[%s7199_s7 + $0x31c8] sm:$0xff]  ;;  %v1833_v34 = vld [vmem:[%s7199_s7 + $0x32c0] sm:$0xff] }
 0x349   : > { %5484 = vmatpush1.bf16.msra.mxu0 %v5483_v53  ;;  %v5505_v53 = vpack.c.bf16 %v1766_v47, %v1762_v46  ;;  %v1808_v46 = vld [vmem:[%s7199_s7 + $0x31f8] sm:$0xff] }
 0x34a   : > { %6508 = vmatpush1.bf16.msra.mxu1 %v6507_v54  ;;  %5486 = vmatprep.subr.bf16.mxu0 %v5485_v55  ;;  %v1761_v54 = vld [vmem:[%s7199_s7 + $0x3080] sm:$0xff] }
 0x34b   : > { %6510 = vmatprep.subr.bf16.mxu1 %v6509_v59  ;;  %v1765_v55 = vld [vmem:[%s7199_s7 + $0x30a0] sm:$0xff]  ;;  %v1770_v59 = vld [vmem:[%s7199_s7 + $0x30c8] sm:$0xff] }
 0x34c   : > { %v5507_v63 = vpack.c.bf16 %v1765_v55, %v1761_v54  ;;  %v1807_v54 = vld [vmem:[%s7199_s7 + $0x31f0] sm:$0xff]  ;;  %v1810_v55 = vld [vmem:[%s7199_s7 + $0x3208] sm:$0xff] }
 0x34d   : > { %5488 = vmatpush1.bf16.msra.mxu0 %v5487_v1  ;;  %v5509_v1 = vpack.c.bf16 %v1774_v60, %v1770_v59  ;;  %v5529_v61 = vpack.c.bf16 %v1814_v56, %v1810_v55 }
 0x34e   : > { %6512 = vmatpush1.bf16.msra.mxu1 %v6511_v2  ;;  %5490 = vmatprep.subr.bf16.mxu0 %v5489_v3  ;;  %v1769_v2 = vld [vmem:[%s7199_s7 + $0x30c0] sm:$0xff] }
 0x34f   : > { %6514 = vmatprep.subr.bf16.mxu1 %v6513_v7  ;;  %v1773_v3 = vld [vmem:[%s7199_s7 + $0x30e0] sm:$0xff]  ;;  %v1778_v7 = vld [vmem:[%s7199_s7 + $0x3108] sm:$0xff] }
 0x350   : > { %v5511_v11 = vpack.c.bf16 %v1773_v3, %v1769_v2  ;;  %v1815_v2 = vld [vmem:[%s7199_s7 + $0x3230] sm:$0xff]  ;;  %v1818_v3 = vld [vmem:[%s7199_s7 + $0x3248] sm:$0xff] }
 0x351   : > { %5492 = vmatpush1.bf16.msra.mxu0 %v5491_v13  ;;  %v5513_v13 = vpack.c.bf16 %v1782_v8, %v1778_v7  ;;  %v5533_v9 = vpack.c.bf16 %v1822_v4, %v1818_v3 }
 0x352   : > { %6516 = vmatpush1.bf16.msra.mxu1 %v6515_v14  ;;  %5494 = vmatprep.subr.bf16.mxu0 %v5493_v15  ;;  %v1777_v14 = vld [vmem:[%s7199_s7 + $0x3100] sm:$0xff] }
 0x353   : > { %6518 = vmatprep.subr.bf16.mxu1 %v6517_v19  ;;  %v1781_v15 = vld [vmem:[%s7199_s7 + $0x3120] sm:$0xff]  ;;  %v1786_v19 = vld [vmem:[%s7199_s7 + $0x3148] sm:$0xff] }
 0x354   : > { %v5515_v23 = vpack.c.bf16 %v1781_v15, %v1777_v14  ;;  %v1823_v14 = vld [vmem:[%s7199_s7 + $0x3270] sm:$0xff]  ;;  %v1826_v15 = vld [vmem:[%s7199_s7 + $0x3288] sm:$0xff] }
 0x355   : > { %5496 = vmatpush1.bf16.msra.mxu0 %v5495_v25  ;;  %v5517_v25 = vpack.c.bf16 %v1790_v20, %v1786_v19  ;;  %v5537_v21 = vpack.c.bf16 %v1830_v16, %v1826_v15 }
 0x356   : > { %6520 = vmatpush1.bf16.msra.mxu1 %v6519_v26  ;;  %5498 = vmatprep.subr.bf16.mxu0 %v5497_v27  ;;  %v1785_v26 = vld [vmem:[%s7199_s7 + $0x3140] sm:$0xff] }
 0x357   : > { %6522 = vmatprep.subr.bf16.mxu1 %v6521_v31  ;;  %v1789_v27 = vld [vmem:[%s7199_s7 + $0x3160] sm:$0xff]  ;;  %v1794_v31 = vld [vmem:[%s7199_s7 + $0x3188] sm:$0xff] }
 0x358   : > { %3103 = vmatmul.mubr.f32.vlgmr.msra.gmra.mrb[0].mxu0 %v199_v37  ;;  %v5519_v35 = vpack.c.bf16 %v1789_v27, %v1785_v26  ;;  %v1831_v26 = vld [vmem:[%s7199_s7 + $0x32b0] sm:$0xff]  ;;  %v1834_v27 = vld [vmem:[%s7199_s7 + $0x32c8] sm:$0xff] }
 0x359   : > { %5500 = vmatpush1.bf16.msra.mxu0 %v5499_v38  ;;  %4239 = vmatmul.mubr.f32.vlgmr.msra.gmra.mrb[0].mxu1 %v199_v37  ;;  %v5521_v37 = vpack.c.bf16 %v1798_v32, %v1794_v31  ;;  %v1793_v38 = vld [vmem:[%s7199_s7 + $0x3180] sm:$0xff]  ;;  %v5541_v33 = vpack.c.bf16 %v1838_v28, %v1834_v27 }
 0x35a   : > { %6524 = vmatpush1.bf16.msra.mxu1 %v6523_v39  ;;  %5502 = vmatprep.subr.bf16.mxu0 %v5501_v40  ;;  %v1797_v39 = vld [vmem:[%s7199_s7 + $0x31a0] sm:$0xff]  ;;  %v1795_v40 = vld [vmem:[%s7199_s7 + $0x3190] sm:$0xff] }
 0x35b   : > { %6526 = vmatprep.subr.bf16.mxu1 %v6525_v44  ;;  %3173 = vmatprep.mubr.f32.mxu0 %v202_v50  ;;  %v1806_v44 = vld [vmem:[%s7199_s7 + $0x31e8] sm:$0xff]  ;;  %v5523_v47 = vpack.c.bf16 %v1797_v39, %v1793_v38  ;;  %v6547_v48 = vpack.c.bf16 %v1799_v42, %v1795_v40  ;;  %v1839_v38 = vld [vmem:[%s7199_s7 + $0x32f0] sm:$0xff]  ;;  %v1848_v42 = vld [vmem:[%s7199_s7 + $0x3338] sm:$0xff] }
 0x35c   : > { %4309 = vmatprep.mubr.f32.mxu1 %v202_v50  ;;  %v5525_v49 = vpack.c.bf16 %v1806_v44, %v1802_v43  ;;  %v1801_v50 = vld [vmem:[%s7199_s7 + $0x31c0] sm:$0xff]  ;;  %v1842_v39 = vld [vmem:[%s7199_s7 + $0x3308] sm:$0xff] }
 0x35d   : > { %5504 = vmatpush1.bf16.msra.mxu0 %v5503_v51  ;;  %v1805_v51 = vld [vmem:[%s7199_s7 + $0x31e0] sm:$0xff]  ;;  %v1846_v40 = vld [vmem:[%s7199_s7 + $0x3328] sm:$0xff] }
 0x35e   : > { %6528 = vmatpush1.bf16.msra.mxu1 %v6527_v52  ;;  %5506 = vmatprep.subr.bf16.mxu0 %v5505_v53  ;;  %v1803_v52 = vld [vmem:[%s7199_s7 + $0x31d0] sm:$0xff]  ;;  %v6549_v53 = vpack.c.bf16 %v1808_v46, %v1804_v45  ;;  %v5527_v59 = vpack.c.bf16 %v1805_v51, %v1801_v50  ;;  %v5545_v45 = vpack.c.bf16 %v1846_v40, %v1842_v39  ;;  %v1841_v46 = vld [vmem:[%s7199_s7 + $0x3300] sm:$0xff]  ;;  %v1850_v51 = vld [vmem:[%s7199_s7 + $0x3348] sm:$0xff] }
 0x35f   : > { %6530 = vmatprep.subr.bf16.mxu1 %v6529_v57  ;;  %v1812_v57 = vld [vmem:[%s7199_s7 + $0x3218] sm:$0xff]  ;;  %v6551_v60 = vpack.c.bf16 %v1807_v54, %v1803_v52  ;;  %v1847_v50 = vld [vmem:[%s7199_s7 + $0x3330] sm:$0xff]  ;;  %v1854_v52 = vld [vmem:[%s7199_s7 + $0x3368] sm:$0xff] }
 0x360   : > { %v1856_v54 = vld [vmem:[%s7199_s7 + $0x3378] sm:$0xff]  ;;  %v201_v39 = vld [vmem:[#allocation2 + $0xc0] sm:$0xff] }
 0x361   : > { %5508 = vmatpush1.bf16.msra.mxu0 %v5507_v63  ;;  %v1813_v63 = vld [vmem:[%s7199_s7 + $0x3220] sm:$0xff] }
 0x362   : > { %6532 = vmatpush1.bf16.msra.mxu1 %v6531_v0  ;;  %5510 = vmatprep.subr.bf16.mxu0 %v5509_v1  ;;  %v1811_v0 = vld [vmem:[%s7199_s7 + $0x3210] sm:$0xff]  ;;  %v6553_v1 = vpack.c.bf16 %v1816_v58, %v1812_v57  ;;  %v5531_v7 = vpack.c.bf16 %v1813_v63, %v1809_v62  ;;  %v5549_v57 = vpack.c.bf16 %v1854_v52, %v1850_v51  ;;  %v1849_v58 = vld [vmem:[%s7199_s7 + $0x3340] sm:$0xff]  ;;  %v1858_v63 = vld [vmem:[%s7199_s7 + $0x3388] sm:$0xff] }
 0x363   : > { %6534 = vmatprep.subr.bf16.mxu1 %v6533_v5  ;;  %v1820_v5 = vld [vmem:[%s7199_s7 + $0x3258] sm:$0xff]  ;;  %v6555_v8 = vpack.c.bf16 %v1815_v2, %v1811_v0  ;;  %v1855_v62 = vld [vmem:[%s7199_s7 + $0x3370] sm:$0xff]  ;;  %v1862_v0 = vld [vmem:[%s7199_s7 + $0x33a8] sm:$0xff] }
 0x364   : > { %v1864_v2 = vld [vmem:[%s7199_s7 + $0x33b8] sm:$0xff] }
 0x365   : > { %5512 = vmatpush1.bf16.msra.mxu0 %v5511_v11  ;;  %v1821_v11 = vld [vmem:[%s7199_s7 + $0x3260] sm:$0xff]  ;;  %v1896_v51 = vld [vmem:[%s7199_s7 + $0x34b8] sm:$0xff] }
 0x366   : > { %6536 = vmatpush1.bf16.msra.mxu1 %v6535_v12  ;;  %5514 = vmatprep.subr.bf16.mxu0 %v5513_v13  ;;  %v1819_v12 = vld [vmem:[%s7199_s7 + $0x3250] sm:$0xff]  ;;  %v6557_v13 = vpack.c.bf16 %v1824_v6, %v1820_v5  ;;  %v5535_v19 = vpack.c.bf16 %v1821_v11, %v1817_v10  ;;  %v5553_v5 = vpack.c.bf16 %v1862_v0, %v1858_v63  ;;  %v1857_v6 = vld [vmem:[%s7199_s7 + $0x3380] sm:$0xff]  ;;  %v1866_v11 = vld [vmem:[%s7199_s7 + $0x33c8] sm:$0xff] }
 0x367   : > { %6538 = vmatprep.subr.bf16.mxu1 %v6537_v17  ;;  %v1828_v17 = vld [vmem:[%s7199_s7 + $0x3298] sm:$0xff]  ;;  %v6559_v20 = vpack.c.bf16 %v1823_v14, %v1819_v12  ;;  %v1863_v10 = vld [vmem:[%s7199_s7 + $0x33b0] sm:$0xff]  ;;  %v1870_v12 = vld [vmem:[%s7199_s7 + $0x33e8] sm:$0xff] }
 0x368   : > { %v1872_v14 = vld [vmem:[%s7199_s7 + $0x33f8] sm:$0xff] }
 0x369   : > { %5516 = vmatpush1.bf16.msra.mxu0 %v5515_v23  ;;  %v1829_v23 = vld [vmem:[%s7199_s7 + $0x32a0] sm:$0xff]  ;;  %v204_v52 = vld [vmem:[#allocation2 + $0xd8] sm:$0xff] }
 0x36a   : > { %6540 = vmatpush1.bf16.msra.mxu1 %v6539_v24  ;;  %5518 = vmatprep.subr.bf16.mxu0 %v5517_v25  ;;  %v1827_v24 = vld [vmem:[%s7199_s7 + $0x3290] sm:$0xff]  ;;  %v6561_v25 = vpack.c.bf16 %v1832_v18, %v1828_v17  ;;  %v5539_v31 = vpack.c.bf16 %v1829_v23, %v1825_v22  ;;  %v5557_v17 = vpack.c.bf16 %v1870_v12, %v1866_v11  ;;  %v1865_v18 = vld [vmem:[%s7199_s7 + $0x33c0] sm:$0xff]  ;;  %v1874_v23 = vld [vmem:[%s7199_s7 + $0x3408] sm:$0xff] }
 0x36b   : > { %6542 = vmatprep.subr.bf16.mxu1 %v6541_v29  ;;  %v1836_v29 = vld [vmem:[%s7199_s7 + $0x32d8] sm:$0xff]  ;;  %v6563_v32 = vpack.c.bf16 %v1831_v26, %v1827_v24  ;;  %v1871_v22 = vld [vmem:[%s7199_s7 + $0x33f0] sm:$0xff]  ;;  %v1878_v24 = vld [vmem:[%s7199_s7 + $0x3428] sm:$0xff] }
 0x36c   : > { %v1880_v26 = vld [vmem:[%s7199_s7 + $0x3438] sm:$0xff] }
 0x36d   : > { %5520 = vmatpush1.bf16.msra.mxu0 %v5519_v35  ;;  %v1837_v35 = vld [vmem:[%s7199_s7 + $0x32e0] sm:$0xff]  ;;  %v1900_v63 = vld [vmem:[%s7199_s7 + $0x34d8] sm:$0xff] }
 0x36e   : > { %6544 = vmatpush1.bf16.msra.mxu1 %v6543_v36  ;;  %5522 = vmatprep.subr.bf16.mxu0 %v5521_v37  ;;  %v1835_v36 = vld [vmem:[%s7199_s7 + $0x32d0] sm:$0xff]  ;;  %v6565_v37 = vpack.c.bf16 %v1840_v30, %v1836_v29  ;;  %v5543_v43 = vpack.c.bf16 %v1837_v35, %v1833_v34  ;;  %v5561_v29 = vpack.c.bf16 %v1878_v24, %v1874_v23  ;;  %v1873_v30 = vld [vmem:[%s7199_s7 + $0x3400] sm:$0xff]  ;;  %v1882_v35 = vld [vmem:[%s7199_s7 + $0x3448] sm:$0xff] }
 0x36f   : > { %6546 = vmatprep.subr.bf16.mxu1 %v6545_v41  ;;  %v1844_v41 = vld [vmem:[%s7199_s7 + $0x3318] sm:$0xff]  ;;  %v6567_v44 = vpack.c.bf16 %v1839_v38, %v1835_v36  ;;  %v1879_v34 = vld [vmem:[%s7199_s7 + $0x3430] sm:$0xff]  ;;  %v1886_v36 = vld [vmem:[%s7199_s7 + $0x3468] sm:$0xff] }
 0x370   : > { %v1888_v38 = vld [vmem:[%s7199_s7 + $0x3478] sm:$0xff] }
 0x371   : > { %5524 = vmatpush1.bf16.msra.mxu0 %v5523_v47  ;;  %v1845_v47 = vld [vmem:[%s7199_s7 + $0x3320] sm:$0xff]  ;;  %v1904_v0 = vld [vmem:[%s7199_s7 + $0x34f8] sm:$0xff] }
 0x372   : > { %6548 = vmatpush1.bf16.msra.mxu1 %v6547_v48  ;;  %5526 = vmatprep.subr.bf16.mxu0 %v5525_v49  ;;  %v1843_v48 = vld [vmem:[%s7199_s7 + $0x3310] sm:$0xff]  ;;  %v6569_v49 = vpack.c.bf16 %v1848_v42, %v1844_v41  ;;  %v5547_v55 = vpack.c.bf16 %v1845_v47, %v1841_v46  ;;  %v5565_v42 = vpack.c.bf16 %v1886_v36, %v1882_v35  ;;  %v1908_v11 = vld [vmem:[%s7199_s7 + $0x3518] sm:$0xff] }
 0x373   : > { %6550 = vmatprep.subr.bf16.mxu1 %v6549_v53  ;;  %v1852_v53 = vld [vmem:[%s7199_s7 + $0x3358] sm:$0xff]  ;;  %v6571_v56 = vpack.c.bf16 %v1847_v50, %v1843_v48  ;;  %v1887_v47 = vld [vmem:[%s7199_s7 + $0x3470] sm:$0xff]  ;;  %v1890_v48 = vld [vmem:[%s7199_s7 + $0x3488] sm:$0xff] }
 0x374   : > { %v1892_v50 = vld [vmem:[%s7199_s7 + $0x3498] sm:$0xff] }
 0x375   : > { %5528 = vmatpush1.bf16.msra.mxu0 %v5527_v59  ;;  %v1853_v59 = vld [vmem:[%s7199_s7 + $0x3360] sm:$0xff]  ;;  %v1912_v12 = vld [vmem:[%s7199_s7 + $0x3538] sm:$0xff] }
 0x376   : > { %6552 = vmatpush1.bf16.msra.mxu1 %v6551_v60  ;;  %5530 = vmatprep.subr.bf16.mxu0 %v5529_v61  ;;  %v1851_v60 = vld [vmem:[%s7199_s7 + $0x3350] sm:$0xff]  ;;  %v6573_v61 = vpack.c.bf16 %v1856_v54, %v1852_v53  ;;  %v5551_v3 = vpack.c.bf16 %v1853_v59, %v1849_v58  ;;  %v6593_v59 = vpack.c.bf16 %v1896_v51, %v1892_v50  ;;  %v1916_v23 = vld [vmem:[%s7199_s7 + $0x3558] sm:$0xff] }
 0x377   : > { %6554 = vmatprep.subr.bf16.mxu1 %v6553_v1  ;;  %v1860_v1 = vld [vmem:[%s7199_s7 + $0x3398] sm:$0xff]  ;;  %v6575_v4 = vpack.c.bf16 %v1855_v62, %v1851_v60  ;;  %v1891_v58 = vld [vmem:[%s7199_s7 + $0x3490] sm:$0xff]  ;;  %v1902_v62 = vld [vmem:[%s7199_s7 + $0x34e8] sm:$0xff] }
 0x378   : > { %v1895_v60 = vld [vmem:[%s7199_s7 + $0x34b0] sm:$0xff]  ;;  %v1920_v24 = vld [vmem:[%s7199_s7 + $0x3578] sm:$0xff] }
 0x379   : > { %5532 = vmatpush1.bf16.msra.mxu0 %v5531_v7  ;;  %v1861_v7 = vld [vmem:[%s7199_s7 + $0x33a0] sm:$0xff]  ;;  %v1924_v35 = vld [vmem:[%s7199_s7 + $0x3598] sm:$0xff] }
 0x37a   : > { %6556 = vmatpush1.bf16.msra.mxu1 %v6555_v8  ;;  %5534 = vmatprep.subr.bf16.mxu0 %v5533_v9  ;;  %v1859_v8 = vld [vmem:[%s7199_s7 + $0x3390] sm:$0xff]  ;;  %v6577_v9 = vpack.c.bf16 %v1864_v2, %v1860_v1  ;;  %v5555_v15 = vpack.c.bf16 %v1861_v7, %v1857_v6  ;;  %v6595_v2 = vpack.c.bf16 %v1895_v60, %v1891_v58  ;;  %v1928_v36 = vld [vmem:[%s7199_s7 + $0x35b8] sm:$0xff]  ;;  %v1942_v58 = vld [vmem:[%s7199_s7 + $0x3628] sm:$0xff] }
 0x37b   : > { %6558 = vmatprep.subr.bf16.mxu1 %v6557_v13  ;;  %v1868_v13 = vld [vmem:[%s7199_s7 + $0x33d8] sm:$0xff]  ;;  %v6579_v16 = vpack.c.bf16 %v1863_v10, %v1859_v8  ;;  %v1899_v6 = vld [vmem:[%s7199_s7 + $0x34d0] sm:$0xff]  ;;  %v6597_v7 = vpack.c.bf16 %v1904_v0, %v1900_v63  ;;  %v1910_v10 = vld [vmem:[%s7199_s7 + $0x3528] sm:$0xff] }
 0x37c   : > { %v1903_v8 = vld [vmem:[%s7199_s7 + $0x34f0] sm:$0xff]  ;;  %v1944_v60 = vld [vmem:[%s7199_s7 + $0x3638] sm:$0xff]  ;;  %v1937_v0 = vld [vmem:[%s7199_s7 + $0x3600] sm:$0xff] }
 0x37d   : > { %5536 = vmatpush1.bf16.msra.mxu0 %v5535_v19  ;;  %v1869_v19 = vld [vmem:[%s7199_s7 + $0x33e0] sm:$0xff] }
 0x37e   : > { %6560 = vmatpush1.bf16.msra.mxu1 %v6559_v20  ;;  %5538 = vmatprep.subr.bf16.mxu0 %v5537_v21  ;;  %v1867_v20 = vld [vmem:[%s7199_s7 + $0x33d0] sm:$0xff]  ;;  %v6581_v21 = vpack.c.bf16 %v1872_v14, %v1868_v13  ;;  %v5559_v27 = vpack.c.bf16 %v1869_v19, %v1865_v18  ;;  %v6599_v14 = vpack.c.bf16 %v1903_v8, %v1899_v6  ;;  %v1950_v6 = vld [vmem:[%s7199_s7 + $0x3668] sm:$0xff]  ;;  %v1952_v8 = vld [vmem:[%s7199_s7 + $0x3678] sm:$0xff] }
 0x37f   : > { %6562 = vmatprep.subr.bf16.mxu1 %v6561_v25  ;;  %v1876_v25 = vld [vmem:[%s7199_s7 + $0x3418] sm:$0xff]  ;;  %v6583_v28 = vpack.c.bf16 %v1871_v22, %v1867_v20  ;;  %v1907_v18 = vld [vmem:[%s7199_s7 + $0x3510] sm:$0xff]  ;;  %v6601_v19 = vpack.c.bf16 %v1912_v12, %v1908_v11  ;;  %v1918_v22 = vld [vmem:[%s7199_s7 + $0x3568] sm:$0xff] }
 0x380   : > { %v1911_v20 = vld [vmem:[%s7199_s7 + $0x3530] sm:$0xff]  ;;  %v1945_v12 = vld [vmem:[%s7199_s7 + $0x3640] sm:$0xff] }
 0x381   : > { %5540 = vmatpush1.bf16.msra.mxu0 %v5539_v31  ;;  %v1877_v31 = vld [vmem:[%s7199_s7 + $0x3420] sm:$0xff] }
 0x382   : > { %6564 = vmatpush1.bf16.msra.mxu1 %v6563_v32  ;;  %5542 = vmatprep.subr.bf16.mxu0 %v5541_v33  ;;  %v1875_v32 = vld [vmem:[%s7199_s7 + $0x3410] sm:$0xff]  ;;  %v6585_v33 = vpack.c.bf16 %v1880_v26, %v1876_v25  ;;  %v5563_v40 = vpack.c.bf16 %v1877_v31, %v1873_v30  ;;  %v6603_v26 = vpack.c.bf16 %v1911_v20, %v1907_v18  ;;  %v1958_v18 = vld [vmem:[%s7199_s7 + $0x36a8] sm:$0xff]  ;;  %v1960_v20 = vld [vmem:[%s7199_s7 + $0x36b8] sm:$0xff] }
 0x383   : > { %6566 = vmatprep.subr.bf16.mxu1 %v6565_v37  ;;  %v1884_v37 = vld [vmem:[%s7199_s7 + $0x3458] sm:$0xff]  ;;  %v6587_v41 = vpack.c.bf16 %v1879_v34, %v1875_v32  ;;  %v1915_v30 = vld [vmem:[%s7199_s7 + $0x3550] sm:$0xff]  ;;  %v6605_v31 = vpack.c.bf16 %v1920_v24, %v1916_v23  ;;  %v1926_v34 = vld [vmem:[%s7199_s7 + $0x35a8] sm:$0xff] }
 0x384   : > { %v6589_v46 = vpack.c.bf16 %v1888_v38, %v1884_v37  ;;  %v1919_v32 = vld [vmem:[%s7199_s7 + $0x3570] sm:$0xff]  ;;  %v1953_v24 = vld [vmem:[%s7199_s7 + $0x3680] sm:$0xff] }
 0x385   : > { %5544 = vmatpush1.bf16.msra.mxu0 %v5543_v43  ;;  %v1881_v43 = vld [vmem:[%s7199_s7 + $0x3440] sm:$0xff]  ;;  %v6607_v38 = vpack.c.bf16 %v1919_v32, %v1915_v30  ;;  %v1966_v30 = vld [vmem:[%s7199_s7 + $0x36e8] sm:$0xff]  ;;  %v1968_v32 = vld [vmem:[%s7199_s7 + $0x36f8] sm:$0xff] }
 0x386   : > { %6568 = vmatpush1.bf16.msra.mxu1 %v6567_v44  ;;  %5546 = vmatprep.subr.bf16.mxu0 %v5545_v45  ;;  %v1885_v44 = vld [vmem:[%s7199_s7 + $0x3460] sm:$0xff]  ;;  %v1883_v45 = vld [vmem:[%s7199_s7 + $0x3450] sm:$0xff] }
 0x387   : > { %6570 = vmatprep.subr.bf16.mxu1 %v6569_v49  ;;  %v1894_v49 = vld [vmem:[%s7199_s7 + $0x34a8] sm:$0xff]  ;;  %v5567_v53 = vpack.c.bf16 %v1885_v44, %v1881_v43  ;;  %v6591_v54 = vpack.c.bf16 %v1887_v47, %v1883_v45  ;;  %v6609_v43 = vpack.c.bf16 %v1928_v36, %v1924_v35  ;;  %v1927_v44 = vld [vmem:[%s7199_s7 + $0x35b0] sm:$0xff]  ;;  %v1932_v47 = vld [vmem:[%s7199_s7 + $0x35d8] sm:$0xff] }
 0x388   : > { %v1930_v45 = vld [vmem:[%s7199_s7 + $0x35c8] sm:$0xff]  ;;  %v1961_v36 = vld [vmem:[%s7199_s7 + $0x36c0] sm:$0xff] }
 0x389   : > { %5548 = vmatpush1.bf16.msra.mxu0 %v5547_v55  ;;  %v5569_v55 = vpack.c.bf16 %v1894_v49, %v1890_v48  ;;  %v1936_v48 = vld [vmem:[%s7199_s7 + $0x35f8] sm:$0xff] }
 0x38a   : > { %6572 = vmatpush1.bf16.msra.mxu1 %v6571_v56  ;;  %5550 = vmatprep.subr.bf16.mxu0 %v5549_v57  ;;  %v1889_v56 = vld [vmem:[%s7199_s7 + $0x3480] sm:$0xff] }
 0x38b   : > { %6574 = vmatprep.subr.bf16.mxu1 %v6573_v61  ;;  %v1893_v57 = vld [vmem:[%s7199_s7 + $0x34a0] sm:$0xff]  ;;  %v1898_v61 = vld [vmem:[%s7199_s7 + $0x34c8] sm:$0xff] }
 0x38c   : > { %v5571_v1 = vpack.c.bf16 %v1893_v57, %v1889_v56  ;;  %v1935_v56 = vld [vmem:[%s7199_s7 + $0x35f0] sm:$0xff]  ;;  %v1938_v57 = vld [vmem:[%s7199_s7 + $0x3608] sm:$0xff] }
 0x38d   : > { %5552 = vmatpush1.bf16.msra.mxu0 %v5551_v3  ;;  %v5573_v3 = vpack.c.bf16 %v1902_v62, %v1898_v61  ;;  %v5593_v63 = vpack.c.bf16 %v1942_v58, %v1938_v57 }
 0x38e   : > { %6576 = vmatpush1.bf16.msra.mxu1 %v6575_v4  ;;  %5554 = vmatprep.subr.bf16.mxu0 %v5553_v5  ;;  %v1897_v4 = vld [vmem:[%s7199_s7 + $0x34c0] sm:$0xff] }
 0x38f   : > { %6578 = vmatprep.subr.bf16.mxu1 %v6577_v9  ;;  %v1901_v5 = vld [vmem:[%s7199_s7 + $0x34e0] sm:$0xff]  ;;  %v1906_v9 = vld [vmem:[%s7199_s7 + $0x3508] sm:$0xff] }
 0x390   : > { %v5575_v13 = vpack.c.bf16 %v1901_v5, %v1897_v4  ;;  %v1943_v4 = vld [vmem:[%s7199_s7 + $0x3630] sm:$0xff]  ;;  %v1946_v5 = vld [vmem:[%s7199_s7 + $0x3648] sm:$0xff] }
 0x391   : > { %5556 = vmatpush1.bf16.msra.mxu0 %v5555_v15  ;;  %v5577_v15 = vpack.c.bf16 %v1910_v10, %v1906_v9  ;;  %v5597_v11 = vpack.c.bf16 %v1950_v6, %v1946_v5 }
 0x392   : > { %6580 = vmatpush1.bf16.msra.mxu1 %v6579_v16  ;;  %5558 = vmatprep.subr.bf16.mxu0 %v5557_v17  ;;  %v1905_v16 = vld [vmem:[%s7199_s7 + $0x3500] sm:$0xff] }
 0x393   : > { %6582 = vmatprep.subr.bf16.mxu1 %v6581_v21  ;;  %v1909_v17 = vld [vmem:[%s7199_s7 + $0x3520] sm:$0xff]  ;;  %v1914_v21 = vld [vmem:[%s7199_s7 + $0x3548] sm:$0xff] }
 0x394   : > { %v5579_v25 = vpack.c.bf16 %v1909_v17, %v1905_v16  ;;  %v1951_v16 = vld [vmem:[%s7199_s7 + $0x3670] sm:$0xff]  ;;  %v1954_v17 = vld [vmem:[%s7199_s7 + $0x3688] sm:$0xff] }
 0x395   : > { %5560 = vmatpush1.bf16.msra.mxu0 %v5559_v27  ;;  %v5581_v27 = vpack.c.bf16 %v1918_v22, %v1914_v21  ;;  %v5601_v23 = vpack.c.bf16 %v1958_v18, %v1954_v17 }
 0x396   : > { %6584 = vmatpush1.bf16.msra.mxu1 %v6583_v28  ;;  %5562 = vmatprep.subr.bf16.mxu0 %v5561_v29  ;;  %v1913_v28 = vld [vmem:[%s7199_s7 + $0x3540] sm:$0xff] }
 0x397   : > { %6586 = vmatprep.subr.bf16.mxu1 %v6585_v33  ;;  %v1917_v29 = vld [vmem:[%s7199_s7 + $0x3560] sm:$0xff]  ;;  %v1922_v33 = vld [vmem:[%s7199_s7 + $0x3588] sm:$0xff] }
 0x398   : > { %3174 = vmatmul.mubr.f32.vlgmr.msra.gmra.mrb[0].mxu0 %v201_v39  ;;  %v5583_v37 = vpack.c.bf16 %v1917_v29, %v1913_v28  ;;  %v1959_v28 = vld [vmem:[%s7199_s7 + $0x36b0] sm:$0xff]  ;;  %v1962_v29 = vld [vmem:[%s7199_s7 + $0x36c8] sm:$0xff] }
 0x399   : > { %5564 = vmatpush1.bf16.msra.mxu0 %v5563_v40  ;;  %4310 = vmatmul.mubr.f32.vlgmr.msra.gmra.mrb[0].mxu1 %v201_v39  ;;  %v5585_v39 = vpack.c.bf16 %v1926_v34, %v1922_v33  ;;  %v1921_v40 = vld [vmem:[%s7199_s7 + $0x3580] sm:$0xff]  ;;  %v5605_v35 = vpack.c.bf16 %v1966_v30, %v1962_v29 }
 0x39a   : > { %6588 = vmatpush1.bf16.msra.mxu1 %v6587_v41  ;;  %5566 = vmatprep.subr.bf16.mxu0 %v5565_v42  ;;  %v1925_v41 = vld [vmem:[%s7199_s7 + $0x35a0] sm:$0xff]  ;;  %v1923_v42 = vld [vmem:[%s7199_s7 + $0x3590] sm:$0xff] }
 0x39b   : > { %6590 = vmatprep.subr.bf16.mxu1 %v6589_v46  ;;  %3244 = vmatprep.mubr.f32.mxu0 %v204_v52  ;;  %v1934_v46 = vld [vmem:[%s7199_s7 + $0x35e8] sm:$0xff]  ;;  %v5587_v49 = vpack.c.bf16 %v1925_v41, %v1921_v40  ;;  %v6611_v50 = vpack.c.bf16 %v1927_v44, %v1923_v42  ;;  %v1967_v40 = vld [vmem:[%s7199_s7 + $0x36f0] sm:$0xff]  ;;  %v1976_v44 = vld [vmem:[%s7199_s7 + $0x3738] sm:$0xff] }
 0x39c   : > { %4380 = vmatprep.mubr.f32.mxu1 %v204_v52  ;;  %v5589_v51 = vpack.c.bf16 %v1934_v46, %v1930_v45  ;;  %v1929_v52 = vld [vmem:[%s7199_s7 + $0x35c0] sm:$0xff]  ;;  %v1970_v41 = vld [vmem:[%s7199_s7 + $0x3708] sm:$0xff] }
 0x39d   : > { %5568 = vmatpush1.bf16.msra.mxu0 %v5567_v53  ;;  %v1933_v53 = vld [vmem:[%s7199_s7 + $0x35e0] sm:$0xff]  ;;  %v1974_v42 = vld [vmem:[%s7199_s7 + $0x3728] sm:$0xff] }
 0x39e   : > { %6592 = vmatpush1.bf16.msra.mxu1 %v6591_v54  ;;  %5570 = vmatprep.subr.bf16.mxu0 %v5569_v55  ;;  %v1931_v54 = vld [vmem:[%s7199_s7 + $0x35d0] sm:$0xff]  ;;  %v6613_v55 = vpack.c.bf16 %v1936_v48, %v1932_v47  ;;  %v5591_v61 = vpack.c.bf16 %v1933_v53, %v1929_v52  ;;  %v5609_v47 = vpack.c.bf16 %v1974_v42, %v1970_v41  ;;  %v1969_v48 = vld [vmem:[%s7199_s7 + $0x3700] sm:$0xff]  ;;  %v1978_v53 = vld [vmem:[%s7199_s7 + $0x3748] sm:$0xff] }
 0x39f   : > { %6594 = vmatprep.subr.bf16.mxu1 %v6593_v59  ;;  %v1940_v59 = vld [vmem:[%s7199_s7 + $0x3618] sm:$0xff]  ;;  %v6615_v62 = vpack.c.bf16 %v1935_v56, %v1931_v54  ;;  %v1975_v52 = vld [vmem:[%s7199_s7 + $0x3730] sm:$0xff]  ;;  %v1982_v54 = vld [vmem:[%s7199_s7 + $0x3768] sm:$0xff] }
 0x3a0   : > { %v1984_v56 = vld [vmem:[%s7199_s7 + $0x3778] sm:$0xff]  ;;  %v203_v41 = vld [vmem:[#allocation2 + $0xd0] sm:$0xff] }
 0x3a1   : > { %5572 = vmatpush1.bf16.msra.mxu0 %v5571_v1  ;;  %v1941_v1 = vld [vmem:[%s7199_s7 + $0x3620] sm:$0xff] }
 0x3a2   : > { %6596 = vmatpush1.bf16.msra.mxu1 %v6595_v2  ;;  %5574 = vmatprep.subr.bf16.mxu0 %v5573_v3  ;;  %v1939_v2 = vld [vmem:[%s7199_s7 + $0x3610] sm:$0xff]  ;;  %v6617_v3 = vpack.c.bf16 %v1944_v60, %v1940_v59  ;;  %v5595_v9 = vpack.c.bf16 %v1941_v1, %v1937_v0  ;;  %v5613_v59 = vpack.c.bf16 %v1982_v54, %v1978_v53  ;;  %v1977_v60 = vld [vmem:[%s7199_s7 + $0x3740] sm:$0xff]  ;;  %v1986_v1 = vld [vmem:[%s7199_s7 + $0x3788] sm:$0xff] }
 0x3a3   : > { %6598 = vmatprep.subr.bf16.mxu1 %v6597_v7  ;;  %v1948_v7 = vld [vmem:[%s7199_s7 + $0x3658] sm:$0xff]  ;;  %v6619_v10 = vpack.c.bf16 %v1943_v4, %v1939_v2  ;;  %v1983_v0 = vld [vmem:[%s7199_s7 + $0x3770] sm:$0xff]  ;;  %v1990_v2 = vld [vmem:[%s7199_s7 + $0x37a8] sm:$0xff] }
 0x3a4   : > { %v1992_v4 = vld [vmem:[%s7199_s7 + $0x37b8] sm:$0xff]  ;;  %v206_v54 = vld [vmem:[#allocation2 + $0xe8] sm:$0xff] }
 0x3a5   : > { %5576 = vmatpush1.bf16.msra.mxu0 %v5575_v13  ;;  %v1949_v13 = vld [vmem:[%s7199_s7 + $0x3660] sm:$0xff]  ;;  %v2024_v53 = vld [vmem:[%s7199_s7 + $0x38b8] sm:$0xff] }
 0x3a6   : > { %6600 = vmatpush1.bf16.msra.mxu1 %v6599_v14  ;;  %5578 = vmatprep.subr.bf16.mxu0 %v5577_v15  ;;  %v1947_v14 = vld [vmem:[%s7199_s7 + $0x3650] sm:$0xff]  ;;  %v6621_v15 = vpack.c.bf16 %v1952_v8, %v1948_v7  ;;  %v5599_v21 = vpack.c.bf16 %v1949_v13, %v1945_v12  ;;  %v5617_v7 = vpack.c.bf16 %v1990_v2, %v1986_v1  ;;  %v1985_v8 = vld [vmem:[%s7199_s7 + $0x3780] sm:$0xff]  ;;  %v1994_v13 = vld [vmem:[%s7199_s7 + $0x37c8] sm:$0xff] }
 0x3a7   : > { %6602 = vmatprep.subr.bf16.mxu1 %v6601_v19  ;;  %v1956_v19 = vld [vmem:[%s7199_s7 + $0x3698] sm:$0xff]  ;;  %v6623_v22 = vpack.c.bf16 %v1951_v16, %v1947_v14  ;;  %v1991_v12 = vld [vmem:[%s7199_s7 + $0x37b0] sm:$0xff]  ;;  %v1998_v14 = vld [vmem:[%s7199_s7 + $0x37e8] sm:$0xff] }
 0x3a8   : > { %v2000_v16 = vld [vmem:[%s7199_s7 + $0x37f8] sm:$0xff] }
 0x3a9   : > { %5580 = vmatpush1.bf16.msra.mxu0 %v5579_v25  ;;  %v1957_v25 = vld [vmem:[%s7199_s7 + $0x36a0] sm:$0xff]  ;;  %v2028_v1 = vld [vmem:[%s7199_s7 + $0x38d8] sm:$0xff] }
 0x3aa   : > { %6604 = vmatpush1.bf16.msra.mxu1 %v6603_v26  ;;  %5582 = vmatprep.subr.bf16.mxu0 %v5581_v27  ;;  %v1955_v26 = vld [vmem:[%s7199_s7 + $0x3690] sm:$0xff]  ;;  %v6625_v27 = vpack.c.bf16 %v1960_v20, %v1956_v19  ;;  %v5603_v33 = vpack.c.bf16 %v1957_v25, %v1953_v24  ;;  %v5621_v19 = vpack.c.bf16 %v1998_v14, %v1994_v13  ;;  %v1993_v20 = vld [vmem:[%s7199_s7 + $0x37c0] sm:$0xff]  ;;  %v2002_v25 = vld [vmem:[%s7199_s7 + $0x3808] sm:$0xff] }
 0x3ab   : > { %6606 = vmatprep.subr.bf16.mxu1 %v6605_v31  ;;  %v1964_v31 = vld [vmem:[%s7199_s7 + $0x36d8] sm:$0xff]  ;;  %v6627_v34 = vpack.c.bf16 %v1959_v28, %v1955_v26  ;;  %v1999_v24 = vld [vmem:[%s7199_s7 + $0x37f0] sm:$0xff]  ;;  %v2006_v26 = vld [vmem:[%s7199_s7 + $0x3828] sm:$0xff] }
 0x3ac   : > { %v2008_v28 = vld [vmem:[%s7199_s7 + $0x3838] sm:$0xff] }
 0x3ad   : > { %5584 = vmatpush1.bf16.msra.mxu0 %v5583_v37  ;;  %v1965_v37 = vld [vmem:[%s7199_s7 + $0x36e0] sm:$0xff]  ;;  %v2032_v2 = vld [vmem:[%s7199_s7 + $0x38f8] sm:$0xff] }
 0x3ae   : > { %6608 = vmatpush1.bf16.msra.mxu1 %v6607_v38  ;;  %5586 = vmatprep.subr.bf16.mxu0 %v5585_v39  ;;  %v1963_v38 = vld [vmem:[%s7199_s7 + $0x36d0] sm:$0xff]  ;;  %v6629_v39 = vpack.c.bf16 %v1968_v32, %v1964_v31  ;;  %v5607_v45 = vpack.c.bf16 %v1965_v37, %v1961_v36  ;;  %v5625_v31 = vpack.c.bf16 %v2006_v26, %v2002_v25  ;;  %v2001_v32 = vld [vmem:[%s7199_s7 + $0x3800] sm:$0xff]  ;;  %v2010_v37 = vld [vmem:[%s7199_s7 + $0x3848] sm:$0xff] }
 0x3af   : > { %6610 = vmatprep.subr.bf16.mxu1 %v6609_v43  ;;  %v1972_v43 = vld [vmem:[%s7199_s7 + $0x3718] sm:$0xff]  ;;  %v6631_v46 = vpack.c.bf16 %v1967_v40, %v1963_v38  ;;  %v2007_v36 = vld [vmem:[%s7199_s7 + $0x3830] sm:$0xff]  ;;  %v2014_v38 = vld [vmem:[%s7199_s7 + $0x3868] sm:$0xff] }
 0x3b0   : > { %v2016_v40 = vld [vmem:[%s7199_s7 + $0x3878] sm:$0xff] }
 0x3b1   : > { %5588 = vmatpush1.bf16.msra.mxu0 %v5587_v49  ;;  %v1973_v49 = vld [vmem:[%s7199_s7 + $0x3720] sm:$0xff]  ;;  %v2036_v13 = vld [vmem:[%s7199_s7 + $0x3918] sm:$0xff] }
 0x3b2   : > { %6612 = vmatpush1.bf16.msra.mxu1 %v6611_v50  ;;  %5590 = vmatprep.subr.bf16.mxu0 %v5589_v51  ;;  %v1971_v50 = vld [vmem:[%s7199_s7 + $0x3710] sm:$0xff]  ;;  %v6633_v51 = vpack.c.bf16 %v1976_v44, %v1972_v43  ;;  %v5611_v57 = vpack.c.bf16 %v1973_v49, %v1969_v48  ;;  %v5629_v44 = vpack.c.bf16 %v2014_v38, %v2010_v37  ;;  %v2040_v14 = vld [vmem:[%s7199_s7 + $0x3938] sm:$0xff] }
 0x3b3   : > { %6614 = vmatprep.subr.bf16.mxu1 %v6613_v55  ;;  %v1980_v55 = vld [vmem:[%s7199_s7 + $0x3758] sm:$0xff]  ;;  %v6635_v58 = vpack.c.bf16 %v1975_v52, %v1971_v50  ;;  %v2015_v49 = vld [vmem:[%s7199_s7 + $0x3870] sm:$0xff]  ;;  %v2018_v50 = vld [vmem:[%s7199_s7 + $0x3888] sm:$0xff] }
 0x3b4   : > { %v2020_v52 = vld [vmem:[%s7199_s7 + $0x3898] sm:$0xff] }
 0x3b5   : > { %5592 = vmatpush1.bf16.msra.mxu0 %v5591_v61  ;;  %v1981_v61 = vld [vmem:[%s7199_s7 + $0x3760] sm:$0xff]  ;;  %v2044_v25 = vld [vmem:[%s7199_s7 + $0x3958] sm:$0xff] }
 0x3b6   : > { %6616 = vmatpush1.bf16.msra.mxu1 %v6615_v62  ;;  %5594 = vmatprep.subr.bf16.mxu0 %v5593_v63  ;;  %v1979_v62 = vld [vmem:[%s7199_s7 + $0x3750] sm:$0xff]  ;;  %v6637_v63 = vpack.c.bf16 %v1984_v56, %v1980_v55  ;;  %v5615_v5 = vpack.c.bf16 %v1981_v61, %v1977_v60  ;;  %v6657_v61 = vpack.c.bf16 %v2024_v53, %v2020_v52  ;;  %v2048_v26 = vld [vmem:[%s7199_s7 + $0x3978] sm:$0xff] }
 0x3b7   : > { %6618 = vmatprep.subr.bf16.mxu1 %v6617_v3  ;;  %v1988_v3 = vld [vmem:[%s7199_s7 + $0x3798] sm:$0xff]  ;;  %v6639_v6 = vpack.c.bf16 %v1983_v0, %v1979_v62  ;;  %v2019_v60 = vld [vmem:[%s7199_s7 + $0x3890] sm:$0xff]  ;;  %v2030_v0 = vld [vmem:[%s7199_s7 + $0x38e8] sm:$0xff] }
 0x3b8   : > { %v2023_v62 = vld [vmem:[%s7199_s7 + $0x38b0] sm:$0xff]  ;;  %v2052_v37 = vld [vmem:[%s7199_s7 + $0x3998] sm:$0xff] }
 0x3b9   : > { %5596 = vmatpush1.bf16.msra.mxu0 %v5595_v9  ;;  %v1989_v9 = vld [vmem:[%s7199_s7 + $0x37a0] sm:$0xff]  ;;  %v2056_v38 = vld [vmem:[%s7199_s7 + $0x39b8] sm:$0xff] }
 0x3ba   : > { %6620 = vmatpush1.bf16.msra.mxu1 %v6619_v10  ;;  %5598 = vmatprep.subr.bf16.mxu0 %v5597_v11  ;;  %v1987_v10 = vld [vmem:[%s7199_s7 + $0x3790] sm:$0xff]  ;;  %v6641_v11 = vpack.c.bf16 %v1992_v4, %v1988_v3  ;;  %v5619_v17 = vpack.c.bf16 %v1989_v9, %v1985_v8  ;;  %v6659_v4 = vpack.c.bf16 %v2023_v62, %v2019_v60  ;;  %v2070_v60 = vld [vmem:[%s7199_s7 + $0x3a28] sm:$0xff]  ;;  %v2072_v62 = vld [vmem:[%s7199_s7 + $0x3a38] sm:$0xff] }
 0x3bb   : > { %6622 = vmatprep.subr.bf16.mxu1 %v6621_v15  ;;  %v1996_v15 = vld [vmem:[%s7199_s7 + $0x37d8] sm:$0xff]  ;;  %v6643_v18 = vpack.c.bf16 %v1991_v12, %v1987_v10  ;;  %v2027_v8 = vld [vmem:[%s7199_s7 + $0x38d0] sm:$0xff]  ;;  %v6661_v9 = vpack.c.bf16 %v2032_v2, %v2028_v1  ;;  %v2038_v12 = vld [vmem:[%s7199_s7 + $0x3928] sm:$0xff] }
 0x3bc   : > { %v2031_v10 = vld [vmem:[%s7199_s7 + $0x38f0] sm:$0xff]  ;;  %v2065_v2 = vld [vmem:[%s7199_s7 + $0x3a00] sm:$0xff] }
 0x3bd   : > { %5600 = vmatpush1.bf16.msra.mxu0 %v5599_v21  ;;  %v1997_v21 = vld [vmem:[%s7199_s7 + $0x37e0] sm:$0xff] }
 0x3be   : > { %6624 = vmatpush1.bf16.msra.mxu1 %v6623_v22  ;;  %5602 = vmatprep.subr.bf16.mxu0 %v5601_v23  ;;  %v1995_v22 = vld [vmem:[%s7199_s7 + $0x37d0] sm:$0xff]  ;;  %v6645_v23 = vpack.c.bf16 %v2000_v16, %v1996_v15  ;;  %v5623_v29 = vpack.c.bf16 %v1997_v21, %v1993_v20  ;;  %v6663_v16 = vpack.c.bf16 %v2031_v10, %v2027_v8  ;;  %v2078_v8 = vld [vmem:[%s7199_s7 + $0x3a68] sm:$0xff]  ;;  %v2080_v10 = vld [vmem:[%s7199_s7 + $0x3a78] sm:$0xff] }
 0x3bf   : > { %6626 = vmatprep.subr.bf16.mxu1 %v6625_v27  ;;  %v2004_v27 = vld [vmem:[%s7199_s7 + $0x3818] sm:$0xff]  ;;  %v6647_v30 = vpack.c.bf16 %v1999_v24, %v1995_v22  ;;  %v2035_v20 = vld [vmem:[%s7199_s7 + $0x3910] sm:$0xff]  ;;  %v6665_v21 = vpack.c.bf16 %v2040_v14, %v2036_v13  ;;  %v2046_v24 = vld [vmem:[%s7199_s7 + $0x3968] sm:$0xff] }
 0x3c0   : > { %v2039_v22 = vld [vmem:[%s7199_s7 + $0x3930] sm:$0xff]  ;;  %v2073_v14 = vld [vmem:[%s7199_s7 + $0x3a40] sm:$0xff] }
 0x3c1   : > { %5604 = vmatpush1.bf16.msra.mxu0 %v5603_v33  ;;  %v2005_v33 = vld [vmem:[%s7199_s7 + $0x3820] sm:$0xff] }
 0x3c2   : > { %6628 = vmatpush1.bf16.msra.mxu1 %v6627_v34  ;;  %5606 = vmatprep.subr.bf16.mxu0 %v5605_v35  ;;  %v2003_v34 = vld [vmem:[%s7199_s7 + $0x3810] sm:$0xff]  ;;  %v6649_v35 = vpack.c.bf16 %v2008_v28, %v2004_v27  ;;  %v5627_v42 = vpack.c.bf16 %v2005_v33, %v2001_v32  ;;  %v6667_v28 = vpack.c.bf16 %v2039_v22, %v2035_v20  ;;  %v2086_v20 = vld [vmem:[%s7199_s7 + $0x3aa8] sm:$0xff]  ;;  %v2088_v22 = vld [vmem:[%s7199_s7 + $0x3ab8] sm:$0xff] }
 0x3c3   : > { %6630 = vmatprep.subr.bf16.mxu1 %v6629_v39  ;;  %v2012_v39 = vld [vmem:[%s7199_s7 + $0x3858] sm:$0xff]  ;;  %v6651_v43 = vpack.c.bf16 %v2007_v36, %v2003_v34  ;;  %v2043_v32 = vld [vmem:[%s7199_s7 + $0x3950] sm:$0xff]  ;;  %v6669_v33 = vpack.c.bf16 %v2048_v26, %v2044_v25  ;;  %v2054_v36 = vld [vmem:[%s7199_s7 + $0x39a8] sm:$0xff] }
 0x3c4   : > { %v6653_v48 = vpack.c.bf16 %v2016_v40, %v2012_v39  ;;  %v2047_v34 = vld [vmem:[%s7199_s7 + $0x3970] sm:$0xff]  ;;  %v2081_v26 = vld [vmem:[%s7199_s7 + $0x3a80] sm:$0xff] }
 0x3c5   : > { %5608 = vmatpush1.bf16.msra.mxu0 %v5607_v45  ;;  %v2009_v45 = vld [vmem:[%s7199_s7 + $0x3840] sm:$0xff]  ;;  %v6671_v40 = vpack.c.bf16 %v2047_v34, %v2043_v32  ;;  %v2094_v32 = vld [vmem:[%s7199_s7 + $0x3ae8] sm:$0xff]  ;;  %v2096_v34 = vld [vmem:[%s7199_s7 + $0x3af8] sm:$0xff] }
 0x3c6   : > { %6632 = vmatpush1.bf16.msra.mxu1 %v6631_v46  ;;  %5610 = vmatprep.subr.bf16.mxu0 %v5609_v47  ;;  %v2013_v46 = vld [vmem:[%s7199_s7 + $0x3860] sm:$0xff]  ;;  %v2011_v47 = vld [vmem:[%s7199_s7 + $0x3850] sm:$0xff] }
 0x3c7   : > { %6634 = vmatprep.subr.bf16.mxu1 %v6633_v51  ;;  %v2022_v51 = vld [vmem:[%s7199_s7 + $0x38a8] sm:$0xff]  ;;  %v5631_v55 = vpack.c.bf16 %v2013_v46, %v2009_v45  ;;  %v6655_v56 = vpack.c.bf16 %v2015_v49, %v2011_v47  ;;  %v6673_v45 = vpack.c.bf16 %v2056_v38, %v2052_v37  ;;  %v2055_v46 = vld [vmem:[%s7199_s7 + $0x39b0] sm:$0xff]  ;;  %v2060_v49 = vld [vmem:[%s7199_s7 + $0x39d8] sm:$0xff] }
 0x3c8   : > { %v2058_v47 = vld [vmem:[%s7199_s7 + $0x39c8] sm:$0xff]  ;;  %v2089_v38 = vld [vmem:[%s7199_s7 + $0x3ac0] sm:$0xff] }
 0x3c9   : > { %5612 = vmatpush1.bf16.msra.mxu0 %v5611_v57  ;;  %v5633_v57 = vpack.c.bf16 %v2022_v51, %v2018_v50  ;;  %v2064_v50 = vld [vmem:[%s7199_s7 + $0x39f8] sm:$0xff] }
 0x3ca   : > { %6636 = vmatpush1.bf16.msra.mxu1 %v6635_v58  ;;  %5614 = vmatprep.subr.bf16.mxu0 %v5613_v59  ;;  %v2017_v58 = vld [vmem:[%s7199_s7 + $0x3880] sm:$0xff] }
 0x3cb   : > { %6638 = vmatprep.subr.bf16.mxu1 %v6637_v63  ;;  %v2021_v59 = vld [vmem:[%s7199_s7 + $0x38a0] sm:$0xff]  ;;  %v2026_v63 = vld [vmem:[%s7199_s7 + $0x38c8] sm:$0xff] }
 0x3cc   : > { %v5635_v3 = vpack.c.bf16 %v2021_v59, %v2017_v58  ;;  %v2063_v58 = vld [vmem:[%s7199_s7 + $0x39f0] sm:$0xff]  ;;  %v2066_v59 = vld [vmem:[%s7199_s7 + $0x3a08] sm:$0xff] }
 0x3cd   : > { %5616 = vmatpush1.bf16.msra.mxu0 %v5615_v5  ;;  %v5637_v5 = vpack.c.bf16 %v2030_v0, %v2026_v63  ;;  %v5657_v1 = vpack.c.bf16 %v2070_v60, %v2066_v59 }
 0x3ce   : > { %6640 = vmatpush1.bf16.msra.mxu1 %v6639_v6  ;;  %5618 = vmatprep.subr.bf16.mxu0 %v5617_v7  ;;  %v2025_v6 = vld [vmem:[%s7199_s7 + $0x38c0] sm:$0xff] }
 0x3cf   : > { %6642 = vmatprep.subr.bf16.mxu1 %v6641_v11  ;;  %v2029_v7 = vld [vmem:[%s7199_s7 + $0x38e0] sm:$0xff]  ;;  %v2034_v11 = vld [vmem:[%s7199_s7 + $0x3908] sm:$0xff] }
 0x3d0   : > { %v5639_v15 = vpack.c.bf16 %v2029_v7, %v2025_v6  ;;  %v2071_v6 = vld [vmem:[%s7199_s7 + $0x3a30] sm:$0xff]  ;;  %v2074_v7 = vld [vmem:[%s7199_s7 + $0x3a48] sm:$0xff] }
 0x3d1   : > { %5620 = vmatpush1.bf16.msra.mxu0 %v5619_v17  ;;  %v5641_v17 = vpack.c.bf16 %v2038_v12, %v2034_v11  ;;  %v5661_v13 = vpack.c.bf16 %v2078_v8, %v2074_v7 }
 0x3d2   : > { %6644 = vmatpush1.bf16.msra.mxu1 %v6643_v18  ;;  %5622 = vmatprep.subr.bf16.mxu0 %v5621_v19  ;;  %v2033_v18 = vld [vmem:[%s7199_s7 + $0x3900] sm:$0xff] }
 0x3d3   : > { %6646 = vmatprep.subr.bf16.mxu1 %v6645_v23  ;;  %v2037_v19 = vld [vmem:[%s7199_s7 + $0x3920] sm:$0xff]  ;;  %v2042_v23 = vld [vmem:[%s7199_s7 + $0x3948] sm:$0xff] }
 0x3d4   : > { %v5643_v27 = vpack.c.bf16 %v2037_v19, %v2033_v18  ;;  %v2079_v18 = vld [vmem:[%s7199_s7 + $0x3a70] sm:$0xff]  ;;  %v2082_v19 = vld [vmem:[%s7199_s7 + $0x3a88] sm:$0xff] }
 0x3d5   : > { %5624 = vmatpush1.bf16.msra.mxu0 %v5623_v29  ;;  %v5645_v29 = vpack.c.bf16 %v2046_v24, %v2042_v23  ;;  %v5665_v25 = vpack.c.bf16 %v2086_v20, %v2082_v19 }
 0x3d6   : > { %6648 = vmatpush1.bf16.msra.mxu1 %v6647_v30  ;;  %5626 = vmatprep.subr.bf16.mxu0 %v5625_v31  ;;  %v2041_v30 = vld [vmem:[%s7199_s7 + $0x3940] sm:$0xff] }
 0x3d7   : > { %6650 = vmatprep.subr.bf16.mxu1 %v6649_v35  ;;  %v2045_v31 = vld [vmem:[%s7199_s7 + $0x3960] sm:$0xff]  ;;  %v2050_v35 = vld [vmem:[%s7199_s7 + $0x3988] sm:$0xff] }
 0x3d8   : > { %3245 = vmatmul.mubr.f32.vlgmr.msra.gmra.mrb[0].mxu0 %v203_v41  ;;  %v5647_v39 = vpack.c.bf16 %v2045_v31, %v2041_v30  ;;  %v2087_v30 = vld [vmem:[%s7199_s7 + $0x3ab0] sm:$0xff]  ;;  %v2090_v31 = vld [vmem:[%s7199_s7 + $0x3ac8] sm:$0xff] }
 0x3d9   : > { %5628 = vmatpush1.bf16.msra.mxu0 %v5627_v42  ;;  %4381 = vmatmul.mubr.f32.vlgmr.msra.gmra.mrb[0].mxu1 %v203_v41  ;;  %v5649_v41 = vpack.c.bf16 %v2054_v36, %v2050_v35  ;;  %v2049_v42 = vld [vmem:[%s7199_s7 + $0x3980] sm:$0xff]  ;;  %v5669_v37 = vpack.c.bf16 %v2094_v32, %v2090_v31 }
 0x3da   : > { %6652 = vmatpush1.bf16.msra.mxu1 %v6651_v43  ;;  %5630 = vmatprep.subr.bf16.mxu0 %v5629_v44  ;;  %v2053_v43 = vld [vmem:[%s7199_s7 + $0x39a0] sm:$0xff]  ;;  %v2051_v44 = vld [vmem:[%s7199_s7 + $0x3990] sm:$0xff] }
 0x3db   : > { %6654 = vmatprep.subr.bf16.mxu1 %v6653_v48  ;;  %3315 = vmatprep.mubr.f32.mxu0 %v206_v54  ;;  %v2062_v48 = vld [vmem:[%s7199_s7 + $0x39e8] sm:$0xff]  ;;  %v5651_v51 = vpack.c.bf16 %v2053_v43, %v2049_v42  ;;  %v6675_v52 = vpack.c.bf16 %v2055_v46, %v2051_v44  ;;  %v2095_v42 = vld [vmem:[%s7199_s7 + $0x3af0] sm:$0xff]  ;;  %v2104_v46 = vld [vmem:[%s7199_s7 + $0x3b38] sm:$0xff] }
 0x3dc   : > { %4451 = vmatprep.mubr.f32.mxu1 %v206_v54  ;;  %v5653_v53 = vpack.c.bf16 %v2062_v48, %v2058_v47  ;;  %v2057_v54 = vld [vmem:[%s7199_s7 + $0x39c0] sm:$0xff]  ;;  %v2098_v43 = vld [vmem:[%s7199_s7 + $0x3b08] sm:$0xff] }
 0x3dd   : > { %5632 = vmatpush1.bf16.msra.mxu0 %v5631_v55  ;;  %v2061_v55 = vld [vmem:[%s7199_s7 + $0x39e0] sm:$0xff]  ;;  %v2102_v44 = vld [vmem:[%s7199_s7 + $0x3b28] sm:$0xff] }
 0x3de   : > { %6656 = vmatpush1.bf16.msra.mxu1 %v6655_v56  ;;  %5634 = vmatprep.subr.bf16.mxu0 %v5633_v57  ;;  %v2059_v56 = vld [vmem:[%s7199_s7 + $0x39d0] sm:$0xff]  ;;  %v6677_v57 = vpack.c.bf16 %v2064_v50, %v2060_v49  ;;  %v5655_v63 = vpack.c.bf16 %v2061_v55, %v2057_v54  ;;  %v5673_v49 = vpack.c.bf16 %v2102_v44, %v2098_v43  ;;  %v2097_v50 = vld [vmem:[%s7199_s7 + $0x3b00] sm:$0xff]  ;;  %v2106_v55 = vld [vmem:[%s7199_s7 + $0x3b48] sm:$0xff] }
 0x3df   : > { %6658 = vmatprep.subr.bf16.mxu1 %v6657_v61  ;;  %v2068_v61 = vld [vmem:[%s7199_s7 + $0x3a18] sm:$0xff]  ;;  %v6679_v0 = vpack.c.bf16 %v2063_v58, %v2059_v56  ;;  %v2103_v54 = vld [vmem:[%s7199_s7 + $0x3b30] sm:$0xff]  ;;  %v2110_v56 = vld [vmem:[%s7199_s7 + $0x3b68] sm:$0xff] }
 0x3e0   : > { %v2112_v58 = vld [vmem:[%s7199_s7 + $0x3b78] sm:$0xff]  ;;  %v205_v43 = vld [vmem:[#allocation2 + $0xe0] sm:$0xff] }
 0x3e1   : > { %5636 = vmatpush1.bf16.msra.mxu0 %v5635_v3  ;;  %v2069_v3 = vld [vmem:[%s7199_s7 + $0x3a20] sm:$0xff] }
 0x3e2   : > { %6660 = vmatpush1.bf16.msra.mxu1 %v6659_v4  ;;  %5638 = vmatprep.subr.bf16.mxu0 %v5637_v5  ;;  %v2067_v4 = vld [vmem:[%s7199_s7 + $0x3a10] sm:$0xff]  ;;  %v6681_v5 = vpack.c.bf16 %v2072_v62, %v2068_v61  ;;  %v5659_v11 = vpack.c.bf16 %v2069_v3, %v2065_v2  ;;  %v5677_v61 = vpack.c.bf16 %v2110_v56, %v2106_v55  ;;  %v2105_v62 = vld [vmem:[%s7199_s7 + $0x3b40] sm:$0xff]  ;;  %v2114_v3 = vld [vmem:[%s7199_s7 + $0x3b88] sm:$0xff] }
 0x3e3   : > { %6662 = vmatprep.subr.bf16.mxu1 %v6661_v9  ;;  %v2076_v9 = vld [vmem:[%s7199_s7 + $0x3a58] sm:$0xff]  ;;  %v6683_v12 = vpack.c.bf16 %v2071_v6, %v2067_v4  ;;  %v2111_v2 = vld [vmem:[%s7199_s7 + $0x3b70] sm:$0xff]  ;;  %v2118_v4 = vld [vmem:[%s7199_s7 + $0x3ba8] sm:$0xff] }
 0x3e4   : > { %v2120_v6 = vld [vmem:[%s7199_s7 + $0x3bb8] sm:$0xff] }
 0x3e5   : > { %5640 = vmatpush1.bf16.msra.mxu0 %v5639_v15  ;;  %v2077_v15 = vld [vmem:[%s7199_s7 + $0x3a60] sm:$0xff]  ;;  %v2152_v55 = vld [vmem:[%s7199_s7 + $0x3cb8] sm:$0xff] }
 0x3e6   : > { %6664 = vmatpush1.bf16.msra.mxu1 %v6663_v16  ;;  %5642 = vmatprep.subr.bf16.mxu0 %v5641_v17  ;;  %v2075_v16 = vld [vmem:[%s7199_s7 + $0x3a50] sm:$0xff]  ;;  %v6685_v17 = vpack.c.bf16 %v2080_v10, %v2076_v9  ;;  %v5663_v23 = vpack.c.bf16 %v2077_v15, %v2073_v14  ;;  %v5681_v9 = vpack.c.bf16 %v2118_v4, %v2114_v3  ;;  %v2113_v10 = vld [vmem:[%s7199_s7 + $0x3b80] sm:$0xff]  ;;  %v2122_v15 = vld [vmem:[%s7199_s7 + $0x3bc8] sm:$0xff] }
 0x3e7   : > { %6666 = vmatprep.subr.bf16.mxu1 %v6665_v21  ;;  %v2084_v21 = vld [vmem:[%s7199_s7 + $0x3a98] sm:$0xff]  ;;  %v6687_v24 = vpack.c.bf16 %v2079_v18, %v2075_v16  ;;  %v2119_v14 = vld [vmem:[%s7199_s7 + $0x3bb0] sm:$0xff]  ;;  %v2126_v16 = vld [vmem:[%s7199_s7 + $0x3be8] sm:$0xff] }
 0x3e8   : > { %v2128_v18 = vld [vmem:[%s7199_s7 + $0x3bf8] sm:$0xff] }
 0x3e9   : > { %5644 = vmatpush1.bf16.msra.mxu0 %v5643_v27  ;;  %v2085_v27 = vld [vmem:[%s7199_s7 + $0x3aa0] sm:$0xff]  ;;  %v208_v56 = vld [vmem:[#allocation2 + $0xf8] sm:$0xff] }
 0x3ea   : > { %6668 = vmatpush1.bf16.msra.mxu1 %v6667_v28  ;;  %5646 = vmatprep.subr.bf16.mxu0 %v5645_v29  ;;  %v2083_v28 = vld [vmem:[%s7199_s7 + $0x3a90] sm:$0xff]  ;;  %v6689_v29 = vpack.c.bf16 %v2088_v22, %v2084_v21  ;;  %v5667_v35 = vpack.c.bf16 %v2085_v27, %v2081_v26  ;;  %v5685_v21 = vpack.c.bf16 %v2126_v16, %v2122_v15  ;;  %v2121_v22 = vld [vmem:[%s7199_s7 + $0x3bc0] sm:$0xff]  ;;  %v2130_v27 = vld [vmem:[%s7199_s7 + $0x3c08] sm:$0xff] }
 0x3eb   : > { %6670 = vmatprep.subr.bf16.mxu1 %v6669_v33  ;;  %v2092_v33 = vld [vmem:[%s7199_s7 + $0x3ad8] sm:$0xff]  ;;  %v6691_v36 = vpack.c.bf16 %v2087_v30, %v2083_v28  ;;  %v2127_v26 = vld [vmem:[%s7199_s7 + $0x3bf0] sm:$0xff]  ;;  %v2134_v28 = vld [vmem:[%s7199_s7 + $0x3c28] sm:$0xff] }
 0x3ec   : > { %v2136_v30 = vld [vmem:[%s7199_s7 + $0x3c38] sm:$0xff] }
 0x3ed   : > { %5648 = vmatpush1.bf16.msra.mxu0 %v5647_v39  ;;  %v2093_v39 = vld [vmem:[%s7199_s7 + $0x3ae0] sm:$0xff]  ;;  %v2156_v3 = vld [vmem:[%s7199_s7 + $0x3cd8] sm:$0xff] }
 0x3ee   : > { %6672 = vmatpush1.bf16.msra.mxu1 %v6671_v40  ;;  %5650 = vmatprep.subr.bf16.mxu0 %v5649_v41  ;;  %v2091_v40 = vld [vmem:[%s7199_s7 + $0x3ad0] sm:$0xff]  ;;  %v6693_v41 = vpack.c.bf16 %v2096_v34, %v2092_v33  ;;  %v5671_v47 = vpack.c.bf16 %v2093_v39, %v2089_v38  ;;  %v5689_v33 = vpack.c.bf16 %v2134_v28, %v2130_v27  ;;  %v2129_v34 = vld [vmem:[%s7199_s7 + $0x3c00] sm:$0xff]  ;;  %v2138_v39 = vld [vmem:[%s7199_s7 + $0x3c48] sm:$0xff] }
 0x3ef   : > { %6674 = vmatprep.subr.bf16.mxu1 %v6673_v45  ;;  %v2100_v45 = vld [vmem:[%s7199_s7 + $0x3b18] sm:$0xff]  ;;  %v6695_v48 = vpack.c.bf16 %v2095_v42, %v2091_v40  ;;  %v2135_v38 = vld [vmem:[%s7199_s7 + $0x3c30] sm:$0xff]  ;;  %v2142_v40 = vld [vmem:[%s7199_s7 + $0x3c68] sm:$0xff] }
 0x3f0   : > { %v2144_v42 = vld [vmem:[%s7199_s7 + $0x3c78] sm:$0xff] }
 0x3f1   : > { %5652 = vmatpush1.bf16.msra.mxu0 %v5651_v51  ;;  %v2101_v51 = vld [vmem:[%s7199_s7 + $0x3b20] sm:$0xff]  ;;  %v2160_v4 = vld [vmem:[%s7199_s7 + $0x3cf8] sm:$0xff] }
 0x3f2   : > { %6676 = vmatpush1.bf16.msra.mxu1 %v6675_v52  ;;  %5654 = vmatprep.subr.bf16.mxu0 %v5653_v53  ;;  %v2099_v52 = vld [vmem:[%s7199_s7 + $0x3b10] sm:$0xff]  ;;  %v6697_v53 = vpack.c.bf16 %v2104_v46, %v2100_v45  ;;  %v5675_v59 = vpack.c.bf16 %v2101_v51, %v2097_v50  ;;  %v5693_v46 = vpack.c.bf16 %v2142_v40, %v2138_v39  ;;  %v2164_v15 = vld [vmem:[%s7199_s7 + $0x3d18] sm:$0xff] }
 0x3f3   : > { %6678 = vmatprep.subr.bf16.mxu1 %v6677_v57  ;;  %v2108_v57 = vld [vmem:[%s7199_s7 + $0x3b58] sm:$0xff]  ;;  %v6699_v60 = vpack.c.bf16 %v2103_v54, %v2099_v52  ;;  %v2143_v51 = vld [vmem:[%s7199_s7 + $0x3c70] sm:$0xff]  ;;  %v2146_v52 = vld [vmem:[%s7199_s7 + $0x3c88] sm:$0xff] }
 0x3f4   : > { %v2148_v54 = vld [vmem:[%s7199_s7 + $0x3c98] sm:$0xff] }
 0x3f5   : > { %5656 = vmatpush1.bf16.msra.mxu0 %v5655_v63  ;;  %v2109_v63 = vld [vmem:[%s7199_s7 + $0x3b60] sm:$0xff]  ;;  %v2168_v16 = vld [vmem:[%s7199_s7 + $0x3d38] sm:$0xff] }
 0x3f6   : > { %6680 = vmatpush1.bf16.msra.mxu1 %v6679_v0  ;;  %5658 = vmatprep.subr.bf16.mxu0 %v5657_v1  ;;  %v2107_v0 = vld [vmem:[%s7199_s7 + $0x3b50] sm:$0xff]  ;;  %v6701_v1 = vpack.c.bf16 %v2112_v58, %v2108_v57  ;;  %v5679_v7 = vpack.c.bf16 %v2109_v63, %v2105_v62  ;;  %v6721_v63 = vpack.c.bf16 %v2152_v55, %v2148_v54  ;;  %v2172_v27 = vld [vmem:[%s7199_s7 + $0x3d58] sm:$0xff] }
 0x3f7   : > { %6682 = vmatprep.subr.bf16.mxu1 %v6681_v5  ;;  %v2116_v5 = vld [vmem:[%s7199_s7 + $0x3b98] sm:$0xff]  ;;  %v6703_v8 = vpack.c.bf16 %v2111_v2, %v2107_v0  ;;  %v2147_v62 = vld [vmem:[%s7199_s7 + $0x3c90] sm:$0xff]  ;;  %v2158_v2 = vld [vmem:[%s7199_s7 + $0x3ce8] sm:$0xff] }
 0x3f8   : > { %v2151_v0 = vld [vmem:[%s7199_s7 + $0x3cb0] sm:$0xff]  ;;  %v2176_v28 = vld [vmem:[%s7199_s7 + $0x3d78] sm:$0xff] }
 0x3f9   : > { %5660 = vmatpush1.bf16.msra.mxu0 %v5659_v11  ;;  %v2117_v11 = vld [vmem:[%s7199_s7 + $0x3ba0] sm:$0xff]  ;;  %v2180_v39 = vld [vmem:[%s7199_s7 + $0x3d98] sm:$0xff] }
 0x3fa   : > { %6684 = vmatpush1.bf16.msra.mxu1 %v6683_v12  ;;  %5662 = vmatprep.subr.bf16.mxu0 %v5661_v13  ;;  %v2115_v12 = vld [vmem:[%s7199_s7 + $0x3b90] sm:$0xff]  ;;  %v6705_v13 = vpack.c.bf16 %v2120_v6, %v2116_v5  ;;  %v5683_v19 = vpack.c.bf16 %v2117_v11, %v2113_v10  ;;  %v6723_v6 = vpack.c.bf16 %v2151_v0, %v2147_v62  ;;  %v2184_v40 = vld [vmem:[%s7199_s7 + $0x3db8] sm:$0xff]  ;;  %v2198_v62 = vld [vmem:[%s7199_s7 + $0x3e28] sm:$0xff] }
 0x3fb   : > { %6686 = vmatprep.subr.bf16.mxu1 %v6685_v17  ;;  %v2124_v17 = vld [vmem:[%s7199_s7 + $0x3bd8] sm:$0xff]  ;;  %v6707_v20 = vpack.c.bf16 %v2119_v14, %v2115_v12  ;;  %v2155_v10 = vld [vmem:[%s7199_s7 + $0x3cd0] sm:$0xff]  ;;  %v6725_v11 = vpack.c.bf16 %v2160_v4, %v2156_v3  ;;  %v2166_v14 = vld [vmem:[%s7199_s7 + $0x3d28] sm:$0xff] }
 0x3fc   : > { %v2159_v12 = vld [vmem:[%s7199_s7 + $0x3cf0] sm:$0xff]  ;;  %v2200_v0 = vld [vmem:[%s7199_s7 + $0x3e38] sm:$0xff]  ;;  %v2193_v4 = vld [vmem:[%s7199_s7 + $0x3e00] sm:$0xff] }
 0x3fd   : > { %5664 = vmatpush1.bf16.msra.mxu0 %v5663_v23  ;;  %v2125_v23 = vld [vmem:[%s7199_s7 + $0x3be0] sm:$0xff] }
 0x3fe   : > { %6688 = vmatpush1.bf16.msra.mxu1 %v6687_v24  ;;  %5666 = vmatprep.subr.bf16.mxu0 %v5665_v25  ;;  %v2123_v24 = vld [vmem:[%s7199_s7 + $0x3bd0] sm:$0xff]  ;;  %v6709_v25 = vpack.c.bf16 %v2128_v18, %v2124_v17  ;;  %v5687_v31 = vpack.c.bf16 %v2125_v23, %v2121_v22  ;;  %v6727_v18 = vpack.c.bf16 %v2159_v12, %v2155_v10  ;;  %v2206_v10 = vld [vmem:[%s7199_s7 + $0x3e68] sm:$0xff]  ;;  %v2208_v12 = vld [vmem:[%s7199_s7 + $0x3e78] sm:$0xff] }
 0x3ff   : > { %6690 = vmatprep.subr.bf16.mxu1 %v6689_v29  ;;  %v2132_v29 = vld [vmem:[%s7199_s7 + $0x3c18] sm:$0xff]  ;;  %v6711_v32 = vpack.c.bf16 %v2127_v26, %v2123_v24  ;;  %v2163_v22 = vld [vmem:[%s7199_s7 + $0x3d10] sm:$0xff]  ;;  %v6729_v23 = vpack.c.bf16 %v2168_v16, %v2164_v15  ;;  %v2174_v26 = vld [vmem:[%s7199_s7 + $0x3d68] sm:$0xff] }
 0x400   : > { %v2167_v24 = vld [vmem:[%s7199_s7 + $0x3d30] sm:$0xff]  ;;  %v2201_v16 = vld [vmem:[%s7199_s7 + $0x3e40] sm:$0xff] }
 0x401   : > { %5668 = vmatpush1.bf16.msra.mxu0 %v5667_v35  ;;  %v2133_v35 = vld [vmem:[%s7199_s7 + $0x3c20] sm:$0xff] }
 0x402   : > { %6692 = vmatpush1.bf16.msra.mxu1 %v6691_v36  ;;  %5670 = vmatprep.subr.bf16.mxu0 %v5669_v37  ;;  %v2131_v36 = vld [vmem:[%s7199_s7 + $0x3c10] sm:$0xff]  ;;  %v6713_v37 = vpack.c.bf16 %v2136_v30, %v2132_v29  ;;  %v5691_v44 = vpack.c.bf16 %v2133_v35, %v2129_v34  ;;  %v6731_v30 = vpack.c.bf16 %v2167_v24, %v2163_v22  ;;  %v2214_v22 = vld [vmem:[%s7199_s7 + $0x3ea8] sm:$0xff]  ;;  %v2216_v24 = vld [vmem:[%s7199_s7 + $0x3eb8] sm:$0xff] }
 0x403   : > { %6694 = vmatprep.subr.bf16.mxu1 %v6693_v41  ;;  %v2140_v41 = vld [vmem:[%s7199_s7 + $0x3c58] sm:$0xff]  ;;  %v6715_v45 = vpack.c.bf16 %v2135_v38, %v2131_v36  ;;  %v2171_v34 = vld [vmem:[%s7199_s7 + $0x3d50] sm:$0xff]  ;;  %v6733_v35 = vpack.c.bf16 %v2176_v28, %v2172_v27  ;;  %v2182_v38 = vld [vmem:[%s7199_s7 + $0x3da8] sm:$0xff] }
 0x404   : > { %v6717_v50 = vpack.c.bf16 %v2144_v42, %v2140_v41  ;;  %v2175_v36 = vld [vmem:[%s7199_s7 + $0x3d70] sm:$0xff]  ;;  %v2209_v28 = vld [vmem:[%s7199_s7 + $0x3e80] sm:$0xff] }
 0x405   : > { %5672 = vmatpush1.bf16.msra.mxu0 %v5671_v47  ;;  %v2137_v47 = vld [vmem:[%s7199_s7 + $0x3c40] sm:$0xff]  ;;  %v6735_v42 = vpack.c.bf16 %v2175_v36, %v2171_v34  ;;  %v2222_v34 = vld [vmem:[%s7199_s7 + $0x3ee8] sm:$0xff]  ;;  %v2224_v36 = vld [vmem:[%s7199_s7 + $0x3ef8] sm:$0xff] }
 0x406   : > { %6696 = vmatpush1.bf16.msra.mxu1 %v6695_v48  ;;  %5674 = vmatprep.subr.bf16.mxu0 %v5673_v49  ;;  %v2141_v48 = vld [vmem:[%s7199_s7 + $0x3c60] sm:$0xff]  ;;  %v2139_v49 = vld [vmem:[%s7199_s7 + $0x3c50] sm:$0xff] }
 0x407   : > { %6698 = vmatprep.subr.bf16.mxu1 %v6697_v53  ;;  %v2150_v53 = vld [vmem:[%s7199_s7 + $0x3ca8] sm:$0xff]  ;;  %v5695_v57 = vpack.c.bf16 %v2141_v48, %v2137_v47  ;;  %v6719_v58 = vpack.c.bf16 %v2143_v51, %v2139_v49  ;;  %v6737_v47 = vpack.c.bf16 %v2184_v40, %v2180_v39  ;;  %v2183_v48 = vld [vmem:[%s7199_s7 + $0x3db0] sm:$0xff]  ;;  %v2188_v51 = vld [vmem:[%s7199_s7 + $0x3dd8] sm:$0xff] }
 0x408   : > { %v2186_v49 = vld [vmem:[%s7199_s7 + $0x3dc8] sm:$0xff]  ;;  %v2217_v40 = vld [vmem:[%s7199_s7 + $0x3ec0] sm:$0xff] }
 0x409   : > { %5676 = vmatpush1.bf16.msra.mxu0 %v5675_v59  ;;  %v5697_v59 = vpack.c.bf16 %v2150_v53, %v2146_v52  ;;  %v2192_v52 = vld [vmem:[%s7199_s7 + $0x3df8] sm:$0xff] }
 0x40a   : > { %6700 = vmatpush1.bf16.msra.mxu1 %v6699_v60  ;;  %5678 = vmatprep.subr.bf16.mxu0 %v5677_v61  ;;  %v2145_v60 = vld [vmem:[%s7199_s7 + $0x3c80] sm:$0xff] }
 0x40b   : > { %6702 = vmatprep.subr.bf16.mxu1 %v6701_v1  ;;  %v2149_v61 = vld [vmem:[%s7199_s7 + $0x3ca0] sm:$0xff]  ;;  %v2154_v1 = vld [vmem:[%s7199_s7 + $0x3cc8] sm:$0xff] }
 0x40c   : > { %v5699_v5 = vpack.c.bf16 %v2149_v61, %v2145_v60  ;;  %v2191_v60 = vld [vmem:[%s7199_s7 + $0x3df0] sm:$0xff]  ;;  %v2194_v61 = vld [vmem:[%s7199_s7 + $0x3e08] sm:$0xff] }
 0x40d   : > { %5680 = vmatpush1.bf16.msra.mxu0 %v5679_v7  ;;  %v5701_v7 = vpack.c.bf16 %v2158_v2, %v2154_v1  ;;  %v5721_v3 = vpack.c.bf16 %v2198_v62, %v2194_v61 }
 0x40e   : > { %6704 = vmatpush1.bf16.msra.mxu1 %v6703_v8  ;;  %5682 = vmatprep.subr.bf16.mxu0 %v5681_v9  ;;  %v2153_v8 = vld [vmem:[%s7199_s7 + $0x3cc0] sm:$0xff] }
 0x40f   : > { %6706 = vmatprep.subr.bf16.mxu1 %v6705_v13  ;;  %v2157_v9 = vld [vmem:[%s7199_s7 + $0x3ce0] sm:$0xff]  ;;  %v2162_v13 = vld [vmem:[%s7199_s7 + $0x3d08] sm:$0xff] }
 0x410   : > { %v5703_v17 = vpack.c.bf16 %v2157_v9, %v2153_v8  ;;  %v2199_v8 = vld [vmem:[%s7199_s7 + $0x3e30] sm:$0xff]  ;;  %v2202_v9 = vld [vmem:[%s7199_s7 + $0x3e48] sm:$0xff] }
 0x411   : > { %5684 = vmatpush1.bf16.msra.mxu0 %v5683_v19  ;;  %v5705_v19 = vpack.c.bf16 %v2166_v14, %v2162_v13  ;;  %v5725_v15 = vpack.c.bf16 %v2206_v10, %v2202_v9 }
 0x412   : > { %6708 = vmatpush1.bf16.msra.mxu1 %v6707_v20  ;;  %5686 = vmatprep.subr.bf16.mxu0 %v5685_v21  ;;  %v2161_v20 = vld [vmem:[%s7199_s7 + $0x3d00] sm:$0xff] }
 0x413   : > { %6710 = vmatprep.subr.bf16.mxu1 %v6709_v25  ;;  %v2165_v21 = vld [vmem:[%s7199_s7 + $0x3d20] sm:$0xff]  ;;  %v2170_v25 = vld [vmem:[%s7199_s7 + $0x3d48] sm:$0xff] }
 0x414   : > { %v5707_v29 = vpack.c.bf16 %v2165_v21, %v2161_v20  ;;  %v2207_v20 = vld [vmem:[%s7199_s7 + $0x3e70] sm:$0xff]  ;;  %v2210_v21 = vld [vmem:[%s7199_s7 + $0x3e88] sm:$0xff] }
 0x415   : > { %5688 = vmatpush1.bf16.msra.mxu0 %v5687_v31  ;;  %v5709_v31 = vpack.c.bf16 %v2174_v26, %v2170_v25  ;;  %v5729_v27 = vpack.c.bf16 %v2214_v22, %v2210_v21 }
 0x416   : > { %6712 = vmatpush1.bf16.msra.mxu1 %v6711_v32  ;;  %5690 = vmatprep.subr.bf16.mxu0 %v5689_v33  ;;  %v2169_v32 = vld [vmem:[%s7199_s7 + $0x3d40] sm:$0xff] }
 0x417   : > { %6714 = vmatprep.subr.bf16.mxu1 %v6713_v37  ;;  %v2173_v33 = vld [vmem:[%s7199_s7 + $0x3d60] sm:$0xff]  ;;  %v2178_v37 = vld [vmem:[%s7199_s7 + $0x3d88] sm:$0xff] }
 0x418   : > { %3316 = vmatmul.mubr.f32.vlgmr.msra.gmra.mrb[0].mxu0 %v205_v43  ;;  %v5711_v41 = vpack.c.bf16 %v2173_v33, %v2169_v32  ;;  %v2215_v32 = vld [vmem:[%s7199_s7 + $0x3eb0] sm:$0xff]  ;;  %v2218_v33 = vld [vmem:[%s7199_s7 + $0x3ec8] sm:$0xff] }
 0x419   : > { %5692 = vmatpush1.bf16.msra.mxu0 %v5691_v44  ;;  %4452 = vmatmul.mubr.f32.vlgmr.msra.gmra.mrb[0].mxu1 %v205_v43  ;;  %v5713_v43 = vpack.c.bf16 %v2182_v38, %v2178_v37  ;;  %v2177_v44 = vld [vmem:[%s7199_s7 + $0x3d80] sm:$0xff]  ;;  %v5733_v39 = vpack.c.bf16 %v2222_v34, %v2218_v33 }
 0x41a   : > { %6716 = vmatpush1.bf16.msra.mxu1 %v6715_v45  ;;  %5694 = vmatprep.subr.bf16.mxu0 %v5693_v46  ;;  %v2181_v45 = vld [vmem:[%s7199_s7 + $0x3da0] sm:$0xff]  ;;  %v2179_v46 = vld [vmem:[%s7199_s7 + $0x3d90] sm:$0xff] }
 0x41b   : > { %6718 = vmatprep.subr.bf16.mxu1 %v6717_v50  ;;  %3386 = vmatprep.mubr.f32.mxu0 %v208_v56  ;;  %v2190_v50 = vld [vmem:[%s7199_s7 + $0x3de8] sm:$0xff]  ;;  %v5715_v53 = vpack.c.bf16 %v2181_v45, %v2177_v44  ;;  %v6739_v54 = vpack.c.bf16 %v2183_v48, %v2179_v46  ;;  %v2223_v44 = vld [vmem:[%s7199_s7 + $0x3ef0] sm:$0xff]  ;;  %v2232_v48 = vld [vmem:[%s7199_s7 + $0x3f38] sm:$0xff] }
 0x41c   : > { %4522 = vmatprep.mubr.f32.mxu1 %v208_v56  ;;  %v5717_v55 = vpack.c.bf16 %v2190_v50, %v2186_v49  ;;  %v2185_v56 = vld [vmem:[%s7199_s7 + $0x3dc0] sm:$0xff]  ;;  %v2226_v45 = vld [vmem:[%s7199_s7 + $0x3f08] sm:$0xff] }
 0x41d   : > { %5696 = vmatpush1.bf16.msra.mxu0 %v5695_v57  ;;  %v2189_v57 = vld [vmem:[%s7199_s7 + $0x3de0] sm:$0xff]  ;;  %v2230_v46 = vld [vmem:[%s7199_s7 + $0x3f28] sm:$0xff] }
 0x41e   : > { %6720 = vmatpush1.bf16.msra.mxu1 %v6719_v58  ;;  %5698 = vmatprep.subr.bf16.mxu0 %v5697_v59  ;;  %v2187_v58 = vld [vmem:[%s7199_s7 + $0x3dd0] sm:$0xff]  ;;  %v6741_v59 = vpack.c.bf16 %v2192_v52, %v2188_v51  ;;  %v5719_v1 = vpack.c.bf16 %v2189_v57, %v2185_v56  ;;  %v5737_v51 = vpack.c.bf16 %v2230_v46, %v2226_v45  ;;  %v2225_v52 = vld [vmem:[%s7199_s7 + $0x3f00] sm:$0xff]  ;;  %v2234_v57 = vld [vmem:[%s7199_s7 + $0x3f48] sm:$0xff] }
 0x41f   : > { %6722 = vmatprep.subr.bf16.mxu1 %v6721_v63  ;;  %v2196_v63 = vld [vmem:[%s7199_s7 + $0x3e18] sm:$0xff]  ;;  %v6743_v2 = vpack.c.bf16 %v2191_v60, %v2187_v58  ;;  %v2231_v56 = vld [vmem:[%s7199_s7 + $0x3f30] sm:$0xff]  ;;  %v2238_v58 = vld [vmem:[%s7199_s7 + $0x3f68] sm:$0xff] }
 0x420   : > { %v2240_v60 = vld [vmem:[%s7199_s7 + $0x3f78] sm:$0xff] }
 0x421   : > { %5700 = vmatpush1.bf16.msra.mxu0 %v5699_v5  ;;  %v2197_v5 = vld [vmem:[%s7199_s7 + $0x3e20] sm:$0xff] }
 0x422   : > { %6724 = vmatpush1.bf16.msra.mxu1 %v6723_v6  ;;  %5702 = vmatprep.subr.bf16.mxu0 %v5701_v7  ;;  %v2195_v6 = vld [vmem:[%s7199_s7 + $0x3e10] sm:$0xff]  ;;  %v6745_v7 = vpack.c.bf16 %v2200_v0, %v2196_v63  ;;  %v5723_v13 = vpack.c.bf16 %v2197_v5, %v2193_v4  ;;  %v5741_v63 = vpack.c.bf16 %v2238_v58, %v2234_v57  ;;  %v2233_v0 = vld [vmem:[%s7199_s7 + $0x3f40] sm:$0xff]  ;;  %v2242_v5 = vld [vmem:[%s7199_s7 + $0x3f88] sm:$0xff] }
 0x423   : > { %6726 = vmatprep.subr.bf16.mxu1 %v6725_v11  ;;  %v2204_v11 = vld [vmem:[%s7199_s7 + $0x3e58] sm:$0xff]  ;;  %v6747_v14 = vpack.c.bf16 %v2199_v8, %v2195_v6  ;;  %v2239_v4 = vld [vmem:[%s7199_s7 + $0x3f70] sm:$0xff]  ;;  %v2246_v6 = vld [vmem:[%s7199_s7 + $0x3fa8] sm:$0xff] }
 0x424   : > { %v2248_v8 = vld [vmem:[%s7199_s7 + $0x3fb8] sm:$0xff] }
 0x425   : > { %5704 = vmatpush1.bf16.msra.mxu0 %v5703_v17  ;;  %v2205_v17 = vld [vmem:[%s7199_s7 + $0x3e60] sm:$0xff] }
 0x426   : > { %6728 = vmatpush1.bf16.msra.mxu1 %v6727_v18  ;;  %5706 = vmatprep.subr.bf16.mxu0 %v5705_v19  ;;  %v2203_v18 = vld [vmem:[%s7199_s7 + $0x3e50] sm:$0xff]  ;;  %v6749_v19 = vpack.c.bf16 %v2208_v12, %v2204_v11  ;;  %v5727_v25 = vpack.c.bf16 %v2205_v17, %v2201_v16  ;;  %v5745_v11 = vpack.c.bf16 %v2246_v6, %v2242_v5  ;;  %v2241_v12 = vld [vmem:[%s7199_s7 + $0x3f80] sm:$0xff]  ;;  %v2250_v17 = vld [vmem:[%s7199_s7 + $0x3fc8] sm:$0xff] }
 0x427   : > { %6730 = vmatprep.subr.bf16.mxu1 %v6729_v23  ;;  %v2212_v23 = vld [vmem:[%s7199_s7 + $0x3e98] sm:$0xff]  ;;  %v6751_v26 = vpack.c.bf16 %v2207_v20, %v2203_v18  ;;  %v2247_v16 = vld [vmem:[%s7199_s7 + $0x3fb0] sm:$0xff]  ;;  %v2254_v18 = vld [vmem:[%s7199_s7 + $0x3fe8] sm:$0xff] }
 0x428   : > { %v2256_v20 = vld [vmem:[%s7199_s7 + $0x3ff8] sm:$0xff] }
 0x429   : > { %5708 = vmatpush1.bf16.msra.mxu0 %v5707_v29  ;;  %v2213_v29 = vld [vmem:[%s7199_s7 + $0x3ea0] sm:$0xff] }
 0x42a   : > { %6732 = vmatpush1.bf16.msra.mxu1 %v6731_v30  ;;  %5710 = vmatprep.subr.bf16.mxu0 %v5709_v31  ;;  %v2211_v30 = vld [vmem:[%s7199_s7 + $0x3e90] sm:$0xff]  ;;  %v6753_v31 = vpack.c.bf16 %v2216_v24, %v2212_v23  ;;  %v5731_v37 = vpack.c.bf16 %v2213_v29, %v2209_v28  ;;  %v5749_v23 = vpack.c.bf16 %v2254_v18, %v2250_v17  ;;  %v2249_v24 = vld [vmem:[%s7199_s7 + $0x3fc0] sm:$0xff] }
 0x42b   : > { %6734 = vmatprep.subr.bf16.mxu1 %v6733_v35  ;;  %v2220_v35 = vld [vmem:[%s7199_s7 + $0x3ed8] sm:$0xff]  ;;  %v6755_v38 = vpack.c.bf16 %v2215_v32, %v2211_v30  ;;  %v2255_v28 = vld [vmem:[%s7199_s7 + $0x3ff0] sm:$0xff] }
 0x42d   : > { %5712 = vmatpush1.bf16.msra.mxu0 %v5711_v41  ;;  %v2221_v41 = vld [vmem:[%s7199_s7 + $0x3ee0] sm:$0xff] }
 0x42e   : > { %6736 = vmatpush1.bf16.msra.mxu1 %v6735_v42  ;;  %5714 = vmatprep.subr.bf16.mxu0 %v5713_v43  ;;  %v2219_v42 = vld [vmem:[%s7199_s7 + $0x3ed0] sm:$0xff]  ;;  %v6757_v43 = vpack.c.bf16 %v2224_v36, %v2220_v35  ;;  %v5735_v49 = vpack.c.bf16 %v2221_v41, %v2217_v40 }
 0x42f   : > { %6738 = vmatprep.subr.bf16.mxu1 %v6737_v47  ;;  %v2228_v47 = vld [vmem:[%s7199_s7 + $0x3f18] sm:$0xff]  ;;  %v6759_v50 = vpack.c.bf16 %v2223_v44, %v2219_v42 }
 0x431   : > { %5716 = vmatpush1.bf16.msra.mxu0 %v5715_v53  ;;  %v2229_v53 = vld [vmem:[%s7199_s7 + $0x3f20] sm:$0xff] }
 0x432   : > { %6740 = vmatpush1.bf16.msra.mxu1 %v6739_v54  ;;  %5718 = vmatprep.subr.bf16.mxu0 %v5717_v55  ;;  %v2227_v54 = vld [vmem:[%s7199_s7 + $0x3f10] sm:$0xff]  ;;  %v6761_v55 = vpack.c.bf16 %v2232_v48, %v2228_v47  ;;  %v5739_v61 = vpack.c.bf16 %v2229_v53, %v2225_v52 }
 0x433   : > { %6742 = vmatprep.subr.bf16.mxu1 %v6741_v59  ;;  %v2236_v59 = vld [vmem:[%s7199_s7 + $0x3f58] sm:$0xff]  ;;  %v6763_v62 = vpack.c.bf16 %v2231_v56, %v2227_v54 }
 0x435   : > { %5720 = vmatpush1.bf16.msra.mxu0 %v5719_v1  ;;  %v2237_v1 = vld [vmem:[%s7199_s7 + $0x3f60] sm:$0xff] }
 0x436   : > { %6744 = vmatpush1.bf16.msra.mxu1 %v6743_v2  ;;  %5722 = vmatprep.subr.bf16.mxu0 %v5721_v3  ;;  %v2235_v2 = vld [vmem:[%s7199_s7 + $0x3f50] sm:$0xff]  ;;  %v6765_v3 = vpack.c.bf16 %v2240_v60, %v2236_v59  ;;  %v5743_v9 = vpack.c.bf16 %v2237_v1, %v2233_v0 }
 0x437   : > { %6746 = vmatprep.subr.bf16.mxu1 %v6745_v7  ;;  %v2244_v7 = vld [vmem:[%s7199_s7 + $0x3f98] sm:$0xff]  ;;  %v6767_v10 = vpack.c.bf16 %v2239_v4, %v2235_v2 }
 0x439   : > { %5724 = vmatpush1.bf16.msra.mxu0 %v5723_v13  ;;  %v2245_v13 = vld [vmem:[%s7199_s7 + $0x3fa0] sm:$0xff] }
 0x43a   : > { %6748 = vmatpush1.bf16.msra.mxu1 %v6747_v14  ;;  %5726 = vmatprep.subr.bf16.mxu0 %v5725_v15  ;;  %v2243_v14 = vld [vmem:[%s7199_s7 + $0x3f90] sm:$0xff]  ;;  %v6769_v15 = vpack.c.bf16 %v2248_v8, %v2244_v7  ;;  %v5747_v21 = vpack.c.bf16 %v2245_v13, %v2241_v12 }
 0x43b   : > { %6750 = vmatprep.subr.bf16.mxu1 %v6749_v19  ;;  %v2252_v19 = vld [vmem:[%s7199_s7 + $0x3fd8] sm:$0xff]  ;;  %v6771_v22 = vpack.c.bf16 %v2247_v16, %v2243_v14 }
 0x43d   : > { %5728 = vmatpush1.bf16.msra.mxu0 %v5727_v25  ;;  %v2253_v25 = vld [vmem:[%s7199_s7 + $0x3fe0] sm:$0xff] }
 0x43e   : > { %6752 = vmatpush1.bf16.msra.mxu1 %v6751_v26  ;;  %5730 = vmatprep.subr.bf16.mxu0 %v5729_v27  ;;  %v6773_v26 = vpack.c.bf16 %v2256_v20, %v2252_v19  ;;  %v2251_v27 = vld [vmem:[%s7199_s7 + $0x3fd0] sm:$0xff]  ;;  %v5751_v29 = vpack.c.bf16 %v2253_v25, %v2249_v24 }
 0x43f   : > { %6754 = vmatprep.subr.bf16.mxu1 %v6753_v31  ;;  %v6775_v30 = vpack.c.bf16 %v2255_v28, %v2251_v27  ;;  %v207_v31 = vld [vmem:[#allocation2 + $0xf0] sm:$0xff] }
 0x441   : > { %5732 = vmatpush1.bf16.msra.mxu0 %v5731_v37 }
 0x442   : > { %6756 = vmatpush1.bf16.msra.mxu1 %v6755_v38  ;;  %5734 = vmatprep.subr.bf16.mxu0 %v5733_v39 }
 0x443   : > { %6758 = vmatprep.subr.bf16.mxu1 %v6757_v43 }
 0x445   : > { %5736 = vmatpush1.bf16.msra.mxu0 %v5735_v49 }
 0x446   : > { %6760 = vmatpush1.bf16.msra.mxu1 %v6759_v50  ;;  %5738 = vmatprep.subr.bf16.mxu0 %v5737_v51 }
 0x447   : > { %6762 = vmatprep.subr.bf16.mxu1 %v6761_v55 }
 0x449   : > { %5740 = vmatpush1.bf16.msra.mxu0 %v5739_v61 }
 0x44a   : > { %6764 = vmatpush1.bf16.msra.mxu1 %v6763_v62  ;;  %5742 = vmatprep.subr.bf16.mxu0 %v5741_v63 }
 0x44b   : > { %6766 = vmatprep.subr.bf16.mxu1 %v6765_v3 }
 0x44d   : > { %5744 = vmatpush1.bf16.msra.mxu0 %v5743_v9 }
 0x44e   : > { %6768 = vmatpush1.bf16.msra.mxu1 %v6767_v10  ;;  %5746 = vmatprep.subr.bf16.mxu0 %v5745_v11 }
 0x44f   : > { %6770 = vmatprep.subr.bf16.mxu1 %v6769_v15 }
 0x451   : > { %5748 = vmatpush1.bf16.msra.mxu0 %v5747_v21 }
 0x452   : > { %6772 = vmatpush1.bf16.msra.mxu1 %v6771_v22  ;;  %5750 = vmatprep.subr.bf16.mxu0 %v5749_v23 }
 0x453   : > { %6774 = vmatprep.subr.bf16.mxu1 %v6773_v26 }
 0x455   : > { %5752 = vmatpush1.bf16.msra.mxu0 %v5751_v29 }
 0x456   : > { %6776 = vmatpush1.bf16.msra.mxu1 %v6775_v30 }
 0x458   : > { %3387 = vmatmul.mubr.f32.vlgmr.msra.gmra.mrb[0].mxu0 %v207_v31 }
 0x459   : > { %4523 = vmatmul.mubr.f32.vlgmr.msra.gmra.mrb[0].mxu1 %v207_v31 }
 0x52b   : > { %v3388_v32 = vpop.f32.mrb[0].mxu0 }
 0x52c   : > { %v4529_v33 = vrot.slane %v3388_v32, 4  ;;  %v4524_v34 = vpop.f32.mrb[0].mxu1  ;;  %v3390_v35 = vpop.f32.mrb[1].mxu0 }
 0x52d   : > { %v4541_v36 = vrot.slane %v4524_v34, 4  ;;  %v4535_v37 = vrot.slane %v3390_v35, 4  ;;  %v4526_v38 = vpop.f32.mrb[1].mxu1 }
 0x52e   : > { %v4530_v39 = vadd.f32 %v4529_v33, %v3388_v32  ;;  %v4547_v40 = vrot.slane %v4526_v38, 4 }
 0x52f   : > { %v4542_v41 = vadd.f32 %v4541_v36, %v4524_v34  ;;  %v4536_v42 = vadd.f32 %v4535_v37, %v3390_v35 }
 0x530   : > { %v4531_v43 = vrot.slane %v4530_v39, 2  ;;  %v4548_v44 = vadd.f32 %v4547_v40, %v4526_v38 }
 0x531   : > { %v4543_v45 = vrot.slane %v4542_v41, 2  ;;  %v4537_v46 = vrot.slane %v4536_v42, 2 }
 0x532   : > { %v4532_v47 = vadd.f32 %v4531_v43, %v4530_v39  ;;  %v4549_v48 = vrot.slane %v4548_v44, 2 }
 0x533   : > { %v4544_v49 = vadd.f32 %v4543_v45, %v4542_v41  ;;  %v4538_v50 = vadd.f32 %v4537_v46, %v4536_v42 }
 0x534   : > { %v4533_v51 = vrot.slane %v4532_v47, 1  ;;  %v4550_v52 = vadd.f32 %v4549_v48, %v4548_v44 }
 0x535   : > { %v4545_v53 = vrot.slane %v4544_v49, 1  ;;  %v4539_v54 = vrot.slane %v4538_v50, 1 }
 0x536   : > { %v4534_v55 = vadd.f32 %v4533_v51, %v4532_v47  ;;  %v4551_v56 = vrot.slane %v4550_v52, 1 }
 0x537   : > { %v4546_v57 = vadd.f32 %v4545_v53, %v4544_v49  ;;  %v4540_v58 = vadd.f32 %v4539_v54, %v4538_v50 }
 0x538   : > { %v4554_v59 = vmul.f32 0.125, %v4534_v55  ;;  %v4552_v60 = vadd.f32 %v4551_v56, %v4550_v52 }
 0x539   : > { %v4556_v61 = vmul.f32 0.125, %v4546_v57  ;;  %v4555_v62 = vmul.f32 0.125, %v4540_v58 }
 0x53a   : > { %v4558_v63 = vsub.f32 %v3388_v32, %v4554_v59  ;;  %v4557_v0 = vmul.f32 0.125, %v4552_v60 }
 0x53b   : > { %v4560_v1 = vsub.f32 %v4524_v34, %v4556_v61  ;;  %v4559_v2 = vsub.f32 %v3390_v35, %v4555_v62 }
 0x53c   : > { %v4562_v3 = vmul.f32 %v4558_v63, %v4558_v63  ;;  %v4561_v4 = vsub.f32 %v4526_v38, %v4557_v0 }
 0x53d   : > { %v4564_v5 = vmul.f32 %v4560_v1, %v4560_v1  ;;  %v4563_v6 = vmul.f32 %v4559_v2, %v4559_v2 }
 0x53e   : > { %v4566_v7 = vrot.slane %v4562_v3, 4  ;;  %v4565_v8 = vmul.f32 %v4561_v4, %v4561_v4 }
 0x53f   : > { %v4578_v9 = vrot.slane %v4564_v5, 4  ;;  %v4572_v10 = vrot.slane %v4563_v6, 4 }
 0x540   : > { %v4567_v11 = vadd.f32 %v4566_v7, %v4562_v3  ;;  %v4584_v12 = vrot.slane %v4565_v8, 4 }
 0x541   : > { %v4579_v13 = vadd.f32 %v4578_v9, %v4564_v5  ;;  %v4573_v14 = vadd.f32 %v4572_v10, %v4563_v6 }
 0x542   : > { %v4568_v15 = vrot.slane %v4567_v11, 2  ;;  %v4585_v16 = vadd.f32 %v4584_v12, %v4565_v8 }
 0x543   : > { %v4580_v17 = vrot.slane %v4579_v13, 2  ;;  %v4574_v18 = vrot.slane %v4573_v14, 2 }
 0x544   : > { %v4569_v19 = vadd.f32 %v4568_v15, %v4567_v11  ;;  %v4586_v20 = vrot.slane %v4585_v16, 2 }
 0x545   : > { %v4581_v21 = vadd.f32 %v4580_v17, %v4579_v13  ;;  %v4575_v22 = vadd.f32 %v4574_v18, %v4573_v14 }
 0x546   : > { %v4570_v23 = vrot.slane %v4569_v19, 1  ;;  %v4587_v24 = vadd.f32 %v4586_v20, %v4585_v16 }
 0x547   : > { %v4582_v25 = vrot.slane %v4581_v21, 1  ;;  %v4576_v26 = vrot.slane %v4575_v22, 1 }
 0x548   : > { %v4571_v27 = vadd.f32 %v4570_v23, %v4569_v19  ;;  %v4588_v28 = vrot.slane %v4587_v24, 1 }
 0x549   : > { %v4583_v29 = vadd.f32 %v4582_v25, %v4581_v21  ;;  %v4577_v30 = vadd.f32 %v4576_v26, %v4575_v22 }
 0x54a   : > { %v4590_v31 = vmul.f32 0.125, %v4571_v27  ;;  %v4589_v32 = vadd.f32 %v4588_v28, %v4587_v24 }
 0x54b   : > { %v4592_v33 = vmul.f32 0.125, %v4583_v29  ;;  %v4591_v34 = vmul.f32 0.125, %v4577_v30 }
 0x54c   : > { %v4594_v35 = vadd.f32 1e-05, %v4590_v31  ;;  %v4593_v36 = vmul.f32 0.125, %v4589_v32 }
 0x54d   : > { %v4596_v37 = vadd.f32 1e-05, %v4592_v33  ;;  %v4595_v38 = vadd.f32 1e-05, %v4591_v34 }
 0x54e   : > { %6897 = vrsqrt.f32 %v4594_v35  ;;  %v4597_v39 = vadd.f32 1e-05, %v4593_v36 }
 0x54f   : > { %6899 = vrsqrt.f32 %v4596_v37 }
 0x550   : > { %6901 = vrsqrt.f32 %v4595_v38 }
 0x551   : > { %6903 = vrsqrt.f32 %v4597_v39 }
 0x558   : > { %v6898_v40 = vpop.eup %6897 }
 0x559   : > { %v6900_v41 = vpop.eup %6899  ;;  %v4602_v42 = vmul.f32 %v6898_v40, %v4558_v63 }
 0x55a   : > { %v6902_v43 = vpop.eup %6901  ;;  %v4604_v44 = vmul.f32 %v6900_v41, %v4560_v1 }
 0x55b   : > { %v6904_v45 = vpop.eup %6903  ;;  %v4606_v46 = vmax.f32 %v4602_v42, 0.0  ;;  %v4603_v47 = vmul.f32 %v6902_v43, %v4559_v2 }
 0x55c   : > { %v4608_v48 = vmax.f32 %v4604_v44, 0.0  ;;  %v4605_v49 = vmul.f32 %v6904_v45, %v4561_v4 }
 0x55d   : > { %4610 = vst [vmem:[%s174_s28] sm:$0xff] %v4606_v46  ;;  %v4607_v50 = vmax.f32 %v4603_v47, 0.0 }
 0x55e   : > { %4612 = vst [vmem:[%s174_s28 + $0x10] sm:$0xff] %v4608_v48  ;;  %v4609_v51 = vmax.f32 %v4605_v49, 0.0 }
 0x55f   : > { %4611 = vst [vmem:[%s174_s28 + $0x8] sm:$0xff] %v4607_v50 }
 0x560   : > { %4613 = vst [vmem:[%s174_s28 + $0x18] sm:$0xff] %v4609_v51 }
 0x561   : > { %6976 = shalt.err (!%p6973_p12)
}
 0x562   : > { %s6977_s19 = scalar_lea.hbm %s9258_s8, 512  ;;  %s6981_s4 = scalar_lea.hbm %s9303_s2, 2048 }
 0x563   : > { %p6978_p0 = scmp.ne.s32.totalorder %s9258_s8, %s6977_s19  ;;  %p6982_p13 = scmp.lt.u32.totalorder %s9258_s8, %s9303_s2 }
 0x564   : > { %p6983_p7 = scmp.lt.u32.totalorder %s6981_s4, %s6977_s19  ;;  %p6985_p8 = scmp.lt.u32.totalorder %s6977_s19, %s9258_s8 }
 0x565   : > { %p6979_p3 = pnand %p6978_p0, %p9321_p9 }
 0x566   : > { %p6984_p6 = por %p6983_p7, %p6982_p13 }
 0x567   : > { %p6980_p11 = pneg %p6979_p3 }
 0x568   : > { %p6986_p10 = por %p6985_p8, %p6984_p6 }
 0x56a   : > { %p6987_p5 = pnand %p6986_p10, %p6980_p11 }
 0x56c   : > { %6990 = shalt.err (!%p6987_p5)
}
 0x56d   : > { %6843 = dma.vmem_to_hbm [thread:$0]  (%p9321_p9), %s9260_s30, 512, %s9258_s8, %s4615_s13  }
 0x56e PF: > { %p6860_p1 = scmp.ge.s32.totalorder %s7033_s12, 2  ;;  %s4641_s29 = sand.u32 1, %s7021_s9  }
 0x56f   : > { %p9322_p2 = scmp.ne.s32.totalorder %s9312_s22, 0  ;;  %s4642_s7 = scalar_lea.sflag [#allocation4], %s4641_s29 }
 0x571   : > { %p6854_p4 = pnand %p6860_p1, %p9322_p2 }
 0x573   : > { %7016 = dma.done.wait (!%p6854_p4), %s4642_s7, 512  }
 0x574   : > { %7018 = vsyncadd (!%p6854_p4), %s4642_s7, 4294966784  ;;  %p16_p12 = scmp.ge.s32.totalorder %s7081_s15, 6   ;;  %s9323_s9 = smov %s7025_s10 }
 0x575   : > { %s9324_s10 = smov %s7029_s11  ;;  %s9325_s11 = smov %s7093_s18 }
 0x576   : > { %s9326_s12 = smov %s7081_s15  ;;  %18 = sbr.rel (!%p16_p12) target bundleno = 6 (0x6), region = 78 }
 0x57d   :  { %4647 = vsyncpa [#allocation3], 1 }
 0x57e   :  { %4649 = vsyncpa [#allocation3 + $0x1], 1 }
 0x57f   :  { %4650 = vsyncpa [#allocation6], 1 }
 0x580   :  { %4652 = vsyncpa [#allocation6 + $0x1], 1 }
 0x581   :  { %4653 = vsyncpa [#allocation4], 1 }
 0x582   :  { %4655 = vsyncpa [#allocation4 + $0x1], 1 }

</bundles_post_ra>
